<compile_context>
chip_gen: v7x
topology: tpu7x:2x2x1
jax: 0.10.0
libtpu: 0.0.40
codegen_flags: <defaults>
</compile_context>

<pallas_src>
import functools

import jax
import jax.numpy as jnp
from jax.experimental import pallas as pl
from jax.experimental.pallas import tpu as pltpu


def _round_up(n, m):
    return ((n + m - 1) // m) * m


# ------------------------------ fused forward kernel ------------------------------
def _make_fused_kernel(num_layers, T, TB, H, L):
    H2, H4, H8 = 2 * H, 4 * H, 8 * H

    def cell(gates, c_prev):
        # gate column order inside each 4H block: [i | f | o | g]
        sig = jax.nn.sigmoid(gates[:, :3 * H])          # EUP pass over i,f,o only
        i = sig[:, 0:H]
        f = sig[:, H:2 * H]
        o = sig[:, 2 * H:3 * H]
        g = jnp.tanh(gates[:, 3 * H:4 * H])
        c_new = f * c_prev + i * g
        return o * jnp.tanh(c_new), c_new

    def kernel(*refs):
        it = iter(refs)
        x_ref = next(it)                                # (T, TB, E)  bf16
        slab_refs = [next(it) for _ in range(num_layers)]   # (Din+H, 8H) bf16 each
        bias_ref = next(it)                             # (num_layers, 8H) f32
        crf_ref = next(it)                              # (2H+L+3, L) f32
        tags_ref = next(it)                             # (T, TB, L) f32, mask-folded one-hot
        llh_ref = next(it)                              # (TB, 1) f32 output block
        hid_ref = next(it)                              # (T*TB, 2H) f32 VMEM scratch

        E = x_ref.shape[-1]
        bias_all = bias_ref[...]

        # ---------------- BiLSTM stack (fwd + bwd fused per layer) ----------------
        for layer in range(num_layers):
            slab = slab_refs[layer][...]                # (Din+H, 8H) bf16
            din = slab.shape[0] - H
            w_ih = slab[:din, :]                        # (Din, 8H) = [fwd 4H | bwd 4H]
            w_hh = slab[din:, :]                        # (H,   8H)
            b = bias_all[layer:layer + 1, :]            # (1, 8H) f32 (pre-summed biases)

            if layer == 0:
                xin = x_ref[...].reshape(T * TB, E)                 # bf16
            else:
                xin = hid_ref[...].astype(jnp.bfloat16)             # (T*TB, 2H)

            # Hoisted input->hidden projection: ONE 128-lane matmul for all timesteps
            # and both directions.
            gx = (jnp.dot(xin, w_ih, preferred_element_type=jnp.float32) + b
                  ).reshape(T, TB, H8)

            h = jnp.zeros((2 * TB, H), jnp.float32)     # rows [0:TB]=fwd, [TB:2TB]=bwd
            c = jnp.zeros((2 * TB, H), jnp.float32)
            # Static unroll (T is small); for large T this would become a
            # lax.fori_loop(..., unroll=True) over the same scratch writes.
            for t in range(T):
                tb = T - 1 - t                          # in-kernel time reversal for bwd
                hh = jnp.dot(h.astype(jnp.bfloat16), w_hh,
                             preferred_element_type=jnp.float32)    # (2TB, 8H)
                gates_f = gx[t, :, :H4] + hh[:TB, :H4]
                gates_b = gx[tb, :, H4:] + hh[TB:, H4:]
                h_f, c_f = cell(gates_f, c[:TB, :])
                h_b, c_b = cell(gates_b, c[TB:, :])
                h = jnp.concatenate([h_f, h_b], axis=0)
                c = jnp.concatenate([c_f, c_b], axis=0)
                # fwd goes to lanes [0:H] at time t, bwd to lanes [H:2H] at time tb
                hid_ref[t * TB:(t + 1) * TB, 0:H] = h_f
                hid_ref[tb * TB:(tb + 1) * TB, H:H2] = h_b

        # TODO(synk): nn.Dropout treated as identity (inference behaviour); training-mode
        # dropout would need pltpu.prng_* masks here.

        # --------------------------------- fc (emissions) --------------------------------
        crf = crf_ref[...]
        fc_w = crf[0:H2, :]                              # (2H, L)
        fc_b = crf[H2:H2 + 1, :]                         # (1, L)
        trans_t = crf[H2 + 1:H2 + 1 + L, :]              # (L, L); trans_t[j,i] = trans[i,j]
        start = crf[H2 + 1 + L:H2 + 2 + L, :]            # (1, L)
        end = crf[H2 + 2 + L:H2 + 3 + L, :]              # (1, L)

        hid_all = hid_ref[...]                           # (T*TB, 2H) f32
        em = (jnp.dot(hid_all, fc_w, preferred_element_type=jnp.float32) + fc_b
              ).reshape(T, TB, L)
        tags = tags_ref[...]                             # (T, TB, L), already mask-folded

        # gold emission score: vectorised multiply-reduce, off the serial alpha chain
        em_gold = jnp.zeros((TB, 1), jnp.float32)
        for t in range(T):
            em_gold = em_gold + jnp.sum(em[t] * tags[t], axis=-1, keepdims=True)

        # --------------------- CRF partition function (serial part only) -----------------
        trans_nb = trans_t[None, :, :]                   # hoisted out of the time loop
        alpha = start + em[0]                            # (TB, L)
        for t in range(1, T):
            m_t = jnp.sum(tags[t], axis=-1, keepdims=True)   # (TB, 1) step mask
            # scores[b, j, i] = alpha[b, i] + trans[i, j]; logsumexp over i (lane axis)
            scores = alpha[:, None, :] + trans_nb             # (TB, L, L)
            mmax = jnp.max(scores, axis=-1)                   # (TB, L)
            lse = mmax + jnp.log(jnp.sum(jnp.exp(scores - mmax[:, :, None]), axis=-1))
            alpha = jnp.where(m_t > 0.5, lse + em[t], alpha)

        alpha_end = alpha + end
        m2 = jnp.max(alpha_end, axis=-1, keepdims=True)
        logz = m2 + jnp.log(jnp.sum(jnp.exp(alpha_end - m2), axis=-1, keepdims=True))
        llh_ref[...] = em_gold - logz                    # gold trans/start/end added outside

    return kernel


# ------------------------------- Parameter setup -----------------------------------
def init_params(key, vocab_size, emb_dim, rnn_hidden, num_layers, num_labels):
    assert rnn_hidden % 2 == 0
    H = rnn_hidden // 2
    keys = jax.random.split(key, 8 + 8 * num_layers)
    ki = iter(keys)

    params = {
        "embedding": 0.1 * jax.random.normal(next(ki), (vocab_size, emb_dim), jnp.float32),
        "lstm_slabs": [],
    }

    bias_rows = []
    for layer in range(num_layers):
        din = emb_dim if layer == 0 else rnn_hidden
        wih, whh, brow = [], [], []
        for _d in ("fwd", "bwd"):
            # pre-transposed weights; gate column order [i|f|o|g] per direction
            wih.append(0.1 * jax.random.normal(next(ki), (din, 4 * H), jnp.float32))
            whh.append(0.1 * jax.random.normal(next(ki), (H, 4 * H), jnp.float32))
            b_ih = 0.1 * jax.random.normal(next(ki), (1, 4 * H), jnp.float32)
            b_hh = 0.1 * jax.random.normal(next(ki), (1, 4 * H), jnp.float32)
            brow.append(b_ih + b_hh)                                   # biases pre-summed
        w_ih_cat = jnp.concatenate(wih, axis=1)                        # (din, 8H)
        w_hh_cat = jnp.concatenate(whh, axis=1)                        # (H, 8H)
        params["lstm_slabs"].append(
            jnp.concatenate([w_ih_cat, w_hh_cat], axis=0).astype(jnp.bfloat16))
        bias_rows.append(jnp.concatenate(brow, axis=1))                # (1, 8H)
    params["lstm_bias"] = jnp.concatenate(bias_rows, axis=0)           # (num_layers, 8H) f32

    fc_w_t = jnp.transpose(
        0.1 * jax.random.normal(next(ki), (num_labels, rnn_hidden), jnp.float32))  # (2H, L)
    fc_b = 0.1 * jax.random.normal(next(ki), (1, num_labels), jnp.float32)
    trans = jax.random.uniform(next(ki), (num_labels, num_labels), jnp.float32, -0.1, 0.1)
    start = jax.random.uniform(next(ki), (1, num_labels), jnp.float32, -0.1, 0.1)
    end = jax.random.uniform(next(ki), (1, num_labels), jnp.float32, -0.1, 0.1)
    # rows: [fc_w_t (2H) | fc_b (1) | trans^T (L) | start (1) | end (1)]
    params["crf_slab"] = jnp.concatenate(
        [fc_w_t, fc_b, jnp.transpose(trans), start, end], axis=0)      # (2H+L+3, L) f32
    return params


# ---------------------------------- Forward ----------------------------------------
@functools.partial(jax.jit, static_argnames=("mode",))
def bilstm_crf_forward(params, input_ids, input_mask, label_ids, mode="train"):
    B, T = input_ids.shape
    E = params["embedding"].shape[1]
    num_layers = len(params["lstm_slabs"])
    H = params["lstm_bias"].shape[1] // 8
    H2 = 2 * H
    L = params["crf_slab"].shape[1]

    # ---- batch padding / tiling: sublane-align B; large batches get a parallel grid ----
    Bp = _round_up(B, 8)
    if Bp > 128:
        TB = 128
        Bp = _round_up(Bp, TB)
    else:
        TB = Bp
    grid = (Bp // TB,)

    # ---- glue ops (embedding gather, one-hot, layout, padding) in plain JAX ----
    emb = params["embedding"][input_ids]                              # (B, T, E)
    x = jnp.transpose(emb, (1, 0, 2))                                 # (T, B, E) time-major
    x = jnp.pad(x, ((0, 0), (0, Bp - B), (0, 0))).astype(jnp.bfloat16)

    labels = jnp.where(label_ids >= 0, label_ids, jnp.zeros_like(label_ids)).astype(jnp.int32)
    maskf = input_mask.astype(jnp.float32)                            # (B, T)
    tags_oh = jax.nn.one_hot(labels, L, dtype=jnp.float32) * maskf[..., None]
    tags_tm = jnp.transpose(tags_oh, (1, 0, 2))                       # (T, B, L)
    tags_tm = jnp.pad(tags_tm, ((0, 0), (0, Bp - B), (0, 0)))         # padded rows: all-zero

    inputs = ([x] + list(params["lstm_slabs"])
              + [params["lstm_bias"], params["crf_slab"], tags_tm])
    in_specs = (
        [pl.BlockSpec((T, TB, E), lambda b: (0, b, 0))]
        + [pl.BlockSpec(s.shape, lambda b: (0, 0)) for s in params["lstm_slabs"]]
        + [pl.BlockSpec(params["lstm_bias"].shape, lambda b: (0, 0)),
           pl.BlockSpec(params["crf_slab"].shape, lambda b: (0, 0)),
           pl.BlockSpec((T, TB, L), lambda b: (0, b, 0))]
    )

    kernel = _make_fused_kernel(num_layers, T, TB, H, L)
    kern_llh = pl.pallas_call(
        kernel,
        grid=grid,
        in_specs=in_specs,
        out_specs=pl.BlockSpec((TB, 1), lambda b: (b, 0)),
        out_shape=jax.ShapeDtypeStruct((Bp, 1), jnp.float32),
        scratch_shapes=[pltpu.VMEM((T * TB, H2), jnp.float32)],
        compiler_params=pltpu.CompilerParams(
            dimension_semantics=("parallel",),            # batch tiles are independent
            vmem_limit_bytes=32 * 1024 * 1024,            # explicit; safe on v5e/v6e/v7x
        ),
    )(*inputs)

    # ---- CRF gold-path start/transition/end score: depends only on tags/mask/params,
    #      so it is computed here (off the in-kernel serial alpha chain). ----
    crf = params["crf_slab"]
    trans = jnp.transpose(crf[H2 + 1:H2 + 1 + L, :])                  # (L, L), trans[i, j]
    start_v = crf[H2 + 1 + L, :]                                      # (L,)
    end_v = crf[H2 + 2 + L, :]                                        # (L,)

    start_sc = start_v[labels[:, 0]]
    trans_sc = jnp.sum(trans[labels[:, :-1], labels[:, 1:]] * maskf[:, 1:], axis=1)
    seq_len = jnp.sum(input_mask.astype(jnp.int32), axis=1)
    last_tag = jnp.take_along_axis(labels, jnp.maximum(seq_len - 1, 0)[:, None], axis=1)[:, 0]
    end_sc = end_v[last_tag]

    llh = kern_llh[:B, 0] + start_sc + trans_sc + end_sc              # (B,)
    loss = -jnp.sum(llh)       # torchcrf reduction='sum'; model returns -1 * llh
    if mode == "train":
        return loss
    # TODO(synk): CRF Viterbi decode (eval path) not implemented; returning loss only.
    return loss


# ------------------------------------ Main ------------------------------------------
if __name__ == "__main__":
    VOCAB, EMB, RNN_HIDDEN, NUM_LAYERS, NUM_LABELS = 50, 32, 32, 2, 8
    B, T = 2, 8

    key = jax.random.PRNGKey(0)
    kp, kid, klab = jax.random.split(key, 3)
    params = init_params(kp, VOCAB, EMB, RNN_HIDDEN, NUM_LAYERS, NUM_LABELS)

    input_ids = jax.random.randint(kid, (B, T), 0, VOCAB, dtype=jnp.int32)
    lengths = jnp.array([8, 5], dtype=jnp.int32)
    positions = jnp.arange(T, dtype=jnp.int32)[None, :]
    input_mask = (positions < lengths[:, None]).astype(jnp.int32)      # prefix mask, mask[:,0]=1
    raw_labels = jax.random.randint(klab, (B, T), 0, NUM_LABELS, dtype=jnp.int32)
    label_ids = jnp.where(input_mask > 0, raw_labels, -jnp.ones_like(raw_labels))

    loss = bilstm_crf_forward(params, input_ids, input_mask, label_ids, mode="train")
    loss = jax.block_until_ready(loss)
    if not bool(jnp.isfinite(loss)):
        raise RuntimeError("non-finite loss")
    print("KERNEL_OK")
</pallas_src>

<mosaic_0001>
module attributes {stable_mosaic.version = 11 : i64} {
  func.func @kernel(%arg0: i32, %arg1: memref<8x8x32xbf16, #tpu.memory_space<vmem>>, %arg2: memref<48x128xbf16, #tpu.memory_space<vmem>>, %arg3: memref<48x128xbf16, #tpu.memory_space<vmem>>, %arg4: memref<2x128xf32, #tpu.memory_space<vmem>>, %arg5: memref<43x8xf32, #tpu.memory_space<vmem>>, %arg6: memref<8x8x8xf32, #tpu.memory_space<vmem>>, %arg7: memref<8x1xf32, #tpu.memory_space<vmem>>, %arg8: memref<64x32xf32, #tpu.memory_space<vmem>>) attributes {dimension_semantics = [#tpu.dimension_semantics<parallel>], iteration_bounds = array<i64: 1>, scalar_prefetch = 0 : i64, scratch_operands = 1 : i64, tpu.core_type = #tpu.core_type<tc>, window_params = [{transform_indices = @transform_0, window_bounds = array<i64: 8, 8, 32>}, {pipeline_mode = #tpu.pipeline_mode<synchronous>, transform_indices = @transform_1, window_bounds = array<i64: 48, 128>}, {pipeline_mode = #tpu.pipeline_mode<synchronous>, transform_indices = @transform_2, window_bounds = array<i64: 48, 128>}, {pipeline_mode = #tpu.pipeline_mode<synchronous>, transform_indices = @transform_3, window_bounds = array<i64: 2, 128>}, {pipeline_mode = #tpu.pipeline_mode<synchronous>, transform_indices = @transform_4, window_bounds = array<i64: 43, 8>}, {transform_indices = @transform_5, window_bounds = array<i64: 8, 8, 8>}, {transform_indices = @transform_6, window_bounds = array<i64: 8, 1>}]} {
    %c0 = arith.constant 0 : index
    %c0_0 = arith.constant 0 : index
    %0 = vector.load %arg4[%c0, %c0_0] : memref<2x128xf32, #tpu.memory_space<vmem>>, vector<2x128xf32>
    %c0_1 = arith.constant 0 : index
    %c0_2 = arith.constant 0 : index
    %1 = vector.load %arg2[%c0_1, %c0_2] : memref<48x128xbf16, #tpu.memory_space<vmem>>, vector<48x128xbf16>
    %2 = vector.extract_strided_slice %1 {offsets = [0, 0], sizes = [32, 128], strides = [1, 1]} : vector<48x128xbf16> to vector<32x128xbf16>
    %3 = vector.extract_strided_slice %1 {offsets = [32, 0], sizes = [16, 128], strides = [1, 1]} : vector<48x128xbf16> to vector<16x128xbf16>
    %4 = vector.extract_strided_slice %0 {offsets = [0, 0], sizes = [1, 128], strides = [1, 1]} : vector<2x128xf32> to vector<1x128xf32>
    %c0_3 = arith.constant 0 : index
    %c0_4 = arith.constant 0 : index
    %c0_5 = arith.constant 0 : index
    %5 = vector.load %arg1[%c0_3, %c0_4, %c0_5] : memref<8x8x32xbf16, #tpu.memory_space<vmem>>, vector<8x8x32xbf16>
    %6 = vector.shape_cast %5 : vector<8x8x32xbf16> to vector<64x32xbf16>
    %cst = arith.constant dense<0.000000e+00> : vector<64x128xf32>
    %7 = tpu.matmul %6, %2, %cst {dimension_numbers = #tpu.dot_dimension_numbers<[1], [0], [0], [1], [0, 0, 1, 1], [], []>} : vector<64x32xbf16>, vector<32x128xbf16>, vector<64x128xf32> -> vector<64x128xf32>
    %8 = vector.broadcast %4 : vector<1x128xf32> to vector<64x128xf32>
    %9 = arith.addf %7, %8 : vector<64x128xf32>
    %10 = vector.shape_cast %9 : vector<64x128xf32> to vector<8x8x128xf32>
    %cst_6 = arith.constant 0.000000e+00 : f32
    %11 = vector.broadcast %cst_6 : f32 to vector<16x16xf32>
    %cst_7 = arith.constant 0.000000e+00 : f32
    %12 = vector.broadcast %cst_7 : f32 to vector<16x16xf32>
    %13 = arith.truncf %11 : vector<16x16xf32> to vector<16x16xbf16>
    %cst_8 = arith.constant dense<0.000000e+00> : vector<16x128xf32>
    %14 = tpu.matmul %13, %3, %cst_8 {dimension_numbers = #tpu.dot_dimension_numbers<[1], [0], [0], [1], [0, 0, 1, 1], [], []>} : vector<16x16xbf16>, vector<16x128xbf16>, vector<16x128xf32> -> vector<16x128xf32>
    %15 = vector.extract_strided_slice %10 {offsets = [0, 0, 0], sizes = [1, 8, 64], strides = [1, 1, 1]} : vector<8x8x128xf32> to vector<1x8x64xf32>
    %16 = vector.shape_cast %15 : vector<1x8x64xf32> to vector<8x64xf32>
    %17 = vector.extract_strided_slice %14 {offsets = [0, 0], sizes = [8, 64], strides = [1, 1]} : vector<16x128xf32> to vector<8x64xf32>
    %18 = arith.addf %16, %17 : vector<8x64xf32>
    %19 = vector.extract_strided_slice %10 {offsets = [7, 0, 64], sizes = [1, 8, 64], strides = [1, 1, 1]} : vector<8x8x128xf32> to vector<1x8x64xf32>
    %20 = vector.shape_cast %19 : vector<1x8x64xf32> to vector<8x64xf32>
    %21 = vector.extract_strided_slice %14 {offsets = [8, 64], sizes = [8, 64], strides = [1, 1]} : vector<16x128xf32> to vector<8x64xf32>
    %22 = arith.addf %20, %21 : vector<8x64xf32>
    %23 = vector.extract_strided_slice %12 {offsets = [0, 0], sizes = [8, 16], strides = [1, 1]} : vector<16x16xf32> to vector<8x16xf32>
    %24 = vector.extract_strided_slice %18 {offsets = [0, 0], sizes = [8, 48], strides = [1, 1]} : vector<8x64xf32> to vector<8x48xf32>
    %25 = arith.negf %24 : vector<8x48xf32>
    %26 = math.exp %25 : vector<8x48xf32>
    %cst_9 = arith.constant 1.000000e+00 : f32
    %27 = vector.broadcast %cst_9 : f32 to vector<8x48xf32>
    %28 = arith.addf %27, %26 : vector<8x48xf32>
    %29 = arith.divf %27, %28 : vector<8x48xf32>
    %30 = vector.extract_strided_slice %29 {offsets = [0, 0], sizes = [8, 16], strides = [1, 1]} : vector<8x48xf32> to vector<8x16xf32>
    %31 = vector.extract_strided_slice %29 {offsets = [0, 16], sizes = [8, 16], strides = [1, 1]} : vector<8x48xf32> to vector<8x16xf32>
    %32 = vector.extract_strided_slice %29 {offsets = [0, 32], sizes = [8, 16], strides = [1, 1]} : vector<8x48xf32> to vector<8x16xf32>
    %33 = vector.extract_strided_slice %18 {offsets = [0, 48], sizes = [8, 16], strides = [1, 1]} : vector<8x64xf32> to vector<8x16xf32>
    %34 = math.tanh %33 : vector<8x16xf32>
    %35 = arith.mulf %31, %23 : vector<8x16xf32>
    %36 = arith.mulf %30, %34 : vector<8x16xf32>
    %37 = arith.addf %35, %36 : vector<8x16xf32>
    %38 = math.tanh %37 : vector<8x16xf32>
    %39 = arith.mulf %32, %38 : vector<8x16xf32>
    %40 = vector.extract_strided_slice %12 {offsets = [8, 0], sizes = [8, 16], strides = [1, 1]} : vector<16x16xf32> to vector<8x16xf32>
    %41 = vector.extract_strided_slice %22 {offsets = [0, 0], sizes = [8, 48], strides = [1, 1]} : vector<8x64xf32> to vector<8x48xf32>
    %42 = arith.negf %41 : vector<8x48xf32>
    %43 = math.exp %42 : vector<8x48xf32>
    %cst_10 = arith.constant 1.000000e+00 : f32
    %44 = vector.broadcast %cst_10 : f32 to vector<8x48xf32>
    %45 = arith.addf %44, %43 : vector<8x48xf32>
    %46 = arith.divf %44, %45 : vector<8x48xf32>
    %47 = vector.extract_strided_slice %46 {offsets = [0, 0], sizes = [8, 16], strides = [1, 1]} : vector<8x48xf32> to vector<8x16xf32>
    %48 = vector.extract_strided_slice %46 {offsets = [0, 16], sizes = [8, 16], strides = [1, 1]} : vector<8x48xf32> to vector<8x16xf32>
    %49 = vector.extract_strided_slice %46 {offsets = [0, 32], sizes = [8, 16], strides = [1, 1]} : vector<8x48xf32> to vector<8x16xf32>
    %50 = vector.extract_strided_slice %22 {offsets = [0, 48], sizes = [8, 16], strides = [1, 1]} : vector<8x64xf32> to vector<8x16xf32>
    %51 = math.tanh %50 : vector<8x16xf32>
    %52 = arith.mulf %48, %40 : vector<8x16xf32>
    %53 = arith.mulf %47, %51 : vector<8x16xf32>
    %54 = arith.addf %52, %53 : vector<8x16xf32>
    %55 = math.tanh %54 : vector<8x16xf32>
    %56 = arith.mulf %49, %55 : vector<8x16xf32>
    %57 = tpu.concatenate %39, %56 in 0 : vector<8x16xf32>, vector<8x16xf32> -> vector<16x16xf32>
    %58 = tpu.concatenate %37, %54 in 0 : vector<8x16xf32>, vector<8x16xf32> -> vector<16x16xf32>
    %c0_11 = arith.constant 0 : index
    %c0_12 = arith.constant 0 : index
    %59 = vector.load %arg8[%c0_11, %c0_12] : memref<64x32xf32, #tpu.memory_space<vmem>>, vector<8x16xf32>
    tpu.vector_store %arg8[%c0_11, %c0_12], %39 {strides = array<i32>} : memref<64x32xf32, #tpu.memory_space<vmem>>, vector<8x16xf32>,
    %c56 = arith.constant 56 : index
    %c16 = arith.constant 16 : index
    %60 = vector.load %arg8[%c56, %c16] : memref<64x32xf32, #tpu.memory_space<vmem>>, vector<8x16xf32>
    tpu.vector_store %arg8[%c56, %c16], %56 {strides = array<i32>} : memref<64x32xf32, #tpu.memory_space<vmem>>, vector<8x16xf32>,
    %61 = arith.truncf %57 : vector<16x16xf32> to vector<16x16xbf16>
    %cst_13 = arith.constant dense<0.000000e+00> : vector<16x128xf32>
    %62 = tpu.matmul %61, %3, %cst_13 {dimension_numbers = #tpu.dot_dimension_numbers<[1], [0], [0], [1], [0, 0, 1, 1], [], []>} : vector<16x16xbf16>, vector<16x128xbf16>, vector<16x128xf32> -> vector<16x128xf32>
    %63 = vector.extract_strided_slice %10 {offsets = [1, 0, 0], sizes = [1, 8, 64], strides = [1, 1, 1]} : vector<8x8x128xf32> to vector<1x8x64xf32>
    %64 = vector.shape_cast %63 : vector<1x8x64xf32> to vector<8x64xf32>
    %65 = vector.extract_strided_slice %62 {offsets = [0, 0], sizes = [8, 64], strides = [1, 1]} : vector<16x128xf32> to vector<8x64xf32>
    %66 = arith.addf %64, %65 : vector<8x64xf32>
    %67 = vector.extract_strided_slice %10 {offsets = [6, 0, 64], sizes = [1, 8, 64], strides = [1, 1, 1]} : vector<8x8x128xf32> to vector<1x8x64xf32>
    %68 = vector.shape_cast %67 : vector<1x8x64xf32> to vector<8x64xf32>
    %69 = vector.extract_strided_slice %62 {offsets = [8, 64], sizes = [8, 64], strides = [1, 1]} : vector<16x128xf32> to vector<8x64xf32>
    %70 = arith.addf %68, %69 : vector<8x64xf32>
    %71 = vector.extract_strided_slice %58 {offsets = [0, 0], sizes = [8, 16], strides = [1, 1]} : vector<16x16xf32> to vector<8x16xf32>
    %72 = vector.extract_strided_slice %66 {offsets = [0, 0], sizes = [8, 48], strides = [1, 1]} : vector<8x64xf32> to vector<8x48xf32>
    %73 = arith.negf %72 : vector<8x48xf32>
    %74 = math.exp %73 : vector<8x48xf32>
    %cst_14 = arith.constant 1.000000e+00 : f32
    %75 = vector.broadcast %cst_14 : f32 to vector<8x48xf32>
    %76 = arith.addf %75, %74 : vector<8x48xf32>
    %77 = arith.divf %75, %76 : vector<8x48xf32>
    %78 = vector.extract_strided_slice %77 {offsets = [0, 0], sizes = [8, 16], strides = [1, 1]} : vector<8x48xf32> to vector<8x16xf32>
    %79 = vector.extract_strided_slice %77 {offsets = [0, 16], sizes = [8, 16], strides = [1, 1]} : vector<8x48xf32> to vector<8x16xf32>
    %80 = vector.extract_strided_slice %77 {offsets = [0, 32], sizes = [8, 16], strides = [1, 1]} : vector<8x48xf32> to vector<8x16xf32>
    %81 = vector.extract_strided_slice %66 {offsets = [0, 48], sizes = [8, 16], strides = [1, 1]} : vector<8x64xf32> to vector<8x16xf32>
    %82 = math.tanh %81 : vector<8x16xf32>
    %83 = arith.mulf %79, %71 : vector<8x16xf32>
    %84 = arith.mulf %78, %82 : vector<8x16xf32>
    %85 = arith.addf %83, %84 : vector<8x16xf32>
    %86 = math.tanh %85 : vector<8x16xf32>
    %87 = arith.mulf %80, %86 : vector<8x16xf32>
    %88 = vector.extract_strided_slice %58 {offsets = [8, 0], sizes = [8, 16], strides = [1, 1]} : vector<16x16xf32> to vector<8x16xf32>
    %89 = vector.extract_strided_slice %70 {offsets = [0, 0], sizes = [8, 48], strides = [1, 1]} : vector<8x64xf32> to vector<8x48xf32>
    %90 = arith.negf %89 : vector<8x48xf32>
    %91 = math.exp %90 : vector<8x48xf32>
    %cst_15 = arith.constant 1.000000e+00 : f32
    %92 = vector.broadcast %cst_15 : f32 to vector<8x48xf32>
    %93 = arith.addf %92, %91 : vector<8x48xf32>
    %94 = arith.divf %92, %93 : vector<8x48xf32>
    %95 = vector.extract_strided_slice %94 {offsets = [0, 0], sizes = [8, 16], strides = [1, 1]} : vector<8x48xf32> to vector<8x16xf32>
    %96 = vector.extract_strided_slice %94 {offsets = [0, 16], sizes = [8, 16], strides = [1, 1]} : vector<8x48xf32> to vector<8x16xf32>
    %97 = vector.extract_strided_slice %94 {offsets = [0, 32], sizes = [8, 16], strides = [1, 1]} : vector<8x48xf32> to vector<8x16xf32>
    %98 = vector.extract_strided_slice %70 {offsets = [0, 48], sizes = [8, 16], strides = [1, 1]} : vector<8x64xf32> to vector<8x16xf32>
    %99 = math.tanh %98 : vector<8x16xf32>
    %100 = arith.mulf %96, %88 : vector<8x16xf32>
    %101 = arith.mulf %95, %99 : vector<8x16xf32>
    %102 = arith.addf %100, %101 : vector<8x16xf32>
    %103 = math.tanh %102 : vector<8x16xf32>
    %104 = arith.mulf %97, %103 : vector<8x16xf32>
    %105 = tpu.concatenate %87, %104 in 0 : vector<8x16xf32>, vector<8x16xf32> -> vector<16x16xf32>
    %106 = tpu.concatenate %85, %102 in 0 : vector<8x16xf32>, vector<8x16xf32> -> vector<16x16xf32>
    %c8 = arith.constant 8 : index
    %c0_16 = arith.constant 0 : index
    %107 = vector.load %arg8[%c8, %c0_16] : memref<64x32xf32, #tpu.memory_space<vmem>>, vector<8x16xf32>
    tpu.vector_store %arg8[%c8, %c0_16], %87 {strides = array<i32>} : memref<64x32xf32, #tpu.memory_space<vmem>>, vector<8x16xf32>,
    %c48 = arith.constant 48 : index
    %c16_17 = arith.constant 16 : index
    %108 = vector.load %arg8[%c48, %c16_17] : memref<64x32xf32, #tpu.memory_space<vmem>>, vector<8x16xf32>
    tpu.vector_store %arg8[%c48, %c16_17], %104 {strides = array<i32>} : memref<64x32xf32, #tpu.memory_space<vmem>>, vector<8x16xf32>,
    %109 = arith.truncf %105 : vector<16x16xf32> to vector<16x16xbf16>
    %cst_18 = arith.constant dense<0.000000e+00> : vector<16x128xf32>
    %110 = tpu.matmul %109, %3, %cst_18 {dimension_numbers = #tpu.dot_dimension_numbers<[1], [0], [0], [1], [0, 0, 1, 1], [], []>} : vector<16x16xbf16>, vector<16x128xbf16>, vector<16x128xf32> -> vector<16x128xf32>
    %111 = vector.extract_strided_slice %10 {offsets = [2, 0, 0], sizes = [1, 8, 64], strides = [1, 1, 1]} : vector<8x8x128xf32> to vector<1x8x64xf32>
    %112 = vector.shape_cast %111 : vector<1x8x64xf32> to vector<8x64xf32>
    %113 = vector.extract_strided_slice %110 {offsets = [0, 0], sizes = [8, 64], strides = [1, 1]} : vector<16x128xf32> to vector<8x64xf32>
    %114 = arith.addf %112, %113 : vector<8x64xf32>
    %115 = vector.extract_strided_slice %10 {offsets = [5, 0, 64], sizes = [1, 8, 64], strides = [1, 1, 1]} : vector<8x8x128xf32> to vector<1x8x64xf32>
    %116 = vector.shape_cast %115 : vector<1x8x64xf32> to vector<8x64xf32>
    %117 = vector.extract_strided_slice %110 {offsets = [8, 64], sizes = [8, 64], strides = [1, 1]} : vector<16x128xf32> to vector<8x64xf32>
    %118 = arith.addf %116, %117 : vector<8x64xf32>
    %119 = vector.extract_strided_slice %106 {offsets = [0, 0], sizes = [8, 16], strides = [1, 1]} : vector<16x16xf32> to vector<8x16xf32>
    %120 = vector.extract_strided_slice %114 {offsets = [0, 0], sizes = [8, 48], strides = [1, 1]} : vector<8x64xf32> to vector<8x48xf32>
    %121 = arith.negf %120 : vector<8x48xf32>
    %122 = math.exp %121 : vector<8x48xf32>
    %cst_19 = arith.constant 1.000000e+00 : f32
    %123 = vector.broadcast %cst_19 : f32 to vector<8x48xf32>
    %124 = arith.addf %123, %122 : vector<8x48xf32>
    %125 = arith.divf %123, %124 : vector<8x48xf32>
    %126 = vector.extract_strided_slice %125 {offsets = [0, 0], sizes = [8, 16], strides = [1, 1]} : vector<8x48xf32> to vector<8x16xf32>
    %127 = vector.extract_strided_slice %125 {offsets = [0, 16], sizes = [8, 16], strides = [1, 1]} : vector<8x48xf32> to vector<8x16xf32>
    %128 = vector.extract_strided_slice %125 {offsets = [0, 32], sizes = [8, 16], strides = [1, 1]} : vector<8x48xf32> to vector<8x16xf32>
    %129 = vector.extract_strided_slice %114 {offsets = [0, 48], sizes = [8, 16], strides = [1, 1]} : vector<8x64xf32> to vector<8x16xf32>
    %130 = math.tanh %129 : vector<8x16xf32>
    %131 = arith.mulf %127, %119 : vector<8x16xf32>
    %132 = arith.mulf %126, %130 : vector<8x16xf32>
    %133 = arith.addf %131, %132 : vector<8x16xf32>
    %134 = math.tanh %133 : vector<8x16xf32>
    %135 = arith.mulf %128, %134 : vector<8x16xf32>
    %136 = vector.extract_strided_slice %106 {offsets = [8, 0], sizes = [8, 16], strides = [1, 1]} : vector<16x16xf32> to vector<8x16xf32>
    %137 = vector.extract_strided_slice %118 {offsets = [0, 0], sizes = [8, 48], strides = [1, 1]} : vector<8x64xf32> to vector<8x48xf32>
    %138 = arith.negf %137 : vector<8x48xf32>
    %139 = math.exp %138 : vector<8x48xf32>
    %cst_20 = arith.constant 1.000000e+00 : f32
    %140 = vector.broadcast %cst_20 : f32 to vector<8x48xf32>
    %141 = arith.addf %140, %139 : vector<8x48xf32>
    %142 = arith.divf %140, %141 : vector<8x48xf32>
    %143 = vector.extract_strided_slice %142 {offsets = [0, 0], sizes = [8, 16], strides = [1, 1]} : vector<8x48xf32> to vector<8x16xf32>
    %144 = vector.extract_strided_slice %142 {offsets = [0, 16], sizes = [8, 16], strides = [1, 1]} : vector<8x48xf32> to vector<8x16xf32>
    %145 = vector.extract_strided_slice %142 {offsets = [0, 32], sizes = [8, 16], strides = [1, 1]} : vector<8x48xf32> to vector<8x16xf32>
    %146 = vector.extract_strided_slice %118 {offsets = [0, 48], sizes = [8, 16], strides = [1, 1]} : vector<8x64xf32> to vector<8x16xf32>
    %147 = math.tanh %146 : vector<8x16xf32>
    %148 = arith.mulf %144, %136 : vector<8x16xf32>
    %149 = arith.mulf %143, %147 : vector<8x16xf32>
    %150 = arith.addf %148, %149 : vector<8x16xf32>
    %151 = math.tanh %150 : vector<8x16xf32>
    %152 = arith.mulf %145, %151 : vector<8x16xf32>
    %153 = tpu.concatenate %135, %152 in 0 : vector<8x16xf32>, vector<8x16xf32> -> vector<16x16xf32>
    %154 = tpu.concatenate %133, %150 in 0 : vector<8x16xf32>, vector<8x16xf32> -> vector<16x16xf32>
    %c16_21 = arith.constant 16 : index
    %c0_22 = arith.constant 0 : index
    %155 = vector.load %arg8[%c16_21, %c0_22] : memref<64x32xf32, #tpu.memory_space<vmem>>, vector<8x16xf32>
    tpu.vector_store %arg8[%c16_21, %c0_22], %135 {strides = array<i32>} : memref<64x32xf32, #tpu.memory_space<vmem>>, vector<8x16xf32>,
    %c40 = arith.constant 40 : index
    %c16_23 = arith.constant 16 : index
    %156 = vector.load %arg8[%c40, %c16_23] : memref<64x32xf32, #tpu.memory_space<vmem>>, vector<8x16xf32>
    tpu.vector_store %arg8[%c40, %c16_23], %152 {strides = array<i32>} : memref<64x32xf32, #tpu.memory_space<vmem>>, vector<8x16xf32>,
    %157 = arith.truncf %153 : vector<16x16xf32> to vector<16x16xbf16>
    %cst_24 = arith.constant dense<0.000000e+00> : vector<16x128xf32>
    %158 = tpu.matmul %157, %3, %cst_24 {dimension_numbers = #tpu.dot_dimension_numbers<[1], [0], [0], [1], [0, 0, 1, 1], [], []>} : vector<16x16xbf16>, vector<16x128xbf16>, vector<16x128xf32> -> vector<16x128xf32>
    %159 = vector.extract_strided_slice %10 {offsets = [3, 0, 0], sizes = [1, 8, 64], strides = [1, 1, 1]} : vector<8x8x128xf32> to vector<1x8x64xf32>
    %160 = vector.shape_cast %159 : vector<1x8x64xf32> to vector<8x64xf32>
    %161 = vector.extract_strided_slice %158 {offsets = [0, 0], sizes = [8, 64], strides = [1, 1]} : vector<16x128xf32> to vector<8x64xf32>
    %162 = arith.addf %160, %161 : vector<8x64xf32>
    %163 = vector.extract_strided_slice %10 {offsets = [4, 0, 64], sizes = [1, 8, 64], strides = [1, 1, 1]} : vector<8x8x128xf32> to vector<1x8x64xf32>
    %164 = vector.shape_cast %163 : vector<1x8x64xf32> to vector<8x64xf32>
    %165 = vector.extract_strided_slice %158 {offsets = [8, 64], sizes = [8, 64], strides = [1, 1]} : vector<16x128xf32> to vector<8x64xf32>
    %166 = arith.addf %164, %165 : vector<8x64xf32>
    %167 = vector.extract_strided_slice %154 {offsets = [0, 0], sizes = [8, 16], strides = [1, 1]} : vector<16x16xf32> to vector<8x16xf32>
    %168 = vector.extract_strided_slice %162 {offsets = [0, 0], sizes = [8, 48], strides = [1, 1]} : vector<8x64xf32> to vector<8x48xf32>
    %169 = arith.negf %168 : vector<8x48xf32>
    %170 = math.exp %169 : vector<8x48xf32>
    %cst_25 = arith.constant 1.000000e+00 : f32
    %171 = vector.broadcast %cst_25 : f32 to vector<8x48xf32>
    %172 = arith.addf %171, %170 : vector<8x48xf32>
    %173 = arith.divf %171, %172 : vector<8x48xf32>
    %174 = vector.extract_strided_slice %173 {offsets = [0, 0], sizes = [8, 16], strides = [1, 1]} : vector<8x48xf32> to vector<8x16xf32>
    %175 = vector.extract_strided_slice %173 {offsets = [0, 16], sizes = [8, 16], strides = [1, 1]} : vector<8x48xf32> to vector<8x16xf32>
    %176 = vector.extract_strided_slice %173 {offsets = [0, 32], sizes = [8, 16], strides = [1, 1]} : vector<8x48xf32> to vector<8x16xf32>
    %177 = vector.extract_strided_slice %162 {offsets = [0, 48], sizes = [8, 16], strides = [1, 1]} : vector<8x64xf32> to vector<8x16xf32>
    %178 = math.tanh %177 : vector<8x16xf32>
    %179 = arith.mulf %175, %167 : vector<8x16xf32>
    %180 = arith.mulf %174, %178 : vector<8x16xf32>
    %181 = arith.addf %179, %180 : vector<8x16xf32>
    %182 = math.tanh %181 : vector<8x16xf32>
    %183 = arith.mulf %176, %182 : vector<8x16xf32>
    %184 = vector.extract_strided_slice %154 {offsets = [8, 0], sizes = [8, 16], strides = [1, 1]} : vector<16x16xf32> to vector<8x16xf32>
    %185 = vector.extract_strided_slice %166 {offsets = [0, 0], sizes = [8, 48], strides = [1, 1]} : vector<8x64xf32> to vector<8x48xf32>
    %186 = arith.negf %185 : vector<8x48xf32>
    %187 = math.exp %186 : vector<8x48xf32>
    %cst_26 = arith.constant 1.000000e+00 : f32
    %188 = vector.broadcast %cst_26 : f32 to vector<8x48xf32>
    %189 = arith.addf %188, %187 : vector<8x48xf32>
    %190 = arith.divf %188, %189 : vector<8x48xf32>
    %191 = vector.extract_strided_slice %190 {offsets = [0, 0], sizes = [8, 16], strides = [1, 1]} : vector<8x48xf32> to vector<8x16xf32>
    %192 = vector.extract_strided_slice %190 {offsets = [0, 16], sizes = [8, 16], strides = [1, 1]} : vector<8x48xf32> to vector<8x16xf32>
    %193 = vector.extract_strided_slice %190 {offsets = [0, 32], sizes = [8, 16], strides = [1, 1]} : vector<8x48xf32> to vector<8x16xf32>
    %194 = vector.extract_strided_slice %166 {offsets = [0, 48], sizes = [8, 16], strides = [1, 1]} : vector<8x64xf32> to vector<8x16xf32>
    %195 = math.tanh %194 : vector<8x16xf32>
    %196 = arith.mulf %192, %184 : vector<8x16xf32>
    %197 = arith.mulf %191, %195 : vector<8x16xf32>
    %198 = arith.addf %196, %197 : vector<8x16xf32>
    %199 = math.tanh %198 : vector<8x16xf32>
    %200 = arith.mulf %193, %199 : vector<8x16xf32>
    %201 = tpu.concatenate %183, %200 in 0 : vector<8x16xf32>, vector<8x16xf32> -> vector<16x16xf32>
    %202 = tpu.concatenate %181, %198 in 0 : vector<8x16xf32>, vector<8x16xf32> -> vector<16x16xf32>
    %c24 = arith.constant 24 : index
    %c0_27 = arith.constant 0 : index
    %203 = vector.load %arg8[%c24, %c0_27] : memref<64x32xf32, #tpu.memory_space<vmem>>, vector<8x16xf32>
    tpu.vector_store %arg8[%c24, %c0_27], %183 {strides = array<i32>} : memref<64x32xf32, #tpu.memory_space<vmem>>, vector<8x16xf32>,
    %c32 = arith.constant 32 : index
    %c16_28 = arith.constant 16 : index
    %204 = vector.load %arg8[%c32, %c16_28] : memref<64x32xf32, #tpu.memory_space<vmem>>, vector<8x16xf32>
    tpu.vector_store %arg8[%c32, %c16_28], %200 {strides = array<i32>} : memref<64x32xf32, #tpu.memory_space<vmem>>, vector<8x16xf32>,
    %205 = arith.truncf %201 : vector<16x16xf32> to vector<16x16xbf16>
    %cst_29 = arith.constant dense<0.000000e+00> : vector<16x128xf32>
    %206 = tpu.matmul %205, %3, %cst_29 {dimension_numbers = #tpu.dot_dimension_numbers<[1], [0], [0], [1], [0, 0, 1, 1], [], []>} : vector<16x16xbf16>, vector<16x128xbf16>, vector<16x128xf32> -> vector<16x128xf32>
    %207 = vector.extract_strided_slice %10 {offsets = [4, 0, 0], sizes = [1, 8, 64], strides = [1, 1, 1]} : vector<8x8x128xf32> to vector<1x8x64xf32>
    %208 = vector.shape_cast %207 : vector<1x8x64xf32> to vector<8x64xf32>
    %209 = vector.extract_strided_slice %206 {offsets = [0, 0], sizes = [8, 64], strides = [1, 1]} : vector<16x128xf32> to vector<8x64xf32>
    %210 = arith.addf %208, %209 : vector<8x64xf32>
    %211 = vector.extract_strided_slice %10 {offsets = [3, 0, 64], sizes = [1, 8, 64], strides = [1, 1, 1]} : vector<8x8x128xf32> to vector<1x8x64xf32>
    %212 = vector.shape_cast %211 : vector<1x8x64xf32> to vector<8x64xf32>
    %213 = vector.extract_strided_slice %206 {offsets = [8, 64], sizes = [8, 64], strides = [1, 1]} : vector<16x128xf32> to vector<8x64xf32>
    %214 = arith.addf %212, %213 : vector<8x64xf32>
    %215 = vector.extract_strided_slice %202 {offsets = [0, 0], sizes = [8, 16], strides = [1, 1]} : vector<16x16xf32> to vector<8x16xf32>
    %216 = vector.extract_strided_slice %210 {offsets = [0, 0], sizes = [8, 48], strides = [1, 1]} : vector<8x64xf32> to vector<8x48xf32>
    %217 = arith.negf %216 : vector<8x48xf32>
    %218 = math.exp %217 : vector<8x48xf32>
    %cst_30 = arith.constant 1.000000e+00 : f32
    %219 = vector.broadcast %cst_30 : f32 to vector<8x48xf32>
    %220 = arith.addf %219, %218 : vector<8x48xf32>
    %221 = arith.divf %219, %220 : vector<8x48xf32>
    %222 = vector.extract_strided_slice %221 {offsets = [0, 0], sizes = [8, 16], strides = [1, 1]} : vector<8x48xf32> to vector<8x16xf32>
    %223 = vector.extract_strided_slice %221 {offsets = [0, 16], sizes = [8, 16], strides = [1, 1]} : vector<8x48xf32> to vector<8x16xf32>
    %224 = vector.extract_strided_slice %221 {offsets = [0, 32], sizes = [8, 16], strides = [1, 1]} : vector<8x48xf32> to vector<8x16xf32>
    %225 = vector.extract_strided_slice %210 {offsets = [0, 48], sizes = [8, 16], strides = [1, 1]} : vector<8x64xf32> to vector<8x16xf32>
    %226 = math.tanh %225 : vector<8x16xf32>
    %227 = arith.mulf %223, %215 : vector<8x16xf32>
    %228 = arith.mulf %222, %226 : vector<8x16xf32>
    %229 = arith.addf %227, %228 : vector<8x16xf32>
    %230 = math.tanh %229 : vector<8x16xf32>
    %231 = arith.mulf %224, %230 : vector<8x16xf32>
    %232 = vector.extract_strided_slice %202 {offsets = [8, 0], sizes = [8, 16], strides = [1, 1]} : vector<16x16xf32> to vector<8x16xf32>
    %233 = vector.extract_strided_slice %214 {offsets = [0, 0], sizes = [8, 48], strides = [1, 1]} : vector<8x64xf32> to vector<8x48xf32>
    %234 = arith.negf %233 : vector<8x48xf32>
    %235 = math.exp %234 : vector<8x48xf32>
    %cst_31 = arith.constant 1.000000e+00 : f32
    %236 = vector.broadcast %cst_31 : f32 to vector<8x48xf32>
    %237 = arith.addf %236, %235 : vector<8x48xf32>
    %238 = arith.divf %236, %237 : vector<8x48xf32>
    %239 = vector.extract_strided_slice %238 {offsets = [0, 0], sizes = [8, 16], strides = [1, 1]} : vector<8x48xf32> to vector<8x16xf32>
    %240 = vector.extract_strided_slice %238 {offsets = [0, 16], sizes = [8, 16], strides = [1, 1]} : vector<8x48xf32> to vector<8x16xf32>
    %241 = vector.extract_strided_slice %238 {offsets = [0, 32], sizes = [8, 16], strides = [1, 1]} : vector<8x48xf32> to vector<8x16xf32>
    %242 = vector.extract_strided_slice %214 {offsets = [0, 48], sizes = [8, 16], strides = [1, 1]} : vector<8x64xf32> to vector<8x16xf32>
    %243 = math.tanh %242 : vector<8x16xf32>
    %244 = arith.mulf %240, %232 : vector<8x16xf32>
    %245 = arith.mulf %239, %243 : vector<8x16xf32>
    %246 = arith.addf %244, %245 : vector<8x16xf32>
    %247 = math.tanh %246 : vector<8x16xf32>
    %248 = arith.mulf %241, %247 : vector<8x16xf32>
    %249 = tpu.concatenate %231, %248 in 0 : vector<8x16xf32>, vector<8x16xf32> -> vector<16x16xf32>
    %250 = tpu.concatenate %229, %246 in 0 : vector<8x16xf32>, vector<8x16xf32> -> vector<16x16xf32>
    %c32_32 = arith.constant 32 : index
    %c0_33 = arith.constant 0 : index
    %251 = vector.load %arg8[%c32_32, %c0_33] : memref<64x32xf32, #tpu.memory_space<vmem>>, vector<8x16xf32>
    tpu.vector_store %arg8[%c32_32, %c0_33], %231 {strides = array<i32>} : memref<64x32xf32, #tpu.memory_space<vmem>>, vector<8x16xf32>,
    %c24_34 = arith.constant 24 : index
    %c16_35 = arith.constant 16 : index
    %252 = vector.load %arg8[%c24_34, %c16_35] : memref<64x32xf32, #tpu.memory_space<vmem>>, vector<8x16xf32>
    tpu.vector_store %arg8[%c24_34, %c16_35], %248 {strides = array<i32>} : memref<64x32xf32, #tpu.memory_space<vmem>>, vector<8x16xf32>,
    %253 = arith.truncf %249 : vector<16x16xf32> to vector<16x16xbf16>
    %cst_36 = arith.constant dense<0.000000e+00> : vector<16x128xf32>
    %254 = tpu.matmul %253, %3, %cst_36 {dimension_numbers = #tpu.dot_dimension_numbers<[1], [0], [0], [1], [0, 0, 1, 1], [], []>} : vector<16x16xbf16>, vector<16x128xbf16>, vector<16x128xf32> -> vector<16x128xf32>
    %255 = vector.extract_strided_slice %10 {offsets = [5, 0, 0], sizes = [1, 8, 64], strides = [1, 1, 1]} : vector<8x8x128xf32> to vector<1x8x64xf32>
    %256 = vector.shape_cast %255 : vector<1x8x64xf32> to vector<8x64xf32>
    %257 = vector.extract_strided_slice %254 {offsets = [0, 0], sizes = [8, 64], strides = [1, 1]} : vector<16x128xf32> to vector<8x64xf32>
    %258 = arith.addf %256, %257 : vector<8x64xf32>
    %259 = vector.extract_strided_slice %10 {offsets = [2, 0, 64], sizes = [1, 8, 64], strides = [1, 1, 1]} : vector<8x8x128xf32> to vector<1x8x64xf32>
    %260 = vector.shape_cast %259 : vector<1x8x64xf32> to vector<8x64xf32>
    %261 = vector.extract_strided_slice %254 {offsets = [8, 64], sizes = [8, 64], strides = [1, 1]} : vector<16x128xf32> to vector<8x64xf32>
    %262 = arith.addf %260, %261 : vector<8x64xf32>
    %263 = vector.extract_strided_slice %250 {offsets = [0, 0], sizes = [8, 16], strides = [1, 1]} : vector<16x16xf32> to vector<8x16xf32>
    %264 = vector.extract_strided_slice %258 {offsets = [0, 0], sizes = [8, 48], strides = [1, 1]} : vector<8x64xf32> to vector<8x48xf32>
    %265 = arith.negf %264 : vector<8x48xf32>
    %266 = math.exp %265 : vector<8x48xf32>
    %cst_37 = arith.constant 1.000000e+00 : f32
    %267 = vector.broadcast %cst_37 : f32 to vector<8x48xf32>
    %268 = arith.addf %267, %266 : vector<8x48xf32>
    %269 = arith.divf %267, %268 : vector<8x48xf32>
    %270 = vector.extract_strided_slice %269 {offsets = [0, 0], sizes = [8, 16], strides = [1, 1]} : vector<8x48xf32> to vector<8x16xf32>
    %271 = vector.extract_strided_slice %269 {offsets = [0, 16], sizes = [8, 16], strides = [1, 1]} : vector<8x48xf32> to vector<8x16xf32>
    %272 = vector.extract_strided_slice %269 {offsets = [0, 32], sizes = [8, 16], strides = [1, 1]} : vector<8x48xf32> to vector<8x16xf32>
    %273 = vector.extract_strided_slice %258 {offsets = [0, 48], sizes = [8, 16], strides = [1, 1]} : vector<8x64xf32> to vector<8x16xf32>
    %274 = math.tanh %273 : vector<8x16xf32>
    %275 = arith.mulf %271, %263 : vector<8x16xf32>
    %276 = arith.mulf %270, %274 : vector<8x16xf32>
    %277 = arith.addf %275, %276 : vector<8x16xf32>
    %278 = math.tanh %277 : vector<8x16xf32>
    %279 = arith.mulf %272, %278 : vector<8x16xf32>
    %280 = vector.extract_strided_slice %250 {offsets = [8, 0], sizes = [8, 16], strides = [1, 1]} : vector<16x16xf32> to vector<8x16xf32>
    %281 = vector.extract_strided_slice %262 {offsets = [0, 0], sizes = [8, 48], strides = [1, 1]} : vector<8x64xf32> to vector<8x48xf32>
    %282 = arith.negf %281 : vector<8x48xf32>
    %283 = math.exp %282 : vector<8x48xf32>
    %cst_38 = arith.constant 1.000000e+00 : f32
    %284 = vector.broadcast %cst_38 : f32 to vector<8x48xf32>
    %285 = arith.addf %284, %283 : vector<8x48xf32>
    %286 = arith.divf %284, %285 : vector<8x48xf32>
    %287 = vector.extract_strided_slice %286 {offsets = [0, 0], sizes = [8, 16], strides = [1, 1]} : vector<8x48xf32> to vector<8x16xf32>
    %288 = vector.extract_strided_slice %286 {offsets = [0, 16], sizes = [8, 16], strides = [1, 1]} : vector<8x48xf32> to vector<8x16xf32>
    %289 = vector.extract_strided_slice %286 {offsets = [0, 32], sizes = [8, 16], strides = [1, 1]} : vector<8x48xf32> to vector<8x16xf32>
    %290 = vector.extract_strided_slice %262 {offsets = [0, 48], sizes = [8, 16], strides = [1, 1]} : vector<8x64xf32> to vector<8x16xf32>
    %291 = math.tanh %290 : vector<8x16xf32>
    %292 = arith.mulf %288, %280 : vector<8x16xf32>
    %293 = arith.mulf %287, %291 : vector<8x16xf32>
    %294 = arith.addf %292, %293 : vector<8x16xf32>
    %295 = math.tanh %294 : vector<8x16xf32>
    %296 = arith.mulf %289, %295 : vector<8x16xf32>
    %297 = tpu.concatenate %279, %296 in 0 : vector<8x16xf32>, vector<8x16xf32> -> vector<16x16xf32>
    %298 = tpu.concatenate %277, %294 in 0 : vector<8x16xf32>, vector<8x16xf32> -> vector<16x16xf32>
    %c40_39 = arith.constant 40 : index
    %c0_40 = arith.constant 0 : index
    %299 = vector.load %arg8[%c40_39, %c0_40] : memref<64x32xf32, #tpu.memory_space<vmem>>, vector<8x16xf32>
    tpu.vector_store %arg8[%c40_39, %c0_40], %279 {strides = array<i32>} : memref<64x32xf32, #tpu.memory_space<vmem>>, vector<8x16xf32>,
    %c16_41 = arith.constant 16 : index
    %c16_42 = arith.constant 16 : index
    %300 = vector.load %arg8[%c16_41, %c16_42] : memref<64x32xf32, #tpu.memory_space<vmem>>, vector<8x16xf32>
    tpu.vector_store %arg8[%c16_41, %c16_42], %296 {strides = array<i32>} : memref<64x32xf32, #tpu.memory_space<vmem>>, vector<8x16xf32>,
    %301 = arith.truncf %297 : vector<16x16xf32> to vector<16x16xbf16>
    %cst_43 = arith.constant dense<0.000000e+00> : vector<16x128xf32>
    %302 = tpu.matmul %301, %3, %cst_43 {dimension_numbers = #tpu.dot_dimension_numbers<[1], [0], [0], [1], [0, 0, 1, 1], [], []>} : vector<16x16xbf16>, vector<16x128xbf16>, vector<16x128xf32> -> vector<16x128xf32>
    %303 = vector.extract_strided_slice %10 {offsets = [6, 0, 0], sizes = [1, 8, 64], strides = [1, 1, 1]} : vector<8x8x128xf32> to vector<1x8x64xf32>
    %304 = vector.shape_cast %303 : vector<1x8x64xf32> to vector<8x64xf32>
    %305 = vector.extract_strided_slice %302 {offsets = [0, 0], sizes = [8, 64], strides = [1, 1]} : vector<16x128xf32> to vector<8x64xf32>
    %306 = arith.addf %304, %305 : vector<8x64xf32>
    %307 = vector.extract_strided_slice %10 {offsets = [1, 0, 64], sizes = [1, 8, 64], strides = [1, 1, 1]} : vector<8x8x128xf32> to vector<1x8x64xf32>
    %308 = vector.shape_cast %307 : vector<1x8x64xf32> to vector<8x64xf32>
    %309 = vector.extract_strided_slice %302 {offsets = [8, 64], sizes = [8, 64], strides = [1, 1]} : vector<16x128xf32> to vector<8x64xf32>
    %310 = arith.addf %308, %309 : vector<8x64xf32>
    %311 = vector.extract_strided_slice %298 {offsets = [0, 0], sizes = [8, 16], strides = [1, 1]} : vector<16x16xf32> to vector<8x16xf32>
    %312 = vector.extract_strided_slice %306 {offsets = [0, 0], sizes = [8, 48], strides = [1, 1]} : vector<8x64xf32> to vector<8x48xf32>
    %313 = arith.negf %312 : vector<8x48xf32>
    %314 = math.exp %313 : vector<8x48xf32>
    %cst_44 = arith.constant 1.000000e+00 : f32
    %315 = vector.broadcast %cst_44 : f32 to vector<8x48xf32>
    %316 = arith.addf %315, %314 : vector<8x48xf32>
    %317 = arith.divf %315, %316 : vector<8x48xf32>
    %318 = vector.extract_strided_slice %317 {offsets = [0, 0], sizes = [8, 16], strides = [1, 1]} : vector<8x48xf32> to vector<8x16xf32>
    %319 = vector.extract_strided_slice %317 {offsets = [0, 16], sizes = [8, 16], strides = [1, 1]} : vector<8x48xf32> to vector<8x16xf32>
    %320 = vector.extract_strided_slice %317 {offsets = [0, 32], sizes = [8, 16], strides = [1, 1]} : vector<8x48xf32> to vector<8x16xf32>
    %321 = vector.extract_strided_slice %306 {offsets = [0, 48], sizes = [8, 16], strides = [1, 1]} : vector<8x64xf32> to vector<8x16xf32>
    %322 = math.tanh %321 : vector<8x16xf32>
    %323 = arith.mulf %319, %311 : vector<8x16xf32>
    %324 = arith.mulf %318, %322 : vector<8x16xf32>
    %325 = arith.addf %323, %324 : vector<8x16xf32>
    %326 = math.tanh %325 : vector<8x16xf32>
    %327 = arith.mulf %320, %326 : vector<8x16xf32>
    %328 = vector.extract_strided_slice %298 {offsets = [8, 0], sizes = [8, 16], strides = [1, 1]} : vector<16x16xf32> to vector<8x16xf32>
    %329 = vector.extract_strided_slice %310 {offsets = [0, 0], sizes = [8, 48], strides = [1, 1]} : vector<8x64xf32> to vector<8x48xf32>
    %330 = arith.negf %329 : vector<8x48xf32>
    %331 = math.exp %330 : vector<8x48xf32>
    %cst_45 = arith.constant 1.000000e+00 : f32
    %332 = vector.broadcast %cst_45 : f32 to vector<8x48xf32>
    %333 = arith.addf %332, %331 : vector<8x48xf32>
    %334 = arith.divf %332, %333 : vector<8x48xf32>
    %335 = vector.extract_strided_slice %334 {offsets = [0, 0], sizes = [8, 16], strides = [1, 1]} : vector<8x48xf32> to vector<8x16xf32>
    %336 = vector.extract_strided_slice %334 {offsets = [0, 16], sizes = [8, 16], strides = [1, 1]} : vector<8x48xf32> to vector<8x16xf32>
    %337 = vector.extract_strided_slice %334 {offsets = [0, 32], sizes = [8, 16], strides = [1, 1]} : vector<8x48xf32> to vector<8x16xf32>
    %338 = vector.extract_strided_slice %310 {offsets = [0, 48], sizes = [8, 16], strides = [1, 1]} : vector<8x64xf32> to vector<8x16xf32>
    %339 = math.tanh %338 : vector<8x16xf32>
    %340 = arith.mulf %336, %328 : vector<8x16xf32>
    %341 = arith.mulf %335, %339 : vector<8x16xf32>
    %342 = arith.addf %340, %341 : vector<8x16xf32>
    %343 = math.tanh %342 : vector<8x16xf32>
    %344 = arith.mulf %337, %343 : vector<8x16xf32>
    %345 = tpu.concatenate %327, %344 in 0 : vector<8x16xf32>, vector<8x16xf32> -> vector<16x16xf32>
    %346 = tpu.concatenate %325, %342 in 0 : vector<8x16xf32>, vector<8x16xf32> -> vector<16x16xf32>
    %c48_46 = arith.constant 48 : index
    %c0_47 = arith.constant 0 : index
    %347 = vector.load %arg8[%c48_46, %c0_47] : memref<64x32xf32, #tpu.memory_space<vmem>>, vector<8x16xf32>
    tpu.vector_store %arg8[%c48_46, %c0_47], %327 {strides = array<i32>} : memref<64x32xf32, #tpu.memory_space<vmem>>, vector<8x16xf32>,
    %c8_48 = arith.constant 8 : index
    %c16_49 = arith.constant 16 : index
    %348 = vector.load %arg8[%c8_48, %c16_49] : memref<64x32xf32, #tpu.memory_space<vmem>>, vector<8x16xf32>
    tpu.vector_store %arg8[%c8_48, %c16_49], %344 {strides = array<i32>} : memref<64x32xf32, #tpu.memory_space<vmem>>, vector<8x16xf32>,
    %349 = arith.truncf %345 : vector<16x16xf32> to vector<16x16xbf16>
    %cst_50 = arith.constant dense<0.000000e+00> : vector<16x128xf32>
    %350 = tpu.matmul %349, %3, %cst_50 {dimension_numbers = #tpu.dot_dimension_numbers<[1], [0], [0], [1], [0, 0, 1, 1], [], []>} : vector<16x16xbf16>, vector<16x128xbf16>, vector<16x128xf32> -> vector<16x128xf32>
    %351 = vector.extract_strided_slice %10 {offsets = [7, 0, 0], sizes = [1, 8, 64], strides = [1, 1, 1]} : vector<8x8x128xf32> to vector<1x8x64xf32>
    %352 = vector.shape_cast %351 : vector<1x8x64xf32> to vector<8x64xf32>
    %353 = vector.extract_strided_slice %350 {offsets = [0, 0], sizes = [8, 64], strides = [1, 1]} : vector<16x128xf32> to vector<8x64xf32>
    %354 = arith.addf %352, %353 : vector<8x64xf32>
    %355 = vector.extract_strided_slice %10 {offsets = [0, 0, 64], sizes = [1, 8, 64], strides = [1, 1, 1]} : vector<8x8x128xf32> to vector<1x8x64xf32>
    %356 = vector.shape_cast %355 : vector<1x8x64xf32> to vector<8x64xf32>
    %357 = vector.extract_strided_slice %350 {offsets = [8, 64], sizes = [8, 64], strides = [1, 1]} : vector<16x128xf32> to vector<8x64xf32>
    %358 = arith.addf %356, %357 : vector<8x64xf32>
    %359 = vector.extract_strided_slice %346 {offsets = [0, 0], sizes = [8, 16], strides = [1, 1]} : vector<16x16xf32> to vector<8x16xf32>
    %360 = vector.extract_strided_slice %354 {offsets = [0, 0], sizes = [8, 48], strides = [1, 1]} : vector<8x64xf32> to vector<8x48xf32>
    %361 = arith.negf %360 : vector<8x48xf32>
    %362 = math.exp %361 : vector<8x48xf32>
    %cst_51 = arith.constant 1.000000e+00 : f32
    %363 = vector.broadcast %cst_51 : f32 to vector<8x48xf32>
    %364 = arith.addf %363, %362 : vector<8x48xf32>
    %365 = arith.divf %363, %364 : vector<8x48xf32>
    %366 = vector.extract_strided_slice %365 {offsets = [0, 0], sizes = [8, 16], strides = [1, 1]} : vector<8x48xf32> to vector<8x16xf32>
    %367 = vector.extract_strided_slice %365 {offsets = [0, 16], sizes = [8, 16], strides = [1, 1]} : vector<8x48xf32> to vector<8x16xf32>
    %368 = vector.extract_strided_slice %365 {offsets = [0, 32], sizes = [8, 16], strides = [1, 1]} : vector<8x48xf32> to vector<8x16xf32>
    %369 = vector.extract_strided_slice %354 {offsets = [0, 48], sizes = [8, 16], strides = [1, 1]} : vector<8x64xf32> to vector<8x16xf32>
    %370 = math.tanh %369 : vector<8x16xf32>
    %371 = arith.mulf %367, %359 : vector<8x16xf32>
    %372 = arith.mulf %366, %370 : vector<8x16xf32>
    %373 = arith.addf %371, %372 : vector<8x16xf32>
    %374 = math.tanh %373 : vector<8x16xf32>
    %375 = arith.mulf %368, %374 : vector<8x16xf32>
    %376 = vector.extract_strided_slice %346 {offsets = [8, 0], sizes = [8, 16], strides = [1, 1]} : vector<16x16xf32> to vector<8x16xf32>
    %377 = vector.extract_strided_slice %358 {offsets = [0, 0], sizes = [8, 48], strides = [1, 1]} : vector<8x64xf32> to vector<8x48xf32>
    %378 = arith.negf %377 : vector<8x48xf32>
    %379 = math.exp %378 : vector<8x48xf32>
    %cst_52 = arith.constant 1.000000e+00 : f32
    %380 = vector.broadcast %cst_52 : f32 to vector<8x48xf32>
    %381 = arith.addf %380, %379 : vector<8x48xf32>
    %382 = arith.divf %380, %381 : vector<8x48xf32>
    %383 = vector.extract_strided_slice %382 {offsets = [0, 0], sizes = [8, 16], strides = [1, 1]} : vector<8x48xf32> to vector<8x16xf32>
    %384 = vector.extract_strided_slice %382 {offsets = [0, 16], sizes = [8, 16], strides = [1, 1]} : vector<8x48xf32> to vector<8x16xf32>
    %385 = vector.extract_strided_slice %382 {offsets = [0, 32], sizes = [8, 16], strides = [1, 1]} : vector<8x48xf32> to vector<8x16xf32>
    %386 = vector.extract_strided_slice %358 {offsets = [0, 48], sizes = [8, 16], strides = [1, 1]} : vector<8x64xf32> to vector<8x16xf32>
    %387 = math.tanh %386 : vector<8x16xf32>
    %388 = arith.mulf %384, %376 : vector<8x16xf32>
    %389 = arith.mulf %383, %387 : vector<8x16xf32>
    %390 = arith.addf %388, %389 : vector<8x16xf32>
    %391 = math.tanh %390 : vector<8x16xf32>
    %392 = arith.mulf %385, %391 : vector<8x16xf32>
    %c56_53 = arith.constant 56 : index
    %c0_54 = arith.constant 0 : index
    %393 = vector.load %arg8[%c56_53, %c0_54] : memref<64x32xf32, #tpu.memory_space<vmem>>, vector<8x16xf32>
    tpu.vector_store %arg8[%c56_53, %c0_54], %375 {strides = array<i32>} : memref<64x32xf32, #tpu.memory_space<vmem>>, vector<8x16xf32>,
    %c0_55 = arith.constant 0 : index
    %c16_56 = arith.constant 16 : index
    %394 = vector.load %arg8[%c0_55, %c16_56] : memref<64x32xf32, #tpu.memory_space<vmem>>, vector<8x16xf32>
    tpu.vector_store %arg8[%c0_55, %c16_56], %392 {strides = array<i32>} : memref<64x32xf32, #tpu.memory_space<vmem>>, vector<8x16xf32>,
    %c0_57 = arith.constant 0 : index
    %c0_58 = arith.constant 0 : index
    %395 = vector.load %arg3[%c0_57, %c0_58] : memref<48x128xbf16, #tpu.memory_space<vmem>>, vector<48x128xbf16>
    %396 = vector.extract_strided_slice %395 {offsets = [0, 0], sizes = [32, 128], strides = [1, 1]} : vector<48x128xbf16> to vector<32x128xbf16>
    %397 = vector.extract_strided_slice %395 {offsets = [32, 0], sizes = [16, 128], strides = [1, 1]} : vector<48x128xbf16> to vector<16x128xbf16>
    %398 = vector.extract_strided_slice %0 {offsets = [1, 0], sizes = [1, 128], strides = [1, 1]} : vector<2x128xf32> to vector<1x128xf32>
    %c0_59 = arith.constant 0 : index
    %c0_60 = arith.constant 0 : index
    %399 = vector.load %arg8[%c0_59, %c0_60] : memref<64x32xf32, #tpu.memory_space<vmem>>, vector<64x32xf32>
    %400 = arith.truncf %399 : vector<64x32xf32> to vector<64x32xbf16>
    %cst_61 = arith.constant dense<0.000000e+00> : vector<64x128xf32>
    %401 = tpu.matmul %400, %396, %cst_61 {dimension_numbers = #tpu.dot_dimension_numbers<[1], [0], [0], [1], [0, 0, 1, 1], [], []>} : vector<64x32xbf16>, vector<32x128xbf16>, vector<64x128xf32> -> vector<64x128xf32>
    %402 = vector.broadcast %398 : vector<1x128xf32> to vector<64x128xf32>
    %403 = arith.addf %401, %402 : vector<64x128xf32>
    %404 = vector.shape_cast %403 : vector<64x128xf32> to vector<8x8x128xf32>
    %cst_62 = arith.constant 0.000000e+00 : f32
    %405 = vector.broadcast %cst_62 : f32 to vector<16x16xf32>
    %cst_63 = arith.constant 0.000000e+00 : f32
    %406 = vector.broadcast %cst_63 : f32 to vector<16x16xf32>
    %407 = arith.truncf %405 : vector<16x16xf32> to vector<16x16xbf16>
    %cst_64 = arith.constant dense<0.000000e+00> : vector<16x128xf32>
    %408 = tpu.matmul %407, %397, %cst_64 {dimension_numbers = #tpu.dot_dimension_numbers<[1], [0], [0], [1], [0, 0, 1, 1], [], []>} : vector<16x16xbf16>, vector<16x128xbf16>, vector<16x128xf32> -> vector<16x128xf32>
    %409 = vector.extract_strided_slice %404 {offsets = [0, 0, 0], sizes = [1, 8, 64], strides = [1, 1, 1]} : vector<8x8x128xf32> to vector<1x8x64xf32>
    %410 = vector.shape_cast %409 : vector<1x8x64xf32> to vector<8x64xf32>
    %411 = vector.extract_strided_slice %408 {offsets = [0, 0], sizes = [8, 64], strides = [1, 1]} : vector<16x128xf32> to vector<8x64xf32>
    %412 = arith.addf %410, %411 : vector<8x64xf32>
    %413 = vector.extract_strided_slice %404 {offsets = [7, 0, 64], sizes = [1, 8, 64], strides = [1, 1, 1]} : vector<8x8x128xf32> to vector<1x8x64xf32>
    %414 = vector.shape_cast %413 : vector<1x8x64xf32> to vector<8x64xf32>
    %415 = vector.extract_strided_slice %408 {offsets = [8, 64], sizes = [8, 64], strides = [1, 1]} : vector<16x128xf32> to vector<8x64xf32>
    %416 = arith.addf %414, %415 : vector<8x64xf32>
    %417 = vector.extract_strided_slice %406 {offsets = [0, 0], sizes = [8, 16], strides = [1, 1]} : vector<16x16xf32> to vector<8x16xf32>
    %418 = vector.extract_strided_slice %412 {offsets = [0, 0], sizes = [8, 48], strides = [1, 1]} : vector<8x64xf32> to vector<8x48xf32>
    %419 = arith.negf %418 : vector<8x48xf32>
    %420 = math.exp %419 : vector<8x48xf32>
    %cst_65 = arith.constant 1.000000e+00 : f32
    %421 = vector.broadcast %cst_65 : f32 to vector<8x48xf32>
    %422 = arith.addf %421, %420 : vector<8x48xf32>
    %423 = arith.divf %421, %422 : vector<8x48xf32>
    %424 = vector.extract_strided_slice %423 {offsets = [0, 0], sizes = [8, 16], strides = [1, 1]} : vector<8x48xf32> to vector<8x16xf32>
    %425 = vector.extract_strided_slice %423 {offsets = [0, 16], sizes = [8, 16], strides = [1, 1]} : vector<8x48xf32> to vector<8x16xf32>
    %426 = vector.extract_strided_slice %423 {offsets = [0, 32], sizes = [8, 16], strides = [1, 1]} : vector<8x48xf32> to vector<8x16xf32>
    %427 = vector.extract_strided_slice %412 {offsets = [0, 48], sizes = [8, 16], strides = [1, 1]} : vector<8x64xf32> to vector<8x16xf32>
    %428 = math.tanh %427 : vector<8x16xf32>
    %429 = arith.mulf %425, %417 : vector<8x16xf32>
    %430 = arith.mulf %424, %428 : vector<8x16xf32>
    %431 = arith.addf %429, %430 : vector<8x16xf32>
    %432 = math.tanh %431 : vector<8x16xf32>
    %433 = arith.mulf %426, %432 : vector<8x16xf32>
    %434 = vector.extract_strided_slice %406 {offsets = [8, 0], sizes = [8, 16], strides = [1, 1]} : vector<16x16xf32> to vector<8x16xf32>
    %435 = vector.extract_strided_slice %416 {offsets = [0, 0], sizes = [8, 48], strides = [1, 1]} : vector<8x64xf32> to vector<8x48xf32>
    %436 = arith.negf %435 : vector<8x48xf32>
    %437 = math.exp %436 : vector<8x48xf32>
    %cst_66 = arith.constant 1.000000e+00 : f32
    %438 = vector.broadcast %cst_66 : f32 to vector<8x48xf32>
    %439 = arith.addf %438, %437 : vector<8x48xf32>
    %440 = arith.divf %438, %439 : vector<8x48xf32>
    %441 = vector.extract_strided_slice %440 {offsets = [0, 0], sizes = [8, 16], strides = [1, 1]} : vector<8x48xf32> to vector<8x16xf32>
    %442 = vector.extract_strided_slice %440 {offsets = [0, 16], sizes = [8, 16], strides = [1, 1]} : vector<8x48xf32> to vector<8x16xf32>
    %443 = vector.extract_strided_slice %440 {offsets = [0, 32], sizes = [8, 16], strides = [1, 1]} : vector<8x48xf32> to vector<8x16xf32>
    %444 = vector.extract_strided_slice %416 {offsets = [0, 48], sizes = [8, 16], strides = [1, 1]} : vector<8x64xf32> to vector<8x16xf32>
    %445 = math.tanh %444 : vector<8x16xf32>
    %446 = arith.mulf %442, %434 : vector<8x16xf32>
    %447 = arith.mulf %441, %445 : vector<8x16xf32>
    %448 = arith.addf %446, %447 : vector<8x16xf32>
    %449 = math.tanh %448 : vector<8x16xf32>
    %450 = arith.mulf %443, %449 : vector<8x16xf32>
    %451 = tpu.concatenate %433, %450 in 0 : vector<8x16xf32>, vector<8x16xf32> -> vector<16x16xf32>
    %452 = tpu.concatenate %431, %448 in 0 : vector<8x16xf32>, vector<8x16xf32> -> vector<16x16xf32>
    %c0_67 = arith.constant 0 : index
    %c0_68 = arith.constant 0 : index
    %453 = vector.load %arg8[%c0_67, %c0_68] : memref<64x32xf32, #tpu.memory_space<vmem>>, vector<8x16xf32>
    tpu.vector_store %arg8[%c0_67, %c0_68], %433 {strides = array<i32>} : memref<64x32xf32, #tpu.memory_space<vmem>>, vector<8x16xf32>,
    %c56_69 = arith.constant 56 : index
    %c16_70 = arith.constant 16 : index
    %454 = vector.load %arg8[%c56_69, %c16_70] : memref<64x32xf32, #tpu.memory_space<vmem>>, vector<8x16xf32>
    tpu.vector_store %arg8[%c56_69, %c16_70], %450 {strides = array<i32>} : memref<64x32xf32, #tpu.memory_space<vmem>>, vector<8x16xf32>,
    %455 = arith.truncf %451 : vector<16x16xf32> to vector<16x16xbf16>
    %cst_71 = arith.constant dense<0.000000e+00> : vector<16x128xf32>
    %456 = tpu.matmul %455, %397, %cst_71 {dimension_numbers = #tpu.dot_dimension_numbers<[1], [0], [0], [1], [0, 0, 1, 1], [], []>} : vector<16x16xbf16>, vector<16x128xbf16>, vector<16x128xf32> -> vector<16x128xf32>
    %457 = vector.extract_strided_slice %404 {offsets = [1, 0, 0], sizes = [1, 8, 64], strides = [1, 1, 1]} : vector<8x8x128xf32> to vector<1x8x64xf32>
    %458 = vector.shape_cast %457 : vector<1x8x64xf32> to vector<8x64xf32>
    %459 = vector.extract_strided_slice %456 {offsets = [0, 0], sizes = [8, 64], strides = [1, 1]} : vector<16x128xf32> to vector<8x64xf32>
    %460 = arith.addf %458, %459 : vector<8x64xf32>
    %461 = vector.extract_strided_slice %404 {offsets = [6, 0, 64], sizes = [1, 8, 64], strides = [1, 1, 1]} : vector<8x8x128xf32> to vector<1x8x64xf32>
    %462 = vector.shape_cast %461 : vector<1x8x64xf32> to vector<8x64xf32>
    %463 = vector.extract_strided_slice %456 {offsets = [8, 64], sizes = [8, 64], strides = [1, 1]} : vector<16x128xf32> to vector<8x64xf32>
    %464 = arith.addf %462, %463 : vector<8x64xf32>
    %465 = vector.extract_strided_slice %452 {offsets = [0, 0], sizes = [8, 16], strides = [1, 1]} : vector<16x16xf32> to vector<8x16xf32>
    %466 = vector.extract_strided_slice %460 {offsets = [0, 0], sizes = [8, 48], strides = [1, 1]} : vector<8x64xf32> to vector<8x48xf32>
    %467 = arith.negf %466 : vector<8x48xf32>
    %468 = math.exp %467 : vector<8x48xf32>
    %cst_72 = arith.constant 1.000000e+00 : f32
    %469 = vector.broadcast %cst_72 : f32 to vector<8x48xf32>
    %470 = arith.addf %469, %468 : vector<8x48xf32>
    %471 = arith.divf %469, %470 : vector<8x48xf32>
    %472 = vector.extract_strided_slice %471 {offsets = [0, 0], sizes = [8, 16], strides = [1, 1]} : vector<8x48xf32> to vector<8x16xf32>
    %473 = vector.extract_strided_slice %471 {offsets = [0, 16], sizes = [8, 16], strides = [1, 1]} : vector<8x48xf32> to vector<8x16xf32>
    %474 = vector.extract_strided_slice %471 {offsets = [0, 32], sizes = [8, 16], strides = [1, 1]} : vector<8x48xf32> to vector<8x16xf32>
    %475 = vector.extract_strided_slice %460 {offsets = [0, 48], sizes = [8, 16], strides = [1, 1]} : vector<8x64xf32> to vector<8x16xf32>
    %476 = math.tanh %475 : vector<8x16xf32>
    %477 = arith.mulf %473, %465 : vector<8x16xf32>
    %478 = arith.mulf %472, %476 : vector<8x16xf32>
    %479 = arith.addf %477, %478 : vector<8x16xf32>
    %480 = math.tanh %479 : vector<8x16xf32>
    %481 = arith.mulf %474, %480 : vector<8x16xf32>
    %482 = vector.extract_strided_slice %452 {offsets = [8, 0], sizes = [8, 16], strides = [1, 1]} : vector<16x16xf32> to vector<8x16xf32>
    %483 = vector.extract_strided_slice %464 {offsets = [0, 0], sizes = [8, 48], strides = [1, 1]} : vector<8x64xf32> to vector<8x48xf32>
    %484 = arith.negf %483 : vector<8x48xf32>
    %485 = math.exp %484 : vector<8x48xf32>
    %cst_73 = arith.constant 1.000000e+00 : f32
    %486 = vector.broadcast %cst_73 : f32 to vector<8x48xf32>
    %487 = arith.addf %486, %485 : vector<8x48xf32>
    %488 = arith.divf %486, %487 : vector<8x48xf32>
    %489 = vector.extract_strided_slice %488 {offsets = [0, 0], sizes = [8, 16], strides = [1, 1]} : vector<8x48xf32> to vector<8x16xf32>
    %490 = vector.extract_strided_slice %488 {offsets = [0, 16], sizes = [8, 16], strides = [1, 1]} : vector<8x48xf32> to vector<8x16xf32>
    %491 = vector.extract_strided_slice %488 {offsets = [0, 32], sizes = [8, 16], strides = [1, 1]} : vector<8x48xf32> to vector<8x16xf32>
    %492 = vector.extract_strided_slice %464 {offsets = [0, 48], sizes = [8, 16], strides = [1, 1]} : vector<8x64xf32> to vector<8x16xf32>
    %493 = math.tanh %492 : vector<8x16xf32>
    %494 = arith.mulf %490, %482 : vector<8x16xf32>
    %495 = arith.mulf %489, %493 : vector<8x16xf32>
    %496 = arith.addf %494, %495 : vector<8x16xf32>
    %497 = math.tanh %496 : vector<8x16xf32>
    %498 = arith.mulf %491, %497 : vector<8x16xf32>
    %499 = tpu.concatenate %481, %498 in 0 : vector<8x16xf32>, vector<8x16xf32> -> vector<16x16xf32>
    %500 = tpu.concatenate %479, %496 in 0 : vector<8x16xf32>, vector<8x16xf32> -> vector<16x16xf32>
    %c8_74 = arith.constant 8 : index
    %c0_75 = arith.constant 0 : index
    %501 = vector.load %arg8[%c8_74, %c0_75] : memref<64x32xf32, #tpu.memory_space<vmem>>, vector<8x16xf32>
    tpu.vector_store %arg8[%c8_74, %c0_75], %481 {strides = array<i32>} : memref<64x32xf32, #tpu.memory_space<vmem>>, vector<8x16xf32>,
    %c48_76 = arith.constant 48 : index
    %c16_77 = arith.constant 16 : index
    %502 = vector.load %arg8[%c48_76, %c16_77] : memref<64x32xf32, #tpu.memory_space<vmem>>, vector<8x16xf32>
    tpu.vector_store %arg8[%c48_76, %c16_77], %498 {strides = array<i32>} : memref<64x32xf32, #tpu.memory_space<vmem>>, vector<8x16xf32>,
    %503 = arith.truncf %499 : vector<16x16xf32> to vector<16x16xbf16>
    %cst_78 = arith.constant dense<0.000000e+00> : vector<16x128xf32>
    %504 = tpu.matmul %503, %397, %cst_78 {dimension_numbers = #tpu.dot_dimension_numbers<[1], [0], [0], [1], [0, 0, 1, 1], [], []>} : vector<16x16xbf16>, vector<16x128xbf16>, vector<16x128xf32> -> vector<16x128xf32>
    %505 = vector.extract_strided_slice %404 {offsets = [2, 0, 0], sizes = [1, 8, 64], strides = [1, 1, 1]} : vector<8x8x128xf32> to vector<1x8x64xf32>
    %506 = vector.shape_cast %505 : vector<1x8x64xf32> to vector<8x64xf32>
    %507 = vector.extract_strided_slice %504 {offsets = [0, 0], sizes = [8, 64], strides = [1, 1]} : vector<16x128xf32> to vector<8x64xf32>
    %508 = arith.addf %506, %507 : vector<8x64xf32>
    %509 = vector.extract_strided_slice %404 {offsets = [5, 0, 64], sizes = [1, 8, 64], strides = [1, 1, 1]} : vector<8x8x128xf32> to vector<1x8x64xf32>
    %510 = vector.shape_cast %509 : vector<1x8x64xf32> to vector<8x64xf32>
    %511 = vector.extract_strided_slice %504 {offsets = [8, 64], sizes = [8, 64], strides = [1, 1]} : vector<16x128xf32> to vector<8x64xf32>
    %512 = arith.addf %510, %511 : vector<8x64xf32>
    %513 = vector.extract_strided_slice %500 {offsets = [0, 0], sizes = [8, 16], strides = [1, 1]} : vector<16x16xf32> to vector<8x16xf32>
    %514 = vector.extract_strided_slice %508 {offsets = [0, 0], sizes = [8, 48], strides = [1, 1]} : vector<8x64xf32> to vector<8x48xf32>
    %515 = arith.negf %514 : vector<8x48xf32>
    %516 = math.exp %515 : vector<8x48xf32>
    %cst_79 = arith.constant 1.000000e+00 : f32
    %517 = vector.broadcast %cst_79 : f32 to vector<8x48xf32>
    %518 = arith.addf %517, %516 : vector<8x48xf32>
    %519 = arith.divf %517, %518 : vector<8x48xf32>
    %520 = vector.extract_strided_slice %519 {offsets = [0, 0], sizes = [8, 16], strides = [1, 1]} : vector<8x48xf32> to vector<8x16xf32>
    %521 = vector.extract_strided_slice %519 {offsets = [0, 16], sizes = [8, 16], strides = [1, 1]} : vector<8x48xf32> to vector<8x16xf32>
    %522 = vector.extract_strided_slice %519 {offsets = [0, 32], sizes = [8, 16], strides = [1, 1]} : vector<8x48xf32> to vector<8x16xf32>
    %523 = vector.extract_strided_slice %508 {offsets = [0, 48], sizes = [8, 16], strides = [1, 1]} : vector<8x64xf32> to vector<8x16xf32>
    %524 = math.tanh %523 : vector<8x16xf32>
    %525 = arith.mulf %521, %513 : vector<8x16xf32>
    %526 = arith.mulf %520, %524 : vector<8x16xf32>
    %527 = arith.addf %525, %526 : vector<8x16xf32>
    %528 = math.tanh %527 : vector<8x16xf32>
    %529 = arith.mulf %522, %528 : vector<8x16xf32>
    %530 = vector.extract_strided_slice %500 {offsets = [8, 0], sizes = [8, 16], strides = [1, 1]} : vector<16x16xf32> to vector<8x16xf32>
    %531 = vector.extract_strided_slice %512 {offsets = [0, 0], sizes = [8, 48], strides = [1, 1]} : vector<8x64xf32> to vector<8x48xf32>
    %532 = arith.negf %531 : vector<8x48xf32>
    %533 = math.exp %532 : vector<8x48xf32>
    %cst_80 = arith.constant 1.000000e+00 : f32
    %534 = vector.broadcast %cst_80 : f32 to vector<8x48xf32>
    %535 = arith.addf %534, %533 : vector<8x48xf32>
    %536 = arith.divf %534, %535 : vector<8x48xf32>
    %537 = vector.extract_strided_slice %536 {offsets = [0, 0], sizes = [8, 16], strides = [1, 1]} : vector<8x48xf32> to vector<8x16xf32>
    %538 = vector.extract_strided_slice %536 {offsets = [0, 16], sizes = [8, 16], strides = [1, 1]} : vector<8x48xf32> to vector<8x16xf32>
    %539 = vector.extract_strided_slice %536 {offsets = [0, 32], sizes = [8, 16], strides = [1, 1]} : vector<8x48xf32> to vector<8x16xf32>
    %540 = vector.extract_strided_slice %512 {offsets = [0, 48], sizes = [8, 16], strides = [1, 1]} : vector<8x64xf32> to vector<8x16xf32>
    %541 = math.tanh %540 : vector<8x16xf32>
    %542 = arith.mulf %538, %530 : vector<8x16xf32>
    %543 = arith.mulf %537, %541 : vector<8x16xf32>
    %544 = arith.addf %542, %543 : vector<8x16xf32>
    %545 = math.tanh %544 : vector<8x16xf32>
    %546 = arith.mulf %539, %545 : vector<8x16xf32>
    %547 = tpu.concatenate %529, %546 in 0 : vector<8x16xf32>, vector<8x16xf32> -> vector<16x16xf32>
    %548 = tpu.concatenate %527, %544 in 0 : vector<8x16xf32>, vector<8x16xf32> -> vector<16x16xf32>
    %c16_81 = arith.constant 16 : index
    %c0_82 = arith.constant 0 : index
    %549 = vector.load %arg8[%c16_81, %c0_82] : memref<64x32xf32, #tpu.memory_space<vmem>>, vector<8x16xf32>
    tpu.vector_store %arg8[%c16_81, %c0_82], %529 {strides = array<i32>} : memref<64x32xf32, #tpu.memory_space<vmem>>, vector<8x16xf32>,
    %c40_83 = arith.constant 40 : index
    %c16_84 = arith.constant 16 : index
    %550 = vector.load %arg8[%c40_83, %c16_84] : memref<64x32xf32, #tpu.memory_space<vmem>>, vector<8x16xf32>
    tpu.vector_store %arg8[%c40_83, %c16_84], %546 {strides = array<i32>} : memref<64x32xf32, #tpu.memory_space<vmem>>, vector<8x16xf32>,
    %551 = arith.truncf %547 : vector<16x16xf32> to vector<16x16xbf16>
    %cst_85 = arith.constant dense<0.000000e+00> : vector<16x128xf32>
    %552 = tpu.matmul %551, %397, %cst_85 {dimension_numbers = #tpu.dot_dimension_numbers<[1], [0], [0], [1], [0, 0, 1, 1], [], []>} : vector<16x16xbf16>, vector<16x128xbf16>, vector<16x128xf32> -> vector<16x128xf32>
    %553 = vector.extract_strided_slice %404 {offsets = [3, 0, 0], sizes = [1, 8, 64], strides = [1, 1, 1]} : vector<8x8x128xf32> to vector<1x8x64xf32>
    %554 = vector.shape_cast %553 : vector<1x8x64xf32> to vector<8x64xf32>
    %555 = vector.extract_strided_slice %552 {offsets = [0, 0], sizes = [8, 64], strides = [1, 1]} : vector<16x128xf32> to vector<8x64xf32>
    %556 = arith.addf %554, %555 : vector<8x64xf32>
    %557 = vector.extract_strided_slice %404 {offsets = [4, 0, 64], sizes = [1, 8, 64], strides = [1, 1, 1]} : vector<8x8x128xf32> to vector<1x8x64xf32>
    %558 = vector.shape_cast %557 : vector<1x8x64xf32> to vector<8x64xf32>
    %559 = vector.extract_strided_slice %552 {offsets = [8, 64], sizes = [8, 64], strides = [1, 1]} : vector<16x128xf32> to vector<8x64xf32>
    %560 = arith.addf %558, %559 : vector<8x64xf32>
    %561 = vector.extract_strided_slice %548 {offsets = [0, 0], sizes = [8, 16], strides = [1, 1]} : vector<16x16xf32> to vector<8x16xf32>
    %562 = vector.extract_strided_slice %556 {offsets = [0, 0], sizes = [8, 48], strides = [1, 1]} : vector<8x64xf32> to vector<8x48xf32>
    %563 = arith.negf %562 : vector<8x48xf32>
    %564 = math.exp %563 : vector<8x48xf32>
    %cst_86 = arith.constant 1.000000e+00 : f32
    %565 = vector.broadcast %cst_86 : f32 to vector<8x48xf32>
    %566 = arith.addf %565, %564 : vector<8x48xf32>
    %567 = arith.divf %565, %566 : vector<8x48xf32>
    %568 = vector.extract_strided_slice %567 {offsets = [0, 0], sizes = [8, 16], strides = [1, 1]} : vector<8x48xf32> to vector<8x16xf32>
    %569 = vector.extract_strided_slice %567 {offsets = [0, 16], sizes = [8, 16], strides = [1, 1]} : vector<8x48xf32> to vector<8x16xf32>
    %570 = vector.extract_strided_slice %567 {offsets = [0, 32], sizes = [8, 16], strides = [1, 1]} : vector<8x48xf32> to vector<8x16xf32>
    %571 = vector.extract_strided_slice %556 {offsets = [0, 48], sizes = [8, 16], strides = [1, 1]} : vector<8x64xf32> to vector<8x16xf32>
    %572 = math.tanh %571 : vector<8x16xf32>
    %573 = arith.mulf %569, %561 : vector<8x16xf32>
    %574 = arith.mulf %568, %572 : vector<8x16xf32>
    %575 = arith.addf %573, %574 : vector<8x16xf32>
    %576 = math.tanh %575 : vector<8x16xf32>
    %577 = arith.mulf %570, %576 : vector<8x16xf32>
    %578 = vector.extract_strided_slice %548 {offsets = [8, 0], sizes = [8, 16], strides = [1, 1]} : vector<16x16xf32> to vector<8x16xf32>
    %579 = vector.extract_strided_slice %560 {offsets = [0, 0], sizes = [8, 48], strides = [1, 1]} : vector<8x64xf32> to vector<8x48xf32>
    %580 = arith.negf %579 : vector<8x48xf32>
    %581 = math.exp %580 : vector<8x48xf32>
    %cst_87 = arith.constant 1.000000e+00 : f32
    %582 = vector.broadcast %cst_87 : f32 to vector<8x48xf32>
    %583 = arith.addf %582, %581 : vector<8x48xf32>
    %584 = arith.divf %582, %583 : vector<8x48xf32>
    %585 = vector.extract_strided_slice %584 {offsets = [0, 0], sizes = [8, 16], strides = [1, 1]} : vector<8x48xf32> to vector<8x16xf32>
    %586 = vector.extract_strided_slice %584 {offsets = [0, 16], sizes = [8, 16], strides = [1, 1]} : vector<8x48xf32> to vector<8x16xf32>
    %587 = vector.extract_strided_slice %584 {offsets = [0, 32], sizes = [8, 16], strides = [1, 1]} : vector<8x48xf32> to vector<8x16xf32>
    %588 = vector.extract_strided_slice %560 {offsets = [0, 48], sizes = [8, 16], strides = [1, 1]} : vector<8x64xf32> to vector<8x16xf32>
    %589 = math.tanh %588 : vector<8x16xf32>
    %590 = arith.mulf %586, %578 : vector<8x16xf32>
    %591 = arith.mulf %585, %589 : vector<8x16xf32>
    %592 = arith.addf %590, %591 : vector<8x16xf32>
    %593 = math.tanh %592 : vector<8x16xf32>
    %594 = arith.mulf %587, %593 : vector<8x16xf32>
    %595 = tpu.concatenate %577, %594 in 0 : vector<8x16xf32>, vector<8x16xf32> -> vector<16x16xf32>
    %596 = tpu.concatenate %575, %592 in 0 : vector<8x16xf32>, vector<8x16xf32> -> vector<16x16xf32>
    %c24_88 = arith.constant 24 : index
    %c0_89 = arith.constant 0 : index
    %597 = vector.load %arg8[%c24_88, %c0_89] : memref<64x32xf32, #tpu.memory_space<vmem>>, vector<8x16xf32>
    tpu.vector_store %arg8[%c24_88, %c0_89], %577 {strides = array<i32>} : memref<64x32xf32, #tpu.memory_space<vmem>>, vector<8x16xf32>,
    %c32_90 = arith.constant 32 : index
    %c16_91 = arith.constant 16 : index
    %598 = vector.load %arg8[%c32_90, %c16_91] : memref<64x32xf32, #tpu.memory_space<vmem>>, vector<8x16xf32>
    tpu.vector_store %arg8[%c32_90, %c16_91], %594 {strides = array<i32>} : memref<64x32xf32, #tpu.memory_space<vmem>>, vector<8x16xf32>,
    %599 = arith.truncf %595 : vector<16x16xf32> to vector<16x16xbf16>
    %cst_92 = arith.constant dense<0.000000e+00> : vector<16x128xf32>
    %600 = tpu.matmul %599, %397, %cst_92 {dimension_numbers = #tpu.dot_dimension_numbers<[1], [0], [0], [1], [0, 0, 1, 1], [], []>} : vector<16x16xbf16>, vector<16x128xbf16>, vector<16x128xf32> -> vector<16x128xf32>
    %601 = vector.extract_strided_slice %404 {offsets = [4, 0, 0], sizes = [1, 8, 64], strides = [1, 1, 1]} : vector<8x8x128xf32> to vector<1x8x64xf32>
    %602 = vector.shape_cast %601 : vector<1x8x64xf32> to vector<8x64xf32>
    %603 = vector.extract_strided_slice %600 {offsets = [0, 0], sizes = [8, 64], strides = [1, 1]} : vector<16x128xf32> to vector<8x64xf32>
    %604 = arith.addf %602, %603 : vector<8x64xf32>
    %605 = vector.extract_strided_slice %404 {offsets = [3, 0, 64], sizes = [1, 8, 64], strides = [1, 1, 1]} : vector<8x8x128xf32> to vector<1x8x64xf32>
    %606 = vector.shape_cast %605 : vector<1x8x64xf32> to vector<8x64xf32>
    %607 = vector.extract_strided_slice %600 {offsets = [8, 64], sizes = [8, 64], strides = [1, 1]} : vector<16x128xf32> to vector<8x64xf32>
    %608 = arith.addf %606, %607 : vector<8x64xf32>
    %609 = vector.extract_strided_slice %596 {offsets = [0, 0], sizes = [8, 16], strides = [1, 1]} : vector<16x16xf32> to vector<8x16xf32>
    %610 = vector.extract_strided_slice %604 {offsets = [0, 0], sizes = [8, 48], strides = [1, 1]} : vector<8x64xf32> to vector<8x48xf32>
    %611 = arith.negf %610 : vector<8x48xf32>
    %612 = math.exp %611 : vector<8x48xf32>
    %cst_93 = arith.constant 1.000000e+00 : f32
    %613 = vector.broadcast %cst_93 : f32 to vector<8x48xf32>
    %614 = arith.addf %613, %612 : vector<8x48xf32>
    %615 = arith.divf %613, %614 : vector<8x48xf32>
    %616 = vector.extract_strided_slice %615 {offsets = [0, 0], sizes = [8, 16], strides = [1, 1]} : vector<8x48xf32> to vector<8x16xf32>
    %617 = vector.extract_strided_slice %615 {offsets = [0, 16], sizes = [8, 16], strides = [1, 1]} : vector<8x48xf32> to vector<8x16xf32>
    %618 = vector.extract_strided_slice %615 {offsets = [0, 32], sizes = [8, 16], strides = [1, 1]} : vector<8x48xf32> to vector<8x16xf32>
    %619 = vector.extract_strided_slice %604 {offsets = [0, 48], sizes = [8, 16], strides = [1, 1]} : vector<8x64xf32> to vector<8x16xf32>
    %620 = math.tanh %619 : vector<8x16xf32>
    %621 = arith.mulf %617, %609 : vector<8x16xf32>
    %622 = arith.mulf %616, %620 : vector<8x16xf32>
    %623 = arith.addf %621, %622 : vector<8x16xf32>
    %624 = math.tanh %623 : vector<8x16xf32>
    %625 = arith.mulf %618, %624 : vector<8x16xf32>
    %626 = vector.extract_strided_slice %596 {offsets = [8, 0], sizes = [8, 16], strides = [1, 1]} : vector<16x16xf32> to vector<8x16xf32>
    %627 = vector.extract_strided_slice %608 {offsets = [0, 0], sizes = [8, 48], strides = [1, 1]} : vector<8x64xf32> to vector<8x48xf32>
    %628 = arith.negf %627 : vector<8x48xf32>
    %629 = math.exp %628 : vector<8x48xf32>
    %cst_94 = arith.constant 1.000000e+00 : f32
    %630 = vector.broadcast %cst_94 : f32 to vector<8x48xf32>
    %631 = arith.addf %630, %629 : vector<8x48xf32>
    %632 = arith.divf %630, %631 : vector<8x48xf32>
    %633 = vector.extract_strided_slice %632 {offsets = [0, 0], sizes = [8, 16], strides = [1, 1]} : vector<8x48xf32> to vector<8x16xf32>
    %634 = vector.extract_strided_slice %632 {offsets = [0, 16], sizes = [8, 16], strides = [1, 1]} : vector<8x48xf32> to vector<8x16xf32>
    %635 = vector.extract_strided_slice %632 {offsets = [0, 32], sizes = [8, 16], strides = [1, 1]} : vector<8x48xf32> to vector<8x16xf32>
    %636 = vector.extract_strided_slice %608 {offsets = [0, 48], sizes = [8, 16], strides = [1, 1]} : vector<8x64xf32> to vector<8x16xf32>
    %637 = math.tanh %636 : vector<8x16xf32>
    %638 = arith.mulf %634, %626 : vector<8x16xf32>
    %639 = arith.mulf %633, %637 : vector<8x16xf32>
    %640 = arith.addf %638, %639 : vector<8x16xf32>
    %641 = math.tanh %640 : vector<8x16xf32>
    %642 = arith.mulf %635, %641 : vector<8x16xf32>
    %643 = tpu.concatenate %625, %642 in 0 : vector<8x16xf32>, vector<8x16xf32> -> vector<16x16xf32>
    %644 = tpu.concatenate %623, %640 in 0 : vector<8x16xf32>, vector<8x16xf32> -> vector<16x16xf32>
    %c32_95 = arith.constant 32 : index
    %c0_96 = arith.constant 0 : index
    %645 = vector.load %arg8[%c32_95, %c0_96] : memref<64x32xf32, #tpu.memory_space<vmem>>, vector<8x16xf32>
    tpu.vector_store %arg8[%c32_95, %c0_96], %625 {strides = array<i32>} : memref<64x32xf32, #tpu.memory_space<vmem>>, vector<8x16xf32>,
    %c24_97 = arith.constant 24 : index
    %c16_98 = arith.constant 16 : index
    %646 = vector.load %arg8[%c24_97, %c16_98] : memref<64x32xf32, #tpu.memory_space<vmem>>, vector<8x16xf32>
    tpu.vector_store %arg8[%c24_97, %c16_98], %642 {strides = array<i32>} : memref<64x32xf32, #tpu.memory_space<vmem>>, vector<8x16xf32>,
    %647 = arith.truncf %643 : vector<16x16xf32> to vector<16x16xbf16>
    %cst_99 = arith.constant dense<0.000000e+00> : vector<16x128xf32>
    %648 = tpu.matmul %647, %397, %cst_99 {dimension_numbers = #tpu.dot_dimension_numbers<[1], [0], [0], [1], [0, 0, 1, 1], [], []>} : vector<16x16xbf16>, vector<16x128xbf16>, vector<16x128xf32> -> vector<16x128xf32>
    %649 = vector.extract_strided_slice %404 {offsets = [5, 0, 0], sizes = [1, 8, 64], strides = [1, 1, 1]} : vector<8x8x128xf32> to vector<1x8x64xf32>
    %650 = vector.shape_cast %649 : vector<1x8x64xf32> to vector<8x64xf32>
    %651 = vector.extract_strided_slice %648 {offsets = [0, 0], sizes = [8, 64], strides = [1, 1]} : vector<16x128xf32> to vector<8x64xf32>
    %652 = arith.addf %650, %651 : vector<8x64xf32>
    %653 = vector.extract_strided_slice %404 {offsets = [2, 0, 64], sizes = [1, 8, 64], strides = [1, 1, 1]} : vector<8x8x128xf32> to vector<1x8x64xf32>
    %654 = vector.shape_cast %653 : vector<1x8x64xf32> to vector<8x64xf32>
    %655 = vector.extract_strided_slice %648 {offsets = [8, 64], sizes = [8, 64], strides = [1, 1]} : vector<16x128xf32> to vector<8x64xf32>
    %656 = arith.addf %654, %655 : vector<8x64xf32>
    %657 = vector.extract_strided_slice %644 {offsets = [0, 0], sizes = [8, 16], strides = [1, 1]} : vector<16x16xf32> to vector<8x16xf32>
    %658 = vector.extract_strided_slice %652 {offsets = [0, 0], sizes = [8, 48], strides = [1, 1]} : vector<8x64xf32> to vector<8x48xf32>
    %659 = arith.negf %658 : vector<8x48xf32>
    %660 = math.exp %659 : vector<8x48xf32>
    %cst_100 = arith.constant 1.000000e+00 : f32
    %661 = vector.broadcast %cst_100 : f32 to vector<8x48xf32>
    %662 = arith.addf %661, %660 : vector<8x48xf32>
    %663 = arith.divf %661, %662 : vector<8x48xf32>
    %664 = vector.extract_strided_slice %663 {offsets = [0, 0], sizes = [8, 16], strides = [1, 1]} : vector<8x48xf32> to vector<8x16xf32>
    %665 = vector.extract_strided_slice %663 {offsets = [0, 16], sizes = [8, 16], strides = [1, 1]} : vector<8x48xf32> to vector<8x16xf32>
    %666 = vector.extract_strided_slice %663 {offsets = [0, 32], sizes = [8, 16], strides = [1, 1]} : vector<8x48xf32> to vector<8x16xf32>
    %667 = vector.extract_strided_slice %652 {offsets = [0, 48], sizes = [8, 16], strides = [1, 1]} : vector<8x64xf32> to vector<8x16xf32>
    %668 = math.tanh %667 : vector<8x16xf32>
    %669 = arith.mulf %665, %657 : vector<8x16xf32>
    %670 = arith.mulf %664, %668 : vector<8x16xf32>
    %671 = arith.addf %669, %670 : vector<8x16xf32>
    %672 = math.tanh %671 : vector<8x16xf32>
    %673 = arith.mulf %666, %672 : vector<8x16xf32>
    %674 = vector.extract_strided_slice %644 {offsets = [8, 0], sizes = [8, 16], strides = [1, 1]} : vector<16x16xf32> to vector<8x16xf32>
    %675 = vector.extract_strided_slice %656 {offsets = [0, 0], sizes = [8, 48], strides = [1, 1]} : vector<8x64xf32> to vector<8x48xf32>
    %676 = arith.negf %675 : vector<8x48xf32>
    %677 = math.exp %676 : vector<8x48xf32>
    %cst_101 = arith.constant 1.000000e+00 : f32
    %678 = vector.broadcast %cst_101 : f32 to vector<8x48xf32>
    %679 = arith.addf %678, %677 : vector<8x48xf32>
    %680 = arith.divf %678, %679 : vector<8x48xf32>
    %681 = vector.extract_strided_slice %680 {offsets = [0, 0], sizes = [8, 16], strides = [1, 1]} : vector<8x48xf32> to vector<8x16xf32>
    %682 = vector.extract_strided_slice %680 {offsets = [0, 16], sizes = [8, 16], strides = [1, 1]} : vector<8x48xf32> to vector<8x16xf32>
    %683 = vector.extract_strided_slice %680 {offsets = [0, 32], sizes = [8, 16], strides = [1, 1]} : vector<8x48xf32> to vector<8x16xf32>
    %684 = vector.extract_strided_slice %656 {offsets = [0, 48], sizes = [8, 16], strides = [1, 1]} : vector<8x64xf32> to vector<8x16xf32>
    %685 = math.tanh %684 : vector<8x16xf32>
    %686 = arith.mulf %682, %674 : vector<8x16xf32>
    %687 = arith.mulf %681, %685 : vector<8x16xf32>
    %688 = arith.addf %686, %687 : vector<8x16xf32>
    %689 = math.tanh %688 : vector<8x16xf32>
    %690 = arith.mulf %683, %689 : vector<8x16xf32>
    %691 = tpu.concatenate %673, %690 in 0 : vector<8x16xf32>, vector<8x16xf32> -> vector<16x16xf32>
    %692 = tpu.concatenate %671, %688 in 0 : vector<8x16xf32>, vector<8x16xf32> -> vector<16x16xf32>
    %c40_102 = arith.constant 40 : index
    %c0_103 = arith.constant 0 : index
    %693 = vector.load %arg8[%c40_102, %c0_103] : memref<64x32xf32, #tpu.memory_space<vmem>>, vector<8x16xf32>
    tpu.vector_store %arg8[%c40_102, %c0_103], %673 {strides = array<i32>} : memref<64x32xf32, #tpu.memory_space<vmem>>, vector<8x16xf32>,
    %c16_104 = arith.constant 16 : index
    %c16_105 = arith.constant 16 : index
    %694 = vector.load %arg8[%c16_104, %c16_105] : memref<64x32xf32, #tpu.memory_space<vmem>>, vector<8x16xf32>
    tpu.vector_store %arg8[%c16_104, %c16_105], %690 {strides = array<i32>} : memref<64x32xf32, #tpu.memory_space<vmem>>, vector<8x16xf32>,
    %695 = arith.truncf %691 : vector<16x16xf32> to vector<16x16xbf16>
    %cst_106 = arith.constant dense<0.000000e+00> : vector<16x128xf32>
    %696 = tpu.matmul %695, %397, %cst_106 {dimension_numbers = #tpu.dot_dimension_numbers<[1], [0], [0], [1], [0, 0, 1, 1], [], []>} : vector<16x16xbf16>, vector<16x128xbf16>, vector<16x128xf32> -> vector<16x128xf32>
    %697 = vector.extract_strided_slice %404 {offsets = [6, 0, 0], sizes = [1, 8, 64], strides = [1, 1, 1]} : vector<8x8x128xf32> to vector<1x8x64xf32>
    %698 = vector.shape_cast %697 : vector<1x8x64xf32> to vector<8x64xf32>
    %699 = vector.extract_strided_slice %696 {offsets = [0, 0], sizes = [8, 64], strides = [1, 1]} : vector<16x128xf32> to vector<8x64xf32>
    %700 = arith.addf %698, %699 : vector<8x64xf32>
    %701 = vector.extract_strided_slice %404 {offsets = [1, 0, 64], sizes = [1, 8, 64], strides = [1, 1, 1]} : vector<8x8x128xf32> to vector<1x8x64xf32>
    %702 = vector.shape_cast %701 : vector<1x8x64xf32> to vector<8x64xf32>
    %703 = vector.extract_strided_slice %696 {offsets = [8, 64], sizes = [8, 64], strides = [1, 1]} : vector<16x128xf32> to vector<8x64xf32>
    %704 = arith.addf %702, %703 : vector<8x64xf32>
    %705 = vector.extract_strided_slice %692 {offsets = [0, 0], sizes = [8, 16], strides = [1, 1]} : vector<16x16xf32> to vector<8x16xf32>
    %706 = vector.extract_strided_slice %700 {offsets = [0, 0], sizes = [8, 48], strides = [1, 1]} : vector<8x64xf32> to vector<8x48xf32>
    %707 = arith.negf %706 : vector<8x48xf32>
    %708 = math.exp %707 : vector<8x48xf32>
    %cst_107 = arith.constant 1.000000e+00 : f32
    %709 = vector.broadcast %cst_107 : f32 to vector<8x48xf32>
    %710 = arith.addf %709, %708 : vector<8x48xf32>
    %711 = arith.divf %709, %710 : vector<8x48xf32>
    %712 = vector.extract_strided_slice %711 {offsets = [0, 0], sizes = [8, 16], strides = [1, 1]} : vector<8x48xf32> to vector<8x16xf32>
    %713 = vector.extract_strided_slice %711 {offsets = [0, 16], sizes = [8, 16], strides = [1, 1]} : vector<8x48xf32> to vector<8x16xf32>
    %714 = vector.extract_strided_slice %711 {offsets = [0, 32], sizes = [8, 16], strides = [1, 1]} : vector<8x48xf32> to vector<8x16xf32>
    %715 = vector.extract_strided_slice %700 {offsets = [0, 48], sizes = [8, 16], strides = [1, 1]} : vector<8x64xf32> to vector<8x16xf32>
    %716 = math.tanh %715 : vector<8x16xf32>
    %717 = arith.mulf %713, %705 : vector<8x16xf32>
    %718 = arith.mulf %712, %716 : vector<8x16xf32>
    %719 = arith.addf %717, %718 : vector<8x16xf32>
    %720 = math.tanh %719 : vector<8x16xf32>
    %721 = arith.mulf %714, %720 : vector<8x16xf32>
    %722 = vector.extract_strided_slice %692 {offsets = [8, 0], sizes = [8, 16], strides = [1, 1]} : vector<16x16xf32> to vector<8x16xf32>
    %723 = vector.extract_strided_slice %704 {offsets = [0, 0], sizes = [8, 48], strides = [1, 1]} : vector<8x64xf32> to vector<8x48xf32>
    %724 = arith.negf %723 : vector<8x48xf32>
    %725 = math.exp %724 : vector<8x48xf32>
    %cst_108 = arith.constant 1.000000e+00 : f32
    %726 = vector.broadcast %cst_108 : f32 to vector<8x48xf32>
    %727 = arith.addf %726, %725 : vector<8x48xf32>
    %728 = arith.divf %726, %727 : vector<8x48xf32>
    %729 = vector.extract_strided_slice %728 {offsets = [0, 0], sizes = [8, 16], strides = [1, 1]} : vector<8x48xf32> to vector<8x16xf32>
    %730 = vector.extract_strided_slice %728 {offsets = [0, 16], sizes = [8, 16], strides = [1, 1]} : vector<8x48xf32> to vector<8x16xf32>
    %731 = vector.extract_strided_slice %728 {offsets = [0, 32], sizes = [8, 16], strides = [1, 1]} : vector<8x48xf32> to vector<8x16xf32>
    %732 = vector.extract_strided_slice %704 {offsets = [0, 48], sizes = [8, 16], strides = [1, 1]} : vector<8x64xf32> to vector<8x16xf32>
    %733 = math.tanh %732 : vector<8x16xf32>
    %734 = arith.mulf %730, %722 : vector<8x16xf32>
    %735 = arith.mulf %729, %733 : vector<8x16xf32>
    %736 = arith.addf %734, %735 : vector<8x16xf32>
    %737 = math.tanh %736 : vector<8x16xf32>
    %738 = arith.mulf %731, %737 : vector<8x16xf32>
    %739 = tpu.concatenate %721, %738 in 0 : vector<8x16xf32>, vector<8x16xf32> -> vector<16x16xf32>
    %740 = tpu.concatenate %719, %736 in 0 : vector<8x16xf32>, vector<8x16xf32> -> vector<16x16xf32>
    %c48_109 = arith.constant 48 : index
    %c0_110 = arith.constant 0 : index
    %741 = vector.load %arg8[%c48_109, %c0_110] : memref<64x32xf32, #tpu.memory_space<vmem>>, vector<8x16xf32>
    tpu.vector_store %arg8[%c48_109, %c0_110], %721 {strides = array<i32>} : memref<64x32xf32, #tpu.memory_space<vmem>>, vector<8x16xf32>,
    %c8_111 = arith.constant 8 : index
    %c16_112 = arith.constant 16 : index
    %742 = vector.load %arg8[%c8_111, %c16_112] : memref<64x32xf32, #tpu.memory_space<vmem>>, vector<8x16xf32>
    tpu.vector_store %arg8[%c8_111, %c16_112], %738 {strides = array<i32>} : memref<64x32xf32, #tpu.memory_space<vmem>>, vector<8x16xf32>,
    %743 = arith.truncf %739 : vector<16x16xf32> to vector<16x16xbf16>
    %cst_113 = arith.constant dense<0.000000e+00> : vector<16x128xf32>
    %744 = tpu.matmul %743, %397, %cst_113 {dimension_numbers = #tpu.dot_dimension_numbers<[1], [0], [0], [1], [0, 0, 1, 1], [], []>} : vector<16x16xbf16>, vector<16x128xbf16>, vector<16x128xf32> -> vector<16x128xf32>
    %745 = vector.extract_strided_slice %404 {offsets = [7, 0, 0], sizes = [1, 8, 64], strides = [1, 1, 1]} : vector<8x8x128xf32> to vector<1x8x64xf32>
    %746 = vector.shape_cast %745 : vector<1x8x64xf32> to vector<8x64xf32>
    %747 = vector.extract_strided_slice %744 {offsets = [0, 0], sizes = [8, 64], strides = [1, 1]} : vector<16x128xf32> to vector<8x64xf32>
    %748 = arith.addf %746, %747 : vector<8x64xf32>
    %749 = vector.extract_strided_slice %404 {offsets = [0, 0, 64], sizes = [1, 8, 64], strides = [1, 1, 1]} : vector<8x8x128xf32> to vector<1x8x64xf32>
    %750 = vector.shape_cast %749 : vector<1x8x64xf32> to vector<8x64xf32>
    %751 = vector.extract_strided_slice %744 {offsets = [8, 64], sizes = [8, 64], strides = [1, 1]} : vector<16x128xf32> to vector<8x64xf32>
    %752 = arith.addf %750, %751 : vector<8x64xf32>
    %753 = vector.extract_strided_slice %740 {offsets = [0, 0], sizes = [8, 16], strides = [1, 1]} : vector<16x16xf32> to vector<8x16xf32>
    %754 = vector.extract_strided_slice %748 {offsets = [0, 0], sizes = [8, 48], strides = [1, 1]} : vector<8x64xf32> to vector<8x48xf32>
    %755 = arith.negf %754 : vector<8x48xf32>
    %756 = math.exp %755 : vector<8x48xf32>
    %cst_114 = arith.constant 1.000000e+00 : f32
    %757 = vector.broadcast %cst_114 : f32 to vector<8x48xf32>
    %758 = arith.addf %757, %756 : vector<8x48xf32>
    %759 = arith.divf %757, %758 : vector<8x48xf32>
    %760 = vector.extract_strided_slice %759 {offsets = [0, 0], sizes = [8, 16], strides = [1, 1]} : vector<8x48xf32> to vector<8x16xf32>
    %761 = vector.extract_strided_slice %759 {offsets = [0, 16], sizes = [8, 16], strides = [1, 1]} : vector<8x48xf32> to vector<8x16xf32>
    %762 = vector.extract_strided_slice %759 {offsets = [0, 32], sizes = [8, 16], strides = [1, 1]} : vector<8x48xf32> to vector<8x16xf32>
    %763 = vector.extract_strided_slice %748 {offsets = [0, 48], sizes = [8, 16], strides = [1, 1]} : vector<8x64xf32> to vector<8x16xf32>
    %764 = math.tanh %763 : vector<8x16xf32>
    %765 = arith.mulf %761, %753 : vector<8x16xf32>
    %766 = arith.mulf %760, %764 : vector<8x16xf32>
    %767 = arith.addf %765, %766 : vector<8x16xf32>
    %768 = math.tanh %767 : vector<8x16xf32>
    %769 = arith.mulf %762, %768 : vector<8x16xf32>
    %770 = vector.extract_strided_slice %740 {offsets = [8, 0], sizes = [8, 16], strides = [1, 1]} : vector<16x16xf32> to vector<8x16xf32>
    %771 = vector.extract_strided_slice %752 {offsets = [0, 0], sizes = [8, 48], strides = [1, 1]} : vector<8x64xf32> to vector<8x48xf32>
    %772 = arith.negf %771 : vector<8x48xf32>
    %773 = math.exp %772 : vector<8x48xf32>
    %cst_115 = arith.constant 1.000000e+00 : f32
    %774 = vector.broadcast %cst_115 : f32 to vector<8x48xf32>
    %775 = arith.addf %774, %773 : vector<8x48xf32>
    %776 = arith.divf %774, %775 : vector<8x48xf32>
    %777 = vector.extract_strided_slice %776 {offsets = [0, 0], sizes = [8, 16], strides = [1, 1]} : vector<8x48xf32> to vector<8x16xf32>
    %778 = vector.extract_strided_slice %776 {offsets = [0, 16], sizes = [8, 16], strides = [1, 1]} : vector<8x48xf32> to vector<8x16xf32>
    %779 = vector.extract_strided_slice %776 {offsets = [0, 32], sizes = [8, 16], strides = [1, 1]} : vector<8x48xf32> to vector<8x16xf32>
    %780 = vector.extract_strided_slice %752 {offsets = [0, 48], sizes = [8, 16], strides = [1, 1]} : vector<8x64xf32> to vector<8x16xf32>
    %781 = math.tanh %780 : vector<8x16xf32>
    %782 = arith.mulf %778, %770 : vector<8x16xf32>
    %783 = arith.mulf %777, %781 : vector<8x16xf32>
    %784 = arith.addf %782, %783 : vector<8x16xf32>
    %785 = math.tanh %784 : vector<8x16xf32>
    %786 = arith.mulf %779, %785 : vector<8x16xf32>
    %c56_116 = arith.constant 56 : index
    %c0_117 = arith.constant 0 : index
    %787 = vector.load %arg8[%c56_116, %c0_117] : memref<64x32xf32, #tpu.memory_space<vmem>>, vector<8x16xf32>
    tpu.vector_store %arg8[%c56_116, %c0_117], %769 {strides = array<i32>} : memref<64x32xf32, #tpu.memory_space<vmem>>, vector<8x16xf32>,
    %c0_118 = arith.constant 0 : index
    %c16_119 = arith.constant 16 : index
    %788 = vector.load %arg8[%c0_118, %c16_119] : memref<64x32xf32, #tpu.memory_space<vmem>>, vector<8x16xf32>
    tpu.vector_store %arg8[%c0_118, %c16_119], %786 {strides = array<i32>} : memref<64x32xf32, #tpu.memory_space<vmem>>, vector<8x16xf32>,
    %c0_120 = arith.constant 0 : index
    %c0_121 = arith.constant 0 : index
    %789 = vector.load %arg5[%c0_120, %c0_121] : memref<43x8xf32, #tpu.memory_space<vmem>>, vector<43x8xf32>
    %790 = vector.extract_strided_slice %789 {offsets = [0, 0], sizes = [32, 8], strides = [1, 1]} : vector<43x8xf32> to vector<32x8xf32>
    %791 = vector.extract_strided_slice %789 {offsets = [32, 0], sizes = [1, 8], strides = [1, 1]} : vector<43x8xf32> to vector<1x8xf32>
    %792 = vector.extract_strided_slice %789 {offsets = [33, 0], sizes = [8, 8], strides = [1, 1]} : vector<43x8xf32> to vector<8x8xf32>
    %793 = vector.extract_strided_slice %789 {offsets = [41, 0], sizes = [1, 8], strides = [1, 1]} : vector<43x8xf32> to vector<1x8xf32>
    %794 = vector.extract_strided_slice %789 {offsets = [42, 0], sizes = [1, 8], strides = [1, 1]} : vector<43x8xf32> to vector<1x8xf32>
    %c0_122 = arith.constant 0 : index
    %c0_123 = arith.constant 0 : index
    %795 = vector.load %arg8[%c0_122, %c0_123] : memref<64x32xf32, #tpu.memory_space<vmem>>, vector<64x32xf32>
    %cst_124 = arith.constant dense<0.000000e+00> : vector<64x8xf32>
    %796 = tpu.matmul %795, %790, %cst_124 {dimension_numbers = #tpu.dot_dimension_numbers<[1], [0], [0], [1], [0, 0, 1, 1], [], []>} : vector<64x32xf32>, vector<32x8xf32>, vector<64x8xf32> -> vector<64x8xf32>
    %797 = vector.broadcast %791 : vector<1x8xf32> to vector<64x8xf32>
    %798 = arith.addf %796, %797 : vector<64x8xf32>
    %799 = vector.shape_cast %798 : vector<64x8xf32> to vector<8x8x8xf32>
    %c0_125 = arith.constant 0 : index
    %c0_126 = arith.constant 0 : index
    %c0_127 = arith.constant 0 : index
    %800 = vector.load %arg6[%c0_125, %c0_126, %c0_127] : memref<8x8x8xf32, #tpu.memory_space<vmem>>, vector<8x8x8xf32>
    %cst_128 = arith.constant 0.000000e+00 : f32
    %801 = vector.broadcast %cst_128 : f32 to vector<8x1xf32>
    %802 = vector.extract_strided_slice %799 {offsets = [0, 0, 0], sizes = [1, 8, 8], strides = [1, 1, 1]} : vector<8x8x8xf32> to vector<1x8x8xf32>
    %803 = vector.shape_cast %802 : vector<1x8x8xf32> to vector<8x8xf32>
    %804 = vector.extract_strided_slice %800 {offsets = [0, 0, 0], sizes = [1, 8, 8], strides = [1, 1, 1]} : vector<8x8x8xf32> to vector<1x8x8xf32>
    %805 = vector.shape_cast %804 : vector<1x8x8xf32> to vector<8x8xf32>
    %806 = arith.mulf %803, %805 : vector<8x8xf32>
    %cst_129 = arith.constant dense<0.000000e+00> : vector<8xf32>
    %807 = vector.multi_reduction <add>, %806, %cst_129 [1] : vector<8x8xf32> to vector<8xf32>
    %808 = vector.shape_cast %807 : vector<8xf32> to vector<8x1xf32>
    %809 = arith.addf %801, %808 : vector<8x1xf32>
    %810 = vector.extract_strided_slice %799 {offsets = [1, 0, 0], sizes = [1, 8, 8], strides = [1, 1, 1]} : vector<8x8x8xf32> to vector<1x8x8xf32>
    %811 = vector.shape_cast %810 : vector<1x8x8xf32> to vector<8x8xf32>
    %812 = vector.extract_strided_slice %800 {offsets = [1, 0, 0], sizes = [1, 8, 8], strides = [1, 1, 1]} : vector<8x8x8xf32> to vector<1x8x8xf32>
    %813 = vector.shape_cast %812 : vector<1x8x8xf32> to vector<8x8xf32>
    %814 = arith.mulf %811, %813 : vector<8x8xf32>
    %cst_130 = arith.constant dense<0.000000e+00> : vector<8xf32>
    %815 = vector.multi_reduction <add>, %814, %cst_130 [1] : vector<8x8xf32> to vector<8xf32>
    %816 = vector.shape_cast %815 : vector<8xf32> to vector<8x1xf32>
    %817 = arith.addf %809, %816 : vector<8x1xf32>
    %818 = vector.extract_strided_slice %799 {offsets = [2, 0, 0], sizes = [1, 8, 8], strides = [1, 1, 1]} : vector<8x8x8xf32> to vector<1x8x8xf32>
    %819 = vector.shape_cast %818 : vector<1x8x8xf32> to vector<8x8xf32>
    %820 = vector.extract_strided_slice %800 {offsets = [2, 0, 0], sizes = [1, 8, 8], strides = [1, 1, 1]} : vector<8x8x8xf32> to vector<1x8x8xf32>
    %821 = vector.shape_cast %820 : vector<1x8x8xf32> to vector<8x8xf32>
    %822 = arith.mulf %819, %821 : vector<8x8xf32>
    %cst_131 = arith.constant dense<0.000000e+00> : vector<8xf32>
    %823 = vector.multi_reduction <add>, %822, %cst_131 [1] : vector<8x8xf32> to vector<8xf32>
    %824 = vector.shape_cast %823 : vector<8xf32> to vector<8x1xf32>
    %825 = arith.addf %817, %824 : vector<8x1xf32>
    %826 = vector.extract_strided_slice %799 {offsets = [3, 0, 0], sizes = [1, 8, 8], strides = [1, 1, 1]} : vector<8x8x8xf32> to vector<1x8x8xf32>
    %827 = vector.shape_cast %826 : vector<1x8x8xf32> to vector<8x8xf32>
    %828 = vector.extract_strided_slice %800 {offsets = [3, 0, 0], sizes = [1, 8, 8], strides = [1, 1, 1]} : vector<8x8x8xf32> to vector<1x8x8xf32>
    %829 = vector.shape_cast %828 : vector<1x8x8xf32> to vector<8x8xf32>
    %830 = arith.mulf %827, %829 : vector<8x8xf32>
    %cst_132 = arith.constant dense<0.000000e+00> : vector<8xf32>
    %831 = vector.multi_reduction <add>, %830, %cst_132 [1] : vector<8x8xf32> to vector<8xf32>
    %832 = vector.shape_cast %831 : vector<8xf32> to vector<8x1xf32>
    %833 = arith.addf %825, %832 : vector<8x1xf32>
    %834 = vector.extract_strided_slice %799 {offsets = [4, 0, 0], sizes = [1, 8, 8], strides = [1, 1, 1]} : vector<8x8x8xf32> to vector<1x8x8xf32>
    %835 = vector.shape_cast %834 : vector<1x8x8xf32> to vector<8x8xf32>
    %836 = vector.extract_strided_slice %800 {offsets = [4, 0, 0], sizes = [1, 8, 8], strides = [1, 1, 1]} : vector<8x8x8xf32> to vector<1x8x8xf32>
    %837 = vector.shape_cast %836 : vector<1x8x8xf32> to vector<8x8xf32>
    %838 = arith.mulf %835, %837 : vector<8x8xf32>
    %cst_133 = arith.constant dense<0.000000e+00> : vector<8xf32>
    %839 = vector.multi_reduction <add>, %838, %cst_133 [1] : vector<8x8xf32> to vector<8xf32>
    %840 = vector.shape_cast %839 : vector<8xf32> to vector<8x1xf32>
    %841 = arith.addf %833, %840 : vector<8x1xf32>
    %842 = vector.extract_strided_slice %799 {offsets = [5, 0, 0], sizes = [1, 8, 8], strides = [1, 1, 1]} : vector<8x8x8xf32> to vector<1x8x8xf32>
    %843 = vector.shape_cast %842 : vector<1x8x8xf32> to vector<8x8xf32>
    %844 = vector.extract_strided_slice %800 {offsets = [5, 0, 0], sizes = [1, 8, 8], strides = [1, 1, 1]} : vector<8x8x8xf32> to vector<1x8x8xf32>
    %845 = vector.shape_cast %844 : vector<1x8x8xf32> to vector<8x8xf32>
    %846 = arith.mulf %843, %845 : vector<8x8xf32>
    %cst_134 = arith.constant dense<0.000000e+00> : vector<8xf32>
    %847 = vector.multi_reduction <add>, %846, %cst_134 [1] : vector<8x8xf32> to vector<8xf32>
    %848 = vector.shape_cast %847 : vector<8xf32> to vector<8x1xf32>
    %849 = arith.addf %841, %848 : vector<8x1xf32>
    %850 = vector.extract_strided_slice %799 {offsets = [6, 0, 0], sizes = [1, 8, 8], strides = [1, 1, 1]} : vector<8x8x8xf32> to vector<1x8x8xf32>
    %851 = vector.shape_cast %850 : vector<1x8x8xf32> to vector<8x8xf32>
    %852 = vector.extract_strided_slice %800 {offsets = [6, 0, 0], sizes = [1, 8, 8], strides = [1, 1, 1]} : vector<8x8x8xf32> to vector<1x8x8xf32>
    %853 = vector.shape_cast %852 : vector<1x8x8xf32> to vector<8x8xf32>
    %854 = arith.mulf %851, %853 : vector<8x8xf32>
    %cst_135 = arith.constant dense<0.000000e+00> : vector<8xf32>
    %855 = vector.multi_reduction <add>, %854, %cst_135 [1] : vector<8x8xf32> to vector<8xf32>
    %856 = vector.shape_cast %855 : vector<8xf32> to vector<8x1xf32>
    %857 = arith.addf %849, %856 : vector<8x1xf32>
    %858 = vector.extract_strided_slice %799 {offsets = [7, 0, 0], sizes = [1, 8, 8], strides = [1, 1, 1]} : vector<8x8x8xf32> to vector<1x8x8xf32>
    %859 = vector.shape_cast %858 : vector<1x8x8xf32> to vector<8x8xf32>
    %860 = vector.extract_strided_slice %800 {offsets = [7, 0, 0], sizes = [1, 8, 8], strides = [1, 1, 1]} : vector<8x8x8xf32> to vector<1x8x8xf32>
    %861 = vector.shape_cast %860 : vector<1x8x8xf32> to vector<8x8xf32>
    %862 = arith.mulf %859, %861 : vector<8x8xf32>
    %cst_136 = arith.constant dense<0.000000e+00> : vector<8xf32>
    %863 = vector.multi_reduction <add>, %862, %cst_136 [1] : vector<8x8xf32> to vector<8xf32>
    %864 = vector.shape_cast %863 : vector<8xf32> to vector<8x1xf32>
    %865 = arith.addf %857, %864 : vector<8x1xf32>
    %866 = vector.shape_cast %792 : vector<8x8xf32> to vector<1x8x8xf32>
    %867 = vector.extract_strided_slice %799 {offsets = [0, 0, 0], sizes = [1, 8, 8], strides = [1, 1, 1]} : vector<8x8x8xf32> to vector<1x8x8xf32>
    %868 = vector.shape_cast %867 : vector<1x8x8xf32> to vector<8x8xf32>
    %869 = vector.broadcast %793 : vector<1x8xf32> to vector<8x8xf32>
    %870 = arith.addf %869, %868 : vector<8x8xf32>
    %871 = vector.extract_strided_slice %800 {offsets = [1, 0, 0], sizes = [1, 8, 8], strides = [1, 1, 1]} : vector<8x8x8xf32> to vector<1x8x8xf32>
    %872 = vector.shape_cast %871 : vector<1x8x8xf32> to vector<8x8xf32>
    %cst_137 = arith.constant dense<0.000000e+00> : vector<8xf32>
    %873 = vector.multi_reduction <add>, %872, %cst_137 [1] : vector<8x8xf32> to vector<8xf32>
    %874 = vector.shape_cast %873 : vector<8xf32> to vector<8x1xf32>
    %875 = vector.shape_cast %870 : vector<8x8xf32> to vector<8x1x8xf32>
    %876 = vector.broadcast %875 : vector<8x1x8xf32> to vector<8x8x8xf32>
    %877 = vector.broadcast %866 : vector<1x8x8xf32> to vector<8x8x8xf32>
    %878 = arith.addf %876, %877 : vector<8x8x8xf32>
    %cst_138 = arith.constant dense<0xFF800000> : vector<8x8xf32>
    %879 = vector.multi_reduction <maximumf>, %878, %cst_138 [2] : vector<8x8x8xf32> to vector<8x8xf32>
    %880 = vector.shape_cast %879 : vector<8x8xf32> to vector<8x8x1xf32>
    %881 = vector.broadcast %880 : vector<8x8x1xf32> to vector<8x8x8xf32>
    %882 = arith.subf %878, %881 : vector<8x8x8xf32>
    %883 = math.exp %882 : vector<8x8x8xf32>
    %cst_139 = arith.constant dense<0.000000e+00> : vector<8x8xf32>
    %884 = vector.multi_reduction <add>, %883, %cst_139 [2] : vector<8x8x8xf32> to vector<8x8xf32>
    %885 = math.log %884 : vector<8x8xf32>
    %886 = arith.addf %879, %885 : vector<8x8xf32>
    %cst_140 = arith.constant 5.000000e-01 : f32
    %887 = vector.broadcast %cst_140 : f32 to vector<8x1xf32>
    %888 = arith.cmpf ogt, %874, %887 : vector<8x1xf32>
    %889 = vector.extract_strided_slice %799 {offsets = [1, 0, 0], sizes = [1, 8, 8], strides = [1, 1, 1]} : vector<8x8x8xf32> to vector<1x8x8xf32>
    %890 = vector.shape_cast %889 : vector<1x8x8xf32> to vector<8x8xf32>
    %891 = arith.addf %886, %890 : vector<8x8xf32>
    %892 = vector.shape_cast %888 : vector<8x1xi1> to vector<8x1xi1>
    %893 = vector.broadcast %892 : vector<8x1xi1> to vector<8x8xi1>
    %894 = arith.select %893, %891, %870 : vector<8x8xi1>, vector<8x8xf32>
    %895 = vector.extract_strided_slice %800 {offsets = [2, 0, 0], sizes = [1, 8, 8], strides = [1, 1, 1]} : vector<8x8x8xf32> to vector<1x8x8xf32>
    %896 = vector.shape_cast %895 : vector<1x8x8xf32> to vector<8x8xf32>
    %cst_141 = arith.constant dense<0.000000e+00> : vector<8xf32>
    %897 = vector.multi_reduction <add>, %896, %cst_141 [1] : vector<8x8xf32> to vector<8xf32>
    %898 = vector.shape_cast %897 : vector<8xf32> to vector<8x1xf32>
    %899 = vector.shape_cast %894 : vector<8x8xf32> to vector<8x1x8xf32>
    %900 = vector.broadcast %899 : vector<8x1x8xf32> to vector<8x8x8xf32>
    %901 = vector.broadcast %866 : vector<1x8x8xf32> to vector<8x8x8xf32>
    %902 = arith.addf %900, %901 : vector<8x8x8xf32>
    %cst_142 = arith.constant dense<0xFF800000> : vector<8x8xf32>
    %903 = vector.multi_reduction <maximumf>, %902, %cst_142 [2] : vector<8x8x8xf32> to vector<8x8xf32>
    %904 = vector.shape_cast %903 : vector<8x8xf32> to vector<8x8x1xf32>
    %905 = vector.broadcast %904 : vector<8x8x1xf32> to vector<8x8x8xf32>
    %906 = arith.subf %902, %905 : vector<8x8x8xf32>
    %907 = math.exp %906 : vector<8x8x8xf32>
    %cst_143 = arith.constant dense<0.000000e+00> : vector<8x8xf32>
    %908 = vector.multi_reduction <add>, %907, %cst_143 [2] : vector<8x8x8xf32> to vector<8x8xf32>
    %909 = math.log %908 : vector<8x8xf32>
    %910 = arith.addf %903, %909 : vector<8x8xf32>
    %cst_144 = arith.constant 5.000000e-01 : f32
    %911 = vector.broadcast %cst_144 : f32 to vector<8x1xf32>
    %912 = arith.cmpf ogt, %898, %911 : vector<8x1xf32>
    %913 = vector.extract_strided_slice %799 {offsets = [2, 0, 0], sizes = [1, 8, 8], strides = [1, 1, 1]} : vector<8x8x8xf32> to vector<1x8x8xf32>
    %914 = vector.shape_cast %913 : vector<1x8x8xf32> to vector<8x8xf32>
    %915 = arith.addf %910, %914 : vector<8x8xf32>
    %916 = vector.shape_cast %912 : vector<8x1xi1> to vector<8x1xi1>
    %917 = vector.broadcast %916 : vector<8x1xi1> to vector<8x8xi1>
    %918 = arith.select %917, %915, %894 : vector<8x8xi1>, vector<8x8xf32>
    %919 = vector.extract_strided_slice %800 {offsets = [3, 0, 0], sizes = [1, 8, 8], strides = [1, 1, 1]} : vector<8x8x8xf32> to vector<1x8x8xf32>
    %920 = vector.shape_cast %919 : vector<1x8x8xf32> to vector<8x8xf32>
    %cst_145 = arith.constant dense<0.000000e+00> : vector<8xf32>
    %921 = vector.multi_reduction <add>, %920, %cst_145 [1] : vector<8x8xf32> to vector<8xf32>
    %922 = vector.shape_cast %921 : vector<8xf32> to vector<8x1xf32>
    %923 = vector.shape_cast %918 : vector<8x8xf32> to vector<8x1x8xf32>
    %924 = vector.broadcast %923 : vector<8x1x8xf32> to vector<8x8x8xf32>
    %925 = vector.broadcast %866 : vector<1x8x8xf32> to vector<8x8x8xf32>
    %926 = arith.addf %924, %925 : vector<8x8x8xf32>
    %cst_146 = arith.constant dense<0xFF800000> : vector<8x8xf32>
    %927 = vector.multi_reduction <maximumf>, %926, %cst_146 [2] : vector<8x8x8xf32> to vector<8x8xf32>
    %928 = vector.shape_cast %927 : vector<8x8xf32> to vector<8x8x1xf32>
    %929 = vector.broadcast %928 : vector<8x8x1xf32> to vector<8x8x8xf32>
    %930 = arith.subf %926, %929 : vector<8x8x8xf32>
    %931 = math.exp %930 : vector<8x8x8xf32>
    %cst_147 = arith.constant dense<0.000000e+00> : vector<8x8xf32>
    %932 = vector.multi_reduction <add>, %931, %cst_147 [2] : vector<8x8x8xf32> to vector<8x8xf32>
    %933 = math.log %932 : vector<8x8xf32>
    %934 = arith.addf %927, %933 : vector<8x8xf32>
    %cst_148 = arith.constant 5.000000e-01 : f32
    %935 = vector.broadcast %cst_148 : f32 to vector<8x1xf32>
    %936 = arith.cmpf ogt, %922, %935 : vector<8x1xf32>
    %937 = vector.extract_strided_slice %799 {offsets = [3, 0, 0], sizes = [1, 8, 8], strides = [1, 1, 1]} : vector<8x8x8xf32> to vector<1x8x8xf32>
    %938 = vector.shape_cast %937 : vector<1x8x8xf32> to vector<8x8xf32>
    %939 = arith.addf %934, %938 : vector<8x8xf32>
    %940 = vector.shape_cast %936 : vector<8x1xi1> to vector<8x1xi1>
    %941 = vector.broadcast %940 : vector<8x1xi1> to vector<8x8xi1>
    %942 = arith.select %941, %939, %918 : vector<8x8xi1>, vector<8x8xf32>
    %943 = vector.extract_strided_slice %800 {offsets = [4, 0, 0], sizes = [1, 8, 8], strides = [1, 1, 1]} : vector<8x8x8xf32> to vector<1x8x8xf32>
    %944 = vector.shape_cast %943 : vector<1x8x8xf32> to vector<8x8xf32>
    %cst_149 = arith.constant dense<0.000000e+00> : vector<8xf32>
    %945 = vector.multi_reduction <add>, %944, %cst_149 [1] : vector<8x8xf32> to vector<8xf32>
    %946 = vector.shape_cast %945 : vector<8xf32> to vector<8x1xf32>
    %947 = vector.shape_cast %942 : vector<8x8xf32> to vector<8x1x8xf32>
    %948 = vector.broadcast %947 : vector<8x1x8xf32> to vector<8x8x8xf32>
    %949 = vector.broadcast %866 : vector<1x8x8xf32> to vector<8x8x8xf32>
    %950 = arith.addf %948, %949 : vector<8x8x8xf32>
    %cst_150 = arith.constant dense<0xFF800000> : vector<8x8xf32>
    %951 = vector.multi_reduction <maximumf>, %950, %cst_150 [2] : vector<8x8x8xf32> to vector<8x8xf32>
    %952 = vector.shape_cast %951 : vector<8x8xf32> to vector<8x8x1xf32>
    %953 = vector.broadcast %952 : vector<8x8x1xf32> to vector<8x8x8xf32>
    %954 = arith.subf %950, %953 : vector<8x8x8xf32>
    %955 = math.exp %954 : vector<8x8x8xf32>
    %cst_151 = arith.constant dense<0.000000e+00> : vector<8x8xf32>
    %956 = vector.multi_reduction <add>, %955, %cst_151 [2] : vector<8x8x8xf32> to vector<8x8xf32>
    %957 = math.log %956 : vector<8x8xf32>
    %958 = arith.addf %951, %957 : vector<8x8xf32>
    %cst_152 = arith.constant 5.000000e-01 : f32
    %959 = vector.broadcast %cst_152 : f32 to vector<8x1xf32>
    %960 = arith.cmpf ogt, %946, %959 : vector<8x1xf32>
    %961 = vector.extract_strided_slice %799 {offsets = [4, 0, 0], sizes = [1, 8, 8], strides = [1, 1, 1]} : vector<8x8x8xf32> to vector<1x8x8xf32>
    %962 = vector.shape_cast %961 : vector<1x8x8xf32> to vector<8x8xf32>
    %963 = arith.addf %958, %962 : vector<8x8xf32>
    %964 = vector.shape_cast %960 : vector<8x1xi1> to vector<8x1xi1>
    %965 = vector.broadcast %964 : vector<8x1xi1> to vector<8x8xi1>
    %966 = arith.select %965, %963, %942 : vector<8x8xi1>, vector<8x8xf32>
    %967 = vector.extract_strided_slice %800 {offsets = [5, 0, 0], sizes = [1, 8, 8], strides = [1, 1, 1]} : vector<8x8x8xf32> to vector<1x8x8xf32>
    %968 = vector.shape_cast %967 : vector<1x8x8xf32> to vector<8x8xf32>
    %cst_153 = arith.constant dense<0.000000e+00> : vector<8xf32>
    %969 = vector.multi_reduction <add>, %968, %cst_153 [1] : vector<8x8xf32> to vector<8xf32>
    %970 = vector.shape_cast %969 : vector<8xf32> to vector<8x1xf32>
    %971 = vector.shape_cast %966 : vector<8x8xf32> to vector<8x1x8xf32>
    %972 = vector.broadcast %971 : vector<8x1x8xf32> to vector<8x8x8xf32>
    %973 = vector.broadcast %866 : vector<1x8x8xf32> to vector<8x8x8xf32>
    %974 = arith.addf %972, %973 : vector<8x8x8xf32>
    %cst_154 = arith.constant dense<0xFF800000> : vector<8x8xf32>
    %975 = vector.multi_reduction <maximumf>, %974, %cst_154 [2] : vector<8x8x8xf32> to vector<8x8xf32>
    %976 = vector.shape_cast %975 : vector<8x8xf32> to vector<8x8x1xf32>
    %977 = vector.broadcast %976 : vector<8x8x1xf32> to vector<8x8x8xf32>
    %978 = arith.subf %974, %977 : vector<8x8x8xf32>
    %979 = math.exp %978 : vector<8x8x8xf32>
    %cst_155 = arith.constant dense<0.000000e+00> : vector<8x8xf32>
    %980 = vector.multi_reduction <add>, %979, %cst_155 [2] : vector<8x8x8xf32> to vector<8x8xf32>
    %981 = math.log %980 : vector<8x8xf32>
    %982 = arith.addf %975, %981 : vector<8x8xf32>
    %cst_156 = arith.constant 5.000000e-01 : f32
    %983 = vector.broadcast %cst_156 : f32 to vector<8x1xf32>
    %984 = arith.cmpf ogt, %970, %983 : vector<8x1xf32>
    %985 = vector.extract_strided_slice %799 {offsets = [5, 0, 0], sizes = [1, 8, 8], strides = [1, 1, 1]} : vector<8x8x8xf32> to vector<1x8x8xf32>
    %986 = vector.shape_cast %985 : vector<1x8x8xf32> to vector<8x8xf32>
    %987 = arith.addf %982, %986 : vector<8x8xf32>
    %988 = vector.shape_cast %984 : vector<8x1xi1> to vector<8x1xi1>
    %989 = vector.broadcast %988 : vector<8x1xi1> to vector<8x8xi1>
    %990 = arith.select %989, %987, %966 : vector<8x8xi1>, vector<8x8xf32>
    %991 = vector.extract_strided_slice %800 {offsets = [6, 0, 0], sizes = [1, 8, 8], strides = [1, 1, 1]} : vector<8x8x8xf32> to vector<1x8x8xf32>
    %992 = vector.shape_cast %991 : vector<1x8x8xf32> to vector<8x8xf32>
    %cst_157 = arith.constant dense<0.000000e+00> : vector<8xf32>
    %993 = vector.multi_reduction <add>, %992, %cst_157 [1] : vector<8x8xf32> to vector<8xf32>
    %994 = vector.shape_cast %993 : vector<8xf32> to vector<8x1xf32>
    %995 = vector.shape_cast %990 : vector<8x8xf32> to vector<8x1x8xf32>
    %996 = vector.broadcast %995 : vector<8x1x8xf32> to vector<8x8x8xf32>
    %997 = vector.broadcast %866 : vector<1x8x8xf32> to vector<8x8x8xf32>
    %998 = arith.addf %996, %997 : vector<8x8x8xf32>
    %cst_158 = arith.constant dense<0xFF800000> : vector<8x8xf32>
    %999 = vector.multi_reduction <maximumf>, %998, %cst_158 [2] : vector<8x8x8xf32> to vector<8x8xf32>
    %1000 = vector.shape_cast %999 : vector<8x8xf32> to vector<8x8x1xf32>
    %1001 = vector.broadcast %1000 : vector<8x8x1xf32> to vector<8x8x8xf32>
    %1002 = arith.subf %998, %1001 : vector<8x8x8xf32>
    %1003 = math.exp %1002 : vector<8x8x8xf32>
    %cst_159 = arith.constant dense<0.000000e+00> : vector<8x8xf32>
    %1004 = vector.multi_reduction <add>, %1003, %cst_159 [2] : vector<8x8x8xf32> to vector<8x8xf32>
    %1005 = math.log %1004 : vector<8x8xf32>
    %1006 = arith.addf %999, %1005 : vector<8x8xf32>
    %cst_160 = arith.constant 5.000000e-01 : f32
    %1007 = vector.broadcast %cst_160 : f32 to vector<8x1xf32>
    %1008 = arith.cmpf ogt, %994, %1007 : vector<8x1xf32>
    %1009 = vector.extract_strided_slice %799 {offsets = [6, 0, 0], sizes = [1, 8, 8], strides = [1, 1, 1]} : vector<8x8x8xf32> to vector<1x8x8xf32>
    %1010 = vector.shape_cast %1009 : vector<1x8x8xf32> to vector<8x8xf32>
    %1011 = arith.addf %1006, %1010 : vector<8x8xf32>
    %1012 = vector.shape_cast %1008 : vector<8x1xi1> to vector<8x1xi1>
    %1013 = vector.broadcast %1012 : vector<8x1xi1> to vector<8x8xi1>
    %1014 = arith.select %1013, %1011, %990 : vector<8x8xi1>, vector<8x8xf32>
    %1015 = vector.extract_strided_slice %800 {offsets = [7, 0, 0], sizes = [1, 8, 8], strides = [1, 1, 1]} : vector<8x8x8xf32> to vector<1x8x8xf32>
    %1016 = vector.shape_cast %1015 : vector<1x8x8xf32> to vector<8x8xf32>
    %cst_161 = arith.constant dense<0.000000e+00> : vector<8xf32>
    %1017 = vector.multi_reduction <add>, %1016, %cst_161 [1] : vector<8x8xf32> to vector<8xf32>
    %1018 = vector.shape_cast %1017 : vector<8xf32> to vector<8x1xf32>
    %1019 = vector.shape_cast %1014 : vector<8x8xf32> to vector<8x1x8xf32>
    %1020 = vector.broadcast %1019 : vector<8x1x8xf32> to vector<8x8x8xf32>
    %1021 = vector.broadcast %866 : vector<1x8x8xf32> to vector<8x8x8xf32>
    %1022 = arith.addf %1020, %1021 : vector<8x8x8xf32>
    %cst_162 = arith.constant dense<0xFF800000> : vector<8x8xf32>
    %1023 = vector.multi_reduction <maximumf>, %1022, %cst_162 [2] : vector<8x8x8xf32> to vector<8x8xf32>
    %1024 = vector.shape_cast %1023 : vector<8x8xf32> to vector<8x8x1xf32>
    %1025 = vector.broadcast %1024 : vector<8x8x1xf32> to vector<8x8x8xf32>
    %1026 = arith.subf %1022, %1025 : vector<8x8x8xf32>
    %1027 = math.exp %1026 : vector<8x8x8xf32>
    %cst_163 = arith.constant dense<0.000000e+00> : vector<8x8xf32>
    %1028 = vector.multi_reduction <add>, %1027, %cst_163 [2] : vector<8x8x8xf32> to vector<8x8xf32>
    %1029 = math.log %1028 : vector<8x8xf32>
    %1030 = arith.addf %1023, %1029 : vector<8x8xf32>
    %cst_164 = arith.constant 5.000000e-01 : f32
    %1031 = vector.broadcast %cst_164 : f32 to vector<8x1xf32>
    %1032 = arith.cmpf ogt, %1018, %1031 : vector<8x1xf32>
    %1033 = vector.extract_strided_slice %799 {offsets = [7, 0, 0], sizes = [1, 8, 8], strides = [1, 1, 1]} : vector<8x8x8xf32> to vector<1x8x8xf32>
    %1034 = vector.shape_cast %1033 : vector<1x8x8xf32> to vector<8x8xf32>
    %1035 = arith.addf %1030, %1034 : vector<8x8xf32>
    %1036 = vector.shape_cast %1032 : vector<8x1xi1> to vector<8x1xi1>
    %1037 = vector.broadcast %1036 : vector<8x1xi1> to vector<8x8xi1>
    %1038 = arith.select %1037, %1035, %1014 : vector<8x8xi1>, vector<8x8xf32>
    %1039 = vector.broadcast %794 : vector<1x8xf32> to vector<8x8xf32>
    %1040 = arith.addf %1038, %1039 : vector<8x8xf32>
    %cst_165 = arith.constant dense<0xFF800000> : vector<8xf32>
    %1041 = vector.multi_reduction <maximumf>, %1040, %cst_165 [1] : vector<8x8xf32> to vector<8xf32>
    %1042 = vector.shape_cast %1041 : vector<8xf32> to vector<8x1xf32>
    %1043 = vector.broadcast %1042 : vector<8x1xf32> to vector<8x8xf32>
    %1044 = arith.subf %1040, %1043 : vector<8x8xf32>
    %1045 = math.exp %1044 : vector<8x8xf32>
    %cst_166 = arith.constant dense<0.000000e+00> : vector<8xf32>
    %1046 = vector.multi_reduction <add>, %1045, %cst_166 [1] : vector<8x8xf32> to vector<8xf32>
    %1047 = vector.shape_cast %1046 : vector<8xf32> to vector<8x1xf32>
    %1048 = math.log %1047 : vector<8x1xf32>
    %1049 = arith.addf %1042, %1048 : vector<8x1xf32>
    %1050 = arith.subf %865, %1049 : vector<8x1xf32>
    %c0_167 = arith.constant 0 : index
    %c0_168 = arith.constant 0 : index
    %1051 = vector.load %arg7[%c0_167, %c0_168] : memref<8x1xf32, #tpu.memory_space<vmem>>, vector<8x1xf32>
    tpu.vector_store %arg7[%c0_167, %c0_168], %1050 {strides = array<i32>} : memref<8x1xf32, #tpu.memory_space<vmem>>, vector<8x1xf32>,
    return
  }
  func.func @transform_0(%arg0: i32) -> (i32, i32, i32) {
    %c0_i32 = arith.constant 0 : i32
    %c0_i32_0 = arith.constant 0 : i32
    %c0_i32_1 = arith.constant 0 : i32
    return %c0_i32, %arg0, %c0_i32_0 : i32, i32, i32
  }
  func.func @transform_1(%arg0: i32) -> (i32, i32) {
    %c0_i32 = arith.constant 0 : i32
    %c0_i32_0 = arith.constant 0 : i32
    %c0_i32_1 = arith.constant 0 : i32
    return %c0_i32, %c0_i32_0 : i32, i32
  }
  func.func @transform_2(%arg0: i32) -> (i32, i32) {
    %c0_i32 = arith.constant 0 : i32
    %c0_i32_0 = arith.constant 0 : i32
    %c0_i32_1 = arith.constant 0 : i32
    return %c0_i32, %c0_i32_0 : i32, i32
  }
  func.func @transform_3(%arg0: i32) -> (i32, i32) {
    %c0_i32 = arith.constant 0 : i32
    %c0_i32_0 = arith.constant 0 : i32
    %c0_i32_1 = arith.constant 0 : i32
    return %c0_i32, %c0_i32_0 : i32, i32
  }
  func.func @transform_4(%arg0: i32) -> (i32, i32) {
    %c0_i32 = arith.constant 0 : i32
    %c0_i32_0 = arith.constant 0 : i32
    %c0_i32_1 = arith.constant 0 : i32
    return %c0_i32, %c0_i32_0 : i32, i32
  }
  func.func @transform_5(%arg0: i32) -> (i32, i32, i32) {
    %c0_i32 = arith.constant 0 : i32
    %c0_i32_0 = arith.constant 0 : i32
    %c0_i32_1 = arith.constant 0 : i32
    return %c0_i32, %arg0, %c0_i32_0 : i32, i32, i32
  }
  func.func @transform_6(%arg0: i32) -> (i32, i32) {
    %c0_i32 = arith.constant 0 : i32
    %c0_i32_0 = arith.constant 0 : i32
    return %arg0, %c0_i32 : i32, i32
  }
}

</mosaic_0001>

<bundles_post_ra>
// kernel: bilstm_crf_forward.1
= control target key start
LH: loop header
LB: loop body
LE: loop exit
PB: predicated region body
PF: predicated region fallthrough
CT: control target
= control target key end

     0   :  { %v7423_v0 = vmov 0.0   ;;  %vm7424_vm0 = vmmov 0   ;;  %v7425_v3 = vmov 0   ;;  %vm75_vm1 = vcmask 261120   ;;  %s7426_s11 = smov 80   ;;  %s7427_s12 = smov 16   ;;  %s10247_s1 = inlined_call_operand.vmem [shape: bf16[48,128], index: 1, kind: input, shape index: {}]   ;;  %s10248_s0 = inlined_call_operand.vmem [shape: bf16[8,8,32], index: 0, kind: input, shape index: {}]   ;;  %s10249_s3 = inlined_call_operand.vmem [shape: f32[2,128], index: 3, kind: input, shape index: {}]   ;;  %s10250_s2 = inlined_call_operand.vmem [shape: bf16[48,128], index: 2, kind: input, shape index: {}]   ;;  %s10251_s4 = inlined_call_operand.vmem [shape: f32[43,8], index: 4, kind: input, shape index: {}]   ;;  %s10252_s5 = inlined_call_operand.vmem [shape: f32[8,8,8], index: 5, kind: input, shape index: {}]   ;;  %s10253_s6 = inlined_call_operand.vmem [shape: f32[8,1], index: 6, kind: output, shape index: {}]  }
   0x1   :  { %6552 = vmatprep.subr.bf16.mxu1 %v7423_v0  ;;  %6554 = vmatprep.mubr.msk.bf16.mxu1 %vm7424_vm0, %v7423_v0  ;;  %v6693_v1 = vld [vmem:[%s10247_s1] sm:$0xff]   ;;  %v7476_v2 = vld [vmem:[%s10247_s1 + $0x10] sm:$0xff]   ;;  %v6695_v4 = vld [vmem:[%s10247_s1 + $0x8] sm:$0xff]   ;;  %v10254_v9 = vlaneseq  ;;  %s7428_s13 = smov 64   ;;  %s7429_s14 = smov 96   ;;  %vm159_vm2 = vcmask 130048  }
   0x2   :  { %6692 = vset.pattern.permute.xlu0 %v7425_v3  ;;  %6691 = vset.pattern.permute.xlu1 %v7425_v3  ;;  %v6696_v5 = vld [vmem:[%s10248_s0] sm:$0xff]   ;;  %v6697_v6 = vld [vmem:[%s10248_s0 + $0x8] sm:$0xff]   ;;  %v6698_v7 = vld [vmem:[%s10248_s0 + $0x10] sm:$0xff]   ;;  %s7430_s15 = smov 48   ;;  %vm269_vm3 = vcmask 261248   ;;  %vm2435_vm4 = vcmask 57344  }
   0x3   :  { %6534 = vmatprep.subr.bf16.mxu0 %v6693_v1  ;;  %6553 = vmatpush3.bf16.msra.mxu1 %v7476_v2  ;;  %v6699_v8 = vld [vmem:[%s10248_s0 + $0x18] sm:$0xff]   ;;  %v7512_v10 = vshrl.u32 %v10254_v9, 7  ;;  %v24_v12 = vld [vmem:[%s10249_s3] sm:$0x3]  ;;  %vm2431_vm5 = vcmask 64513   ;;  %vm2277_vm6 = vcmask 64512  }
   0x4   :  { %6535 = vmatpush3.bf16.msra.mxu0 %v6693_v1  ;;  %6558 = vmatprep.subr.bf16.mxu1 %v7423_v0  ;;  %vm2833_vm7 = vcmask 121912   ;;  %vm2898_vm8 = vcmask 1041409   ;;  %vm2900_vm9 = vcmask 1042434   ;;  %vm2902_vm10 = vcmask 1043459  }
   0x5   :  { %6536 = vmatprep.subr.bf16.mxu0 %v6695_v4  ;;  %6538 = vmatprep.mubr.msk.bf16.mxu0 %vm75_vm1, %v6696_v5  ;;  %v7515_v11 = vsub.s32 0, %v7512_v10  ;;  %vm2904_vm11 = vcmask 1044484   ;;  %vm2906_vm12 = vcmask 1045509   ;;  %vm2908_vm13 = vcmask 1046534  }
   0x6   :  { %vm2910_vm14 = vcmask 1047559  }
   0x7   :  { %v42_v13 = vrot.slane %v24_v12, %v7515_v11 }
   0x8   :  { %6537 = vmatpush3.bf16.msra.mxu0 %v6695_v4 }
   0x9   :  { %6546 = vmatprep.subr.bf16.mxu0 %v7423_v0 }
   0xb   :  { %6539 = vmatmul.mubr.msk.bf16.vlgmr.msra.gmra.mrb[0].mxu0 %vm75_vm1, %v6697_v6 }
   0xc   :  { %6547 = vmatpush3.bf16.msra.mxu0 %v7476_v2  ;;  %6542 = vmatprep.mubr.msk.bf16.mxu0 %vm75_vm1, %v6698_v7 }
   0xd   :  { %6564 = vmatprep.subr.bf16.mxu0 %v7423_v0 }
  0x13   :  { %6543 = vmatmul.mubr.msk.bf16.gmra.mrb[4].mxu0 %vm75_vm1, %v6699_v8 }
  0x14   :  { %6548 = vmatprep.mubr.msk.bf16.mxu0 %vm7424_vm0, %v7423_v0 }
  0x1b   :  { %6549 = vmatmul.mubr.bf16.vlgmr.msra.gmra.mrb[8].mxu0 %v7425_v3 }
  0x1c   :  { %6565 = vmatpush3.bf16.msra.mxu0 %v7476_v2  ;;  %6566 = vmatprep.mubr.msk.bf16.mxu0 %vm7424_vm0, %v7423_v0 }
  0x1d   :  { %6576 = vmatprep.subr.bf16.mxu0 %v7423_v0 }
  0xde   :  { %v6540_v14 = vpop.f32.mrb[0].mxu0 }
  0xdf   :  { %v7521_v15 = vadd.f32 %v6540_v14, %v42_v13  ;;  %v122_v16 = vpop.f32.mrb[1].mxu0 }
  0xe0   :  { %v6541_v17 = vpop.f32.mrb[2].mxu0  ;;  %v7536_v34 = vadd.f32 %v122_v16, %v42_v13 }
  0xe1   :  { %v7523_v18 = vadd.f32 %v6541_v17, %v42_v13  ;;  %v125_v19 = vpop.f32.mrb[3].mxu0 }
  0xe2   :  { %v7525_v20 = vadd.f32 %v125_v19, %v42_v13 }
  0xe6   :  { %v6544_v21 = vpop.f32.mrb[4].mxu0 }
  0xe7   :  { %v7527_v22 = vadd.f32 %v6544_v21, %v42_v13  ;;  %v138_v23 = vpop.f32.mrb[5].mxu0 }
  0xe8   :  { %v7529_v24 = vadd.f32 %v138_v23, %v42_v13  ;;  %v6545_v25 = vpop.f32.mrb[6].mxu0 }
  0xe9   :  { %v141_v26 = vpop.f32.mrb[7].mxu0  ;;  %v7533_v29 = vadd.f32 %v6545_v25, %v42_v13 }
  0xea   :  { %v7531_v27 = vadd.f32 %v141_v26, %v42_v13 }
  0xee   :  { %v197_v28 = vpop.f32.mrb[8].mxu0 }
  0xef   :  { %v6550_v30 = vpop.f32.mrb[9].mxu0  ;;  %v204_v35 = vadd.f32 %v197_v28, %v7536_v34 }
  0xf0   :  { %v200_v31 = vpop.f32.mrb[10].mxu0 }
  0xf1   :  { %v205_v32 = vadd.f32 %v200_v31, %v7533_v29  ;;  %v6551_v33 = vpop.f32.mrb[11].mxu0  ;;  %v6417_v39 = vmul.f32 -1.442695, %v204_v35 }
  0xf3   :  { %6703 = vtanh.f32 %v205_v32  ;;  %v6418_v38 = vmul.f32 -1.442695, %v205_v32 }
  0xf4   :  { %6705 = vtanh.f32 %v204_v35 }
  0xf5   :  { %6707 = vpow2.f32 %v6418_v38 }
  0xf6   :  { %6709 = vpow2.f32 %v6417_v39 }
  0xfd   :  { %v6704_v36 = vpop.eup %6703 }
  0xfe   :  { %239 = vrot.lane.b32.xlu0 %v6704_v36, %s7426_s11  ;;  %v6706_v37 = vpop.eup %6705 }
  0xff   :  { %v6708_v40 = vpop.eup %6707 }
 0x100   :  { %v233_v41 = vadd.f32 1.0, %v6708_v40  ;;  %v6710_v42 = vpop.eup %6709 }
 0x101   :  { %v209_v43 = vadd.f32 1.0, %v6710_v42 }
 0x102   :  { %215 = vrot.lane.b32.xlu0 %v6706_v37, %s7426_s11  ;;  %6711 = vrcp.f32 %v233_v41 }
 0x103   :  { %6713 = vrcp.f32 %v209_v43 }
 0x10c   :  { %v6712_v44 = vpop.eup %6711 }
 0x10d   :  { %v6714_v47 = vpop.eup %6713  ;;  %v237_v50 = vmul.f32 0.0, %v6712_v44 }
 0x10e   :  { %v213_v53 = vmul.f32 0.0, %v6714_v47 }
 0x170   :  { %v240_v45 = vpop.permute.xlu0 %239 }
 0x171   :  { %v242_v46 = vmul.f32 %v6712_v44, %v240_v45 }
 0x173   :  { %244 = vrot.lane.b32.xlu1 %v242_v46, %s7427_s12 }
 0x174   :  { %v216_v48 = vpop.permute.xlu0 %215 }
 0x175   :  { %v218_v49 = vmul.f32 %v6714_v47, %v216_v48 }
 0x177   :  { %220 = vrot.lane.b32.xlu1 %v218_v49, %s7427_s12 }
 0x1e5   :  { %v245_v51 = vpop.permute.xlu1 %244 }
 0x1e6   :  { %v247_v52 = vadd.f32 %v245_v51, %v237_v50 }
 0x1e8   :  { %6715 = vtanh.f32 %v247_v52 }
 0x1e9   :  { %v221_v54 = vpop.permute.xlu1 %220 }
 0x1ea   :  { %v223_v55 = vadd.f32 %v221_v54, %v213_v53 }
 0x1ec   :  { %6717 = vtanh.f32 %v223_v55 }
 0x1f2   :  { %v6716_v56 = vpop.eup %6715 }
 0x1f3   :  { %250 = vrot.lane.b32.xlu0 %v6716_v56, %s7427_s12 }
 0x1f6   :  { %v6718_v57 = vpop.eup %6717 }
 0x1f7   :  { %226 = vrot.lane.b32.xlu1 %v6718_v57, %s7427_s12 }
 0x265   :  { %v251_v58 = vpop.permute.xlu0 %250 }
 0x266   :  { %v7545_v59 = vmul.f32 %v6712_v44, %v251_v58 }
 0x268   :  { %255 = vrot.lane.b32.xlu0 %v7545_v59, %s7428_s13 }
 0x269   :  { %v227_v60 = vpop.permute.xlu1 %226 }
 0x26a   :  { %v7550_v61 = vmul.f32 %v6714_v47, %v227_v60 }
 0x26c   :  { %259 = vrot.lane.b32.xlu0 %v247_v52, %s7428_s13 }
 0x2da   :  { %v256_v62 = vpop.permute.xlu0 %255 }
 0x2db   :  { %v271_v63 = vpack.c.bf16 %v256_v62, %v7550_v61 }
 0x2dd   :  { %273 = vrot.lane.b32.xlu1 %v271_v63, %s7429_s14 }
 0x2de   :  { %v260_v16 = vpop.permute.xlu0 %259 }
 0x34f   :  { %v274_v1 = vpop.permute.xlu1 %273 }
 0x350   :  { %6555 = vmatmul.mubr.msk.bf16.vlgmr.msra.gmra.mrb[0].mxu1 %vm159_vm2, %v274_v1 }
 0x351   :  { %6559 = vmatpush3.bf16.msra.mxu1 %v7476_v2  ;;  %6560 = vmatprep.mubr.msk.bf16.mxu1 %vm7424_vm0, %v7423_v0 }
 0x352   :  { %6570 = vmatprep.subr.bf16.mxu1 %v7423_v0 }
 0x423   :  { %v312_v4 = vpop.f32.mrb[0].mxu1 }
 0x424   :  { %v319_v5 = vadd.f32 %v312_v4, %v7525_v20  ;;  %v6556_v6 = vpop.f32.mrb[1].mxu1 }
 0x425   :  { %v315_v7 = vpop.f32.mrb[2].mxu1 }
 0x426   :  { %6719 = vtanh.f32 %v319_v5  ;;  %v320_v8 = vadd.f32 %v315_v7, %v7527_v22  ;;  %v6557_v12 = vpop.f32.mrb[3].mxu1  ;;  %v6420_v17 = vmul.f32 -1.442695, %v319_v5 }
 0x428   :  { %6721 = vtanh.f32 %v320_v8  ;;  %v6421_v19 = vmul.f32 -1.442695, %v320_v8 }
 0x429   :  { %6723 = vpow2.f32 %v6420_v17 }
 0x42a   :  { %6725 = vpow2.f32 %v6421_v19 }
 0x430   :  { %v6720_v13 = vpop.eup %6719 }
 0x431   :  { %330 = vrot.lane.b32.xlu0 %v6720_v13, %s7426_s11 }
 0x432   :  { %v6722_v14 = vpop.eup %6721 }
 0x433   :  { %357 = vrot.lane.b32.xlu1 %v6722_v14, %s7426_s11  ;;  %v6724_v21 = vpop.eup %6723 }
 0x434   :  { %v6726_v23 = vpop.eup %6725  ;;  %v324_v25 = vadd.f32 1.0, %v6724_v21 }
 0x435   :  { %v348_v26 = vadd.f32 1.0, %v6726_v23 }
 0x436   :  { %6727 = vrcp.f32 %v324_v25 }
 0x437   :  { %352 = vrot.lane.b32.xlu1 %v260_v16, %s7428_s13  ;;  %6729 = vrcp.f32 %v348_v26 }
 0x440   :  { %v6728_v28 = vpop.eup %6727 }
 0x441   :  { %v6730_v32 = vpop.eup %6729  ;;  %v328_v37 = vmul.f32 %v6728_v28, %v223_v55 }
 0x4a3   :  { %v331_v30 = vpop.permute.xlu0 %330 }
 0x4a4   :  { %v333_v31 = vmul.f32 %v6728_v28, %v331_v30 }
 0x4a5   :  { %v358_v33 = vpop.permute.xlu1 %357 }
 0x4a6   :  { %335 = vrot.lane.b32.xlu1 %v333_v31, %s7427_s12  ;;  %v360_v35 = vmul.f32 %v6730_v32, %v358_v33 }
 0x4a8   :  { %362 = vrot.lane.b32.xlu0 %v360_v35, %s7427_s12 }
 0x4a9   :  { %v353_v36 = vpop.permute.xlu1 %352 }
 0x4aa   :  { %v355_v40 = vmul.f32 %v6730_v32, %v353_v36 }
 0x518   :  { %v336_v38 = vpop.permute.xlu1 %335 }
 0x519   :  { %v338_v39 = vadd.f32 %v336_v38, %v328_v37 }
 0x51a   :  { %v363_v41 = vpop.permute.xlu0 %362 }
 0x51b   :  { %6731 = vtanh.f32 %v338_v39  ;;  %v365_v42 = vadd.f32 %v363_v41, %v355_v40 }
 0x51d   :  { %6733 = vtanh.f32 %v365_v42 }
 0x525   :  { %v6732_v43 = vpop.eup %6731 }
 0x526   :  { %341 = vrot.lane.b32.xlu1 %v6732_v43, %s7427_s12 }
 0x527   :  { %v6734_v44 = vpop.eup %6733 }
 0x528   :  { %368 = vrot.lane.b32.xlu0 %v6734_v44, %s7427_s12 }
 0x598   :  { %v342_v47 = vpop.permute.xlu1 %341 }
 0x599   :  { %v7573_v48 = vmul.f32 %v6728_v28, %v342_v47 }
 0x59a   :  { %v369_v45 = vpop.permute.xlu0 %368 }
 0x59b   :  { %v7568_v46 = vmul.f32 %v6730_v32, %v369_v45 }
 0x59d   :  { %373 = vrot.lane.b32.xlu0 %v7568_v46, %s7428_s13 }
 0x5a1   :  { %377 = vrot.lane.b32.xlu0 %v365_v42, %s7428_s13 }
 0x60f   :  { %v374_v49 = vpop.permute.xlu0 %373 }
 0x610   :  { %v388_v50 = vpack.c.bf16 %v374_v49, %v7573_v48 }
 0x612   :  { %390 = vrot.lane.b32.xlu1 %v388_v50, %s7429_s14 }
 0x613   :  { %v378_v62 = vpop.permute.xlu0 %377 }
 0x684   :  { %v391_v51 = vpop.permute.xlu1 %390 }
 0x685   :  { %6561 = vmatmul.mubr.msk.bf16.vlgmr.msra.gmra.mrb[4].mxu1 %vm159_vm2, %v391_v51 }
 0x686   :  { %6571 = vmatpush3.bf16.msra.mxu1 %v7476_v2  ;;  %6572 = vmatprep.mubr.msk.bf16.mxu1 %vm7424_vm0, %v7423_v0 }
 0x687   :  { %6582 = vmatprep.subr.bf16.mxu1 %v7423_v0 }
 0x758   :  { %v429_v52 = vpop.f32.mrb[4].mxu1 }
 0x759   :  { %v436_v53 = vadd.f32 %v429_v52, %v7521_v15  ;;  %v6562_v54 = vpop.f32.mrb[5].mxu1 }
 0x75a   :  { %v432_v55 = vpop.f32.mrb[6].mxu1 }
 0x75b   :  { %6735 = vtanh.f32 %v436_v53  ;;  %v437_v56 = vadd.f32 %v432_v55, %v7531_v27  ;;  %v6563_v57 = vpop.f32.mrb[7].mxu1  ;;  %v6423_v63 = vmul.f32 -1.442695, %v436_v53 }
 0x75d   :  { %6737 = vtanh.f32 %v437_v56  ;;  %v6424_v1 = vmul.f32 -1.442695, %v437_v56 }
 0x75e   :  { %6739 = vpow2.f32 %v6423_v63 }
 0x75f   :  { %6741 = vpow2.f32 %v6424_v1 }
 0x765   :  { %v6736_v58 = vpop.eup %6735 }
 0x766   :  { %447 = vrot.lane.b32.xlu0 %v6736_v58, %s7426_s11 }
 0x767   :  { %v6738_v60 = vpop.eup %6737 }
 0x768   :  { %474 = vrot.lane.b32.xlu1 %v6738_v60, %s7426_s11  ;;  %v6740_v4 = vpop.eup %6739 }
 0x769   :  { %v6742_v5 = vpop.eup %6741  ;;  %v441_v6 = vadd.f32 1.0, %v6740_v4 }
 0x76a   :  { %v465_v7 = vadd.f32 1.0, %v6742_v5 }
 0x76b   :  { %6743 = vrcp.f32 %v441_v6 }
 0x76c   :  { %469 = vrot.lane.b32.xlu1 %v378_v62, %s7428_s13  ;;  %6745 = vrcp.f32 %v465_v7 }
 0x775   :  { %v6744_v8 = vpop.eup %6743 }
 0x776   :  { %v6746_v14 = vpop.eup %6745  ;;  %v445_v21 = vmul.f32 %v6744_v8, %v338_v39 }
 0x7d8   :  { %v448_v12 = vpop.permute.xlu0 %447 }
 0x7d9   :  { %v450_v13 = vmul.f32 %v6744_v8, %v448_v12 }
 0x7da   :  { %v475_v16 = vpop.permute.xlu1 %474 }
 0x7db   :  { %452 = vrot.lane.b32.xlu1 %v450_v13, %s7427_s12  ;;  %v477_v17 = vmul.f32 %v6746_v14, %v475_v16 }
 0x7dd   :  { %479 = vrot.lane.b32.xlu0 %v477_v17, %s7427_s12 }
 0x7de   :  { %v470_v19 = vpop.permute.xlu1 %469 }
 0x7df   :  { %v472_v26 = vmul.f32 %v6746_v14, %v470_v19 }
 0x84d   :  { %v453_v23 = vpop.permute.xlu1 %452 }
 0x84e   :  { %v455_v25 = vadd.f32 %v453_v23, %v445_v21 }
 0x84f   :  { %v480_v28 = vpop.permute.xlu0 %479 }
 0x850   :  { %6747 = vtanh.f32 %v455_v25  ;;  %v482_v30 = vadd.f32 %v480_v28, %v472_v26 }
 0x852   :  { %6749 = vtanh.f32 %v482_v30 }
 0x85a   :  { %v6748_v31 = vpop.eup %6747 }
 0x85b   :  { %458 = vrot.lane.b32.xlu1 %v6748_v31, %s7427_s12 }
 0x85c   :  { %v6750_v32 = vpop.eup %6749 }
 0x85d   :  { %485 = vrot.lane.b32.xlu0 %v6750_v32, %s7427_s12 }
 0x8cd   :  { %v459_v36 = vpop.permute.xlu1 %458 }
 0x8ce   :  { %v7596_v37 = vmul.f32 %v6744_v8, %v459_v36 }
 0x8cf   :  { %v486_v33 = vpop.permute.xlu0 %485 }
 0x8d0   :  { %v7591_v35 = vmul.f32 %v6746_v14, %v486_v33 }
 0x8d2   :  { %490 = vrot.lane.b32.xlu0 %v7591_v35, %s7428_s13 }
 0x8d6   :  { %494 = vrot.lane.b32.xlu0 %v482_v30, %s7428_s13 }
 0x944   :  { %v491_v38 = vpop.permute.xlu0 %490 }
 0x945   :  { %v505_v39 = vpack.c.bf16 %v491_v38, %v7596_v37 }
 0x947   :  { %507 = vrot.lane.b32.xlu1 %v505_v39, %s7429_s14 }
 0x948   :  { %v495_v51 = vpop.permute.xlu0 %494 }
 0x9b9   :  { %v508_v40 = vpop.permute.xlu1 %507 }
 0x9ba   :  { %6567 = vmatmul.mubr.msk.bf16.vlgmr.msra.gmra.mrb[12].mxu0 %vm159_vm2, %v508_v40 }
 0x9bb   :  { %6577 = vmatpush3.bf16.msra.mxu0 %v7476_v2  ;;  %6578 = vmatprep.mubr.msk.bf16.mxu0 %vm7424_vm0, %v7423_v0 }
 0x9bc   :  { %6588 = vmatprep.subr.bf16.mxu0 %v7423_v0 }
 0xa8d   :  { %v546_v41 = vpop.f32.mrb[12].mxu0 }
 0xa8e   :  { %v553_v42 = vadd.f32 %v546_v41, %v7523_v18  ;;  %v6568_v43 = vpop.f32.mrb[13].mxu0 }
 0xa8f   :  { %v549_v44 = vpop.f32.mrb[14].mxu0 }
 0xa90   :  { %6751 = vtanh.f32 %v553_v42  ;;  %v554_v45 = vadd.f32 %v549_v44, %v7529_v24  ;;  %v6569_v47 = vpop.f32.mrb[15].mxu0  ;;  %v6426_v52 = vmul.f32 -1.442695, %v553_v42 }
 0xa92   :  { %6753 = vtanh.f32 %v554_v45  ;;  %v6427_v53 = vmul.f32 -1.442695, %v554_v45 }
 0xa93   :  { %6755 = vpow2.f32 %v6426_v52 }
 0xa94   :  { %6757 = vpow2.f32 %v6427_v53 }
 0xa9a   :  { %v6752_v49 = vpop.eup %6751 }
 0xa9b   :  { %564 = vrot.lane.b32.xlu0 %v6752_v49, %s7426_s11 }
 0xa9c   :  { %v6754_v50 = vpop.eup %6753 }
 0xa9d   :  { %591 = vrot.lane.b32.xlu1 %v6754_v50, %s7426_s11  ;;  %v6756_v54 = vpop.eup %6755 }
 0xa9e   :  { %v6758_v55 = vpop.eup %6757  ;;  %v558_v56 = vadd.f32 1.0, %v6756_v54 }
 0xa9f   :  { %v582_v57 = vadd.f32 1.0, %v6758_v55 }
 0xaa0   :  { %6759 = vrcp.f32 %v558_v56 }
 0xaa1   :  { %586 = vrot.lane.b32.xlu1 %v495_v51, %s7428_s13  ;;  %6761 = vrcp.f32 %v582_v57 }
 0xaaa   :  { %v6760_v58 = vpop.eup %6759 }
 0xaab   :  { %v6762_v63 = vpop.eup %6761  ;;  %v562_v6 = vmul.f32 %v6760_v58, %v455_v25 }
 0xb0d   :  { %v565_v60 = vpop.permute.xlu0 %564 }
 0xb0e   :  { %v567_v62 = vmul.f32 %v6760_v58, %v565_v60 }
 0xb0f   :  { %v592_v1 = vpop.permute.xlu1 %591 }
 0xb10   :  { %569 = vrot.lane.b32.xlu1 %v567_v62, %s7427_s12  ;;  %v594_v4 = vmul.f32 %v6762_v63, %v592_v1 }
 0xb12   :  { %596 = vrot.lane.b32.xlu0 %v594_v4, %s7427_s12 }
 0xb13   :  { %v587_v5 = vpop.permute.xlu1 %586 }
 0xb14   :  { %v589_v12 = vmul.f32 %v6762_v63, %v587_v5 }
 0xb82   :  { %v570_v7 = vpop.permute.xlu1 %569 }
 0xb83   :  { %v572_v8 = vadd.f32 %v570_v7, %v562_v6 }
 0xb84   :  { %v597_v13 = vpop.permute.xlu0 %596 }
 0xb85   :  { %6763 = vtanh.f32 %v572_v8  ;;  %v599_v14 = vadd.f32 %v597_v13, %v589_v12 }
 0xb87   :  { %6765 = vtanh.f32 %v599_v14 }
 0xb8f   :  { %v6764_v16 = vpop.eup %6763 }
 0xb90   :  { %575 = vrot.lane.b32.xlu1 %v6764_v16, %s7427_s12 }
 0xb91   :  { %v6766_v17 = vpop.eup %6765 }
 0xb92   :  { %602 = vrot.lane.b32.xlu0 %v6766_v17, %s7427_s12 }
 0xc02   :  { %v576_v23 = vpop.permute.xlu1 %575 }
 0xc03   :  { %v7619_v25 = vmul.f32 %v6760_v58, %v576_v23 }
 0xc04   :  { %v603_v19 = vpop.permute.xlu0 %602 }
 0xc05   :  { %v7614_v21 = vmul.f32 %v6762_v63, %v603_v19 }
 0xc07   :  { %607 = vrot.lane.b32.xlu0 %v7614_v21, %s7428_s13 }
 0xc0b   :  { %611 = vrot.lane.b32.xlu0 %v599_v14, %s7428_s13 }
 0xc79   :  { %v608_v26 = vpop.permute.xlu0 %607 }
 0xc7a   :  { %v622_v28 = vpack.c.bf16 %v608_v26, %v7619_v25 }
 0xc7c   :  { %624 = vrot.lane.b32.xlu1 %v622_v28, %s7429_s14 }
 0xc7d   :  { %v612_v42 = vpop.permute.xlu0 %611 }
 0xcee   :  { %v625_v30 = vpop.permute.xlu1 %624 }
 0xcef   :  { %6573 = vmatmul.mubr.msk.bf16.vlgmr.msra.gmra.mrb[8].mxu1 %vm159_vm2, %v625_v30 }
 0xcf0   :  { %6583 = vmatpush3.bf16.msra.mxu1 %v7476_v2  ;;  %6584 = vmatprep.mubr.msk.bf16.mxu1 %vm7424_vm0, %v7423_v0 }
 0xdc2   :  { %v663_v31 = vpop.f32.mrb[8].mxu1 }
 0xdc3   :  { %v670_v32 = vadd.f32 %v663_v31, %v7529_v24  ;;  %v6574_v33 = vpop.f32.mrb[9].mxu1 }
 0xdc4   :  { %v666_v36 = vpop.f32.mrb[10].mxu1 }
 0xdc5   :  { %6767 = vtanh.f32 %v670_v32  ;;  %v671_v38 = vadd.f32 %v666_v36, %v7523_v18  ;;  %v6575_v39 = vpop.f32.mrb[11].mxu1  ;;  %v6429_v43 = vmul.f32 -1.442695, %v670_v32 }
 0xdc7   :  { %6769 = vtanh.f32 %v671_v38  ;;  %v6430_v44 = vmul.f32 -1.442695, %v671_v38 }
 0xdc8   :  { %6771 = vpow2.f32 %v6429_v43 }
 0xdc9   :  { %6773 = vpow2.f32 %v6430_v44 }
 0xdcf   :  { %v6768_v40 = vpop.eup %6767 }
 0xdd0   :  { %681 = vrot.lane.b32.xlu0 %v6768_v40, %s7426_s11 }
 0xdd1   :  { %v6770_v41 = vpop.eup %6769 }
 0xdd2   :  { %708 = vrot.lane.b32.xlu1 %v6770_v41, %s7426_s11  ;;  %v6772_v24 = vpop.eup %6771 }
 0xdd3   :  { %v6774_v45 = vpop.eup %6773  ;;  %v675_v47 = vadd.f32 1.0, %v6772_v24 }
 0xdd4   :  { %v699_v49 = vadd.f32 1.0, %v6774_v45 }
 0xdd5   :  { %6775 = vrcp.f32 %v675_v47 }
 0xdd6   :  { %703 = vrot.lane.b32.xlu1 %v612_v42, %s7428_s13  ;;  %6777 = vrcp.f32 %v699_v49 }
 0xddf   :  { %v6776_v18 = vpop.eup %6775 }
 0xde0   :  { %v6778_v52 = vpop.eup %6777  ;;  %v679_v56 = vmul.f32 %v6776_v18, %v572_v8 }
 0xe42   :  { %v682_v50 = vpop.permute.xlu0 %681 }
 0xe43   :  { %v684_v51 = vmul.f32 %v6776_v18, %v682_v50 }
 0xe44   :  { %v709_v53 = vpop.permute.xlu1 %708 }
 0xe45   :  { %686 = vrot.lane.b32.xlu1 %v684_v51, %s7427_s12  ;;  %v711_v54 = vmul.f32 %v6778_v52, %v709_v53 }
 0xe47   :  { %713 = vrot.lane.b32.xlu0 %v711_v54, %s7427_s12 }
 0xe48   :  { %v704_v55 = vpop.permute.xlu1 %703 }
 0xe49   :  { %v706_v60 = vmul.f32 %v6778_v52, %v704_v55 }
 0xeb7   :  { %v687_v57 = vpop.permute.xlu1 %686 }
 0xeb8   :  { %v689_v58 = vadd.f32 %v687_v57, %v679_v56 }
 0xeb9   :  { %v714_v62 = vpop.permute.xlu0 %713 }
 0xeba   :  { %6779 = vtanh.f32 %v689_v58  ;;  %v716_v63 = vadd.f32 %v714_v62, %v706_v60 }
 0xebc   :  { %6781 = vtanh.f32 %v716_v63 }
 0xec4   :  { %v6780_v1 = vpop.eup %6779 }
 0xec5   :  { %692 = vrot.lane.b32.xlu1 %v6780_v1, %s7427_s12 }
 0xec6   :  { %v6782_v4 = vpop.eup %6781 }
 0xec7   :  { %719 = vrot.lane.b32.xlu0 %v6782_v4, %s7427_s12 }
 0xf37   :  { %v693_v7 = vpop.permute.xlu1 %692 }
 0xf38   :  { %v7641_v8 = vmul.f32 %v6776_v18, %v693_v7 }
 0xf39   :  { %v720_v5 = vpop.permute.xlu0 %719 }
 0xf3a   :  { %v7636_v6 = vmul.f32 %v6778_v52, %v720_v5 }
 0xf3c   :  { %724 = vrot.lane.b32.xlu0 %v7636_v6, %s7428_s13 }
 0xf40   :  { %728 = vrot.lane.b32.xlu0 %v716_v63, %s7428_s13 }
 0xfae   :  { %v725_v12 = vpop.permute.xlu0 %724 }
 0xfaf   :  { %v739_v13 = vpack.c.bf16 %v725_v12, %v7641_v8 }
 0xfb1   :  { %741 = vrot.lane.b32.xlu1 %v739_v13, %s7429_s14 }
0x1023   :  { %v742_v14 = vpop.permute.xlu1 %741 }
0x1024   :  { %6579 = vmatmul.mubr.msk.bf16.vlgmr.msra.gmra.mrb[16].mxu0 %vm159_vm2, %v742_v14 }
0x1025   :  { %6589 = vmatpush3.bf16.msra.mxu0 %v7476_v2  ;;  %6590 = vmatprep.mubr.msk.bf16.mxu0 %vm7424_vm0, %v7423_v0  ;;  %v729_v2 = vpop.permute.xlu0 %728 }
0x1026   :  { %6606 = vmatprep.subr.bf16.mxu0 %v7423_v0 }
0x10f7   :  { %v780_v16 = vpop.f32.mrb[16].mxu0 }
0x10f8   :  { %v787_v17 = vadd.f32 %v780_v16, %v7531_v27  ;;  %v6580_v19 = vpop.f32.mrb[17].mxu0 }
0x10f9   :  { %v783_v23 = vpop.f32.mrb[18].mxu0 }
0x10fa   :  { %6783 = vtanh.f32 %v787_v17  ;;  %v788_v26 = vadd.f32 %v783_v23, %v7521_v15  ;;  %v6581_v28 = vpop.f32.mrb[19].mxu0  ;;  %v6432_v32 = vmul.f32 -1.442695, %v787_v17 }
0x10fc   :  { %6785 = vtanh.f32 %v788_v26  ;;  %v6433_v33 = vmul.f32 -1.442695, %v788_v26 }
0x10fd   :  { %6787 = vpow2.f32 %v6432_v32 }
0x10fe   :  { %6789 = vpow2.f32 %v6433_v33 }
0x1104   :  { %v6784_v30 = vpop.eup %6783 }
0x1105   :  { %798 = vrot.lane.b32.xlu0 %v6784_v30, %s7426_s11 }
0x1106   :  { %v6786_v31 = vpop.eup %6785 }
0x1107   :  { %825 = vrot.lane.b32.xlu1 %v6786_v31, %s7426_s11  ;;  %v6788_v27 = vpop.eup %6787 }
0x1108   :  { %v6790_v36 = vpop.eup %6789  ;;  %v792_v38 = vadd.f32 1.0, %v6788_v27 }
0x1109   :  { %v816_v39 = vadd.f32 1.0, %v6790_v36 }
0x110a   :  { %6791 = vrcp.f32 %v792_v38 }
0x110b   :  { %820 = vrot.lane.b32.xlu1 %v729_v2, %s7428_s13  ;;  %6793 = vrcp.f32 %v816_v39 }
0x1114   :  { %v6792_v15 = vpop.eup %6791 }
0x1115   :  { %v6794_v42 = vpop.eup %6793  ;;  %v796_v45 = vmul.f32 %v6792_v15, %v689_v58 }
0x1177   :  { %v799_v40 = vpop.permute.xlu0 %798 }
0x1178   :  { %v801_v41 = vmul.f32 %v6792_v15, %v799_v40 }
0x1179   :  { %v826_v43 = vpop.permute.xlu1 %825 }
0x117a   :  { %803 = vrot.lane.b32.xlu1 %v801_v41, %s7427_s12  ;;  %v828_v44 = vmul.f32 %v6794_v42, %v826_v43 }
0x117c   :  { %830 = vrot.lane.b32.xlu0 %v828_v44, %s7427_s12 }
0x117d   :  { %v821_v24 = vpop.permute.xlu1 %820 }
0x117e   :  { %v823_v18 = vmul.f32 %v6794_v42, %v821_v24 }
0x11ec   :  { %v804_v47 = vpop.permute.xlu1 %803 }
0x11ed   :  { %v806_v49 = vadd.f32 %v804_v47, %v796_v45 }
0x11ee   :  { %v831_v50 = vpop.permute.xlu0 %830 }
0x11ef   :  { %6795 = vtanh.f32 %v806_v49  ;;  %v833_v51 = vadd.f32 %v831_v50, %v823_v18 }
0x11f1   :  { %6797 = vtanh.f32 %v833_v51 }
0x11f9   :  { %v6796_v52 = vpop.eup %6795 }
0x11fa   :  { %809 = vrot.lane.b32.xlu1 %v6796_v52, %s7427_s12 }
0x11fb   :  { %v6798_v53 = vpop.eup %6797 }
0x11fc   :  { %836 = vrot.lane.b32.xlu0 %v6798_v53, %s7427_s12 }
0x126c   :  { %v810_v56 = vpop.permute.xlu1 %809 }
0x126d   :  { %v7664_v57 = vmul.f32 %v6792_v15, %v810_v56 }
0x126e   :  { %v837_v54 = vpop.permute.xlu0 %836 }
0x126f   :  { %v7659_v55 = vmul.f32 %v6794_v42, %v837_v54 }
0x1271   :  { %841 = vrot.lane.b32.xlu0 %v7659_v55, %s7428_s13 }
0x1275   :  { %845 = vrot.lane.b32.xlu0 %v833_v51, %s7428_s13 }
0x12e3   :  { %v842_v58 = vpop.permute.xlu0 %841 }
0x12e4   :  { %v856_v60 = vpack.c.bf16 %v842_v58, %v7664_v57 }
0x12e6   :  { %858 = vrot.lane.b32.xlu1 %v856_v60, %s7429_s14 }
0x12e7   :  { %v846_v16 = vpop.permute.xlu0 %845 }
0x1358   :  { %v859_v62 = vpop.permute.xlu1 %858 }
0x1359   :  { %6585 = vmatmul.mubr.msk.bf16.vlgmr.msra.gmra.mrb[12].mxu1 %vm159_vm2, %v859_v62 }
0x142c   :  { %v897_v63 = vpop.f32.mrb[12].mxu1 }
0x142d   :  { %v904_v1 = vadd.f32 %v897_v63, %v7527_v22  ;;  %v6586_v4 = vpop.f32.mrb[13].mxu1 }
0x142e   :  { %v900_v5 = vpop.f32.mrb[14].mxu1 }
0x142f   :  { %6799 = vtanh.f32 %v904_v1  ;;  %v905_v7 = vadd.f32 %v900_v5, %v7525_v20  ;;  %v6587_v12 = vpop.f32.mrb[15].mxu1  ;;  %v6435_v17 = vmul.f32 -1.442695, %v904_v1 }
0x1431   :  { %6801 = vtanh.f32 %v905_v7  ;;  %v6436_v19 = vmul.f32 -1.442695, %v905_v7 }
0x1432   :  { %6803 = vpow2.f32 %v6435_v17 }
0x1433   :  { %6805 = vpow2.f32 %v6436_v19 }
0x1439   :  { %v6800_v13 = vpop.eup %6799 }
0x143a   :  { %915 = vrot.lane.b32.xlu0 %v6800_v13, %s7426_s11 }
0x143b   :  { %v6802_v14 = vpop.eup %6801 }
0x143c   :  { %942 = vrot.lane.b32.xlu1 %v6802_v14, %s7426_s11  ;;  %v6804_v22 = vpop.eup %6803 }
0x143d   :  { %v6806_v23 = vpop.eup %6805  ;;  %v909_v26 = vadd.f32 1.0, %v6804_v22 }
0x143e   :  { %v933_v28 = vadd.f32 1.0, %v6806_v23 }
0x143f   :  { %6807 = vrcp.f32 %v909_v26 }
0x1440   :  { %937 = vrot.lane.b32.xlu1 %v846_v16, %s7428_s13  ;;  %6809 = vrcp.f32 %v933_v28 }
0x1449   :  { %v6808_v20 = vpop.eup %6807 }
0x144a   :  { %v6810_v2 = vpop.eup %6809  ;;  %v913_v36 = vmul.f32 %v6808_v20, %v806_v49 }
0x14ac   :  { %v916_v30 = vpop.permute.xlu0 %915 }
0x14ad   :  { %v918_v31 = vmul.f32 %v6808_v20, %v916_v30 }
0x14ae   :  { %v943_v32 = vpop.permute.xlu1 %942 }
0x14af   :  { %920 = vrot.lane.b32.xlu1 %v918_v31, %s7427_s12  ;;  %v945_v33 = vmul.f32 %v6810_v2, %v943_v32 }
0x14b1   :  { %947 = vrot.lane.b32.xlu0 %v945_v33, %s7427_s12 }
0x14b2   :  { %v938_v27 = vpop.permute.xlu1 %937 }
0x14b3   :  { %v940_v15 = vmul.f32 %v6810_v2, %v938_v27 }
0x1521   :  { %v921_v38 = vpop.permute.xlu1 %920 }
0x1522   :  { %v923_v39 = vadd.f32 %v921_v38, %v913_v36 }
0x1523   :  { %v948_v40 = vpop.permute.xlu0 %947 }
0x1524   :  { %6811 = vtanh.f32 %v923_v39  ;;  %v950_v41 = vadd.f32 %v948_v40, %v940_v15 }
0x1526   :  { %6813 = vtanh.f32 %v950_v41 }
0x152e   :  { %v6812_v42 = vpop.eup %6811 }
0x152f   :  { %926 = vrot.lane.b32.xlu1 %v6812_v42, %s7427_s12 }
0x1530   :  { %v6814_v43 = vpop.eup %6813 }
0x1531   :  { %953 = vrot.lane.b32.xlu0 %v6814_v43, %s7427_s12 }
0x15a1   :  { %v927_v45 = vpop.permute.xlu1 %926 }
0x15a2   :  { %v7680_v47 = vmul.f32 %v6808_v20, %v927_v45 }
0x15a3   :  { %v954_v44 = vpop.permute.xlu0 %953 }
0x15a4   :  { %v956_v24 = vmul.f32 %v6810_v2, %v954_v44 }
0x15a6   :  { %958 = vrot.lane.b32.xlu0 %v956_v24, %s7428_s13 }
0x15aa   :  { %962 = vrot.lane.b32.xlu0 %v950_v41, %s7428_s13 }
0x1618   :  { %v959_v49 = vpop.permute.xlu0 %958 }
0x1619   :  { %v973_v18 = vpack.c.bf16 %v959_v49, %v7680_v47 }
0x161b   :  { %975 = vrot.lane.b32.xlu1 %v973_v18, %s7429_s14 }
0x161c   :  { %v963_v63 = vpop.permute.xlu0 %962 }
0x168d   :  { %v976_v50 = vpop.permute.xlu1 %975 }
0x168e   :  { %6591 = vmatmul.mubr.msk.bf16.vlgmr.msra.gmra.mrb[20].mxu0 %vm159_vm2, %v976_v50 }
0x168f   :  { %6608 = vmatprep.mubr.msk.bf16.mxu0 %vm7424_vm0, %v7423_v0 }
0x1761   :  { %v1014_v51 = vpop.f32.mrb[20].mxu0 }
0x1762   :  { %v1021_v52 = vadd.f32 %v1014_v51, %v7533_v29  ;;  %v6592_v53 = vpop.f32.mrb[21].mxu0 }
0x1763   :  { %v1017_v54 = vpop.f32.mrb[22].mxu0 }
0x1764   :  { %6815 = vtanh.f32 %v1021_v52  ;;  %v1022_v56 = vadd.f32 %v1017_v54, %v7536_v34  ;;  %v6593_v58 = vpop.f32.mrb[23].mxu0  ;;  %v6438_v1 = vmul.f32 -1.442695, %v1021_v52 }
0x1766   :  { %6817 = vtanh.f32 %v1022_v56  ;;  %v6439_v4 = vmul.f32 -1.442695, %v1022_v56 }
0x1767   :  { %6819 = vpow2.f32 %v6438_v1  ;;  %v7774_v1 = vsub.s32 1, %v7512_v10 }
0x1768   :  { %6821 = vpow2.f32 %v6439_v4  ;;  %v7411_v4 = vld [vmem:[%s10249_s3] sm:$0x3] }
0x176e   :  { %v6816_v60 = vpop.eup %6815 }
0x176f   :  { %1032 = vrot.lane.b32.xlu0 %v6816_v60, %s7426_s11 }
0x1770   :  { %v6818_v62 = vpop.eup %6817 }
0x1771   :  { %1059 = vrot.lane.b32.xlu1 %v6818_v62, %s7426_s11  ;;  %v6820_v29 = vpop.eup %6819 }
0x1772   :  { %v6822_v5 = vpop.eup %6821  ;;  %v1026_v7 = vadd.f32 1.0, %v6820_v29  ;;  %v1105_v29 = vrot.slane %v7411_v4, %v7774_v1 }
0x1773   :  { %v1050_v12 = vadd.f32 1.0, %v6822_v5 }
0x1774   :  { %6823 = vrcp.f32 %v1026_v7 }
0x1775   :  { %1054 = vrot.lane.b32.xlu1 %v963_v63, %s7428_s13  ;;  %6825 = vrcp.f32 %v1050_v12 }
0x177e   :  { %v7692_v34 = vpop.eup %6823 }
0x177f   :  { %v6826_v16 = vpop.eup %6825  ;;  %v1030_v23 = vmul.f32 %v7692_v34, %v923_v39 }
0x17e1   :  { %v1033_v13 = vpop.permute.xlu0 %1032 }
0x17e2   :  { %v1035_v14 = vmul.f32 %v7692_v34, %v1033_v13 }
0x17e3   :  { %v1060_v17 = vpop.permute.xlu1 %1059 }
0x17e4   :  { %1037 = vrot.lane.b32.xlu1 %v1035_v14, %s7427_s12  ;;  %v1062_v19 = vmul.f32 %v6826_v16, %v1060_v17 }
0x17e6   :  { %1064 = vrot.lane.b32.xlu0 %v1062_v19, %s7427_s12 }
0x17e7   :  { %v1055_v22 = vpop.permute.xlu1 %1054 }
0x17e8   :  { %v1057_v20 = vmul.f32 %v6826_v16, %v1055_v22 }
0x1856   :  { %v1038_v26 = vpop.permute.xlu1 %1037 }
0x1857   :  { %v1040_v28 = vadd.f32 %v1038_v26, %v1030_v23 }
0x1858   :  { %v1065_v30 = vpop.permute.xlu0 %1064 }
0x1859   :  { %6827 = vtanh.f32 %v1040_v28  ;;  %v1067_v31 = vadd.f32 %v1065_v30, %v1057_v20 }
0x185b   :  { %6829 = vtanh.f32 %v1067_v31 }
0x1863   :  { %v6828_v2 = vpop.eup %6827 }
0x1864   :  { %1043 = vrot.lane.b32.xlu1 %v6828_v2, %s7427_s12 }
0x1865   :  { %v6830_v32 = vpop.eup %6829 }
0x1866   :  { %1070 = vrot.lane.b32.xlu0 %v6830_v32, %s7427_s12 }
0x1868   :  { %380 = vrot.lane.b32.xlu1 %v7573_v48, %s7429_s14  ;;  %v7729_v48 = vld [vmem:[%s10250_s2 + $0x10] sm:$0xff]  }
0x1869   :  { %6607 = vmatpush3.bf16.msra.mxu0 %v7729_v48 }
0x186a   :  { %262 = vrot.lane.b32.xlu0 %v7550_v61, %s7429_s14  ;;  %v6700_v61 = vld [vmem:[%s10250_s2] sm:$0xff]   ;;  %6612 = vmatprep.subr.bf16.mxu0 %v7423_v0 }
0x186b   :  { %6594 = vmatprep.subr.bf16.mxu1 %v6700_v61 }
0x186c   :  { %614 = vrot.lane.b32.xlu1 %v7619_v25, %s7429_s14  ;;  %6595 = vmatpush3.bf16.msra.mxu1 %v6700_v61 }
0x186d   :  { %6609 = vmatmul.mubr.bf16.vlgmr.msra.gmra.mrb[24].mxu0 %v7425_v3 }
0x186e   :  { %497 = vrot.lane.b32.xlu0 %v7596_v37, %s7429_s14  ;;  %6613 = vmatpush3.bf16.msra.mxu0 %v7729_v48 }
0x186f   :  { %6614 = vmatprep.mubr.msk.bf16.mxu0 %vm7424_vm0, %v7423_v0  ;;  %6624 = vmatprep.subr.bf16.mxu0 %v7423_v0 }
0x1870   :  { %852 = vrot.lane.b32.xlu1 %v7659_v55, %s7430_s15 }
0x1872   :  { %969 = vrot.lane.b32.xlu0 %v956_v24, %s7430_s15 }
0x1874   :  { %618 = vrot.lane.b32.xlu1 %v7614_v21, %s7430_s15 }
0x1876   :  { %735 = vrot.lane.b32.xlu0 %v7636_v6, %s7430_s15 }
0x187a   :  { %501 = vrot.lane.b32.xlu0 %v7591_v35, %s7430_s15 }
0x187e   :  { %266 = vrot.lane.b32.xlu0 %v7545_v59, %s7430_s15  ;;  %v6702_v59 = vld [vmem:[%s10250_s2 + $0x8] sm:$0xff]  }
0x187f   :  { %6596 = vmatprep.subr.bf16.mxu1 %v6702_v59 }
0x1880   :  { %6597 = vmatpush3.bf16.msra.mxu1 %v6702_v59 }
0x1881   :  { %6618 = vmatprep.subr.bf16.mxu1 %v7423_v0 }
0x1882   :  { %731 = vrot.lane.b32.xlu0 %v7641_v8, %s7429_s14 }
0x1886   :  { %965 = vrot.lane.b32.xlu0 %v7680_v47, %s7429_s14 }
0x18d6   :  { %v1044_v35 = vpop.permute.xlu1 %1043 }
0x18d7   :  { %v1046_v27 = vmul.f32 %v7692_v34, %v1044_v35 }
0x18d8   :  { %v1071_v37 = vpop.permute.xlu0 %1070 }
0x18d9   :  { %v1073_v21 = vmul.f32 %v6826_v16, %v1071_v37 }
0x18da   :  { %v381_v25 = vpop.permute.xlu1 %380 }
0x18db   :  { %383 = vst.msk [vmem:[#allocation2 + $0x8] sm:$0xff] %vm159_vm2, %v381_v25  ;;  %1080 = vrot.lane.b32.xlu1 %v1073_v21, %s7430_s15 }
0x18dc   :  { %v263_v6 = vpop.permute.xlu0 %262 }
0x18dd   :  { %265 = vst.msk [vmem:[#allocation2] sm:$0xff] %vm159_vm2, %v263_v6 }
0x18de   :  { %v615_v3 = vpop.permute.xlu1 %614 }
0x18df   :  { %617 = vst.msk [vmem:[#allocation2 + $0x18] sm:$0xff] %vm159_vm2, %v615_v3  ;;  %384 = vrot.lane.b32.xlu1 %v7568_v46, %s7430_s15 }
0x18e0   :  { %v498_v8 = vpop.permute.xlu0 %497 }
0x18e1   :  { %500 = vst.msk [vmem:[#allocation2 + $0x10] sm:$0xff] %vm159_vm2, %v498_v8 }
0x18e2   :  { %v853_v55 = vpop.permute.xlu1 %852 }
0x18e3   :  { %855 = vst.msk [vmem:[#allocation2 + $0x10] sm:$0xff] %vm269_vm3, %v853_v55  ;;  %848 = vrot.lane.b32.xlu1 %v7664_v57, %s7429_s14 }
0x18e4   :  { %v970_v33 = vpop.permute.xlu0 %969 }
0x18e5   :  { %972 = vst.msk [vmem:[#allocation2 + $0x8] sm:$0xff] %vm269_vm3, %v970_v33 }
0x18e6   :  { %v619_v36 = vpop.permute.xlu1 %618 }
0x18e7   :  { %621 = vst.msk [vmem:[#allocation2 + $0x20] sm:$0xff] %vm269_vm3, %v619_v36  ;;  %1075 = vrot.lane.b32.xlu1 %v1046_v27, %s7429_s14 }
0x18e8   :  { %v736_v46 = vpop.permute.xlu0 %735 }
0x18e9   :  { %738 = vst.msk [vmem:[#allocation2 + $0x18] sm:$0xff] %vm269_vm3, %v736_v46 }
0x18ea   :  { %v1092_v47 = vld [vmem:[#allocation2 + $0x10] sm:$0xff] }
0x18ec   :  { %v502_v38 = vpop.permute.xlu0 %501  ;;  %v1091_v24 = vld [vmem:[#allocation2 + $0x8] sm:$0xff] }
0x18ed   :  { %504 = vst.msk [vmem:[#allocation2 + $0x28] sm:$0xff] %vm269_vm3, %v502_v38 }
0x18f0   :  { %v267_v39 = vpop.permute.xlu0 %266  ;;  %v1093_v42 = vld [vmem:[#allocation2 + $0x18] sm:$0xff] }
0x18f1   :  { %270 = vst.msk [vmem:[#allocation2 + $0x38] sm:$0xff] %vm269_vm3, %v267_v39  ;;  %v1099_v49 = vpack.c.bf16 %v1093_v42, %v1092_v47 }
0x18f4   :  { %v732_v57 = vpop.permute.xlu0 %731 }
0x18f5   :  { %734 = vst.msk [vmem:[#allocation2 + $0x20] sm:$0xff] %vm159_vm2, %v732_v57 }
0x18f8   :  { %v966_v41 = vpop.permute.xlu0 %965 }
0x18fc   :  { %v1094_v50 = vld [vmem:[#allocation2 + $0x20] sm:$0xff] }
0x1940   :  { %v1235_v58 = vpop.f32.mrb[24].mxu0 }
0x1941   :  { %v6610_v60 = vpop.f32.mrb[25].mxu0 }
0x1942   :  { %v1238_v62 = vpop.f32.mrb[26].mxu0 }
0x1943   :  { %v6611_v63 = vpop.f32.mrb[27].mxu0 }
0x194d   :  { %v1081_v15 = vpop.permute.xlu1 %1080 }
0x194e   :  { %1083 = vst.msk [vmem:[#allocation2] sm:$0xff] %vm269_vm3, %v1081_v15 }
0x1951   :  { %v385_v40 = vpop.permute.xlu1 %384 }
0x1952   :  { %387 = vst.msk [vmem:[#allocation2 + $0x30] sm:$0xff] %vm269_vm3, %v385_v40 }
0x1953   :  { %968 = vst.msk [vmem:[#allocation2 + $0x30] sm:$0xff] %vm159_vm2, %v966_v41 }
0x1955   :  { %v849_v43 = vpop.permute.xlu1 %848  ;;  %v1090_v44 = vld [vmem:[#allocation2] sm:$0xff] }
0x1956   :  { %851 = vst.msk [vmem:[#allocation2 + $0x28] sm:$0xff] %vm159_vm2, %v849_v43  ;;  %v1098_v45 = vpack.c.bf16 %v1091_v24, %v1090_v44 }
0x1958   :  { %6598 = vmatprep.mubr.msk.bf16.mxu1 %vm75_vm1, %v1098_v45 }
0x1959   :  { %v1076_v18 = vpop.permute.xlu1 %1075  ;;  %6599 = vmatmul.mubr.msk.bf16.vlgmr.msra.gmra.mrb[16].mxu1 %vm75_vm1, %v1099_v49 }
0x195a   :  { %1078 = vst.msk [vmem:[#allocation2 + $0x38] sm:$0xff] %vm159_vm2, %v1076_v18  ;;  %6619 = vmatpush3.bf16.msra.mxu1 %v7729_v48  ;;  %v1096_v53 = vld [vmem:[#allocation2 + $0x30] sm:$0xff] }
0x195b   :  { %6630 = vmatprep.subr.bf16.mxu1 %v7423_v0 }
0x195d   :  { %v1095_v51 = vld [vmem:[#allocation2 + $0x28] sm:$0xff] }
0x195e   :  { %v1100_v52 = vpack.c.bf16 %v1095_v51, %v1094_v50 }
0x1960   :  { %6602 = vmatprep.mubr.msk.bf16.mxu1 %vm75_vm1, %v1100_v52 }
0x1961   :  { %v1097_v54 = vld [vmem:[#allocation2 + $0x38] sm:$0xff] }
0x1962   :  { %v1101_v56 = vpack.c.bf16 %v1097_v54, %v1096_v53 }
0x1964   :  { %6603 = vmatmul.mubr.msk.bf16.gmra.mrb[20].mxu1 %vm75_vm1, %v1101_v56 }
0x1965   :  { %6620 = vmatprep.mubr.msk.bf16.mxu1 %vm7424_vm0, %v7423_v0 }
0x1a2c   :  { %v6600_v5 = vpop.f32.mrb[16].mxu1 }
0x1a2d   :  { %v7780_v7 = vadd.f32 %v6600_v5, %v1105_v29  ;;  %v1164_v12 = vpop.f32.mrb[17].mxu1 }
0x1a2e   :  { %v7782_v34 = vadd.f32 %v1164_v12, %v1105_v29  ;;  %v6601_v13 = vpop.f32.mrb[18].mxu1 }
0x1a2f   :  { %v7784_v14 = vadd.f32 %v6601_v13, %v1105_v29  ;;  %v1167_v16 = vpop.f32.mrb[19].mxu1 }
0x1a30   :  { %v7786_v17 = vadd.f32 %v1167_v16, %v1105_v29  ;;  %v1242_v19 = vadd.f32 %v1235_v58, %v7782_v34 }
0x1a32   :  { %6831 = vtanh.f32 %v1242_v19  ;;  %v6447_v35 = vmul.f32 -1.442695, %v1242_v19 }
0x1a37   :  { %v6604_v22 = vpop.f32.mrb[20].mxu1 }
0x1a38   :  { %v7789_v23 = vadd.f32 %v6604_v22, %v1105_v29  ;;  %v1180_v26 = vpop.f32.mrb[21].mxu1 }
0x1a39   :  { %v7791_v28 = vadd.f32 %v1180_v26, %v1105_v29  ;;  %v6605_v20 = vpop.f32.mrb[22].mxu1 }
0x1a3a   :  { %v7793_v30 = vadd.f32 %v6605_v20, %v1105_v29  ;;  %v1183_v31 = vpop.f32.mrb[23].mxu1 }
0x1a3b   :  { %v7795_v2 = vadd.f32 %v1183_v31, %v1105_v29 }
0x1a3c   :  { %10263 = vst [vmem:[#allocation3_spill] sm:$0xff] %v7793_v30  ;;  %v6832_v32 = vpop.eup %6831  ;;  %v1243_v61 = vadd.f32 %v1238_v62, %v7793_v30 }
0x1a3d   :  { %1253 = vrot.lane.b32.xlu1 %v6832_v32, %s7426_s11 }
0x1a3e   :  { %6833 = vtanh.f32 %v1243_v61  ;;  %v6448_v37 = vmul.f32 -1.442695, %v1243_v61 }
0x1a3f   :  { %6835 = vpow2.f32 %v6447_v35 }
0x1a40   :  { %6837 = vpow2.f32 %v6448_v37 }
0x1a48   :  { %v6834_v59 = vpop.eup %6833 }
0x1a49   :  { %1277 = vrot.lane.b32.xlu0 %v6834_v59, %s7426_s11  ;;  %v6836_v21 = vpop.eup %6835 }
0x1a4a   :  { %v1247_v25 = vadd.f32 1.0, %v6836_v21  ;;  %v6838_v6 = vpop.eup %6837 }
0x1a4b   :  { %v1271_v3 = vadd.f32 1.0, %v6838_v6 }
0x1a4c   :  { %6839 = vrcp.f32 %v1247_v25 }
0x1a4d   :  { %6841 = vrcp.f32 %v1271_v3 }
0x1a56   :  { %v6840_v8 = vpop.eup %6839 }
0x1a57   :  { %v6842_v27 = vpop.eup %6841  ;;  %v1251_v38 = vmul.f32 0.0, %v6840_v8 }
0x1a58   :  { %v1275_v15 = vmul.f32 0.0, %v6842_v27 }
0x1aaf   :  { %v1254_v55 = vpop.permute.xlu1 %1253 }
0x1ab0   :  { %v1256_v33 = vmul.f32 %v6840_v8, %v1254_v55 }
0x1ab2   :  { %1258 = vrot.lane.b32.xlu1 %v1256_v33, %s7427_s12 }
0x1abb   :  { %v1278_v36 = vpop.permute.xlu0 %1277 }
0x1abc   :  { %v1280_v46 = vmul.f32 %v6842_v27, %v1278_v36 }
0x1abe   :  { %1282 = vrot.lane.b32.xlu0 %v1280_v46, %s7427_s12 }
0x1b24   :  { %v1259_v39 = vpop.permute.xlu1 %1258 }
0x1b25   :  { %v1261_v57 = vadd.f32 %v1259_v39, %v1251_v38 }
0x1b27   :  { %6843 = vtanh.f32 %v1261_v57 }
0x1b30   :  { %v1283_v40 = vpop.permute.xlu0 %1282 }
0x1b31   :  { %v6844_v41 = vpop.eup %6843  ;;  %v1285_v42 = vadd.f32 %v1283_v40, %v1275_v15 }
0x1b32   :  { %1264 = vrot.lane.b32.xlu1 %v6844_v41, %s7427_s12 }
0x1b33   :  { %6845 = vtanh.f32 %v1285_v42 }
0x1b3d   :  { %v6846_v43 = vpop.eup %6845 }
0x1b3e   :  { %1288 = vrot.lane.b32.xlu0 %v6846_v43, %s7427_s12 }
0x1ba4   :  { %v1265_v45 = vpop.permute.xlu1 %1264 }
0x1ba5   :  { %v7809_v47 = vmul.f32 %v6840_v8, %v1265_v45 }
0x1bb0   :  { %v1289_v44 = vpop.permute.xlu0 %1288 }
0x1bb1   :  { %v7804_v24 = vmul.f32 %v6842_v27, %v1289_v44 }
0x1bb3   :  { %10264 = vst [vmem:[#allocation4_spill] sm:$0xff] %v7804_v24  ;;  %1293 = vrot.lane.b32.xlu0 %v7804_v24, %s7428_s13 }
0x1bb7   :  { %1297 = vrot.lane.b32.xlu0 %v1285_v42, %s7428_s13 }
0x1c25   :  { %v1294_v49 = vpop.permute.xlu0 %1293 }
0x1c26   :  { %v1308_v18 = vpack.c.bf16 %v1294_v49, %v7809_v47 }
0x1c28   :  { %1310 = vrot.lane.b32.xlu1 %v1308_v18, %s7429_s14 }
0x1c29   :  { %v1298_v63 = vpop.permute.xlu0 %1297 }
0x1c9a   :  { %v1311_v50 = vpop.permute.xlu1 %1310 }
0x1c9b   :  { %6615 = vmatmul.mubr.msk.bf16.vlgmr.msra.gmra.mrb[28].mxu0 %vm159_vm2, %v1311_v50 }
0x1c9c   :  { %6625 = vmatpush3.bf16.msra.mxu0 %v7729_v48  ;;  %6626 = vmatprep.mubr.msk.bf16.mxu0 %vm7424_vm0, %v7423_v0 }
0x1c9d   :  { %6636 = vmatprep.subr.bf16.mxu0 %v7423_v0 }
0x1d6e   :  { %v1349_v51 = vpop.f32.mrb[28].mxu0 }
0x1d6f   :  { %v1356_v52 = vadd.f32 %v1349_v51, %v7786_v17  ;;  %v6616_v53 = vpop.f32.mrb[29].mxu0 }
0x1d70   :  { %v1352_v54 = vpop.f32.mrb[30].mxu0 }
0x1d71   :  { %6847 = vtanh.f32 %v1356_v52  ;;  %v1357_v56 = vadd.f32 %v1352_v54, %v7789_v23  ;;  %v6617_v58 = vpop.f32.mrb[31].mxu0  ;;  %v6450_v4 = vmul.f32 -1.442695, %v1356_v52 }
0x1d73   :  { %6849 = vtanh.f32 %v1357_v56  ;;  %v6451_v29 = vmul.f32 -1.442695, %v1357_v56 }
0x1d74   :  { %6851 = vpow2.f32 %v6450_v4 }
0x1d75   :  { %6853 = vpow2.f32 %v6451_v29 }
0x1d7b   :  { %v6848_v60 = vpop.eup %6847 }
0x1d7c   :  { %1367 = vrot.lane.b32.xlu0 %v6848_v60, %s7426_s11 }
0x1d7d   :  { %v6850_v62 = vpop.eup %6849 }
0x1d7e   :  { %1394 = vrot.lane.b32.xlu1 %v6850_v62, %s7426_s11  ;;  %v6852_v5 = vpop.eup %6851 }
0x1d7f   :  { %v6854_v12 = vpop.eup %6853  ;;  %v1361_v13 = vadd.f32 1.0, %v6852_v5 }
0x1d80   :  { %v1385_v16 = vadd.f32 1.0, %v6854_v12 }
0x1d81   :  { %6855 = vrcp.f32 %v1361_v13 }
0x1d82   :  { %1389 = vrot.lane.b32.xlu1 %v1298_v63, %s7428_s13  ;;  %6857 = vrcp.f32 %v1385_v16 }
0x1d8b   :  { %v6856_v19 = vpop.eup %6855 }
0x1d8c   :  { %v6858_v20 = vpop.eup %6857  ;;  %v1365_v59 = vmul.f32 %v6856_v19, %v1261_v57 }
0x1dee   :  { %v1368_v22 = vpop.permute.xlu0 %1367 }
0x1def   :  { %v1370_v26 = vmul.f32 %v6856_v19, %v1368_v22 }
0x1df0   :  { %v1395_v31 = vpop.permute.xlu1 %1394 }
0x1df1   :  { %1372 = vrot.lane.b32.xlu1 %v1370_v26, %s7427_s12  ;;  %v1397_v32 = vmul.f32 %v6858_v20, %v1395_v31 }
0x1df3   :  { %1399 = vrot.lane.b32.xlu0 %v1397_v32, %s7427_s12 }
0x1df4   :  { %v1390_v61 = vpop.permute.xlu1 %1389 }
0x1df5   :  { %v1392_v21 = vmul.f32 %v6858_v20, %v1390_v61 }
0x1e63   :  { %v1373_v35 = vpop.permute.xlu1 %1372 }
0x1e64   :  { %v1375_v37 = vadd.f32 %v1373_v35, %v1365_v59 }
0x1e65   :  { %v1400_v25 = vpop.permute.xlu0 %1399 }
0x1e66   :  { %6859 = vtanh.f32 %v1375_v37  ;;  %v1402_v6 = vadd.f32 %v1400_v25, %v1392_v21 }
0x1e68   :  { %6861 = vtanh.f32 %v1402_v6 }
0x1e70   :  { %v6860_v3 = vpop.eup %6859 }
0x1e71   :  { %1378 = vrot.lane.b32.xlu1 %v6860_v3, %s7427_s12 }
0x1e72   :  { %v6862_v8 = vpop.eup %6861 }
0x1e73   :  { %1405 = vrot.lane.b32.xlu0 %v6862_v8, %s7427_s12 }
0x1ee3   :  { %v1379_v27 = vpop.permute.xlu1 %1378 }
0x1ee4   :  { %v7832_v36 = vmul.f32 %v6856_v19, %v1379_v27 }
0x1ee5   :  { %v1406_v55 = vpop.permute.xlu0 %1405 }
0x1ee6   :  { %v7827_v33 = vmul.f32 %v6858_v20, %v1406_v55 }
0x1ee8   :  { %10265 = vst [vmem:[#allocation5_spill] sm:$0xff] %v7827_v33  ;;  %1410 = vrot.lane.b32.xlu0 %v7827_v33, %s7428_s13 }
0x1eec   :  { %1414 = vrot.lane.b32.xlu0 %v1402_v6, %s7428_s13 }
0x1f5a   :  { %v1411_v46 = vpop.permute.xlu0 %1410 }
0x1f5b   :  { %v1425_v38 = vpack.c.bf16 %v1411_v46, %v7832_v36 }
0x1f5d   :  { %1427 = vrot.lane.b32.xlu1 %v1425_v38, %s7429_s14 }
0x1f5e   :  { %v1415_v49 = vpop.permute.xlu0 %1414 }
0x1fcf   :  { %v1428_v39 = vpop.permute.xlu1 %1427 }
0x1fd0   :  { %6621 = vmatmul.mubr.msk.bf16.vlgmr.msra.gmra.mrb[24].mxu1 %vm159_vm2, %v1428_v39 }
0x1fd1   :  { %6631 = vmatpush3.bf16.msra.mxu1 %v7729_v48  ;;  %6632 = vmatprep.mubr.msk.bf16.mxu1 %vm7424_vm0, %v7423_v0 }
0x1fd2   :  { %6642 = vmatprep.subr.bf16.mxu1 %v7423_v0 }
0x20a3   :  { %v1466_v57 = vpop.f32.mrb[24].mxu1 }
0x20a4   :  { %v1473_v15 = vadd.f32 %v1466_v57, %v7780_v7  ;;  %v6622_v40 = vpop.f32.mrb[25].mxu1 }
0x20a5   :  { %v1469_v41 = vpop.f32.mrb[26].mxu1 }
0x20a6   :  { %6863 = vtanh.f32 %v1473_v15  ;;  %v1474_v42 = vadd.f32 %v1469_v41, %v7795_v2  ;;  %v6623_v43 = vpop.f32.mrb[27].mxu1  ;;  %v6453_v18 = vmul.f32 -1.442695, %v1473_v15 }
0x20a8   :  { %6865 = vtanh.f32 %v1474_v42  ;;  %v6454_v50 = vmul.f32 -1.442695, %v1474_v42 }
0x20a9   :  { %6867 = vpow2.f32 %v6453_v18 }
0x20aa   :  { %6869 = vpow2.f32 %v6454_v50 }
0x20b0   :  { %v6864_v44 = vpop.eup %6863 }
0x20b1   :  { %1484 = vrot.lane.b32.xlu0 %v6864_v44, %s7426_s11 }
0x20b2   :  { %v6866_v45 = vpop.eup %6865 }
0x20b3   :  { %1511 = vrot.lane.b32.xlu1 %v6866_v45, %s7426_s11  ;;  %v6868_v51 = vpop.eup %6867 }
0x20b4   :  { %v6870_v52 = vpop.eup %6869  ;;  %v1478_v53 = vadd.f32 1.0, %v6868_v51 }
0x20b5   :  { %v1502_v54 = vadd.f32 1.0, %v6870_v52 }
0x20b6   :  { %6871 = vrcp.f32 %v1478_v53 }
0x20b7   :  { %1506 = vrot.lane.b32.xlu1 %v1415_v49, %s7428_s13  ;;  %6873 = vrcp.f32 %v1502_v54 }
0x20c0   :  { %v6872_v56 = vpop.eup %6871 }
0x20c1   :  { %v6874_v62 = vpop.eup %6873  ;;  %v1482_v5 = vmul.f32 %v6872_v56, %v1375_v37 }
0x2123   :  { %v1485_v58 = vpop.permute.xlu0 %1484 }
0x2124   :  { %v1487_v60 = vmul.f32 %v6872_v56, %v1485_v58 }
0x2125   :  { %v1512_v63 = vpop.permute.xlu1 %1511 }
0x2126   :  { %1489 = vrot.lane.b32.xlu1 %v1487_v60, %s7427_s12  ;;  %v1514_v4 = vmul.f32 %v6874_v62, %v1512_v63 }
0x2128   :  { %1516 = vrot.lane.b32.xlu0 %v1514_v4, %s7427_s12 }
0x2129   :  { %v1507_v29 = vpop.permute.xlu1 %1506 }
0x212a   :  { %v1509_v16 = vmul.f32 %v6874_v62, %v1507_v29 }
0x2198   :  { %v1490_v12 = vpop.permute.xlu1 %1489 }
0x2199   :  { %v1492_v13 = vadd.f32 %v1490_v12, %v1482_v5 }
0x219a   :  { %v1517_v19 = vpop.permute.xlu0 %1516 }
0x219b   :  { %6875 = vtanh.f32 %v1492_v13  ;;  %v1519_v22 = vadd.f32 %v1517_v19, %v1509_v16 }
0x219d   :  { %6877 = vtanh.f32 %v1519_v22 }
0x21a5   :  { %v6876_v26 = vpop.eup %6875 }
0x21a6   :  { %1495 = vrot.lane.b32.xlu1 %v6876_v26, %s7427_s12 }
0x21a7   :  { %v6878_v20 = vpop.eup %6877 }
0x21a8   :  { %1522 = vrot.lane.b32.xlu0 %v6878_v20, %s7427_s12 }
0x2218   :  { %v1496_v61 = vpop.permute.xlu1 %1495 }
0x2219   :  { %v7855_v59 = vmul.f32 %v6872_v56, %v1496_v61 }
0x221a   :  { %v1523_v31 = vpop.permute.xlu0 %1522 }
0x221b   :  { %v7850_v32 = vmul.f32 %v6874_v62, %v1523_v31 }
0x221d   :  { %1527 = vrot.lane.b32.xlu0 %v7850_v32, %s7428_s13 }
0x2221   :  { %1531 = vrot.lane.b32.xlu0 %v1519_v22, %s7428_s13 }
0x228f   :  { %v1528_v35 = vpop.permute.xlu0 %1527 }
0x2290   :  { %v1542_v37 = vpack.c.bf16 %v1528_v35, %v7855_v59 }
0x2292   :  { %1544 = vrot.lane.b32.xlu1 %v1542_v37, %s7429_s14 }
0x2293   :  { %v1532_v39 = vpop.permute.xlu0 %1531 }
0x2304   :  { %v1545_v21 = vpop.permute.xlu1 %1544 }
0x2305   :  { %6627 = vmatmul.mubr.msk.bf16.vlgmr.msra.gmra.mrb[32].mxu0 %vm159_vm2, %v1545_v21 }
0x2306   :  { %6637 = vmatpush3.bf16.msra.mxu0 %v7729_v48  ;;  %6638 = vmatprep.mubr.msk.bf16.mxu0 %vm7424_vm0, %v7423_v0 }
0x2307   :  { %6648 = vmatprep.subr.bf16.mxu0 %v7423_v0 }
0x23d8   :  { %v1583_v25 = vpop.f32.mrb[32].mxu0 }
0x23d9   :  { %v1590_v6 = vadd.f32 %v1583_v25, %v7784_v14  ;;  %v6628_v3 = vpop.f32.mrb[33].mxu0 }
0x23da   :  { %v1586_v8 = vpop.f32.mrb[34].mxu0 }
0x23db   :  { %6879 = vtanh.f32 %v1590_v6  ;;  %v1591_v55 = vadd.f32 %v1586_v8, %v7791_v28  ;;  %v6629_v27 = vpop.f32.mrb[35].mxu0  ;;  %v6456_v57 = vmul.f32 -1.442695, %v1590_v6 }
0x23dd   :  { %6881 = vtanh.f32 %v1591_v55  ;;  %v6457_v15 = vmul.f32 -1.442695, %v1591_v55 }
0x23de   :  { %6883 = vpow2.f32 %v6456_v57 }
0x23df   :  { %6885 = vpow2.f32 %v6457_v15 }
0x23e5   :  { %v6880_v46 = vpop.eup %6879 }
0x23e6   :  { %1601 = vrot.lane.b32.xlu0 %v6880_v46, %s7426_s11 }
0x23e7   :  { %v6882_v38 = vpop.eup %6881 }
0x23e8   :  { %1628 = vrot.lane.b32.xlu1 %v6882_v38, %s7426_s11  ;;  %v6884_v40 = vpop.eup %6883 }
0x23e9   :  { %v6886_v41 = vpop.eup %6885  ;;  %v1595_v42 = vadd.f32 1.0, %v6884_v40 }
0x23ea   :  { %v1619_v43 = vadd.f32 1.0, %v6886_v41 }
0x23eb   :  { %6887 = vrcp.f32 %v1595_v42 }
0x23ec   :  { %1623 = vrot.lane.b32.xlu1 %v1532_v39, %s7428_s13  ;;  %6889 = vrcp.f32 %v1619_v43 }
0x23f5   :  { %v6888_v44 = vpop.eup %6887 }
0x23f6   :  { %v6890_v18 = vpop.eup %6889  ;;  %v1599_v53 = vmul.f32 %v6888_v44, %v1492_v13 }
0x2458   :  { %v1602_v45 = vpop.permute.xlu0 %1601 }
0x2459   :  { %v1604_v49 = vmul.f32 %v6888_v44, %v1602_v45 }
0x245a   :  { %v1629_v50 = vpop.permute.xlu1 %1628 }
0x245b   :  { %1606 = vrot.lane.b32.xlu1 %v1604_v49, %s7427_s12  ;;  %v1631_v51 = vmul.f32 %v6890_v18, %v1629_v50 }
0x245d   :  { %1633 = vrot.lane.b32.xlu0 %v1631_v51, %s7427_s12 }
0x245e   :  { %v1624_v52 = vpop.permute.xlu1 %1623 }
0x245f   :  { %v1626_v58 = vmul.f32 %v6890_v18, %v1624_v52 }
0x24cd   :  { %v1607_v54 = vpop.permute.xlu1 %1606 }
0x24ce   :  { %v1609_v56 = vadd.f32 %v1607_v54, %v1599_v53 }
0x24cf   :  { %v1634_v60 = vpop.permute.xlu0 %1633 }
0x24d0   :  { %6891 = vtanh.f32 %v1609_v56  ;;  %v1636_v62 = vadd.f32 %v1634_v60, %v1626_v58 }
0x24d2   :  { %6893 = vtanh.f32 %v1636_v62 }
0x24da   :  { %v6892_v63 = vpop.eup %6891 }
0x24db   :  { %1612 = vrot.lane.b32.xlu1 %v6892_v63, %s7427_s12 }
0x24dc   :  { %v6894_v4 = vpop.eup %6893 }
0x24dd   :  { %1639 = vrot.lane.b32.xlu0 %v6894_v4, %s7427_s12 }
0x254d   :  { %v1613_v12 = vpop.permute.xlu1 %1612 }
0x254e   :  { %v7878_v13 = vmul.f32 %v6888_v44, %v1613_v12 }
0x254f   :  { %v1640_v29 = vpop.permute.xlu0 %1639 }
0x2550   :  { %v7873_v5 = vmul.f32 %v6890_v18, %v1640_v29 }
0x2552   :  { %1644 = vrot.lane.b32.xlu0 %v7873_v5, %s7428_s13 }
0x2556   :  { %1648 = vrot.lane.b32.xlu0 %v1636_v62, %s7428_s13 }
0x25c4   :  { %v1645_v16 = vpop.permute.xlu0 %1644 }
0x25c5   :  { %v1659_v19 = vpack.c.bf16 %v1645_v16, %v7878_v13 }
0x25c7   :  { %1661 = vrot.lane.b32.xlu1 %v1659_v19, %s7429_s14 }
0x25c8   :  { %v1649_v6 = vpop.permute.xlu0 %1648 }
0x2639   :  { %v1662_v22 = vpop.permute.xlu1 %1661 }
0x263a   :  { %6633 = vmatmul.mubr.msk.bf16.vlgmr.msra.gmra.mrb[28].mxu1 %vm159_vm2, %v1662_v22 }
0x263b   :  { %6643 = vmatpush3.bf16.msra.mxu1 %v7729_v48  ;;  %6644 = vmatprep.mubr.msk.bf16.mxu1 %vm7424_vm0, %v7423_v0 }
0x270d   :  { %v1700_v26 = vpop.f32.mrb[28].mxu1 }
0x270e   :  { %v1707_v20 = vadd.f32 %v1700_v26, %v7791_v28  ;;  %v6634_v31 = vpop.f32.mrb[29].mxu1 }
0x270f   :  { %v1703_v61 = vpop.f32.mrb[30].mxu1 }
0x2710   :  { %6895 = vtanh.f32 %v1707_v20  ;;  %v1708_v35 = vadd.f32 %v1703_v61, %v7784_v14  ;;  %v6635_v37 = vpop.f32.mrb[31].mxu1  ;;  %v6459_v3 = vmul.f32 -1.442695, %v1707_v20 }
0x2712   :  { %6897 = vtanh.f32 %v1708_v35  ;;  %v6460_v8 = vmul.f32 -1.442695, %v1708_v35 }
0x2713   :  { %6899 = vpow2.f32 %v6459_v3 }
0x2714   :  { %6901 = vpow2.f32 %v6460_v8 }
0x271a   :  { %v6896_v21 = vpop.eup %6895 }
0x271b   :  { %1718 = vrot.lane.b32.xlu0 %v6896_v21, %s7426_s11 }
0x271c   :  { %v6898_v25 = vpop.eup %6897 }
0x271d   :  { %1745 = vrot.lane.b32.xlu1 %v6898_v25, %s7426_s11  ;;  %v6900_v28 = vpop.eup %6899 }
0x271e   :  { %v6902_v55 = vpop.eup %6901  ;;  %v1712_v27 = vadd.f32 1.0, %v6900_v28 }
0x271f   :  { %v1736_v46 = vadd.f32 1.0, %v6902_v55 }
0x2720   :  { %6903 = vrcp.f32 %v1712_v27 }
0x2721   :  { %1740 = vrot.lane.b32.xlu1 %v1649_v6, %s7428_s13  ;;  %6905 = vrcp.f32 %v1736_v46 }
0x272a   :  { %v6904_v14 = vpop.eup %6903 }
0x272b   :  { %v6906_v57 = vpop.eup %6905  ;;  %v1716_v42 = vmul.f32 %v6904_v14, %v1609_v56 }
0x278d   :  { %v1719_v38 = vpop.permute.xlu0 %1718 }
0x278e   :  { %v1721_v39 = vmul.f32 %v6904_v14, %v1719_v38 }
0x278f   :  { %v1746_v15 = vpop.permute.xlu1 %1745 }
0x2790   :  { %1723 = vrot.lane.b32.xlu1 %v1721_v39, %s7427_s12  ;;  %v1748_v40 = vmul.f32 %v6906_v57, %v1746_v15 }
0x2792   :  { %1750 = vrot.lane.b32.xlu0 %v1748_v40, %s7427_s12 }
0x2793   :  { %v1741_v41 = vpop.permute.xlu1 %1740 }
0x2794   :  { %v1743_v45 = vmul.f32 %v6906_v57, %v1741_v41 }
0x2802   :  { %v1724_v43 = vpop.permute.xlu1 %1723 }
0x2803   :  { %v1726_v44 = vadd.f32 %v1724_v43, %v1716_v42 }
0x2804   :  { %v1751_v49 = vpop.permute.xlu0 %1750 }
0x2805   :  { %6907 = vtanh.f32 %v1726_v44  ;;  %v1753_v18 = vadd.f32 %v1751_v49, %v1743_v45 }
0x2807   :  { %6909 = vtanh.f32 %v1753_v18 }
0x280f   :  { %v6908_v50 = vpop.eup %6907 }
0x2810   :  { %1729 = vrot.lane.b32.xlu1 %v6908_v50, %s7427_s12 }
0x2811   :  { %v6910_v51 = vpop.eup %6909 }
0x2812   :  { %1756 = vrot.lane.b32.xlu0 %v6910_v51, %s7427_s12 }
0x2882   :  { %v1730_v54 = vpop.permute.xlu1 %1729 }
0x2883   :  { %v7900_v56 = vmul.f32 %v6904_v14, %v1730_v54 }
0x2884   :  { %v1757_v52 = vpop.permute.xlu0 %1756 }
0x2885   :  { %v7895_v53 = vmul.f32 %v6906_v57, %v1757_v52 }
0x2887   :  { %1761 = vrot.lane.b32.xlu0 %v7895_v53, %s7428_s13 }
0x288b   :  { %1765 = vrot.lane.b32.xlu0 %v1753_v18, %s7428_s13 }
0x28f9   :  { %v1762_v58 = vpop.permute.xlu0 %1761 }
0x28fa   :  { %v1776_v60 = vpack.c.bf16 %v1762_v58, %v7900_v56 }
0x28fc   :  { %1778 = vrot.lane.b32.xlu1 %v1776_v60, %s7429_s14 }
0x296e   :  { %v1779_v62 = vpop.permute.xlu1 %1778 }
0x296f   :  { %6639 = vmatmul.mubr.msk.bf16.vlgmr.msra.gmra.mrb[36].mxu0 %vm159_vm2, %v1779_v62 }
0x2970   :  { %6649 = vmatpush3.bf16.msra.mxu0 %v7729_v48  ;;  %6650 = vmatprep.mubr.msk.bf16.mxu0 %vm7424_vm0, %v7423_v0  ;;  %v1766_v48 = vpop.permute.xlu0 %1765 }
0x2a42   :  { %v1817_v63 = vpop.f32.mrb[36].mxu0 }
0x2a43   :  { %v1824_v4 = vadd.f32 %v1817_v63, %v7795_v2  ;;  %v6640_v29 = vpop.f32.mrb[37].mxu0 }
0x2a44   :  { %v1820_v12 = vpop.f32.mrb[38].mxu0 }
0x2a45   :  { %6911 = vtanh.f32 %v1824_v4  ;;  %v1825_v16 = vadd.f32 %v1820_v12, %v7780_v7  ;;  %v6641_v19 = vpop.f32.mrb[39].mxu0  ;;  %v6462_v0 = vmul.f32 -1.442695, %v1824_v4 }
0x2a47   :  { %6913 = vtanh.f32 %v1825_v16  ;;  %v6463_v20 = vmul.f32 -1.442695, %v1825_v16 }
0x2a48   :  { %6915 = vpow2.f32 %v6462_v0 }
0x2a49   :  { %6917 = vpow2.f32 %v6463_v20 }
0x2a4f   :  { %v6912_v22 = vpop.eup %6911 }
0x2a50   :  { %1835 = vrot.lane.b32.xlu0 %v6912_v22, %s7426_s11 }
0x2a51   :  { %v6914_v26 = vpop.eup %6913 }
0x2a52   :  { %1862 = vrot.lane.b32.xlu1 %v6914_v26, %s7426_s11  ;;  %v6916_v2 = vpop.eup %6915 }
0x2a53   :  { %v6918_v31 = vpop.eup %6917  ;;  %v1829_v61 = vadd.f32 1.0, %v6916_v2 }
0x2a54   :  { %v1853_v35 = vadd.f32 1.0, %v6918_v31 }
0x2a55   :  { %6919 = vrcp.f32 %v1829_v61 }
0x2a56   :  { %1857 = vrot.lane.b32.xlu1 %v1766_v48, %s7428_s13  ;;  %6921 = vrcp.f32 %v1853_v35 }
0x2a5f   :  { %v6920_v7 = vpop.eup %6919 }
0x2a60   :  { %v6922_v25 = vpop.eup %6921  ;;  %v1833_v28 = vmul.f32 %v6920_v7, %v1726_v44 }
0x2ac2   :  { %v1836_v37 = vpop.permute.xlu0 %1835 }
0x2ac3   :  { %v1838_v21 = vmul.f32 %v6920_v7, %v1836_v37 }
0x2ac4   :  { %v1863_v6 = vpop.permute.xlu1 %1862 }
0x2ac5   :  { %1840 = vrot.lane.b32.xlu1 %v1838_v21, %s7427_s12  ;;  %v1865_v3 = vmul.f32 %v6922_v25, %v1863_v6 }
0x2ac7   :  { %1867 = vrot.lane.b32.xlu0 %v1865_v3, %s7427_s12 }
0x2ac8   :  { %v1858_v8 = vpop.permute.xlu1 %1857 }
0x2ac9   :  { %v1860_v46 = vmul.f32 %v6922_v25, %v1858_v8 }
0x2b37   :  { %v1841_v55 = vpop.permute.xlu1 %1840 }
0x2b38   :  { %v1843_v27 = vadd.f32 %v1841_v55, %v1833_v28 }
0x2b39   :  { %v1868_v14 = vpop.permute.xlu0 %1867 }
0x2b3a   :  { %6923 = vtanh.f32 %v1843_v27  ;;  %v1870_v38 = vadd.f32 %v1868_v14, %v1860_v46 }
0x2b3c   :  { %6925 = vtanh.f32 %v1870_v38 }
0x2b44   :  { %v6924_v39 = vpop.eup %6923 }
0x2b45   :  { %1846 = vrot.lane.b32.xlu1 %v6924_v39, %s7427_s12 }
0x2b46   :  { %v6926_v57 = vpop.eup %6925 }
0x2b47   :  { %1873 = vrot.lane.b32.xlu0 %v6926_v57, %s7427_s12 }
0x2bb7   :  { %v1847_v41 = vpop.permute.xlu1 %1846 }
0x2bb8   :  { %v7922_v42 = vmul.f32 %v6920_v7, %v1847_v41 }
0x2bb9   :  { %v1874_v15 = vpop.permute.xlu0 %1873 }
0x2bba   :  { %v7917_v40 = vmul.f32 %v6922_v25, %v1874_v15 }
0x2bbc   :  { %1878 = vrot.lane.b32.xlu0 %v7917_v40, %s7428_s13 }
0x2bc0   :  { %1882 = vrot.lane.b32.xlu0 %v1870_v38, %s7428_s13 }
0x2c2e   :  { %v1879_v43 = vpop.permute.xlu0 %1878 }
0x2c2f   :  { %v1893_v44 = vpack.c.bf16 %v1879_v43, %v7922_v42 }
0x2c31   :  { %1895 = vrot.lane.b32.xlu1 %v1893_v44, %s7429_s14 }
0x2c32   :  { %v1883_v62 = vpop.permute.xlu0 %1882 }
0x2ca3   :  { %v1896_v45 = vpop.permute.xlu1 %1895 }
0x2ca4   :  { %6645 = vmatmul.mubr.msk.bf16.vlgmr.msra.gmra.mrb[32].mxu1 %vm159_vm2, %v1896_v45 }
0x2d77   :  { %v1934_v49 = vpop.f32.mrb[32].mxu1 }
0x2d78   :  { %v1941_v18 = vadd.f32 %v1934_v49, %v7789_v23  ;;  %v6646_v50 = vpop.f32.mrb[33].mxu1 }
0x2d79   :  { %v1937_v51 = vpop.f32.mrb[34].mxu1 }
0x2d7a   :  { %6927 = vtanh.f32 %v1941_v18  ;;  %v1942_v52 = vadd.f32 %v1937_v51, %v7786_v17  ;;  %v6647_v54 = vpop.f32.mrb[35].mxu1  ;;  %v6465_v63 = vmul.f32 -1.442695, %v1941_v18 }
0x2d7c   :  { %6929 = vtanh.f32 %v1942_v52  ;;  %v6466_v4 = vmul.f32 -1.442695, %v1942_v52 }
0x2d7d   :  { %6931 = vpow2.f32 %v6465_v63  ;;  %v2122_v63 = vld [vmem:[%s10251_s4 + $0x8] sm:$0xff] }
0x2d7e   :  { %6933 = vpow2.f32 %v6466_v4 }
0x2d84   :  { %v6928_v58 = vpop.eup %6927 }
0x2d85   :  { %1952 = vrot.lane.b32.xlu0 %v6928_v58, %s7426_s11 }
0x2d86   :  { %v6930_v60 = vpop.eup %6929 }
0x2d87   :  { %1979 = vrot.lane.b32.xlu1 %v6930_v60, %s7426_s11  ;;  %v6932_v23 = vpop.eup %6931 }
0x2d88   :  { %v6934_v29 = vpop.eup %6933  ;;  %v1946_v12 = vadd.f32 1.0, %v6932_v23 }
0x2d89   :  { %v1970_v16 = vadd.f32 1.0, %v6934_v29 }
0x2d8a   :  { %6935 = vrcp.f32 %v1946_v12 }
0x2d8b   :  { %1974 = vrot.lane.b32.xlu1 %v1883_v62, %s7428_s13  ;;  %6937 = vrcp.f32 %v1970_v16 }
0x2d94   :  { %v6936_v17 = vpop.eup %6935 }
0x2d95   :  { %v6938_v26 = vpop.eup %6937  ;;  %v1950_v2 = vmul.f32 %v6936_v17, %v1843_v27 }
0x2df7   :  { %v1953_v19 = vpop.permute.xlu0 %1952 }
0x2df8   :  { %v1955_v22 = vmul.f32 %v6936_v17, %v1953_v19 }
0x2df9   :  { %v1980_v48 = vpop.permute.xlu1 %1979 }
0x2dfa   :  { %1957 = vrot.lane.b32.xlu1 %v1955_v22, %s7427_s12  ;;  %v1982_v0 = vmul.f32 %v6938_v26, %v1980_v48 }
0x2dfc   :  { %1984 = vrot.lane.b32.xlu0 %v1982_v0, %s7427_s12 }
0x2dfd   :  { %v1975_v20 = vpop.permute.xlu1 %1974 }
0x2dfe   :  { %v1977_v35 = vmul.f32 %v6938_v26, %v1975_v20 }
0x2e6c   :  { %v1958_v31 = vpop.permute.xlu1 %1957 }
0x2e6d   :  { %v7934_v61 = vadd.f32 %v1958_v31, %v1950_v2  ;;  %v7994_v2 = vld [vmem:[%s10251_s4 + $0x20] sm:$0xff] }
0x2e6e   :  { %v1985_v7 = vpop.permute.xlu0 %1984  ;;  %v7998_v31 = vrot.slane %v7994_v2, %v7515_v11 }
0x2e6f   :  { %10266 = vst [vmem:[#allocation6_spill] sm:$0xff] %v7934_v61  ;;  %6939 = vtanh.f32 %v7934_v61  ;;  %v1987_v37 = vadd.f32 %v1985_v7, %v1977_v35 }
0x2e71   :  { %6941 = vtanh.f32 %v1987_v37 }
0x2e79   :  { %v6940_v21 = vpop.eup %6939 }
0x2e7a   :  { %1963 = vrot.lane.b32.xlu1 %v6940_v21, %s7427_s12 }
0x2e7b   :  { %v6942_v25 = vpop.eup %6941 }
0x2e7c   :  { %1990 = vrot.lane.b32.xlu0 %v6942_v25, %s7427_s12 }
0x2eec   :  { %v1964_v8 = vpop.permute.xlu1 %1963 }
0x2eed   :  { %v7941_v28 = vmul.f32 %v6936_v17, %v1964_v8 }
0x2eee   :  { %v1991_v6 = vpop.permute.xlu0 %1990 }
0x2eef   :  { %v1993_v3 = vmul.f32 %v6938_v26, %v1991_v6  ;;  %10267 = vst [vmem:[#allocation7_spill] sm:$0xff] %v7941_v28  ;;  %v8008_v6 = vsub.s32 2, %v7512_v10 }
0x2ef1   :  { %1995 = vrot.lane.b32.xlu0 %v1993_v3, %s7428_s13 }
0x2ef5   :  { %1999 = vrot.lane.b32.xlu0 %v1987_v37, %s7428_s13 }
0x2f63   :  { %v1996_v55 = vpop.permute.xlu0 %1995 }
0x2f64   :  { %v2010_v27 = vpack.c.bf16 %v1996_v55, %v7941_v28 }
0x2f66   :  { %2012 = vrot.lane.b32.xlu1 %v2010_v27, %s7429_s14  ;;  %v8017_v27 = vsub.s32 3, %v7512_v10 }
0x2f67   :  { %v2000_v46 = vpop.permute.xlu0 %1999 }
0x2f68   :  { %2091 = vrot.lane.b32.xlu0 %v2000_v46, %s7428_s13 }
0x2fd8   :  { %v2013_v14 = vpop.permute.xlu1 %2012 }
0x2fd9   :  { %6651 = vmatmul.mubr.msk.bf16.vlgmr.msra.gmra.mrb[40].mxu0 %vm159_vm2, %v2013_v14  ;;  %v8022_v14 = vsub.s32 4, %v7512_v10 }
0x2fda   :  { %v2092_v52 = vpop.permute.xlu0 %2091 }
0x30ac   :  { %v7947_v38 = vpop.f32.mrb[40].mxu0 }
0x30ad   :  { %10268 = vst [vmem:[#allocation8_spill] sm:$0xff] %v7947_v38  ;;  %v6652_v39 = vpop.f32.mrb[41].mxu0 }
0x30ae   :  { %v2054_v57 = vpop.f32.mrb[42].mxu0 }
0x30af   :  { %v2059_v15 = vadd.f32 %v2054_v57, %v7782_v34  ;;  %v6653_v41 = vpop.f32.mrb[43].mxu0  ;;  %v8027_v57 = vsub.s32 5, %v7512_v10 }
0x30b1   :  { %6943 = vtanh.f32 %v2059_v15  ;;  %v6469_v44 = vmul.f32 -1.442695, %v2059_v15  ;;  %v7431_v15 = vmov 1966171168  }
0x30b2   :  { %v2328_v41 = vunpack.c.l.s4 %v7431_v15 }
0x30b3   :  { %6945 = vpow2.f32 %v6469_v44  ;;  %v8036_v44 = vld [vmem:[%s10251_s4 + $0x28] sm:$0x7] }
0x30bb   :  { %v6944_v43 = vpop.eup %6943 }
0x30bc   :  { %2096 = vrot.lane.b32.xlu1 %v6944_v43, %s7426_s11 }
0x30bd   :  { %v6946_v45 = vpop.eup %6945 }
0x30be   :  { %v2087_v49 = vadd.f32 1.0, %v6946_v45 }
0x30c0   :  { %6947 = vrcp.f32 %v2087_v49  ;;  %v2320_v49 = vrot.slane %v8036_v44, %v7774_v1 }
0x30ca   :  { %v6948_v18 = vpop.eup %6947 }
0x30cb   :  { %v2094_v34 = vmul.f32 %v6948_v18, %v2092_v52 }
0x312e   :  { %v2097_v50 = vpop.permute.xlu1 %2096 }
0x312f   :  { %v2099_v51 = vmul.f32 %v6948_v18, %v2097_v50 }
0x3131   :  { %2101 = vrot.lane.b32.xlu1 %v2099_v51, %s7427_s12 }
0x3135   :  { %1300 = vrot.lane.b32.xlu1 %v7809_v47, %s7429_s14  ;;  %v2121_v47 = vld [vmem:[%s10251_s4] sm:$0xff] }
0x3136   :  { %v6674_v4 = vpack.c.bf16 %v2122_v63, %v2121_v47 }
0x3138   :  { %6675 = vmatprep.subr.bf16.mxu1 %v6674_v4 }
0x3139   :  { %6677 = vmatpush3.bf16.msra.mxu1 %v6674_v4 }
0x31a3   :  { %v2102_v54 = vpop.permute.xlu1 %2101 }
0x31a4   :  { %v2104_v58 = vadd.f32 %v2102_v54, %v2094_v34 }
0x31a6   :  { %6949 = vtanh.f32 %v2104_v58 }
0x31a7   :  { %v1301_v60 = vpop.permute.xlu1 %1300 }
0x31a8   :  { %1303 = vst.msk [vmem:[#allocation2] sm:$0xff] %vm159_vm2, %v1301_v60 }
0x31b0   :  { %v6950_v62 = vpop.eup %6949 }
0x31b1   :  { %2107 = vrot.lane.b32.xlu0 %v6950_v62, %s7427_s12 }
0x31b5   :  { %1417 = vrot.lane.b32.xlu0 %v7832_v36, %s7429_s14  ;;  %v2123_v36 = vld [vmem:[%s10251_s4 + $0x10] sm:$0xff] }
0x31b9   :  { %2006 = vrot.lane.b32.xlu0 %v1993_v3, %s7430_s15 }
0x31bd   :  { %1534 = vrot.lane.b32.xlu0 %v7855_v59, %s7429_s14  ;;  %v2124_v59 = vld [vmem:[%s10251_s4 + $0x18] sm:$0xff] }
0x31c1   :  { %1772 = vrot.lane.b32.xlu0 %v7895_v53, %s7430_s15  ;;  %v6678_v53 = vpack.c.bf16 %v2124_v59, %v2123_v36 }
0x31c3   :  { %6679 = vmatprep.subr.bf16.mxu1 %v6678_v53 }
0x31c4   :  { %6681 = vmatpush3.bf16.msra.mxu1 %v6678_v53 }
0x3223   :  { %v2108_v23 = vpop.permute.xlu0 %2107 }
0x3224   :  { %v2110_v29 = vmul.f32 %v6948_v18, %v2108_v23  ;;  %v2329_v18 = vunpack.c.0.s8 %v2328_v41 }
0x3226   :  { %2117 = vrot.lane.b32.xlu1 %v2110_v29, %s7430_s15  ;;  %v8048_v51 = vsub.s32 %v2329_v18, %v7512_v10 }
0x3227   :  { %v1418_v12 = vpop.permute.xlu0 %1417 }
0x3228   :  { %1420 = vst.msk [vmem:[#allocation2 + $0x8] sm:$0xff] %vm159_vm2, %v1418_v12 }
0x322a   :  { %1651 = vrot.lane.b32.xlu1 %v7878_v13, %s7429_s14 }
0x322b   :  { %v2007_v16 = vpop.permute.xlu0 %2006 }
0x322c   :  { %2009 = vst.msk [vmem:[#allocation2 + $0x8] sm:$0xff] %vm269_vm3, %v2007_v16 }
0x322e   :  { %1889 = vrot.lane.b32.xlu1 %v7917_v40, %s7430_s15 }
0x322f   :  { %v1535_v17 = vpop.permute.xlu0 %1534 }
0x3230   :  { %1537 = vst.msk [vmem:[#allocation2 + $0x10] sm:$0xff] %vm159_vm2, %v1535_v17 }
0x3233   :  { %v1773_v26 = vpop.permute.xlu0 %1772  ;;  %v2128_v0 = vld [vmem:[#allocation2 + $0x8] sm:$0xff] }
0x3298   :  { %v2118_v19 = vpop.permute.xlu1 %2117 }
0x3299   :  { %2120 = vst.msk [vmem:[#allocation2] sm:$0xff] %vm269_vm3, %v2118_v19 }
0x329c   :  { %v1652_v22 = vpop.permute.xlu1 %1651 }
0x329d   :  { %1654 = vst.msk [vmem:[#allocation2 + $0x18] sm:$0xff] %vm159_vm2, %v1652_v22 }
0x329e   :  { %1775 = vst.msk [vmem:[#allocation2 + $0x18] sm:$0xff] %vm269_vm3, %v1773_v26 }
0x32a0   :  { %v1890_v48 = vpop.permute.xlu1 %1889  ;;  %v2127_v13 = vld [vmem:[#allocation2] sm:$0xff] }
0x32a1   :  { %1892 = vst.msk [vmem:[#allocation2 + $0x10] sm:$0xff] %vm269_vm3, %v1890_v48  ;;  %6662 = vmatprep.mubr.msk.f32.mxu1 %vm75_vm1, %v2127_v13 }
0x32a2   :  { %6663 = vmatmul.mubr.msk.f32.vlgmr.msra.gmra.mrb[36].mxu1 %vm75_vm1, %v2128_v0 }
0x32a5   :  { %v2130_v20 = vld [vmem:[#allocation2 + $0x18] sm:$0xff] }
0x32a8   :  { %v2129_v40 = vld [vmem:[#allocation2 + $0x10] sm:$0xff] }
0x32a9   :  { %6665 = vmatprep.mubr.msk.f32.mxu1 %vm75_vm1, %v2129_v40 }
0x32aa   :  { %6666 = vmatmul.mubr.msk.f32.gmra.mrb[38].mxu1 %vm75_vm1, %v2130_v20 }
0x3375   :  { %v6664_v35 = vpop.f32.mrb[36].mxu1 }
0x3376   :  { %v8001_v7 = vadd.f32 %v6664_v35, %v7998_v31  ;;  %v2229_v37 = vpop.f32.mrb[37].mxu1 }
0x3377   :  { %v8040_v45 = vadd.f32 %v2229_v37, %v7998_v31 }
0x3378   :  { %10269 = vst [vmem:[#allocation9_spill] sm:$0xff] %v8001_v7  ;;  %v2630_v21 = vrot.slane %v8001_v7, %v7515_v11  ;;  %v2642_v25 = vrot.slane %v8001_v7, %v7774_v1  ;;  %v2654_v55 = vrot.slane %v8001_v7, %v8008_v6  ;;  %v2666_v46 = vrot.slane %v8001_v7, %v8017_v27 }
0x3379   :  { %v2678_v39 = vrot.slane %v8001_v7, %v8022_v14  ;;  %v8031_v43 = vrot.slane %v8001_v7, %v8027_v57  ;;  %10270 = vst [vmem:[#allocation10_spill] sm:$0xff] %v8040_v45  ;;  %v8045_v50 = vadd.f32 %v2320_v49, %v8040_v45 }
0x337a   :  { %2637 = vbcast.lane.b32.xlu0 %v2630_v21, 263  ;;  %2633 = vbcast.lane.b32.xlu1 %v2630_v21, 511 }
0x337b   :  { %v2333_v52 = vrot.slane %v8045_v50, %v8048_v51  ;;  %v2326_v58 = vcombine.high %v8045_v50, %v8045_v50 }
0x337d   :  { %v8010_v3 = vpop.f32.mrb[38].mxu1  ;;  %v2341_v34 = vcombine.high %v2333_v52, %v2333_v52  ;;  %v2349_v54 = vrot.slane %v2333_v52, %v8048_v51  ;;  %v2340_v47 = vrot.slane %v2326_v58, %v8048_v51 }
0x337e   :  { %2649 = vbcast.lane.b32.xlu0 %v2642_v25, 263  ;;  %2645 = vbcast.lane.b32.xlu1 %v2642_v25, 511  ;;  %v8012_v8 = vpop.f32.mrb[39].mxu1 }
0x337f   :  { %v2378_v60 = vrot.slane %v2349_v54, %v7515_v11  ;;  %v2363_v62 = vrot.slane %v2341_v34, %v8048_v51  ;;  %v2371_v36 = vcombine.high %v2349_v54, %v2349_v54  ;;  %v2356_v29 = vrot.slane %v2340_v47, %v8048_v51 }
0x3380   :  { %v2342_v12 = vcombine.high %v2340_v47, %v2340_v47 }
0x3381   :  { %v8059_v63 = vadd.f32 %v2378_v60, %v8036_v44  ;;  %v2382_v4 = vrot.slane %v2363_v62, %v7515_v11  ;;  %v2386_v23 = vrot.slane %v2371_v36, %v7515_v11  ;;  %v2394_v19 = vrot.slane %v2356_v29, %v7515_v11 }
0x3382   :  { %2661 = vbcast.lane.b32.xlu0 %v2654_v55, 263  ;;  %2657 = vbcast.lane.b32.xlu1 %v2654_v55, 511  ;;  %v2373_v22 = vcombine.high %v2363_v62, %v2363_v62  ;;  %v8076_v26 = vadd.f32 %v2378_v60, %v7994_v2  ;;  %v2370_v40 = vrot.slane %v2342_v12, %v8048_v51 }
0x3383   :  { %v2436_v59 = vsel %vm2435_vm4, %v8059_v63, -inf  ;;  %v8065_v53 = vadd.f32 %v2382_v4, %v7994_v2  ;;  %v8072_v17 = vadd.f32 %v2386_v23, %v7994_v2  ;;  %v8081_v13 = vadd.f32 %v2394_v19, %v7994_v2 }
0x3384   :  { %v2390_v0 = vrot.slane %v2373_v22, %v7515_v11  ;;  %v2432_v20 = vsel %vm2431_vm5, %v8076_v26, -inf  ;;  %v8088_v35 = vadd.f32 %v2382_v4, %v8036_v44  ;;  %v2398_v25 = vrot.slane %v2370_v40, %v7515_v11 }
0x3385   :  { %v2439_v16 = vsel %vm2431_vm5, %v8065_v53, -inf  ;;  %v2445_v48 = vsel %vm2431_vm5, %v8072_v17, -inf  ;;  %v2457_v37 = vsel %vm2431_vm5, %v8081_v13, -inf  ;;  %v2372_v55 = vcombine.high %v2356_v29, %v2356_v29 }
0x3386   :  { %2673 = vbcast.lane.b32.xlu0 %v2666_v46, 263  ;;  %2669 = vbcast.lane.b32.xlu1 %v2666_v46, 511  ;;  %v8093_v21 = vadd.f32 %v2390_v0, %v7994_v2  ;;  %v2442_v46 = vsel %vm2435_vm4, %v8088_v35, -inf  ;;  %v8104_v41 = vadd.f32 %v2398_v25, %v7994_v2  ;;  %v2374_v18 = vcombine.high %v2370_v40, %v2370_v40 }
0x3387   :  { %v2402_v49 = vrot.slane %v2372_v55, %v7515_v11  ;;  %v8110_v34 = vadd.f32 %v2394_v19, %v8036_v44  ;;  %v8121_v47 = vadd.f32 %v2390_v0, %v8036_v44  ;;  %v8148_v0 = vsub.s32 6, %v7512_v10 }
0x3388   :  { %v2451_v15 = vsel %vm2431_vm5, %v8093_v21, -inf  ;;  %v2463_v54 = vsel %vm2431_vm5, %v8104_v41, -inf  ;;  %v2406_v60 = vrot.slane %v2374_v18, %v7515_v11 }
0x3389   :  { %v8115_v58 = vadd.f32 %v2402_v49, %v7994_v2  ;;  %v2460_v62 = vsel %vm2435_vm4, %v8110_v34, -inf  ;;  %v2702_v40 = vrot.slane %v8001_v7, %v8148_v0 }
0x338a   :  { %2685 = vbcast.lane.b32.xlu0 %v2678_v39, 263  ;;  %2681 = vbcast.lane.b32.xlu1 %v2678_v39, 511  ;;  %v8099_v39 = vadd.f32 %v2386_v23, %v8036_v44  ;;  %v8126_v36 = vadd.f32 %v2406_v60, %v7994_v2  ;;  %v8131_v23 = vadd.f32 %v2398_v25, %v8036_v44 }
0x338b   :  { %v2469_v4 = vsel %vm2431_vm5, %v8115_v58, -inf  ;;  %v8143_v22 = vadd.f32 %v2406_v60, %v8036_v44 }
0x338c   :  { %v2448_v52 = vsel %vm2435_vm4, %v8099_v39, -inf  ;;  %v2475_v29 = vsel %vm2431_vm5, %v8126_v36, -inf  ;;  %v2466_v12 = vsel %vm2435_vm4, %v8131_v23, -inf }
0x338e   :  { %2693 = vbcast.lane.b32.xlu1 %v8031_v43, 511 }
0x33a9   :  { %2437 = vmax.xlane.f32.xlu0 %v2436_v59  ;;  %v2454_v59 = vsel %vm2435_vm4, %v8121_v47, -inf }
0x33ad   :  { %2440 = vmax.xlane.f32.xlu0 %v2439_v16  ;;  %v8138_v16 = vadd.f32 %v2402_v49, %v8036_v44 }
0x33af   :  { %v2472_v19 = vsel %vm2435_vm4, %v8138_v16, -inf }
0x33b1   :  { %2446 = vmax.xlane.f32.xlu0 %v2445_v48  ;;  %v2478_v48 = vsel %vm2435_vm4, %v8143_v22, -inf }
0x33b2   :  { %2433 = vmax.xlane.f32.xlu1 %v2432_v20 }
0x33b5   :  { %2458 = vmax.xlane.f32.xlu0 %v2457_v37 }
0x33b6   :  { %2443 = vmax.xlane.f32.xlu1 %v2442_v46 }
0x33b9   :  { %2452 = vmax.xlane.f32.xlu0 %v2451_v15 }
0x33ba   :  { %2449 = vmax.xlane.f32.xlu1 %v2448_v52 }
0x33bd   :  { %2464 = vmax.xlane.f32.xlu0 %v2463_v54 }
0x33be   :  { %2461 = vmax.xlane.f32.xlu1 %v2460_v62 }
0x33c1   :  { %2470 = vmax.xlane.f32.xlu0 %v2469_v4 }
0x33c2   :  { %2455 = vmax.xlane.f32.xlu1 %v2454_v59 }
0x33c5   :  { %2476 = vmax.xlane.f32.xlu0 %v2475_v29 }
0x33c6   :  { %2467 = vmax.xlane.f32.xlu1 %v2466_v12 }
0x33ca   :  { %2473 = vmax.xlane.f32.xlu1 %v2472_v19 }
0x33ce   :  { %2479 = vmax.xlane.f32.xlu1 %v2478_v48 }
0x33db   :  { %2697 = vbcast.lane.b32.xlu0 %v8031_v43, 263 }
0x33df   :  { %2705 = vbcast.lane.b32.xlu1 %v2702_v40, 511  ;;  %2709 = vbcast.lane.b32.xlu0 %v2702_v40, 263 }
0x33ec   :  { %v8153_v20 = vpop.permute.xlu0 %2637  ;;  %v8155_v37 = vpop.permute.xlu1 %2633 }
0x33f0   :  { %v8157_v25 = vpop.permute.xlu0 %2649  ;;  %v8159_v55 = vpop.permute.xlu1 %2645 }
0x33f4   :  { %v8161_v46 = vpop.permute.xlu0 %2661  ;;  %v8163_v15 = vpop.permute.xlu1 %2657 }
0x33f8   :  { %v8165_v49 = vpop.permute.xlu0 %2673  ;;  %v8167_v43 = vpop.permute.xlu1 %2669 }
0x33fc   :  { %v8169_v18 = vpop.permute.xlu0 %2685  ;;  %v8171_v52 = vpop.permute.xlu1 %2681 }
0x3400   :  { %v8179_v59 = vpop.permute.xlu1 %2693 }
0x3436   :  { %v8173_v54 = vpop.xlane.xlu0 %2437 }
0x3437   :  { %v2482_v60 = vsub.f32 %v8059_v63, %v8173_v54 }
0x3439   :  { %v2499_v62 = vmul.f32 1.442695, %v2482_v60 }
0x343a   :  { %v8177_v4 = vpop.xlane.xlu0 %2440 }
0x343b   :  { %6951 = vpow2.f32 %v2499_v62  ;;  %v2483_v29 = vsub.f32 %v8065_v53, %v8177_v4 }
0x343d   :  { %v2501_v40 = vmul.f32 1.442695, %v2483_v29 }
0x343e   :  { %v8183_v12 = vpop.xlane.xlu0 %2446 }
0x343f   :  { %v8185_v19 = vpop.xlane.xlu1 %2433  ;;  %v2485_v63 = vsub.f32 %v8072_v17, %v8183_v12 }
0x3440   :  { %v2481_v48 = vsub.f32 %v8076_v26, %v8185_v19 }
0x3441   :  { %v2505_v33 = vmul.f32 1.442695, %v2485_v63 }
0x3442   :  { %v2497_v60 = vmul.f32 1.442695, %v2481_v48  ;;  %v8191_v9 = vpop.xlane.xlu0 %2458 }
0x3443   :  { %v8193_v45 = vpop.xlane.xlu1 %2443  ;;  %v2489_v28 = vsub.f32 %v8081_v13, %v8191_v9 }
0x3444   :  { %6953 = vpow2.f32 %v2497_v60  ;;  %v2484_v53 = vsub.f32 %v8088_v35, %v8193_v45 }
0x3445   :  { %v6952_v62 = vpop.eup %6951  ;;  %6955 = vpow2.f32 %v2501_v40  ;;  %v2513_v35 = vmul.f32 1.442695, %v2489_v28 }
0x3446   :  { %v2503_v26 = vmul.f32 1.442695, %v2484_v53  ;;  %v8199_v29 = vpop.xlane.xlu0 %2452  ;;  %v2532_v17 = vsel %vm2435_vm4, %v6952_v62, 0.0 }
0x3447   :  { %v8202_v48 = vpop.xlane.xlu1 %2449  ;;  %2533 = vadd.xlane.f32.xlu1 %v2532_v17  ;;  %v2487_v40 = vsub.f32 %v8093_v21, %v8199_v29 }
0x3448   :  { %6957 = vpow2.f32 %v2503_v26  ;;  %v2486_v60 = vsub.f32 %v8099_v39, %v8202_v48 }
0x3449   :  { %6959 = vpow2.f32 %v2505_v33  ;;  %v2509_v26 = vmul.f32 1.442695, %v2487_v40 }
0x344a   :  { %v2507_v63 = vmul.f32 1.442695, %v2486_v60  ;;  %v8208_v24 = vpop.xlane.xlu0 %2464 }
0x344b   :  { %v8210_v13 = vpop.xlane.xlu1 %2461  ;;  %v2491_v39 = vsub.f32 %v8104_v41, %v8208_v24 }
0x344c   :  { %6961 = vpow2.f32 %v2507_v63  ;;  %v2490_v53 = vsub.f32 %v8110_v34, %v8210_v13 }
0x344d   :  { %6963 = vpow2.f32 %v2513_v35  ;;  %v2517_v35 = vmul.f32 1.442695, %v2491_v39 }
0x344e   :  { %v6954_v62 = vpop.eup %6953  ;;  %v2515_v33 = vmul.f32 1.442695, %v2490_v53  ;;  %v8216_v28 = vpop.xlane.xlu0 %2470 }
0x344f   :  { %v6956_v17 = vpop.eup %6955  ;;  %v8218_v21 = vpop.xlane.xlu1 %2455  ;;  %v2529_v60 = vsel %vm2431_vm5, %v6954_v62, 0.0  ;;  %v2493_v40 = vsub.f32 %v8115_v58, %v8216_v28 }
0x3450   :  { %6965 = vpow2.f32 %v2515_v33  ;;  %v2488_v63 = vsub.f32 %v8121_v47, %v8218_v21  ;;  %2530 = vadd.xlane.f32.xlu0 %v2529_v60  ;;  %v2535_v62 = vsel %vm2431_vm5, %v6956_v17, 0.0 }
0x3451   :  { %6967 = vpow2.f32 %v2509_v26  ;;  %v2521_v39 = vmul.f32 1.442695, %v2493_v40 }
0x3452   :  { %v6958_v34 = vpop.eup %6957  ;;  %v2511_v41 = vmul.f32 1.442695, %v2488_v63  ;;  %v8225_v53 = vpop.xlane.xlu0 %2476 }
0x3453   :  { %v8227_v61 = vpop.xlane.xlu1 %2467  ;;  %v2538_v38 = vsel %vm2435_vm4, %v6958_v34, 0.0  ;;  %v6960_v33 = vpop.eup %6959  ;;  %v2495_v58 = vsub.f32 %v8126_v36, %v8225_v53 }
0x3454   :  { %6969 = vpow2.f32 %v2511_v41  ;;  %v2492_v47 = vsub.f32 %v8131_v23, %v8227_v61  ;;  %2539 = vadd.xlane.f32.xlu1 %v2538_v38  ;;  %2536 = vadd.xlane.f32.xlu0 %v2535_v62  ;;  %v2541_v17 = vsel %vm2431_vm5, %v6960_v33, 0.0 }
0x3455   :  { %6971 = vpow2.f32 %v2517_v35  ;;  %v2525_v35 = vmul.f32 1.442695, %v2495_v58 }
0x3456   :  { %v6962_v26 = vpop.eup %6961  ;;  %v2519_v60 = vmul.f32 1.442695, %v2492_v47 }
0x3457   :  { %v8235_v63 = vpop.xlane.xlu1 %2473  ;;  %v2544_v34 = vsel %vm2435_vm4, %v6962_v26, 0.0  ;;  %v6964_v30 = vpop.eup %6963 }
0x3458   :  { %6973 = vpow2.f32 %v2519_v60  ;;  %v2494_v23 = vsub.f32 %v8138_v16, %v8235_v63  ;;  %2545 = vadd.xlane.f32.xlu1 %v2544_v34  ;;  %2542 = vadd.xlane.f32.xlu0 %v2541_v17  ;;  %v2553_v62 = vsel %vm2431_vm5, %v6964_v30, 0.0 }
0x3459   :  { %6975 = vpow2.f32 %v2521_v39 }
0x345a   :  { %v6966_v38 = vpop.eup %6965  ;;  %v2523_v40 = vmul.f32 1.442695, %v2494_v23 }
0x345b   :  { %v8241_v41 = vpop.xlane.xlu1 %2479  ;;  %v2556_v36 = vsel %vm2435_vm4, %v6966_v38, 0.0  ;;  %v6968_v47 = vpop.eup %6967 }
0x345c   :  { %6977 = vpow2.f32 %v2523_v40  ;;  %v2496_v33 = vsub.f32 %v8143_v22, %v8241_v41  ;;  %2557 = vadd.xlane.f32.xlu1 %v2556_v36  ;;  %2554 = vadd.xlane.f32.xlu0 %v2553_v62  ;;  %v2547_v58 = vsel %vm2431_vm5, %v6968_v47, 0.0 }
0x345d   :  { %6979 = vpow2.f32 %v2525_v35 }
0x345e   :  { %v6970_v16 = vpop.eup %6969  ;;  %v2527_v26 = vmul.f32 1.442695, %v2496_v33  ;;  %v8256_v33 = vsub.s32 7, %v7512_v10 }
0x345f   :  { %v2550_v39 = vsel %vm2435_vm4, %v6970_v16, 0.0  ;;  %v6972_v60 = vpop.eup %6971 }
0x3460   :  { %6981 = vpow2.f32 %v2527_v26  ;;  %2551 = vadd.xlane.f32.xlu1 %v2550_v39  ;;  %2548 = vadd.xlane.f32.xlu0 %v2547_v58  ;;  %v2559_v17 = vsel %vm2431_vm5, %v6972_v60, 0.0  ;;  %v2714_v16 = vrot.slane %v8001_v7, %v8256_v33  ;;  %v8260_v26 = vpop.permute.xlu1 %2705  ;;  %v8262_v39 = vpop.permute.xlu0 %2697 }
0x3462   :  { %v6974_v34 = vpop.eup %6973 }
0x3463   :  { %v2562_v30 = vsel %vm2435_vm4, %v6974_v34, 0.0  ;;  %v6976_v23 = vpop.eup %6975 }
0x3464   :  { %2563 = vadd.xlane.f32.xlu1 %v2562_v30  ;;  %2560 = vadd.xlane.f32.xlu0 %v2559_v17  ;;  %v2565_v35 = vsel %vm2431_vm5, %v6976_v23, 0.0  ;;  %v8264_v60 = vpop.permute.xlu0 %2709 }
0x3466   :  { %v6978_v22 = vpop.eup %6977 }
0x3467   :  { %v2568_v38 = vsel %vm2435_vm4, %v6978_v22, 0.0  ;;  %v6980_v40 = vpop.eup %6979 }
0x3468   :  { %2569 = vadd.xlane.f32.xlu1 %v2568_v38  ;;  %2566 = vadd.xlane.f32.xlu0 %v2565_v35  ;;  %v2571_v47 = vsel %vm2431_vm5, %v6980_v40, 0.0 }
0x346a   :  { %v6982_v36 = vpop.eup %6981 }
0x346b   :  { %v2574_v62 = vsel %vm2435_vm4, %v6982_v36, 0.0 }
0x346c   :  { %2575 = vadd.xlane.f32.xlu1 %v2574_v62  ;;  %2572 = vadd.xlane.f32.xlu0 %v2571_v47 }
0x347d   :  { %2717 = vbcast.lane.b32.xlu1 %v2714_v16, 511 }
0x3482   :  { %2721 = vbcast.lane.b32.xlu0 %v2714_v16, 263 }
0x34d4   :  { %v2534_v58 = vpop.xlane.xlu1 %2533 }
0x34d5   :  { %6983 = vlog2.f32 %v2534_v58 }
0x34dd   :  { %v2531_v34 = vpop.xlane.xlu0 %2530 }
0x34de   :  { %6985 = vlog2.f32 %v2531_v34 }
0x34df   :  { %v6984_v30 = vpop.eup %6983 }
0x34e0   :  { %v2580_v17 = vmul.f32 0.6931472, %v6984_v30 }
0x34e1   :  { %v2540_v23 = vpop.xlane.xlu1 %2539  ;;  %v2537_v22 = vpop.xlane.xlu0 %2536 }
0x34e2   :  { %v2610_v38 = vadd.f32 %v2580_v17, %v8173_v54  ;;  %6987 = vlog2.f32 %v2540_v23 }
0x34e3   :  { %6989 = vlog2.f32 %v2537_v22 }
0x34e4   :  { %v2740_v35 = vadd.f32 %v8153_v20, %v2610_v38 }
0x34e5   :  { %v2546_v40 = vpop.xlane.xlu1 %2545  ;;  %v2543_v36 = vpop.xlane.xlu0 %2542 }
0x34e6   :  { %6991 = vlog2.f32 %v2546_v40  ;;  %2777 = vperm.xlu0 %6692, %v2740_v35  }
0x34e7   :  { %6993 = vlog2.f32 %v2543_v36 }
0x34e8   :  { %v6986_v62 = vpop.eup %6985 }
0x34e9   :  { %v2578_v47 = vmul.f32 0.6931472, %v6986_v62  ;;  %v2555_v16 = vpop.xlane.xlu0 %2554  ;;  %v2558_v58 = vpop.xlane.xlu1 %2557 }
0x34ea   :  { %6995 = vlog2.f32 %v2555_v16 }
0x34eb   :  { %v2609_v34 = vadd.f32 %v2578_v47, %v8185_v19  ;;  %6997 = vlog2.f32 %v2558_v58 }
0x34ec   :  { %v6988_v30 = vpop.eup %6987 }
0x34ed   :  { %v6990_v7 = vpop.eup %6989  ;;  %v2739_v54 = vadd.f32 %v8155_v37, %v2609_v34  ;;  %v2584_v17 = vmul.f32 0.6931472, %v6988_v30  ;;  %v2549_v20 = vpop.xlane.xlu0 %2548 }
0x34ee   :  { %v2582_v23 = vmul.f32 0.6931472, %v6990_v7  ;;  %6999 = vlog2.f32 %v2549_v20  ;;  %v2552_v19 = vpop.xlane.xlu1 %2551 }
0x34ef   :  { %2774 = vperm.xlu1 %6691, %v2739_v54   ;;  %v2612_v40 = vadd.f32 %v2584_v17, %v8193_v45  ;;  %7001 = vlog2.f32 %v2552_v19 }
0x34f0   :  { %v6992_v22 = vpop.eup %6991  ;;  %v2611_v38 = vadd.f32 %v2582_v23, %v8177_v4 }
0x34f1   :  { %v6994_v35 = vpop.eup %6993  ;;  %v2588_v36 = vmul.f32 0.6931472, %v6992_v22  ;;  %v2561_v34 = vpop.xlane.xlu0 %2560  ;;  %v2742_v4 = vadd.f32 %v8157_v25, %v2612_v40 }
0x34f2   :  { %v2586_v62 = vmul.f32 0.6931472, %v6994_v35  ;;  %v2741_v47 = vadd.f32 %v8159_v55, %v2611_v38  ;;  %7003 = vlog2.f32 %v2561_v34  ;;  %v2564_v17 = vpop.xlane.xlu1 %2563 }
0x34f3   :  { %v2614_v7 = vadd.f32 %v2588_v36, %v8202_v48  ;;  %7005 = vlog2.f32 %v2564_v17  ;;  %v8301_v17 = vadd.f32 %v8012_v8, %v7998_v31 }
0x34f4   :  { %v2613_v16 = vadd.f32 %v2586_v62, %v8183_v12  ;;  %2780 = vperm.xlu1 %6691, %v2741_v47   ;;  %v6996_v37 = vpop.eup %6995 }
0x34f5   :  { %v2594_v58 = vmul.f32 0.6931472, %v6996_v37  ;;  %v6998_v54 = vpop.eup %6997  ;;  %v2744_v12 = vadd.f32 %v8161_v46, %v2614_v7  ;;  %v2567_v22 = vpop.xlane.xlu0 %2566  ;;  %v3244_v8 = vrot.slane %v8301_v17, %v8008_v6 }
0x34f6   :  { %v2743_v30 = vadd.f32 %v8163_v15, %v2613_v16  ;;  %v2596_v45 = vmul.f32 0.6931472, %v6998_v54  ;;  %v2570_v38 = vpop.xlane.xlu1 %2569  ;;  %7007 = vlog2.f32 %v2567_v22  ;;  %v3256_v22 = vrot.slane %v8301_v17, %v8017_v27 }
0x34f7   :  { %v2617_v55 = vadd.f32 %v2594_v58, %v8191_v9  ;;  %7009 = vlog2.f32 %v2570_v38 }
0x34f8   :  { %2783 = vperm.xlu1 %6691, %v2742_v4   ;;  %2786 = vperm.xlu0 %6692, %v2743_v30   ;;  %v7000_v23 = vpop.eup %6999  ;;  %v2618_v48 = vadd.f32 %v2596_v45, %v8210_v13 }
0x34f9   :  { %v2590_v20 = vmul.f32 0.6931472, %v7000_v23  ;;  %v2747_v25 = vadd.f32 %v8171_v52, %v2617_v55  ;;  %v7002_v15 = vpop.eup %7001  ;;  %v2573_v54 = vpop.xlane.xlu0 %2572 }
0x34fa   :  { %v2592_v35 = vmul.f32 0.6931472, %v7002_v15  ;;  %v2748_v9 = vadd.f32 %v8169_v18, %v2618_v48  ;;  %v2576_v13 = vpop.xlane.xlu1 %2575 }
0x34fb   :  { %v2615_v40 = vadd.f32 %v2590_v20, %v8199_v29  ;;  %7011 = vlog2.f32 %v2576_v13  ;;  %v10271_v13 = vlaneseq }
0x34fc   :  { %2789 = vperm.xlu1 %6691, %v2744_v12   ;;  %v7004_v36 = vpop.eup %7003  ;;  %v2616_v46 = vadd.f32 %v2592_v35, %v8218_v21  ;;  %7013 = vlog2.f32 %v2573_v54 }
0x34fd   :  { %v2598_v62 = vmul.f32 0.6931472, %v7004_v36  ;;  %v2745_v19 = vadd.f32 %v8167_v43, %v2615_v40  ;;  %v7006_v47 = vpop.eup %7005  ;;  %v2722_v55 = vpop.permute.xlu0 %2721 }
0x34fe   :  { %v2600_v52 = vmul.f32 0.6931472, %v7006_v47  ;;  %v2746_v37 = vadd.f32 %v8165_v49, %v2616_v46 }
0x34ff   :  { %v2619_v16 = vadd.f32 %v2598_v62, %v8208_v24  ;;  %v2269_v24 = vld [vmem:[%s10252_s5 + $0x8] sm:$0xff] }
0x3500   :  { %2798 = vperm.xlu1 %6691, %v2747_v25   ;;  %v7008_v29 = vpop.eup %7007  ;;  %v2620_v18 = vadd.f32 %v2600_v52, %v8227_v61  ;;  %v2322_v61 = vsel %vm2277_vm6, %v2269_v24, 0.0  ;;  %v8314_v25 = vrot.slane %v8301_v17, %v8022_v14 }
0x3501   :  { %v2602_v7 = vmul.f32 0.6931472, %v7008_v29  ;;  %v2749_v58 = vadd.f32 %v8179_v59, %v2619_v16  ;;  %v7010_v21 = vpop.eup %7009 }
0x3502   :  { %v2604_v34 = vmul.f32 0.6931472, %v7010_v21  ;;  %v2750_v4 = vadd.f32 %v8262_v39, %v2620_v18 }
0x3503   :  { %v2621_v43 = vadd.f32 %v2602_v7, %v8216_v28 }
0x3504   :  { %2801 = vperm.xlu1 %6691, %v2748_v9   ;;  %v2622_v49 = vadd.f32 %v2604_v34, %v8235_v63  ;;  %v3220_v63 = vrot.slane %v8301_v17, %v7515_v11 }
0x3505   :  { %v7012_v30 = vpop.eup %7011  ;;  %v2751_v45 = vadd.f32 %v8260_v26, %v2621_v43  ;;  %v3232_v26 = vrot.slane %v8301_v17, %v7774_v1 }
0x3506   :  { %v2608_v59 = vmul.f32 0.6931472, %v7012_v30  ;;  %v2752_v39 = vadd.f32 %v8264_v60, %v2622_v49  ;;  %v7014_v23 = vpop.eup %7013  ;;  %v2718_v60 = vpop.permute.xlu1 %2717 }
0x3507   :  { %v2606_v48 = vmul.f32 0.6931472, %v7014_v23 }
0x3508   :  { %2792 = vperm.xlu1 %6691, %v2745_v19   ;;  %v2624_v28 = vadd.f32 %v2608_v59, %v8241_v41  ;;  %v2822_v19 = vand.u32 127, %v10271_v13 }
0x3509   :  { %v2623_v41 = vadd.f32 %v2606_v48, %v8225_v53 }
0x350a   :  { %v2754_v12 = vadd.f32 %v2722_v55, %v2624_v28  ;;  %v2828_v52 = vadd.s32 4294967289, %v2822_v19  ;;  %v2823_v16 = vadd.s32 1, %v2822_v19 }
0x350b   :  { %v2753_v20 = vadd.f32 %v2718_v60, %v2623_v41 }
0x350c   :  { %2795 = vperm.xlu1 %6691, %v2746_v37   ;;  %v8319_v18 = vsub.s32 %v2828_v52, %v7512_v10  ;;  %v8322_v7 = vsub.s32 %v2823_v16, %v7512_v10 }
0x3510   :  { %2804 = vperm.xlu1 %6691, %v2749_v58  }
0x3514   :  { %2807 = vperm.xlu1 %6691, %v2750_v4  }
0x3517   :  { %2323 = vadd.xlane.f32.xlu0 %v2322_v61 }
0x3518   :  { %2810 = vperm.xlu1 %6691, %v2751_v45  }
0x351c   :  { %2813 = vperm.xlu1 %6691, %v2752_v39  }
0x3520   :  { %2819 = vperm.xlu1 %6691, %v2754_v12  }
0x3524   :  { %3223 = vbcast.lane.b32.xlu1 %v3220_v63, 511 }
0x3528   :  { %3235 = vbcast.lane.b32.xlu1 %v3232_v26, 511 }
0x352c   :  { %3239 = vbcast.lane.b32.xlu1 %v3232_v26, 263 }
0x352d   :  { %2816 = vperm.xlu0 %6692, %v2753_v20  }
0x3530   :  { %3247 = vbcast.lane.b32.xlu1 %v3244_v8, 511 }
0x3531   :  { %3227 = vbcast.lane.b32.xlu0 %v3220_v63, 263 }
0x3534   :  { %3259 = vbcast.lane.b32.xlu1 %v3256_v22, 511 }
0x3535   :  { %3251 = vbcast.lane.b32.xlu0 %v3244_v8, 263 }
0x3538   :  { %3271 = vbcast.lane.b32.xlu1 %v8314_v25, 511 }
0x3539   :  { %3263 = vbcast.lane.b32.xlu0 %v3256_v22, 263 }
0x3565   :  { %v2778_v37 = vpop.permute.xlu0 %2777 }
0x3566   :  { %v2832_v61 = vrot.slane %v2778_v37, %v8319_v18 }
0x356e   :  { %v2775_v53 = vpop.permute.xlu1 %2774 }
0x356f   :  { %v2827_v43 = vrot.slane %v2775_v53, %v8322_v7 }
0x3571   :  { %v2834_v45 = vsel %vm2833_vm7, %v2832_v61, %v2827_v43 }
0x3573   :  { %v2781_v15 = vpop.permute.xlu1 %2780 }
0x3574   :  { %v2838_v4 = vrot.slane %v2781_v15, %v8322_v7 }
0x3577   :  { %v2784_v38 = vpop.permute.xlu1 %2783  ;;  %v2787_v21 = vpop.permute.xlu0 %2786 }
0x3578   :  { %v2842_v58 = vrot.slane %v2784_v38, %v8319_v18  ;;  %v2847_v54 = vrot.slane %v2787_v21, %v8322_v7 }
0x357a   :  { %v2843_v10 = vsel %vm2833_vm7, %v2842_v58, %v2838_v4 }
0x357b   :  { %v2790_v35 = vpop.permute.xlu1 %2789  ;;  %v2899_v55 = vsel %vm2898_vm8, %v2843_v10, %v2834_v45 }
0x357c   :  { %v2851_v34 = vrot.slane %v2790_v35, %v8319_v18 }
0x357e   :  { %v2852_v59 = vsel %vm2833_vm7, %v2851_v34, %v2847_v54 }
0x357f   :  { %v2799_v40 = vpop.permute.xlu1 %2798  ;;  %v2901_v48 = vsel %vm2900_vm9, %v2852_v59, %v2899_v55 }
0x3580   :  { %v2865_v41 = vrot.slane %v2799_v40, %v8322_v7 }
0x3583   :  { %v2802_v9 = vpop.permute.xlu1 %2801 }
0x3584   :  { %v2869_v12 = vrot.slane %v2802_v9, %v8319_v18 }
0x3586   :  { %v2870_v53 = vsel %vm2833_vm7, %v2869_v12, %v2865_v41 }
0x3587   :  { %v2793_v36 = vpop.permute.xlu1 %2792 }
0x3588   :  { %v2856_v49 = vrot.slane %v2793_v36, %v8322_v7 }
0x358b   :  { %v2796_v46 = vpop.permute.xlu1 %2795 }
0x358c   :  { %v2860_v30 = vrot.slane %v2796_v46, %v8319_v18 }
0x358e   :  { %v2861_v28 = vsel %vm2833_vm7, %v2860_v30, %v2856_v49 }
0x358f   :  { %v2805_v62 = vpop.permute.xlu1 %2804  ;;  %v2903_v60 = vsel %vm2902_vm10, %v2861_v28, %v2901_v48 }
0x3590   :  { %v2874_v26 = vrot.slane %v2805_v62, %v8322_v7  ;;  %v2905_v35 = vsel %vm2904_vm11, %v2870_v53, %v2903_v60 }
0x3593   :  { %v2808_v47 = vpop.permute.xlu1 %2807 }
0x3594   :  { %v2878_v39 = vrot.slane %v2808_v47, %v8319_v18 }
0x3596   :  { %v2879_v22 = vsel %vm2833_vm7, %v2878_v39, %v2874_v26 }
0x3597   :  { %v2811_v29 = vpop.permute.xlu1 %2810  ;;  %v2907_v36 = vsel %vm2906_vm12, %v2879_v22, %v2905_v35 }
0x3598   :  { %v2883_v20 = vrot.slane %v2811_v29, %v8322_v7 }
0x359b   :  { %v2814_v24 = vpop.permute.xlu1 %2813 }
0x359c   :  { %v2887_v23 = vrot.slane %v2814_v24, %v8319_v18 }
0x359e   :  { %v2888_v15 = vsel %vm2833_vm7, %v2887_v23, %v2883_v20 }
0x359f   :  { %v2820_v8 = vpop.permute.xlu1 %2819  ;;  %v2909_v46 = vsel %vm2908_vm13, %v2888_v15, %v2907_v36 }
0x35a0   :  { %v2896_v9 = vrot.slane %v2820_v8, %v8319_v18 }
0x35a4   :  { %v2324_v63 = vpop.xlane.xlu0 %2323 }
0x35a5   :  { %vm2625_vm15 = vcmp.gt.f32.partialorder %v2324_v63, 0.5 }
0x35ac   :  { %v2817_v38 = vpop.permute.xlu0 %2816 }
0x35ad   :  { %v2892_v40 = vrot.slane %v2817_v38, %v8322_v7 }
0x35af   :  { %v2897_v62 = vsel %vm2833_vm7, %v2896_v9, %v2892_v40 }
0x35b0   :  { %v2911_v13 = vsel %vm2910_vm14, %v2897_v62, %v2909_v46 }
0x35b1   :  { %v8356_v19 = vsel %vm2625_vm15, %v2911_v13, %v8045_v50 }
0x35b2   :  { %v2925_v47 = vrot.slane %v8356_v19, %v8048_v51  ;;  %v2918_v52 = vcombine.high %v8356_v19, %v8356_v19 }
0x35b4   :  { %v2941_v16 = vrot.slane %v2925_v47, %v8048_v51  ;;  %v2933_v37 = vcombine.high %v2925_v47, %v2925_v47  ;;  %v2932_v29 = vrot.slane %v2918_v52, %v8048_v51 }
0x35b6   :  { %v2970_v58 = vrot.slane %v2941_v16, %v7515_v11  ;;  %v2963_v21 = vcombine.high %v2941_v16, %v2941_v16  ;;  %v2955_v34 = vrot.slane %v2933_v37, %v8048_v51  ;;  %v2948_v43 = vrot.slane %v2932_v29, %v8048_v51 }
0x35b7   :  { %v2934_v10 = vcombine.high %v2932_v29, %v2932_v29 }
0x35b8   :  { %v8368_v50 = vadd.f32 %v2970_v58, %v8036_v44  ;;  %v8371_v4 = vadd.f32 %v2970_v58, %v7994_v2  ;;  %v2978_v30 = vrot.slane %v2963_v21, %v7515_v11  ;;  %v2974_v54 = vrot.slane %v2955_v34, %v7515_v11 }
0x35b9   :  { %v2986_v24 = vrot.slane %v2948_v43, %v7515_v11  ;;  %v2965_v61 = vcombine.high %v2955_v34, %v2955_v34  ;;  %v2962_v55 = vrot.slane %v2934_v10, %v8048_v51  ;;  %v2964_v41 = vcombine.high %v2948_v43, %v2948_v43 }
0x35ba   :  { %v3026_v49 = vsel %vm2435_vm4, %v8368_v50, -inf  ;;  %v3023_v59 = vsel %vm2431_vm5, %v8371_v4, -inf  ;;  %v8381_v45 = vadd.f32 %v2978_v30, %v8036_v44  ;;  %v8384_v28 = vadd.f32 %v2974_v54, %v7994_v2 }
0x35bb   :  { %3027 = vmax.xlane.f32.xlu0 %v3026_v49  ;;  %3024 = vmax.xlane.f32.xlu1 %v3023_v59  ;;  %v8387_v39 = vadd.f32 %v2974_v54, %v8036_v44  ;;  %v8395_v63 = vadd.f32 %v2986_v24, %v8036_v44  ;;  %v2982_v48 = vrot.slane %v2965_v61, %v7515_v11  ;;  %v8460_v61 = vpop.permute.xlu1 %3223  ;;  %v8468_v59 = vpop.permute.xlu0 %3227 }
0x35bc   :  { %v3038_v12 = vsel %vm2435_vm4, %v8381_v45, -inf  ;;  %v3029_v23 = vsel %vm2431_vm5, %v8384_v28, -inf  ;;  %v8399_v26 = vadd.f32 %v2978_v30, %v7994_v2  ;;  %v2990_v22 = vrot.slane %v2962_v55, %v7515_v11 }
0x35bd   :  { %v3032_v60 = vsel %vm2435_vm4, %v8387_v39, -inf  ;;  %v3050_v20 = vsel %vm2435_vm4, %v8395_v63, -inf  ;;  %v8406_v8 = vadd.f32 %v2982_v48, %v8036_v44  ;;  %v8412_v15 = vadd.f32 %v2986_v24, %v7994_v2 }
0x35be   :  { %v3035_v53 = vsel %vm2431_vm5, %v8399_v26, -inf  ;;  %v8417_v35 = vadd.f32 %v2990_v22, %v8036_v44  ;;  %v2994_v9 = vrot.slane %v2964_v41, %v7515_v11  ;;  %v2966_v40 = vcombine.high %v2962_v55, %v2962_v55 }
0x35bf   :  { %3039 = vmax.xlane.f32.xlu0 %v3038_v12  ;;  %3030 = vmax.xlane.f32.xlu1 %v3029_v23  ;;  %v3044_v38 = vsel %vm2435_vm4, %v8406_v8, -inf  ;;  %v3047_v36 = vsel %vm2431_vm5, %v8412_v15, -inf  ;;  %v8425_v62 = vadd.f32 %v2982_v48, %v7994_v2  ;;  %v8436_v37 = vadd.f32 %v2990_v22, %v7994_v2  ;;  %v8472_v55 = vpop.permute.xlu0 %3251 }
0x35c0   :  { %v3056_v46 = vsel %vm2435_vm4, %v8417_v35, -inf  ;;  %v8428_v13 = vadd.f32 %v2994_v9, %v8036_v44  ;;  %v2998_v47 = vrot.slane %v2966_v40, %v7515_v11  ;;  %v8446_v34 = vadd.f32 %v2994_v9, %v7994_v2 }
0x35c1   :  { %v3041_v52 = vsel %vm2431_vm5, %v8425_v62, -inf  ;;  %v3053_v58 = vsel %vm2431_vm5, %v8436_v37, -inf  ;;  %v3280_v54 = vrot.slane %v8301_v17, %v8027_v57  ;;  %v3292_v24 = vrot.slane %v8301_v17, %v8148_v0 }
0x35c2   :  { %v3062_v16 = vsel %vm2435_vm4, %v8428_v13, -inf  ;;  %v8439_v29 = vadd.f32 %v2998_v47, %v8036_v44  ;;  %v3059_v43 = vsel %vm2431_vm5, %v8446_v34, -inf  ;;  %v8451_v30 = vadd.f32 %v2998_v47, %v7994_v2  ;;  %v8462_v2 = vpop.permute.xlu1 %3235 }
0x35c3   :  { %3033 = vmax.xlane.f32.xlu1 %v3032_v60  ;;  %3051 = vmax.xlane.f32.xlu0 %v3050_v20  ;;  %v8476_v23 = vpop.permute.xlu0 %3263 }
0x35c4   :  { %v3068_v21 = vsel %vm2435_vm4, %v8439_v29, -inf  ;;  %v3065_v44 = vsel %vm2431_vm5, %v8451_v30, -inf }
0x35c6   :  { %v8464_v10 = vpop.permute.xlu1 %3239 }
0x35c7   :  { %3036 = vmax.xlane.f32.xlu1 %v3035_v53  ;;  %3045 = vmax.xlane.f32.xlu0 %v3044_v38 }
0x35ca   :  { %v8466_v49 = vpop.permute.xlu1 %3247 }
0x35cb   :  { %3048 = vmax.xlane.f32.xlu1 %v3047_v36  ;;  %3057 = vmax.xlane.f32.xlu0 %v3056_v46 }
0x35cf   :  { %3042 = vmax.xlane.f32.xlu1 %v3041_v52  ;;  %3063 = vmax.xlane.f32.xlu0 %v3062_v16 }
0x35d3   :  { %3054 = vmax.xlane.f32.xlu1 %v3053_v58  ;;  %3069 = vmax.xlane.f32.xlu0 %v3068_v21 }
0x35d7   :  { %3060 = vmax.xlane.f32.xlu1 %v3059_v43 }
0x35db   :  { %3066 = vmax.xlane.f32.xlu1 %v3065_v44 }
0x35e9   :  { %3275 = vbcast.lane.b32.xlu0 %v8314_v25, 263  ;;  %v8470_v25 = vpop.permute.xlu1 %3259 }
0x35ec   :  { %3283 = vbcast.lane.b32.xlu1 %v3280_v54, 511 }
0x35ed   :  { %3287 = vbcast.lane.b32.xlu0 %v3280_v54, 263  ;;  %v8474_v12 = vpop.permute.xlu1 %3271 }
0x35f0   :  { %3295 = vbcast.lane.b32.xlu1 %v3292_v24, 511 }
0x35f1   :  { %3299 = vbcast.lane.b32.xlu0 %v3292_v24, 263 }
0x3648   :  { %v8478_v48 = vpop.xlane.xlu1 %3024  ;;  %v8480_v41 = vpop.xlane.xlu0 %3027 }
0x3649   :  { %v3071_v60 = vsub.f32 %v8371_v4, %v8478_v48  ;;  %v3072_v20 = vsub.f32 %v8368_v50, %v8480_v41 }
0x364b   :  { %v3087_v22 = vmul.f32 1.442695, %v3071_v60  ;;  %v3089_v53 = vmul.f32 1.442695, %v3072_v20 }
0x364c   :  { %v8486_v38 = vpop.xlane.xlu1 %3030  ;;  %v8488_v9 = vpop.xlane.xlu0 %3039 }
0x364d   :  { %7015 = vpow2.f32 %v3087_v22  ;;  %v3073_v40 = vsub.f32 %v8384_v28, %v8486_v38  ;;  %v3076_v46 = vsub.f32 %v8381_v45, %v8488_v9 }
0x364e   :  { %7017 = vpow2.f32 %v3089_v53 }
0x364f   :  { %v3091_v36 = vmul.f32 1.442695, %v3073_v40  ;;  %v3097_v52 = vmul.f32 1.442695, %v3076_v46 }
0x3650   :  { %v8494_v47 = vpop.xlane.xlu1 %3033  ;;  %v8496_v4 = vpop.xlane.xlu0 %3051 }
0x3651   :  { %7019 = vpow2.f32 %v3091_v36  ;;  %v3074_v50 = vsub.f32 %v8387_v39, %v8494_v47  ;;  %v3080_v58 = vsub.f32 %v8395_v63, %v8496_v4 }
0x3653   :  { %v3093_v16 = vmul.f32 1.442695, %v3074_v50  ;;  %v3105_v44 = vmul.f32 1.442695, %v3080_v58 }
0x3654   :  { %v8502_v21 = vpop.xlane.xlu1 %3036  ;;  %v8504_v28 = vpop.xlane.xlu0 %3045 }
0x3655   :  { %7021 = vpow2.f32 %v3093_v16  ;;  %v3075_v45 = vsub.f32 %v8399_v26, %v8502_v21  ;;  %v3078_v39 = vsub.f32 %v8406_v8, %v8504_v28 }
0x3656   :  { %7023 = vpow2.f32 %v3097_v52 }
0x3657   :  { %v7016_v43 = vpop.eup %7015  ;;  %v3095_v54 = vmul.f32 1.442695, %v3075_v45  ;;  %v3101_v40 = vmul.f32 1.442695, %v3078_v39 }
0x3658   :  { %v7018_v24 = vpop.eup %7017  ;;  %v8510_v60 = vpop.xlane.xlu1 %3048  ;;  %v3119_v63 = vsel %vm2431_vm5, %v7016_v43, 0.0 }
0x3659   :  { %v8512_v20 = vpop.xlane.xlu0 %3057  ;;  %7025 = vpow2.f32 %v3095_v54  ;;  %v3079_v22 = vsub.f32 %v8412_v15, %v8510_v60  ;;  %3120 = vadd.xlane.f32.xlu1 %v3119_v63  ;;  %v3122_v26 = vsel %vm2435_vm4, %v7018_v24, 0.0 }
0x365a   :  { %3123 = vadd.xlane.f32.xlu0 %v3122_v26  ;;  %7027 = vpow2.f32 %v3105_v44  ;;  %v3082_v8 = vsub.f32 %v8417_v35, %v8512_v20 }
0x365b   :  { %v7020_v53 = vpop.eup %7019  ;;  %v3103_v36 = vmul.f32 1.442695, %v3079_v22 }
0x365c   :  { %v8520_v46 = vpop.xlane.xlu1 %3042  ;;  %v3125_v52 = vsel %vm2431_vm5, %v7020_v53, 0.0  ;;  %v3109_v58 = vmul.f32 1.442695, %v3082_v8 }
0x365d   :  { %v8522_v50 = vpop.xlane.xlu0 %3063  ;;  %7029 = vpow2.f32 %v3103_v36  ;;  %v3077_v15 = vsub.f32 %v8425_v62, %v8520_v46  ;;  %3126 = vadd.xlane.f32.xlu1 %v3125_v52 }
0x365e   :  { %7031 = vpow2.f32 %v3101_v40  ;;  %v3084_v43 = vsub.f32 %v8428_v13, %v8522_v50 }
0x365f   :  { %v7022_v16 = vpop.eup %7021  ;;  %v3099_v45 = vmul.f32 1.442695, %v3077_v15 }
0x3660   :  { %v8529_v44 = vpop.xlane.xlu1 %3054  ;;  %v3128_v54 = vsel %vm2435_vm4, %v7022_v16, 0.0  ;;  %v7024_v39 = vpop.eup %7023  ;;  %v3113_v63 = vmul.f32 1.442695, %v3084_v43 }
0x3661   :  { %v8531_v35 = vpop.xlane.xlu0 %3069  ;;  %7033 = vpow2.f32 %v3099_v45  ;;  %v3081_v24 = vsub.f32 %v8436_v37, %v8529_v44  ;;  %3129 = vadd.xlane.f32.xlu0 %v3128_v54  ;;  %v3134_v40 = vsel %vm2435_vm4, %v7024_v39, 0.0 }
0x3662   :  { %7035 = vpow2.f32 %v3109_v58  ;;  %v3086_v26 = vsub.f32 %v8439_v29, %v8531_v35 }
0x3663   :  { %v7026_v62 = vpop.eup %7025  ;;  %v3107_v22 = vmul.f32 1.442695, %v3081_v24 }
0x3664   :  { %v8538_v13 = vpop.xlane.xlu1 %3060  ;;  %v3131_v53 = vsel %vm2431_vm5, %v7026_v62, 0.0  ;;  %v7028_v36 = vpop.eup %7027  ;;  %v3117_v52 = vmul.f32 1.442695, %v3086_v26 }
0x3665   :  { %7037 = vpow2.f32 %v3107_v22  ;;  %v3083_v8 = vsub.f32 %v8446_v34, %v8538_v13  ;;  %3132 = vadd.xlane.f32.xlu1 %v3131_v53  ;;  %3135 = vadd.xlane.f32.xlu0 %v3134_v40  ;;  %v3146_v58 = vsel %vm2435_vm4, %v7028_v36, 0.0 }
0x3666   :  { %7039 = vpow2.f32 %v3113_v63 }
0x3667   :  { %v7030_v37 = vpop.eup %7029  ;;  %v3111_v15 = vmul.f32 1.442695, %v3083_v8 }
0x3668   :  { %v8544_v16 = vpop.xlane.xlu1 %3066  ;;  %v3143_v29 = vsel %vm2431_vm5, %v7030_v37, 0.0  ;;  %v7032_v45 = vpop.eup %7031 }
0x3669   :  { %7041 = vpow2.f32 %v3111_v15  ;;  %v3085_v43 = vsub.f32 %v8451_v30, %v8544_v16  ;;  %3144 = vadd.xlane.f32.xlu1 %v3143_v29  ;;  %3147 = vadd.xlane.f32.xlu0 %v3146_v58  ;;  %v3140_v24 = vsel %vm2435_vm4, %v7032_v45, 0.0  ;;  %v3304_v29 = vrot.slane %v8301_v17, %v8256_v33  ;;  %v2270_v58 = vld [vmem:[%s10252_s5 + $0x10] sm:$0xff] }
0x366a   :  { %7043 = vpow2.f32 %v3117_v52  ;;  %v2914_v45 = vsel %vm2277_vm6, %v2270_v58, 0.0 }
0x366b   :  { %v7034_v34 = vpop.eup %7033  ;;  %v3115_v54 = vmul.f32 1.442695, %v3085_v43  ;;  %v8564_v43 = vpop.permute.xlu0 %3275 }
0x366c   :  { %v3137_v39 = vsel %vm2431_vm5, %v7034_v34, 0.0  ;;  %v7036_v62 = vpop.eup %7035  ;;  %v8566_v34 = vpop.permute.xlu1 %3283 }
0x366d   :  { %7045 = vpow2.f32 %v3115_v54  ;;  %3138 = vadd.xlane.f32.xlu1 %v3137_v39  ;;  %3141 = vadd.xlane.f32.xlu0 %v3140_v24  ;;  %v3152_v26 = vsel %vm2435_vm4, %v7036_v62, 0.0 }
0x366f   :  { %v7038_v63 = vpop.eup %7037  ;;  %v8568_v54 = vpop.permute.xlu0 %3287 }
0x3670   :  { %v3149_v22 = vsel %vm2431_vm5, %v7038_v63, 0.0  ;;  %v7040_v53 = vpop.eup %7039  ;;  %v8570_v39 = vpop.permute.xlu1 %3295 }
0x3671   :  { %3150 = vadd.xlane.f32.xlu1 %v3149_v22  ;;  %3153 = vadd.xlane.f32.xlu0 %v3152_v26  ;;  %v3158_v36 = vsel %vm2435_vm4, %v7040_v53, 0.0 }
0x3673   :  { %v7042_v30 = vpop.eup %7041  ;;  %v8572_v24 = vpop.permute.xlu0 %3299 }
0x3674   :  { %v3155_v40 = vsel %vm2431_vm5, %v7042_v30, 0.0  ;;  %v7044_v8 = vpop.eup %7043 }
0x3675   :  { %3156 = vadd.xlane.f32.xlu1 %v3155_v40  ;;  %3159 = vadd.xlane.f32.xlu0 %v3158_v36  ;;  %v3164_v15 = vsel %vm2435_vm4, %v7044_v8, 0.0 }
0x3677   :  { %v7046_v37 = vpop.eup %7045 }
0x3678   :  { %v3161_v52 = vsel %vm2431_vm5, %v7046_v37, 0.0 }
0x3679   :  { %3162 = vadd.xlane.f32.xlu1 %v3161_v52  ;;  %3165 = vadd.xlane.f32.xlu0 %v3164_v15 }
0x368a   :  { %3307 = vbcast.lane.b32.xlu1 %v3304_v29, 511 }
0x368f   :  { %3311 = vbcast.lane.b32.xlu0 %v3304_v29, 263 }
0x36ae   :  { %2915 = vadd.xlane.f32.xlu1 %v2914_v45 }
0x36e6   :  { %v3121_v62 = vpop.xlane.xlu1 %3120 }
0x36e7   :  { %7047 = vlog2.f32 %v3121_v62  ;;  %v3124_v63 = vpop.xlane.xlu0 %3123 }
0x36e8   :  { %7049 = vlog2.f32 %v3124_v63 }
0x36ea   :  { %v3127_v22 = vpop.xlane.xlu1 %3126 }
0x36eb   :  { %7051 = vlog2.f32 %v3127_v22 }
0x36ee   :  { %v3130_v26 = vpop.xlane.xlu0 %3129 }
0x36ef   :  { %7053 = vlog2.f32 %v3130_v26 }
0x36f1   :  { %v7048_v53 = vpop.eup %7047 }
0x36f2   :  { %v7050_v30 = vpop.eup %7049  ;;  %v3168_v40 = vmul.f32 0.6931472, %v7048_v53  ;;  %v3133_v36 = vpop.xlane.xlu1 %3132 }
0x36f3   :  { %v3136_v8 = vpop.xlane.xlu0 %3135  ;;  %v3170_v37 = vmul.f32 0.6931472, %v7050_v30  ;;  %7055 = vlog2.f32 %v3133_v36 }
0x36f4   :  { %v3199_v52 = vadd.f32 %v3168_v40, %v8478_v48  ;;  %7057 = vlog2.f32 %v3136_v8 }
0x36f5   :  { %v7052_v15 = vpop.eup %7051  ;;  %v3200_v29 = vadd.f32 %v3170_v37, %v8480_v41 }
0x36f6   :  { %v3172_v58 = vmul.f32 0.6931472, %v7052_v15  ;;  %v3145_v45 = vpop.xlane.xlu1 %3144  ;;  %v3329_v63 = vadd.f32 %v8460_v61, %v3199_v52 }
0x36f7   :  { %v3148_v62 = vpop.xlane.xlu0 %3147  ;;  %7059 = vlog2.f32 %v3145_v45  ;;  %v3330_v22 = vadd.f32 %v8468_v59, %v3200_v29 }
0x36f8   :  { %v3201_v26 = vadd.f32 %v3172_v58, %v8486_v38  ;;  %7061 = vlog2.f32 %v3148_v62  ;;  %3364 = vperm.xlu1 %6691, %v3329_v63  }
0x36f9   :  { %v7054_v53 = vpop.eup %7053  ;;  %3367 = vperm.xlu0 %6692, %v3330_v22  }
0x36fa   :  { %v3174_v30 = vmul.f32 0.6931472, %v7054_v53  ;;  %v3139_v48 = vpop.xlane.xlu1 %3138  ;;  %v3331_v36 = vadd.f32 %v8462_v2, %v3201_v26 }
0x36fb   :  { %v3142_v40 = vpop.xlane.xlu0 %3141  ;;  %7063 = vlog2.f32 %v3139_v48 }
0x36fc   :  { %v3202_v41 = vadd.f32 %v3174_v30, %v8494_v47  ;;  %3370 = vperm.xlu1 %6691, %v3331_v36   ;;  %7065 = vlog2.f32 %v3142_v40 }
0x36fd   :  { %v7056_v8 = vpop.eup %7055 }
0x36fe   :  { %v7058_v61 = vpop.eup %7057  ;;  %v3176_v37 = vmul.f32 0.6931472, %v7056_v8  ;;  %v3332_v38 = vadd.f32 %v8464_v10, %v3202_v41  ;;  %v3151_v15 = vpop.xlane.xlu1 %3150 }
0x36ff   :  { %v3154_v59 = vpop.xlane.xlu0 %3153  ;;  %v3178_v52 = vmul.f32 0.6931472, %v7058_v61  ;;  %7067 = vlog2.f32 %v3151_v15 }
0x3700   :  { %v3203_v29 = vadd.f32 %v3176_v37, %v8502_v21  ;;  %3373 = vperm.xlu0 %6692, %v3332_v38   ;;  %7069 = vlog2.f32 %v3154_v59 }
0x3701   :  { %v7060_v58 = vpop.eup %7059  ;;  %v3204_v45 = vadd.f32 %v3178_v52, %v8488_v9 }
0x3702   :  { %v7062_v2 = vpop.eup %7061  ;;  %v3184_v62 = vmul.f32 0.6931472, %v7060_v58  ;;  %v3333_v63 = vadd.f32 %v8466_v49, %v3203_v29  ;;  %v3157_v40 = vpop.xlane.xlu1 %3156 }
0x3703   :  { %v3160_v47 = vpop.xlane.xlu0 %3159  ;;  %v3186_v22 = vmul.f32 0.6931472, %v7062_v2  ;;  %v3334_v26 = vadd.f32 %v8472_v55, %v3204_v45 }
0x3704   :  { %v3207_v53 = vadd.f32 %v3184_v62, %v8510_v60  ;;  %3376 = vperm.xlu1 %6691, %v3333_v63  }
0x3705   :  { %v7064_v10 = vpop.eup %7063  ;;  %3379 = vperm.xlu0 %6692, %v3334_v26   ;;  %v3208_v9 = vadd.f32 %v3186_v22, %v8496_v4 }
0x3706   :  { %v3337_v30 = vadd.f32 %v8474_v12, %v3207_v53  ;;  %v3180_v48 = vmul.f32 0.6931472, %v7064_v10  ;;  %v7066_v36 = vpop.eup %7065  ;;  %v3163_v12 = vpop.xlane.xlu1 %3162 }
0x3707   :  { %v3166_v21 = vpop.xlane.xlu0 %3165  ;;  %v3182_v55 = vmul.f32 0.6931472, %v7066_v36  ;;  %v3338_v60 = vadd.f32 %v8564_v43, %v3208_v9 }
0x3708   :  { %7071 = vlog2.f32 %v3166_v21  ;;  %v3205_v49 = vadd.f32 %v3180_v48, %v8520_v46 }
0x3709   :  { %3388 = vperm.xlu0 %6692, %v3337_v30   ;;  %7073 = vlog2.f32 %v3157_v40  ;;  %v7068_v41 = vpop.eup %7067  ;;  %v3206_v8 = vadd.f32 %v3182_v55, %v8504_v28 }
0x370a   :  { %7075 = vlog2.f32 %v3160_v47  ;;  %v3188_v61 = vmul.f32 0.6931472, %v7068_v41  ;;  %v3335_v4 = vadd.f32 %v8470_v25, %v3205_v49  ;;  %v7070_v37 = vpop.eup %7069 }
0x370b   :  { %7077 = vlog2.f32 %v3163_v12  ;;  %v3190_v52 = vmul.f32 0.6931472, %v7070_v37  ;;  %v3336_v15 = vadd.f32 %v8476_v23, %v3206_v8  ;;  %v3312_v58 = vpop.permute.xlu0 %3311 }
0x370c   :  { %v3209_v38 = vadd.f32 %v3188_v61, %v8529_v44 }
0x370d   :  { %3391 = vperm.xlu0 %6692, %v3338_v60   ;;  %v3210_v28 = vadd.f32 %v3190_v52, %v8512_v20 }
0x370e   :  { %v3339_v25 = vadd.f32 %v8566_v34, %v3209_v38 }
0x370f   :  { %v3340_v63 = vadd.f32 %v8568_v54, %v3210_v28 }
0x3711   :  { %3382 = vperm.xlu0 %6692, %v3335_v4  }
0x3712   :  { %v7072_v59 = vpop.eup %7071 }
0x3713   :  { %v3198_v46 = vmul.f32 0.6931472, %v7072_v59  ;;  %v7074_v43 = vpop.eup %7073 }
0x3714   :  { %v3192_v45 = vmul.f32 0.6931472, %v7074_v43  ;;  %v7076_v62 = vpop.eup %7075 }
0x3715   :  { %v3214_v29 = vadd.f32 %v3198_v46, %v8531_v35  ;;  %3385 = vperm.xlu0 %6692, %v3336_v15   ;;  %v3194_v47 = vmul.f32 0.6931472, %v7076_v62  ;;  %v7078_v23 = vpop.eup %7077 }
0x3716   :  { %v3211_v44 = vadd.f32 %v3192_v45, %v8538_v13  ;;  %v3196_v20 = vmul.f32 0.6931472, %v7078_v23  ;;  %v8608_v13 = vadd.f32 %v8010_v3, %v7998_v31 }
0x3717   :  { %v3344_v2 = vadd.f32 %v3312_v58, %v3214_v29  ;;  %v3212_v35 = vadd.f32 %v3194_v47, %v8522_v50 }
0x3718   :  { %v3341_v22 = vadd.f32 %v8570_v39, %v3211_v44  ;;  %10272 = vst [vmem:[#allocation11_spill] sm:$0xff] %v8608_v13  ;;  %v3213_v34 = vadd.f32 %v3196_v20, %v8544_v16  ;;  %v3798_v39 = vrot.slane %v8608_v13, %v7515_v11  ;;  %v3822_v3 = vrot.slane %v8608_v13, %v8008_v6 }
0x3719   :  { %3394 = vperm.xlu0 %6692, %v3339_v25   ;;  %3409 = vperm.xlu1 %6691, %v3344_v2   ;;  %v3342_v54 = vadd.f32 %v8572_v24, %v3212_v35  ;;  %v3846_v16 = vrot.slane %v8608_v13, %v8022_v14  ;;  %v3858_v24 = vrot.slane %v8608_v13, %v8027_v57 }
0x371d   :  { %3397 = vperm.xlu0 %6692, %v3340_v63   ;;  %1655 = vrot.lane.b32.xlu1 %v7873_v5, %s7430_s15  ;;  %v3308_v5 = vpop.permute.xlu1 %3307 }
0x371e   :  { %v3343_v50 = vadd.f32 %v3308_v5, %v3213_v34 }
0x3721   :  { %3400 = vperm.xlu0 %6692, %v3341_v22   ;;  %1768 = vrot.lane.b32.xlu1 %v7900_v56, %s7429_s14  ;;  %v3810_v56 = vrot.slane %v8608_v13, %v7774_v1 }
0x3725   :  { %3403 = vperm.xlu0 %6692, %v3342_v54   ;;  %1885 = vrot.lane.b32.xlu1 %v7922_v42, %s7429_s14  ;;  %v3834_v42 = vrot.slane %v8608_v13, %v8017_v27 }
0x3729   :  { %3406 = vperm.xlu0 %6692, %v3343_v50   ;;  %3805 = vbcast.lane.b32.xlu1 %v3798_v39, 263 }
0x372d   :  { %1538 = vrot.lane.b32.xlu0 %v7850_v32, %s7430_s15  ;;  %3817 = vbcast.lane.b32.xlu1 %v3810_v56, 263 }
0x3731   :  { %3801 = vbcast.lane.b32.xlu0 %v3798_v39, 511  ;;  %3829 = vbcast.lane.b32.xlu1 %v3822_v3, 263 }
0x3735   :  { %3813 = vbcast.lane.b32.xlu0 %v3810_v56, 511  ;;  %3841 = vbcast.lane.b32.xlu1 %v3834_v42, 263 }
0x3739   :  { %3825 = vbcast.lane.b32.xlu0 %v3822_v3, 511  ;;  %3853 = vbcast.lane.b32.xlu1 %v3846_v16, 263 }
0x373b   :  { %v2916_v53 = vpop.xlane.xlu1 %2915 }
0x373c   :  { %vm3215_vm0 = vcmp.gt.f32.partialorder %v2916_v53, 0.5 }
0x373d   :  { %3837 = vbcast.lane.b32.xlu0 %v3834_v42, 511  ;;  %3865 = vbcast.lane.b32.xlu1 %v3858_v24, 263 }
0x3741   :  { %3849 = vbcast.lane.b32.xlu0 %v3846_v16, 511 }
0x3745   :  { %3861 = vbcast.lane.b32.xlu0 %v3858_v24, 511 }
0x3777   :  { %v3365_v30 = vpop.permute.xlu1 %3364 }
0x3778   :  { %v3368_v32 = vpop.permute.xlu0 %3367  ;;  %v3414_v37 = vrot.slane %v3365_v30, %v8322_v7 }
0x3779   :  { %v3418_v59 = vrot.slane %v3368_v32, %v8319_v18 }
0x377b   :  { %v3371_v48 = vpop.permute.xlu1 %3370  ;;  %v3419_v28 = vsel %vm2833_vm7, %v3418_v59, %v3414_v37 }
0x377c   :  { %v3423_v38 = vrot.slane %v3371_v48, %v8322_v7 }
0x377f   :  { %v3374_v26 = vpop.permute.xlu0 %3373 }
0x3780   :  { %v3427_v61 = vrot.slane %v3374_v26, %v8319_v18 }
0x3782   :  { %v3428_v43 = vsel %vm2833_vm7, %v3427_v61, %v3423_v38  ;;  %v8687_v61 = vld [vmem:[%s10251_s4 + $0x20] sm:$0xff] }
0x3783   :  { %v3377_v36 = vpop.permute.xlu1 %3376  ;;  %v3483_v25 = vsel %vm2898_vm8, %v3428_v43, %v3419_v28 }
0x3784   :  { %v3380_v10 = vpop.permute.xlu0 %3379  ;;  %v3432_v12 = vrot.slane %v3377_v36, %v8322_v7 }
0x3785   :  { %v3436_v4 = vrot.slane %v3380_v10, %v8319_v18 }
0x3787   :  { %v3437_v58 = vsel %vm2833_vm7, %v3436_v4, %v3432_v12 }
0x3788   :  { %v3389_v21 = vpop.permute.xlu0 %3388  ;;  %v3484_v47 = vsel %vm2900_vm9, %v3437_v58, %v3483_v25 }
0x3789   :  { %v3450_v35 = vrot.slane %v3389_v21, %v8322_v7 }
0x378c   :  { %v3392_v9 = vpop.permute.xlu0 %3391 }
0x378d   :  { %v3454_v62 = vrot.slane %v3392_v9, %v8319_v18 }
0x378f   :  { %v3455_v54 = vsel %vm2833_vm7, %v3454_v62, %v3450_v35 }
0x3790   :  { %v3383_v40 = vpop.permute.xlu0 %3382 }
0x3791   :  { %v3441_v29 = vrot.slane %v3383_v40, %v8322_v7 }
0x3794   :  { %v3386_v49 = vpop.permute.xlu0 %3385 }
0x3795   :  { %v3445_v52 = vrot.slane %v3386_v49, %v8319_v18 }
0x3797   :  { %v3446_v45 = vsel %vm2833_vm7, %v3445_v52, %v3441_v29 }
0x3798   :  { %v3410_v55 = vpop.permute.xlu1 %3409  ;;  %v3395_v60 = vpop.permute.xlu0 %3394  ;;  %v3485_v20 = vsel %vm2902_vm10, %v3446_v45, %v3484_v47 }
0x3799   :  { %v3459_v63 = vrot.slane %v3395_v60, %v8322_v7  ;;  %v3481_v56 = vrot.slane %v3410_v55, %v8319_v18  ;;  %v3486_v3 = vsel %vm2904_vm11, %v3455_v54, %v3485_v20 }
0x379c   :  { %v1656_v41 = vpop.permute.xlu1 %1655  ;;  %v3398_v8 = vpop.permute.xlu0 %3397 }
0x379d   :  { %1658 = vst.msk [vmem:[#allocation2 + $0x20] sm:$0xff] %vm269_vm3, %v1656_v41  ;;  %v3463_v2 = vrot.slane %v3398_v8, %v8319_v18  ;;  %v8679_v41 = vld [vmem:[%s10251_s4 + $0x28] sm:$0x7] }
0x379f   :  { %v3464_v34 = vsel %vm2833_vm7, %v3463_v2, %v3459_v63 }
0x37a0   :  { %v1769_v46 = vpop.permute.xlu1 %1768  ;;  %v3401_v15 = vpop.permute.xlu0 %3400  ;;  %v3487_v16 = vsel %vm2906_vm12, %v3464_v34, %v3486_v3 }
0x37a1   :  { %1771 = vst.msk [vmem:[#allocation2 + $0x20] sm:$0xff] %vm159_vm2, %v1769_v46  ;;  %v3468_v22 = vrot.slane %v3401_v15, %v8322_v7 }
0x37a4   :  { %v3404_v44 = vpop.permute.xlu0 %3403  ;;  %v1886_v21 = vpop.permute.xlu1 %1885 }
0x37a5   :  { %v3472_v23 = vrot.slane %v3404_v44, %v8319_v18 }
0x37a7   :  { %v3473_v5 = vsel %vm2833_vm7, %v3472_v23, %v3468_v22 }
0x37a8   :  { %v3407_v50 = vpop.permute.xlu0 %3406  ;;  %v2131_v39 = vld [vmem:[#allocation2 + $0x20] sm:$0xff]  ;;  %v3488_v24 = vsel %vm2908_vm13, %v3473_v5, %v3487_v16 }
0x37a9   :  { %v3477_v42 = vrot.slane %v3407_v50, %v8322_v7  ;;  %6668 = vmatprep.mubr.msk.f32.mxu1 %vm75_vm1, %v2131_v39 }
0x37ab   :  { %v3482_v32 = vsel %vm2833_vm7, %v3481_v56, %v3477_v42 }
0x37ac   :  { %v3489_v26 = vsel %vm2910_vm14, %v3482_v32, %v3488_v24  ;;  %v1539_v10 = vpop.permute.xlu0 %1538 }
0x37ad   :  { %v8663_v30 = vsel %vm3215_vm0, %v3489_v26, %v8356_v19  ;;  %1541 = vst.msk [vmem:[#allocation2 + $0x28] sm:$0xff] %vm269_vm3, %v1539_v10 }
0x37ae   :  { %1888 = vst.msk [vmem:[#allocation2 + $0x28] sm:$0xff] %vm159_vm2, %v1886_v21  ;;  %v3503_v9 = vrot.slane %v8663_v30, %v8048_v51  ;;  %v3496_v48 = vcombine.high %v8663_v30, %v8663_v30 }
0x37b0   :  { %v3519_v40 = vrot.slane %v3503_v9, %v8048_v51  ;;  %v3511_v53 = vcombine.high %v3503_v9, %v3503_v9  ;;  %v3510_v36 = vrot.slane %v3496_v48, %v8048_v51 }
0x37b2   :  { %v3548_v49 = vrot.slane %v3519_v40, %v7515_v11  ;;  %v3533_v19 = vrot.slane %v3511_v53, %v8048_v51  ;;  %v3526_v55 = vrot.slane %v3510_v36, %v8048_v51  ;;  %v3512_v60 = vcombine.high %v3510_v36, %v3510_v36 }
0x37b3   :  { %v3541_v52 = vcombine.high %v3519_v40, %v3519_v40  ;;  %v3870_v53 = vrot.slane %v8608_v13, %v8148_v0 }
0x37b4   :  { %v8682_v8 = vadd.f32 %v8679_v41, %v3548_v49  ;;  %v8690_v12 = vadd.f32 %v8687_v61, %v3548_v49  ;;  %v3552_v4 = vrot.slane %v3533_v19, %v7515_v11  ;;  %v3564_v37 = vrot.slane %v3526_v55, %v7515_v11 }
0x37b5   :  { %v2132_v59 = vld [vmem:[#allocation2 + $0x28] sm:$0xff]  ;;  %v3540_v38 = vrot.slane %v3512_v60, %v8048_v51  ;;  %v3542_v46 = vcombine.high %v3526_v55, %v3526_v55  ;;  %v3556_v25 = vrot.slane %v3541_v52, %v7515_v11  ;;  %v3543_v54 = vcombine.high %v3533_v19, %v3533_v19 }
0x37b6   :  { %6669 = vmatmul.mubr.msk.f32.gmra.mrb[40].mxu1 %vm75_vm1, %v2132_v59  ;;  %v3604_v15 = vsel %vm2435_vm4, %v8682_v8, -inf  ;;  %v3601_v43 = vsel %vm2431_vm5, %v8690_v12, -inf  ;;  %v8701_v29 = vadd.f32 %v8687_v61, %v3552_v4  ;;  %v8704_v58 = vadd.f32 %v8687_v61, %v3564_v37 }
0x37b7   :  { %3605 = vmax.xlane.f32.xlu1 %v3604_v15  ;;  %3602 = vmax.xlane.f32.xlu0 %v3601_v43  ;;  %v3568_v28 = vrot.slane %v3540_v38, %v7515_v11  ;;  %v8710_v2 = vadd.f32 %v8679_v41, %v3552_v4  ;;  %v3572_v47 = vrot.slane %v3542_v46, %v7515_v11  ;;  %v8779_v4 = vpop.permute.xlu1 %3805 }
0x37b8   :  { %v3607_v45 = vsel %vm2431_vm5, %v8701_v29, -inf  ;;  %v3625_v62 = vsel %vm2431_vm5, %v8704_v58, -inf  ;;  %v3544_v63 = vcombine.high %v3540_v38, %v3540_v38  ;;  %v8720_v23 = vadd.f32 %v8687_v61, %v3556_v25 }
0x37b9   :  { %v8716_v44 = vadd.f32 %v8687_v61, %v3568_v28  ;;  %v3610_v35 = vsel %vm2435_vm4, %v8710_v2, -inf  ;;  %v8727_v22 = vadd.f32 %v8687_v61, %v3572_v47  ;;  %v8735_v39 = vadd.f32 %v8679_v41, %v3556_v25 }
0x37ba   :  { %v3576_v34 = vrot.slane %v3544_v63, %v7515_v11  ;;  %v3613_v5 = vsel %vm2431_vm5, %v8720_v23, -inf  ;;  %v8745_v16 = vadd.f32 %v8679_v41, %v3564_v37  ;;  %v3560_v24 = vrot.slane %v3543_v54, %v7515_v11  ;;  %v8781_v37 = vpop.permute.xlu0 %3801 }
0x37bb   :  { %3608 = vmax.xlane.f32.xlu0 %v3607_v45  ;;  %3626 = vmax.xlane.f32.xlu1 %v3625_v62  ;;  %v3631_v20 = vsel %vm2431_vm5, %v8716_v44, -inf  ;;  %v3637_v50 = vsel %vm2431_vm5, %v8727_v22, -inf  ;;  %v3616_v3 = vsel %vm2435_vm4, %v8735_v39, -inf  ;;  %v8761_v48 = vadd.f32 %v8679_v41, %v3568_v28  ;;  %v8783_v59 = vpop.permute.xlu1 %3817 }
0x37bc   :  { %v8738_v56 = vadd.f32 %v8687_v61, %v3576_v34  ;;  %v3628_v32 = vsel %vm2435_vm4, %v8745_v16, -inf  ;;  %v8751_v26 = vadd.f32 %v8687_v61, %v3560_v24  ;;  %v8756_v21 = vadd.f32 %v8679_v41, %v3560_v24 }
0x37bd   :  { %v3634_v40 = vsel %vm2435_vm4, %v8761_v48, -inf  ;;  %v8768_v36 = vadd.f32 %v8679_v41, %v3572_v47  ;;  %v3882_v19 = vrot.slane %v8608_v13, %v8256_v33  ;;  %v8775_v55 = vadd.f32 %v8679_v41, %v3576_v34 }
0x37be   :  { %v3643_v42 = vsel %vm2431_vm5, %v8738_v56, -inf  ;;  %v3619_v10 = vsel %vm2431_vm5, %v8751_v26, -inf  ;;  %v3622_v9 = vsel %vm2435_vm4, %v8756_v21, -inf  ;;  %v8785_v38 = vpop.permute.xlu0 %3813 }
0x37bf   :  { %3611 = vmax.xlane.f32.xlu0 %v3610_v35  ;;  %3632 = vmax.xlane.f32.xlu1 %v3631_v20  ;;  %v3640_v49 = vsel %vm2435_vm4, %v8768_v36, -inf  ;;  %v3646_v60 = vsel %vm2435_vm4, %v8775_v55, -inf  ;;  %v8787_v52 = vpop.permute.xlu1 %3829 }
0x37c2   :  { %v8789_v46 = vpop.permute.xlu0 %3825 }
0x37c3   :  { %3614 = vmax.xlane.f32.xlu0 %v3613_v5  ;;  %3638 = vmax.xlane.f32.xlu1 %v3637_v50  ;;  %v8791_v15 = vpop.permute.xlu1 %3841 }
0x37c6   :  { %v8793_v43 = vpop.permute.xlu0 %3837 }
0x37c7   :  { %3617 = vmax.xlane.f32.xlu0 %v3616_v3  ;;  %3644 = vmax.xlane.f32.xlu1 %v3643_v42  ;;  %v8795_v28 = vpop.permute.xlu1 %3853 }
0x37ca   :  { %v8797_v45 = vpop.permute.xlu0 %3849 }
0x37cb   :  { %3629 = vmax.xlane.f32.xlu0 %v3628_v32  ;;  %v8799_v25 = vpop.permute.xlu1 %3865 }
0x37ce   :  { %v8801_v62 = vpop.permute.xlu0 %3861 }
0x37cf   :  { %3620 = vmax.xlane.f32.xlu0 %v3619_v10 }
0x37d3   :  { %3623 = vmax.xlane.f32.xlu0 %v3622_v9 }
0x37d7   :  { %3635 = vmax.xlane.f32.xlu0 %v3634_v40 }
0x37d8   :  { %3877 = vbcast.lane.b32.xlu1 %v3870_v53, 263 }
0x37db   :  { %3641 = vmax.xlane.f32.xlu0 %v3640_v49 }
0x37dc   :  { %3889 = vbcast.lane.b32.xlu1 %v3882_v19, 263 }
0x37df   :  { %3647 = vmax.xlane.f32.xlu0 %v3646_v60 }
0x37f5   :  { %3873 = vbcast.lane.b32.xlu0 %v3870_v53, 511 }
0x37f9   :  { %3885 = vbcast.lane.b32.xlu0 %v3882_v19, 511 }
0x3844   :  { %v8803_v47 = vpop.xlane.xlu1 %3605  ;;  %v8805_v63 = vpop.xlane.xlu0 %3602 }
0x3845   :  { %v3650_v35 = vsub.f32 %v8682_v8, %v8803_v47  ;;  %v3649_v20 = vsub.f32 %v8690_v12, %v8805_v63 }
0x3847   :  { %v3667_v34 = vmul.f32 1.442695, %v3650_v35  ;;  %v3665_v54 = vmul.f32 1.442695, %v3649_v20 }
0x3848   :  { %v8811_v5 = vpop.xlane.xlu0 %3608  ;;  %v8817_v24 = vpop.xlane.xlu1 %3626 }
0x3849   :  { %7079 = vpow2.f32 %v3667_v34  ;;  %v3651_v50 = vsub.f32 %v8701_v29, %v8811_v5  ;;  %v3657_v12 = vsub.f32 %v8704_v58, %v8817_v24 }
0x384a   :  { %7081 = vpow2.f32 %v3665_v54 }
0x384b   :  { %v3669_v3 = vmul.f32 1.442695, %v3651_v50  ;;  %v3681_v49 = vmul.f32 1.442695, %v3657_v12 }
0x384c   :  { %v8815_v42 = vpop.xlane.xlu0 %3611  ;;  %v8827_v19 = vpop.xlane.xlu1 %3632 }
0x384d   :  { %v3652_v8 = vsub.f32 %v8710_v2, %v8815_v42  ;;  %7083 = vpow2.f32 %v3669_v3 }
0x384f   :  { %v3671_v32 = vmul.f32 1.442695, %v3652_v8 }
0x3850   :  { %v8823_v10 = vpop.xlane.xlu0 %3614  ;;  %v8840_v3 = vpop.xlane.xlu1 %3638 }
0x3851   :  { %v3653_v9 = vsub.f32 %v8720_v23, %v8823_v10  ;;  %7085 = vpow2.f32 %v3671_v32 }
0x3853   :  { %v7080_v29 = vpop.eup %7079  ;;  %v3673_v40 = vmul.f32 1.442695, %v3653_v9 }
0x3854   :  { %v7082_v53 = vpop.eup %7081  ;;  %v8829_v60 = vpop.xlane.xlu0 %3617  ;;  %v3700_v2 = vsel %vm2435_vm4, %v7080_v29, 0.0 }
0x3855   :  { %v3654_v35 = vsub.f32 %v8735_v39, %v8829_v60  ;;  %3701 = vadd.xlane.f32.xlu0 %v3700_v2  ;;  %v3697_v58 = vsel %vm2431_vm5, %v7082_v53, 0.0  ;;  %7087 = vpow2.f32 %v3673_v40  ;;  %v3659_v39 = vsub.f32 %v8716_v44, %v8827_v19  ;;  %v8851_v2 = vpop.xlane.xlu1 %3644 }
0x3856   :  { %3698 = vadd.xlane.f32.xlu1 %v3697_v58  ;;  %7089 = vpow2.f32 %v3681_v49  ;;  %v3661_v40 = vsub.f32 %v8727_v22, %v8840_v3 }
0x3857   :  { %v3675_v23 = vmul.f32 1.442695, %v3654_v35  ;;  %v7084_v20 = vpop.eup %7083 }
0x3858   :  { %v8835_v34 = vpop.xlane.xlu0 %3629  ;;  %v3703_v50 = vsel %vm2431_vm5, %v7084_v20, 0.0  ;;  %v3663_v20 = vsub.f32 %v8738_v56, %v8851_v2 }
0x3859   :  { %v3658_v54 = vsub.f32 %v8745_v16, %v8835_v34  ;;  %7091 = vpow2.f32 %v3675_v23  ;;  %v3685_v16 = vmul.f32 1.442695, %v3659_v39  ;;  %v3689_v23 = vmul.f32 1.442695, %v3661_v40 }
0x385a   :  { %3704 = vadd.xlane.f32.xlu1 %v3703_v50 }
0x385b   :  { %v3683_v8 = vmul.f32 1.442695, %v3658_v54  ;;  %v7086_v32 = vpop.eup %7085 }
0x385c   :  { %v8844_v12 = vpop.xlane.xlu0 %3620  ;;  %v3706_v29 = vsel %vm2435_vm4, %v7086_v32, 0.0 }
0x385d   :  { %7093 = vpow2.f32 %v3683_v8  ;;  %v3655_v9 = vsub.f32 %v8751_v26, %v8844_v12  ;;  %3707 = vadd.xlane.f32.xlu0 %v3706_v29 }
0x385f   :  { %v3677_v53 = vmul.f32 1.442695, %v3655_v9  ;;  %v7088_v49 = vpop.eup %7087  ;;  %v3693_v9 = vmul.f32 1.442695, %v3663_v20 }
0x3860   :  { %v8853_v44 = vpop.xlane.xlu0 %3623  ;;  %v3709_v58 = vsel %vm2431_vm5, %v7088_v49, 0.0  ;;  %v7090_v26 = vpop.eup %7089 }
0x3861   :  { %7095 = vpow2.f32 %v3677_v53  ;;  %v3656_v35 = vsub.f32 %v8756_v21, %v8853_v44  ;;  %3710 = vadd.xlane.f32.xlu1 %v3709_v58  ;;  %v3721_v8 = vsel %vm2431_vm5, %v7090_v26, 0.0 }
0x3862   :  { %7097 = vpow2.f32 %v3685_v16 }
0x3863   :  { %v3679_v22 = vmul.f32 1.442695, %v3656_v35  ;;  %v7092_v54 = vpop.eup %7091 }
0x3864   :  { %v8860_v50 = vpop.xlane.xlu0 %3635  ;;  %v3712_v21 = vsel %vm2435_vm4, %v7092_v54, 0.0 }
0x3865   :  { %7099 = vpow2.f32 %v3679_v22  ;;  %v3660_v39 = vsub.f32 %v8761_v48, %v8860_v50  ;;  %3722 = vadd.xlane.f32.xlu1 %v3721_v8  ;;  %3713 = vadd.xlane.f32.xlu0 %v3712_v21 }
0x3866   :  { %7101 = vpow2.f32 %v3689_v23 }
0x3867   :  { %v7094_v32 = vpop.eup %7093  ;;  %v3687_v29 = vmul.f32 1.442695, %v3660_v39 }
0x3868   :  { %v8866_v16 = vpop.xlane.xlu0 %3641  ;;  %v3724_v56 = vsel %vm2435_vm4, %v7094_v32, 0.0 }
0x3869   :  { %7103 = vpow2.f32 %v3687_v29  ;;  %v3662_v40 = vsub.f32 %v8768_v36, %v8866_v16  ;;  %3725 = vadd.xlane.f32.xlu0 %v3724_v56 }
0x386a   :  { %7105 = vpow2.f32 %v3693_v9 }
0x386b   :  { %v7096_v48 = vpop.eup %7095  ;;  %v3691_v53 = vmul.f32 1.442695, %v3662_v40 }
0x386c   :  { %v8871_v49 = vpop.xlane.xlu0 %3647  ;;  %v3715_v35 = vsel %vm2431_vm5, %v7096_v48, 0.0  ;;  %v7098_v58 = vpop.eup %7097 }
0x386d   :  { %7107 = vpow2.f32 %v3691_v53  ;;  %v3664_v26 = vsub.f32 %v8775_v55, %v8871_v49  ;;  %3716 = vadd.xlane.f32.xlu1 %v3715_v35  ;;  %v3727_v22 = vsel %vm2431_vm5, %v7098_v58, 0.0  ;;  %v8889_v58 = vpop.permute.xlu1 %3877 }
0x386f   :  { %v7100_v23 = vpop.eup %7099  ;;  %v3695_v20 = vmul.f32 1.442695, %v3664_v26 }
0x3870   :  { %v3718_v36 = vsel %vm2435_vm4, %v7100_v23, 0.0  ;;  %v7102_v54 = vpop.eup %7101  ;;  %v8887_v35 = vpop.permute.xlu0 %3873 }
0x3871   :  { %7109 = vpow2.f32 %v3695_v20  ;;  %3728 = vadd.xlane.f32.xlu1 %v3727_v22  ;;  %3719 = vadd.xlane.f32.xlu0 %v3718_v36  ;;  %v3733_v8 = vsel %vm2431_vm5, %v7102_v54, 0.0  ;;  %v8893_v23 = vpop.permute.xlu1 %3889 }
0x3873   :  { %v7104_v39 = vpop.eup %7103 }
0x3874   :  { %v3730_v21 = vsel %vm2435_vm4, %v7104_v39, 0.0  ;;  %v7106_v32 = vpop.eup %7105  ;;  %v8891_v26 = vpop.permute.xlu0 %3885 }
0x3875   :  { %3734 = vadd.xlane.f32.xlu1 %v3733_v8  ;;  %3731 = vadd.xlane.f32.xlu0 %v3730_v21  ;;  %v3739_v9 = vsel %vm2431_vm5, %v7106_v32, 0.0 }
0x3877   :  { %v7108_v55 = vpop.eup %7107 }
0x3878   :  { %v3736_v29 = vsel %vm2435_vm4, %v7108_v55, 0.0 }
0x3879   :  { %3740 = vadd.xlane.f32.xlu1 %v3739_v9  ;;  %3737 = vadd.xlane.f32.xlu0 %v3736_v29 }
0x387b   :  { %v7110_v56 = vpop.eup %7109 }
0x387c   :  { %v3742_v40 = vsel %vm2435_vm4, %v7110_v56, 0.0 }
0x387d   :  { %3743 = vadd.xlane.f32.xlu0 %v3742_v40 }
0x3889   :  { %v8883_v48 = vpop.f32.mrb[40].mxu1 }
0x388a   :  { %v8885_v53 = vpop.f32.mrb[41].mxu1 }
0x38e2   :  { %v3702_v20 = vpop.xlane.xlu0 %3701 }
0x38e3   :  { %v3699_v22 = vpop.xlane.xlu1 %3698  ;;  %7111 = vlog2.f32 %v3702_v20 }
0x38e4   :  { %7113 = vlog2.f32 %v3699_v22 }
0x38e7   :  { %v3705_v36 = vpop.xlane.xlu1 %3704 }
0x38e8   :  { %7115 = vlog2.f32 %v3705_v36 }
0x38ea   :  { %v3708_v54 = vpop.xlane.xlu0 %3707 }
0x38eb   :  { %7117 = vlog2.f32 %v3708_v54 }
0x38ed   :  { %v7112_v39 = vpop.eup %7111 }
0x38ee   :  { %v7114_v8 = vpop.eup %7113  ;;  %v3748_v21 = vmul.f32 0.6931472, %v7112_v39  ;;  %v3711_v55 = vpop.xlane.xlu1 %3710 }
0x38ef   :  { %v3746_v32 = vmul.f32 0.6931472, %v7114_v8  ;;  %7119 = vlog2.f32 %v3711_v55 }
0x38f0   :  { %v3778_v9 = vadd.f32 %v3748_v21, %v8803_v47 }
0x38f1   :  { %v3777_v29 = vadd.f32 %v3746_v32, %v8805_v63 }
0x38f2   :  { %v7116_v56 = vpop.eup %7115  ;;  %v3908_v40 = vadd.f32 %v8779_v4, %v3778_v9  ;;  %v3723_v20 = vpop.xlane.xlu1 %3722 }
0x38f3   :  { %v3750_v13 = vmul.f32 0.6931472, %v7116_v56  ;;  %v3714_v22 = vpop.xlane.xlu0 %3713  ;;  %v3907_v36 = vadd.f32 %v8781_v37, %v3777_v29  ;;  %7121 = vlog2.f32 %v3723_v20 }
0x38f4   :  { %3945 = vperm.xlu1 %6691, %v3908_v40   ;;  %7123 = vlog2.f32 %v3714_v22 }
0x38f5   :  { %v3779_v54 = vadd.f32 %v3750_v13, %v8811_v5  ;;  %3942 = vperm.xlu0 %6692, %v3907_v36   ;;  %v7118_v39 = vpop.eup %7117 }
0x38f6   :  { %v3752_v8 = vmul.f32 0.6931472, %v7118_v39 }
0x38f7   :  { %v3726_v47 = vpop.xlane.xlu0 %3725  ;;  %v3909_v21 = vadd.f32 %v8785_v38, %v3779_v54 }
0x38f8   :  { %7125 = vlog2.f32 %v3726_v47  ;;  %v3780_v63 = vadd.f32 %v3752_v8, %v8815_v42 }
0x38f9   :  { %3948 = vperm.xlu0 %6692, %v3909_v21   ;;  %v7120_v4 = vpop.eup %7119 }
0x38fa   :  { %v3717_v32 = vpop.xlane.xlu1 %3716  ;;  %v3754_v55 = vmul.f32 0.6931472, %v7120_v4  ;;  %v3910_v37 = vadd.f32 %v8783_v59, %v3780_v63 }
0x38fb   :  { %7127 = vlog2.f32 %v3717_v32 }
0x38fc   :  { %v3781_v9 = vadd.f32 %v3754_v55, %v8823_v10  ;;  %3951 = vperm.xlu1 %6691, %v3910_v37  }
0x38fd   :  { %v7122_v13 = vpop.eup %7121 }
0x38fe   :  { %v3720_v5 = vpop.xlane.xlu0 %3719  ;;  %v7124_v29 = vpop.eup %7123  ;;  %v3911_v56 = vadd.f32 %v8789_v46, %v3781_v9  ;;  %v3762_v40 = vmul.f32 0.6931472, %v7122_v13 }
0x38ff   :  { %v3756_v38 = vmul.f32 0.6931472, %v7124_v29  ;;  %v3729_v20 = vpop.xlane.xlu1 %3728  ;;  %7129 = vlog2.f32 %v3720_v5 }
0x3900   :  { %3954 = vperm.xlu0 %6692, %v3911_v56   ;;  %7131 = vlog2.f32 %v3729_v20  ;;  %v3785_v36 = vadd.f32 %v3762_v40, %v8817_v24 }
0x3901   :  { %v3782_v22 = vadd.f32 %v3756_v38, %v8829_v60 }
0x3902   :  { %v7126_v42 = vpop.eup %7125  ;;  %v3732_v54 = vpop.xlane.xlu0 %3731  ;;  %v3915_v21 = vadd.f32 %v8797_v45, %v3785_v36 }
0x3903   :  { %v3764_v59 = vmul.f32 0.6931472, %v7126_v42  ;;  %v3912_v10 = vadd.f32 %v8787_v52, %v3782_v22  ;;  %7133 = vlog2.f32 %v3732_v54  ;;  %v3735_v47 = vpop.xlane.xlu1 %3734 }
0x3904   :  { %7135 = vlog2.f32 %v3735_v47 }
0x3905   :  { %v7128_v39 = vpop.eup %7127  ;;  %3957 = vperm.xlu1 %6691, %v3912_v10   ;;  %v3786_v46 = vadd.f32 %v3764_v59, %v8835_v34 }
0x3906   :  { %v3758_v8 = vmul.f32 0.6931472, %v7128_v39  ;;  %v3738_v24 = vpop.xlane.xlu0 %3737 }
0x3907   :  { %v3916_v32 = vadd.f32 %v8795_v28, %v3786_v46  ;;  %7137 = vlog2.f32 %v3738_v24  ;;  %v3741_v38 = vpop.xlane.xlu1 %3740 }
0x3908   :  { %v3783_v60 = vadd.f32 %v3758_v8, %v8844_v12  ;;  %7139 = vlog2.f32 %v3741_v38 }
0x3909   :  { %v7130_v63 = vpop.eup %7129  ;;  %3966 = vperm.xlu1 %6691, %v3915_v21  }
0x390a   :  { %v3760_v4 = vmul.f32 0.6931472, %v7130_v63  ;;  %v7132_v55 = vpop.eup %7131  ;;  %v3913_v34 = vadd.f32 %v8793_v43, %v3783_v60  ;;  %v3744_v59 = vpop.xlane.xlu0 %3743 }
0x390b   :  { %v3766_v52 = vmul.f32 0.6931472, %v7132_v55  ;;  %7141 = vlog2.f32 %v3744_v59 }
0x390c   :  { %v3784_v37 = vadd.f32 %v3760_v4, %v8853_v44 }
0x390d   :  { %3969 = vperm.xlu1 %6691, %v3916_v32   ;;  %v7134_v9 = vpop.eup %7133  ;;  %v3787_v45 = vadd.f32 %v3766_v52, %v8827_v19  ;;  %v2271_v19 = vld [vmem:[%s10252_s5 + $0x18] sm:$0xff] }
0x390e   :  { %v3768_v13 = vmul.f32 0.6931472, %v7134_v9  ;;  %v3914_v5 = vadd.f32 %v8791_v15, %v3784_v37  ;;  %v7136_v12 = vpop.eup %7135  ;;  %v3492_v15 = vsel %vm2277_vm6, %v2271_v19, 0.0 }
0x390f   :  { %v3770_v29 = vmul.f32 0.6931472, %v7136_v12  ;;  %v3917_v56 = vadd.f32 %v8801_v62, %v3787_v45 }
0x3910   :  { %v3788_v28 = vadd.f32 %v3768_v13, %v8860_v50 }
0x3911   :  { %3960 = vperm.xlu1 %6691, %v3913_v34   ;;  %v7138_v40 = vpop.eup %7137  ;;  %v3789_v44 = vadd.f32 %v3770_v29, %v8840_v3  ;;  %v8928_v3 = vadd.f32 %v8885_v53, %v7998_v31 }
0x3912   :  { %v3772_v43 = vmul.f32 0.6931472, %v7138_v40  ;;  %v3918_v20 = vadd.f32 %v8799_v25, %v3788_v28  ;;  %v7140_v22 = vpop.eup %7139 }
0x3913   :  { %v3919_v62 = vadd.f32 %v8887_v35, %v3789_v44  ;;  %v4376_v42 = vrot.slane %v8928_v3, %v7515_v11  ;;  %v3774_v36 = vmul.f32 0.6931472, %v7140_v22  ;;  %v4400_v53 = vrot.slane %v8928_v3, %v8008_v6 }
0x3914   :  { %v3790_v50 = vadd.f32 %v3772_v43, %v8866_v16  ;;  %v4388_v16 = vrot.slane %v8928_v3, %v7774_v1  ;;  %v4412_v54 = vrot.slane %v8928_v3, %v8017_v27  ;;  %v4424_v10 = vrot.slane %v8928_v3, %v8022_v14 }
0x3915   :  { %3963 = vperm.xlu1 %6691, %v3914_v5   ;;  %v3791_v35 = vadd.f32 %v3774_v36, %v8851_v2  ;;  %v7142_v39 = vpop.eup %7141  ;;  %v4436_v46 = vrot.slane %v8928_v3, %v8027_v57  ;;  %v8948_v8 = vrot.slane %v8928_v3, %v8148_v0 }
0x3916   :  { %v3920_v25 = vadd.f32 %v8889_v58, %v3790_v50  ;;  %v3776_v2 = vmul.f32 0.6931472, %v7142_v39 }
0x3917   :  { %v3921_v58 = vadd.f32 %v8891_v26, %v3791_v35 }
0x3918   :  { %v3792_v26 = vadd.f32 %v3776_v2, %v8871_v49 }
0x3919   :  { %3972 = vperm.xlu1 %6691, %v3917_v56  }
0x391a   :  { %v3922_v47 = vadd.f32 %v8893_v23, %v3792_v26 }
0x391d   :  { %3975 = vperm.xlu1 %6691, %v3918_v20  }
0x391f   :  { %3493 = vadd.xlane.f32.xlu0 %v3492_v15 }
0x3921   :  { %3978 = vperm.xlu1 %6691, %v3919_v62  }
0x3925   :  { %3981 = vperm.xlu1 %6691, %v3920_v25  }
0x3929   :  { %4379 = vbcast.lane.b32.xlu1 %v4376_v42, 511 }
0x392d   :  { %4391 = vbcast.lane.b32.xlu1 %v4388_v16, 511 }
0x3931   :  { %4395 = vbcast.lane.b32.xlu1 %v4388_v16, 263 }
0x3935   :  { %4403 = vbcast.lane.b32.xlu1 %v4400_v53, 511  ;;  %3984 = vperm.xlu0 %6692, %v3921_v58  }
0x3939   :  { %4415 = vbcast.lane.b32.xlu1 %v4412_v54, 511  ;;  %4383 = vbcast.lane.b32.xlu0 %v4376_v42, 263 }
0x393d   :  { %4427 = vbcast.lane.b32.xlu1 %v4424_v10, 511  ;;  %4407 = vbcast.lane.b32.xlu0 %v4400_v53, 263 }
0x3941   :  { %4439 = vbcast.lane.b32.xlu1 %v4436_v46, 511  ;;  %4419 = vbcast.lane.b32.xlu0 %v4412_v54, 263 }
0x3945   :  { %4451 = vbcast.lane.b32.xlu1 %v8948_v8, 511  ;;  %4431 = vbcast.lane.b32.xlu0 %v4424_v10, 263 }
0x3949   :  { %3987 = vperm.xlu1 %6691, %v3922_v47   ;;  %4443 = vbcast.lane.b32.xlu0 %v4436_v46, 263 }
0x3973   :  { %v3946_v21 = vpop.permute.xlu1 %3945 }
0x3974   :  { %v3943_v23 = vpop.permute.xlu0 %3942  ;;  %v3996_v38 = vrot.slane %v3946_v21, %v8319_v18 }
0x3975   :  { %v3992_v43 = vrot.slane %v3943_v23, %v8322_v7 }
0x3977   :  { %v3997_v36 = vsel %vm2833_vm7, %v3996_v38, %v3992_v43 }
0x3978   :  { %v3949_v12 = vpop.permute.xlu0 %3948 }
0x3979   :  { %v4001_v20 = vrot.slane %v3949_v12, %v8322_v7 }
0x397b   :  { %v3952_v63 = vpop.permute.xlu1 %3951 }
0x397c   :  { %v4005_v40 = vrot.slane %v3952_v63, %v8319_v18 }
0x397e   :  { %v4006_v25 = vsel %vm2833_vm7, %v4005_v40, %v4001_v20 }
0x397f   :  { %v3955_v28 = vpop.permute.xlu0 %3954  ;;  %v4061_v59 = vsel %vm2898_vm8, %v4006_v25, %v3997_v36 }
0x3980   :  { %v4010_v15 = vrot.slane %v3955_v28, %v8322_v7 }
0x3984   :  { %v3958_v60 = vpop.permute.xlu1 %3957 }
0x3985   :  { %v4014_v44 = vrot.slane %v3958_v60, %v8319_v18 }
0x3987   :  { %v4015_v22 = vsel %vm2833_vm7, %v4014_v44, %v4010_v15 }
0x3988   :  { %v3967_v4 = vpop.permute.xlu1 %3966  ;;  %v4062_v10 = vsel %vm2900_vm9, %v4015_v22, %v4061_v59 }
0x3989   :  { %v4028_v2 = vrot.slane %v3967_v4, %v8322_v7 }
0x398c   :  { %v3970_v24 = vpop.permute.xlu1 %3969 }
0x398d   :  { %v4032_v53 = vrot.slane %v3970_v24, %v8319_v18 }
0x398f   :  { %v4033_v63 = vsel %vm2833_vm7, %v4032_v53, %v4028_v2 }
0x3990   :  { %v3961_v32 = vpop.permute.xlu1 %3960 }
0x3991   :  { %v4019_v42 = vrot.slane %v3961_v32, %v8322_v7 }
0x3994   :  { %v3964_v55 = vpop.permute.xlu1 %3963 }
0x3995   :  { %v4023_v19 = vrot.slane %v3964_v55, %v8319_v18 }
0x3997   :  { %v4024_v16 = vsel %vm2833_vm7, %v4023_v19, %v4019_v42 }
0x3998   :  { %v3973_v52 = vpop.permute.xlu1 %3972  ;;  %v4063_v46 = vsel %vm2902_vm10, %v4024_v16, %v4062_v10 }
0x3999   :  { %v4037_v39 = vrot.slane %v3973_v52, %v8322_v7  ;;  %v4064_v32 = vsel %vm2904_vm11, %v4033_v63, %v4063_v46 }
0x399c   :  { %v3976_v49 = vpop.permute.xlu1 %3975 }
0x399d   :  { %v4041_v35 = vrot.slane %v3976_v49, %v8319_v18 }
0x399f   :  { %v4042_v21 = vsel %vm2833_vm7, %v4041_v35, %v4037_v39 }
0x39a0   :  { %v3979_v37 = vpop.permute.xlu1 %3978  ;;  %v4065_v4 = vsel %vm2906_vm12, %v4042_v21, %v4064_v32 }
0x39a1   :  { %v4046_v26 = vrot.slane %v3979_v37, %v8322_v7 }
0x39a4   :  { %v3982_v34 = vpop.permute.xlu1 %3981 }
0x39a5   :  { %v4050_v58 = vrot.slane %v3982_v34, %v8319_v18 }
0x39a7   :  { %v4051_v60 = vsel %vm2833_vm7, %v4050_v58, %v4046_v26 }
0x39a8   :  { %v8952_v9 = vpop.permute.xlu1 %4379  ;;  %v4066_v49 = vsel %vm2908_vm13, %v4051_v60, %v4065_v4 }
0x39ac   :  { %v8954_v45 = vpop.permute.xlu1 %4391  ;;  %v3494_v50 = vpop.xlane.xlu0 %3493 }
0x39ad   :  { %vm3793_vm15 = vcmp.gt.f32.partialorder %v3494_v50, 0.5 }
0x39b0   :  { %v8956_v13 = vpop.permute.xlu1 %4395 }
0x39b4   :  { %v8958_v5 = vpop.permute.xlu1 %4403  ;;  %v3985_v47 = vpop.permute.xlu0 %3984 }
0x39b5   :  { %v4055_v55 = vrot.slane %v3985_v47, %v8322_v7 }
0x39b8   :  { %v8960_v29 = vpop.permute.xlu1 %4415 }
0x39bc   :  { %v8962_v56 = vpop.permute.xlu1 %4427 }
0x39c0   :  { %v8971_v62 = vpop.permute.xlu1 %4439 }
0x39c4   :  { %v8982_v54 = vpop.permute.xlu1 %4451 }
0x39c8   :  { %v3988_v24 = vpop.permute.xlu1 %3987 }
0x39c9   :  { %v4059_v52 = vrot.slane %v3988_v24, %v8319_v18 }
0x39cb   :  { %v4060_v37 = vsel %vm2833_vm7, %v4059_v52, %v4055_v55 }
0x39cc   :  { %v4067_v34 = vsel %vm2910_vm14, %v4060_v37, %v4066_v49 }
0x39cd   :  { %v9000_v23 = vsel %vm3793_vm15, %v4067_v34, %v8663_v30 }
0x39ce   :  { %v4081_v12 = vrot.slane %v9000_v23, %v8048_v51  ;;  %v4074_v28 = vcombine.high %v9000_v23, %v9000_v23 }
0x39d0   :  { %v4097_v40 = vrot.slane %v4081_v12, %v8048_v51  ;;  %v4089_v44 = vcombine.high %v4081_v12, %v4081_v12  ;;  %v4088_v38 = vrot.slane %v4074_v28, %v8048_v51 }
0x39d2   :  { %v4126_v43 = vrot.slane %v4097_v40, %v7515_v11  ;;  %v4119_v20 = vcombine.high %v4097_v40, %v4097_v40  ;;  %v4111_v19 = vrot.slane %v4089_v44, %v8048_v51  ;;  %v4104_v15 = vrot.slane %v4088_v38, %v8048_v51 }
0x39d3   :  { %v4090_v16 = vcombine.high %v4088_v38, %v4088_v38 }
0x39d4   :  { %v9012_v30 = vadd.f32 %v8679_v41, %v4126_v43  ;;  %v9015_v50 = vadd.f32 %v8687_v61, %v4126_v43  ;;  %v4134_v25 = vrot.slane %v4119_v20, %v7515_v11  ;;  %v4130_v42 = vrot.slane %v4111_v19, %v7515_v11 }
0x39d5   :  { %v4142_v22 = vrot.slane %v4104_v15, %v7515_v11  ;;  %v4121_v36 = vcombine.high %v4111_v19, %v4111_v19  ;;  %v4118_v39 = vrot.slane %v4090_v16, %v8048_v51  ;;  %v4120_v63 = vcombine.high %v4104_v15, %v4104_v15 }
0x39d6   :  { %v4182_v35 = vsel %vm2435_vm4, %v9012_v30, -inf  ;;  %v4179_v59 = vsel %vm2431_vm5, %v9015_v50, -inf  ;;  %v9025_v53 = vadd.f32 %v8679_v41, %v4134_v25  ;;  %v9028_v58 = vadd.f32 %v8687_v61, %v4130_v42 }
0x39d7   :  { %4183 = vmax.xlane.f32.xlu0 %v4182_v35  ;;  %4180 = vmax.xlane.f32.xlu1 %v4179_v59  ;;  %v9031_v10 = vadd.f32 %v8679_v41, %v4130_v42  ;;  %v9039_v26 = vadd.f32 %v8679_v41, %v4142_v22  ;;  %v4138_v47 = vrot.slane %v4121_v36, %v7515_v11 }
0x39d8   :  { %v4194_v2 = vsel %vm2435_vm4, %v9025_v53, -inf  ;;  %v4185_v46 = vsel %vm2431_vm5, %v9028_v58, -inf  ;;  %v9043_v21 = vadd.f32 %v8687_v61, %v4134_v25  ;;  %v4146_v55 = vrot.slane %v4118_v39, %v7515_v11 }
0x39d9   :  { %v4188_v60 = vsel %vm2435_vm4, %v9031_v10, -inf  ;;  %v4206_v24 = vsel %vm2435_vm4, %v9039_v26, -inf  ;;  %v9050_v32 = vadd.f32 %v8679_v41, %v4138_v47  ;;  %v9056_v4 = vadd.f32 %v8687_v61, %v4142_v22 }
0x39da   :  { %v4191_v52 = vsel %vm2431_vm5, %v9043_v21, -inf  ;;  %v9061_v37 = vadd.f32 %v8679_v41, %v4146_v55  ;;  %v4150_v34 = vrot.slane %v4120_v63, %v7515_v11  ;;  %v4122_v12 = vcombine.high %v4118_v39, %v4118_v39  ;;  %v9105_v39 = vpop.permute.xlu0 %4383 }
0x39db   :  { %4195 = vmax.xlane.f32.xlu0 %v4194_v2  ;;  %4186 = vmax.xlane.f32.xlu1 %v4185_v46  ;;  %v4200_v49 = vsel %vm2435_vm4, %v9050_v32, -inf  ;;  %v4203_v28 = vsel %vm2431_vm5, %v9056_v4, -inf  ;;  %v9069_v44 = vadd.f32 %v8687_v61, %v4138_v47  ;;  %v9080_v15 = vadd.f32 %v8687_v61, %v4146_v55 }
0x39dc   :  { %v4212_v40 = vsel %vm2435_vm4, %v9061_v37, -inf  ;;  %v9072_v38 = vadd.f32 %v8679_v41, %v4150_v34  ;;  %v4154_v43 = vrot.slane %v4122_v12, %v7515_v11  ;;  %v9090_v36 = vadd.f32 %v8687_v61, %v4150_v34 }
0x39dd   :  { %v4197_v20 = vsel %vm2431_vm5, %v9069_v44, -inf  ;;  %v4209_v42 = vsel %vm2431_vm5, %v9080_v15, -inf  ;;  %v9102_v59 = vrot.slane %v8928_v3, %v8256_v33 }
0x39de   :  { %v4218_v19 = vsel %vm2435_vm4, %v9072_v38, -inf  ;;  %v9083_v25 = vadd.f32 %v8679_v41, %v4154_v43  ;;  %v4215_v16 = vsel %vm2431_vm5, %v9090_v36, -inf  ;;  %v9095_v35 = vadd.f32 %v8687_v61, %v4154_v43  ;;  %v9107_v2 = vpop.permute.xlu0 %4407 }
0x39df   :  { %4189 = vmax.xlane.f32.xlu1 %v4188_v60  ;;  %4207 = vmax.xlane.f32.xlu0 %v4206_v24 }
0x39e0   :  { %v4224_v22 = vsel %vm2435_vm4, %v9083_v25, -inf  ;;  %v4221_v41 = vsel %vm2431_vm5, %v9095_v35, -inf }
0x39e2   :  { %v9109_v46 = vpop.permute.xlu0 %4419 }
0x39e3   :  { %4192 = vmax.xlane.f32.xlu1 %v4191_v52  ;;  %4201 = vmax.xlane.f32.xlu0 %v4200_v49 }
0x39e6   :  { %v9111_v61 = vpop.permute.xlu0 %4431 }
0x39e7   :  { %4204 = vmax.xlane.f32.xlu1 %v4203_v28  ;;  %4213 = vmax.xlane.f32.xlu0 %v4212_v40 }
0x39ea   :  { %v9113_v47 = vpop.permute.xlu0 %4443 }
0x39eb   :  { %4198 = vmax.xlane.f32.xlu1 %v4197_v20  ;;  %4219 = vmax.xlane.f32.xlu0 %v4218_v19 }
0x39ef   :  { %4210 = vmax.xlane.f32.xlu1 %v4209_v42  ;;  %4225 = vmax.xlane.f32.xlu0 %v4224_v22 }
0x39f3   :  { %4216 = vmax.xlane.f32.xlu1 %v4215_v16 }
0x39f7   :  { %4222 = vmax.xlane.f32.xlu1 %v4221_v41 }
0x3a05   :  { %4455 = vbcast.lane.b32.xlu0 %v8948_v8, 263 }
0x3a08   :  { %4463 = vbcast.lane.b32.xlu1 %v9102_v59, 511 }
0x3a64   :  { %v9115_v63 = vpop.xlane.xlu1 %4180  ;;  %v9117_v60 = vpop.xlane.xlu0 %4183 }
0x3a65   :  { %v4227_v8 = vsub.f32 %v9015_v50, %v9115_v63  ;;  %v4228_v24 = vsub.f32 %v9012_v30, %v9117_v60 }
0x3a67   :  { %v4243_v55 = vmul.f32 1.442695, %v4227_v8  ;;  %v4245_v52 = vmul.f32 1.442695, %v4228_v24 }
0x3a68   :  { %v9123_v49 = vpop.xlane.xlu1 %4186  ;;  %v9125_v34 = vpop.xlane.xlu0 %4195 }
0x3a69   :  { %7143 = vpow2.f32 %v4243_v55  ;;  %v4229_v12 = vsub.f32 %v9028_v58, %v9123_v49  ;;  %v4232_v40 = vsub.f32 %v9025_v53, %v9125_v34 }
0x3a6a   :  { %7145 = vpow2.f32 %v4245_v52 }
0x3a6b   :  { %v4247_v28 = vmul.f32 1.442695, %v4229_v12  ;;  %v4253_v20 = vmul.f32 1.442695, %v4232_v40 }
0x3a6c   :  { %v9131_v43 = vpop.xlane.xlu1 %4189  ;;  %v9133_v50 = vpop.xlane.xlu0 %4207 }
0x3a6d   :  { %7147 = vpow2.f32 %v4247_v28  ;;  %v4230_v30 = vsub.f32 %v9031_v10, %v9131_v43  ;;  %v4236_v42 = vsub.f32 %v9039_v26, %v9133_v50 }
0x3a6f   :  { %v4249_v19 = vmul.f32 1.442695, %v4230_v30  ;;  %v4261_v41 = vmul.f32 1.442695, %v4236_v42 }
0x3a70   :  { %v9139_v22 = vpop.xlane.xlu1 %4192  ;;  %v9141_v58 = vpop.xlane.xlu0 %4201 }
0x3a71   :  { %7149 = vpow2.f32 %v4249_v19  ;;  %v4231_v53 = vsub.f32 %v9043_v21, %v9139_v22  ;;  %v4234_v10 = vsub.f32 %v9050_v32, %v9141_v58 }
0x3a72   :  { %7151 = vpow2.f32 %v4253_v20 }
0x3a73   :  { %v7144_v16 = vpop.eup %7143  ;;  %v4251_v8 = vmul.f32 1.442695, %v4231_v53  ;;  %v4257_v40 = vmul.f32 1.442695, %v4234_v10 }
0x3a74   :  { %v7146_v24 = vpop.eup %7145  ;;  %v9147_v55 = vpop.xlane.xlu1 %4204  ;;  %v4275_v26 = vsel %vm2431_vm5, %v7144_v16, 0.0 }
0x3a75   :  { %v9149_v52 = vpop.xlane.xlu0 %4213  ;;  %7153 = vpow2.f32 %v4251_v8  ;;  %v4235_v12 = vsub.f32 %v9056_v4, %v9147_v55  ;;  %4276 = vadd.xlane.f32.xlu1 %v4275_v26  ;;  %v4278_v21 = vsel %vm2435_vm4, %v7146_v24, 0.0 }
0x3a76   :  { %4279 = vadd.xlane.f32.xlu0 %v4278_v21  ;;  %7155 = vpow2.f32 %v4261_v41  ;;  %v4238_v32 = vsub.f32 %v9061_v37, %v9149_v52 }
0x3a77   :  { %v7148_v28 = vpop.eup %7147  ;;  %v4259_v30 = vmul.f32 1.442695, %v4235_v12 }
0x3a78   :  { %v9157_v20 = vpop.xlane.xlu1 %4198  ;;  %v4281_v42 = vsel %vm2431_vm5, %v7148_v28, 0.0  ;;  %v4265_v16 = vmul.f32 1.442695, %v4238_v32 }
0x3a79   :  { %v9159_v19 = vpop.xlane.xlu0 %4219  ;;  %7157 = vpow2.f32 %v4259_v30  ;;  %v4233_v4 = vsub.f32 %v9069_v44, %v9157_v20  ;;  %4282 = vadd.xlane.f32.xlu1 %v4281_v42 }
0x3a7a   :  { %7159 = vpow2.f32 %v4257_v40  ;;  %v4240_v8 = vsub.f32 %v9072_v38, %v9159_v19 }
0x3a7b   :  { %v7150_v53 = vpop.eup %7149  ;;  %v4255_v41 = vmul.f32 1.442695, %v4233_v4 }
0x3a7c   :  { %v9166_v10 = vpop.xlane.xlu1 %4210  ;;  %v4284_v24 = vsel %vm2435_vm4, %v7150_v53, 0.0  ;;  %v7152_v26 = vpop.eup %7151  ;;  %v4269_v21 = vmul.f32 1.442695, %v4240_v8 }
0x3a7d   :  { %v9168_v37 = vpop.xlane.xlu0 %4225  ;;  %7161 = vpow2.f32 %v4255_v41  ;;  %v4237_v12 = vsub.f32 %v9080_v15, %v9166_v10  ;;  %4285 = vadd.xlane.f32.xlu0 %v4284_v24  ;;  %v4290_v32 = vsel %vm2435_vm4, %v7152_v26, 0.0 }
0x3a7e   :  { %7163 = vpow2.f32 %v4265_v16  ;;  %v4242_v40 = vsub.f32 %v9083_v25, %v9168_v37 }
0x3a7f   :  { %v7154_v44 = vpop.eup %7153  ;;  %v4263_v28 = vmul.f32 1.442695, %v4237_v12 }
0x3a80   :  { %v9175_v38 = vpop.xlane.xlu1 %4216  ;;  %v4287_v30 = vsel %vm2431_vm5, %v7154_v44, 0.0  ;;  %v7156_v42 = vpop.eup %7155  ;;  %v4273_v53 = vmul.f32 1.442695, %v4242_v40 }
0x3a81   :  { %7165 = vpow2.f32 %v4263_v28  ;;  %v4239_v4 = vsub.f32 %v9090_v36, %v9175_v38  ;;  %4288 = vadd.xlane.f32.xlu1 %v4287_v30  ;;  %4291 = vadd.xlane.f32.xlu0 %v4290_v32  ;;  %v4302_v8 = vsel %vm2435_vm4, %v7156_v42, 0.0 }
0x3a82   :  { %7167 = vpow2.f32 %v4269_v21 }
0x3a83   :  { %v7158_v15 = vpop.eup %7157  ;;  %v4267_v16 = vmul.f32 1.442695, %v4239_v4 }
0x3a84   :  { %v9181_v41 = vpop.xlane.xlu1 %4222  ;;  %v4299_v25 = vsel %vm2431_vm5, %v7158_v15, 0.0  ;;  %v7160_v24 = vpop.eup %7159 }
0x3a85   :  { %7169 = vpow2.f32 %v4267_v16  ;;  %v4241_v26 = vsub.f32 %v9095_v35, %v9181_v41  ;;  %4300 = vadd.xlane.f32.xlu1 %v4299_v25  ;;  %4303 = vadd.xlane.f32.xlu0 %v4302_v8  ;;  %v4296_v21 = vsel %vm2435_vm4, %v7160_v24, 0.0  ;;  %v10273_v24 = vld [vmem:[#allocation3_spill] sm:$0xff] }
0x3a86   :  { %7171 = vpow2.f32 %v4273_v53 }
0x3a87   :  { %v7162_v36 = vpop.eup %7161  ;;  %v4271_v12 = vmul.f32 1.442695, %v4241_v26  ;;  %v10274_v26 = vld [vmem:[#allocation8_spill] sm:$0xff] }
0x3a88   :  { %v4293_v44 = vsel %vm2431_vm5, %v7162_v36, 0.0  ;;  %v7164_v28 = vpop.eup %7163  ;;  %v9197_v36 = vadd.f32 %v10274_v26, %v10273_v24 }
0x3a89   :  { %7173 = vpow2.f32 %v4271_v12  ;;  %4294 = vadd.xlane.f32.xlu1 %v4293_v44  ;;  %4297 = vadd.xlane.f32.xlu0 %v4296_v21  ;;  %v4308_v32 = vsel %vm2435_vm4, %v7164_v28, 0.0  ;;  %v2272_v44 = vld [vmem:[%s10252_s5 + $0x20] sm:$0xff]  ;;  %v9206_v28 = vpop.permute.xlu1 %4463 }
0x3a8a   :  { %7175 = vtanh.f32 %v9197_v36  ;;  %v4070_v21 = vsel %vm2277_vm6, %v2272_v44, 0.0 }
0x3a8b   :  { %v7166_v40 = vpop.eup %7165 }
0x3a8c   :  { %v4305_v30 = vsel %vm2431_vm5, %v7166_v40, 0.0  ;;  %v7168_v42 = vpop.eup %7167  ;;  %v9208_v40 = vpop.permute.xlu0 %4455 }
0x3a8d   :  { %4306 = vadd.xlane.f32.xlu1 %v4305_v30  ;;  %4309 = vadd.xlane.f32.xlu0 %v4308_v32  ;;  %v4314_v15 = vsel %vm2435_vm4, %v7168_v42, 0.0 }
0x3a8f   :  { %v7170_v35 = vpop.eup %7169 }
0x3a90   :  { %v4311_v4 = vsel %vm2431_vm5, %v7170_v35, 0.0  ;;  %v7172_v53 = vpop.eup %7171 }
0x3a91   :  { %4312 = vadd.xlane.f32.xlu1 %v4311_v4  ;;  %4315 = vadd.xlane.f32.xlu0 %v4314_v15  ;;  %v4320_v8 = vsel %vm2435_vm4, %v7172_v53, 0.0 }
0x3a93   :  { %v7174_v16 = vpop.eup %7173 }
0x3a94   :  { %v4317_v25 = vsel %vm2431_vm5, %v7174_v16, 0.0  ;;  %v7176_v12 = vpop.eup %7175 }
0x3a95   :  { %4318 = vadd.xlane.f32.xlu1 %v4317_v25  ;;  %4321 = vadd.xlane.f32.xlu0 %v4320_v8 }
0x3aa6   :  { %2069 = vrot.lane.b32.xlu1 %v7176_v12, %s7426_s11 }
0x3aab   :  { %4467 = vbcast.lane.b32.xlu0 %v9102_v59, 263 }
0x3aca   :  { %4071 = vadd.xlane.f32.xlu0 %v4070_v21 }
0x3b02   :  { %v4277_v30 = vpop.xlane.xlu1 %4276 }
0x3b03   :  { %7177 = vlog2.f32 %v4277_v30  ;;  %v4280_v32 = vpop.xlane.xlu0 %4279 }
0x3b04   :  { %7179 = vlog2.f32 %v4280_v32 }
0x3b06   :  { %v4283_v42 = vpop.xlane.xlu1 %4282 }
0x3b07   :  { %7181 = vlog2.f32 %v4283_v42 }
0x3b0a   :  { %v4286_v35 = vpop.xlane.xlu0 %4285 }
0x3b0b   :  { %7183 = vlog2.f32 %v4286_v35 }
0x3b0d   :  { %v7178_v59 = vpop.eup %7177 }
0x3b0e   :  { %v7180_v4 = vpop.eup %7179  ;;  %v4324_v15 = vmul.f32 0.6931472, %v7178_v59  ;;  %v4289_v53 = vpop.xlane.xlu1 %4288 }
0x3b0f   :  { %v4292_v16 = vpop.xlane.xlu0 %4291  ;;  %v4326_v25 = vmul.f32 0.6931472, %v7180_v4  ;;  %7185 = vlog2.f32 %v4289_v53 }
0x3b10   :  { %v4355_v8 = vadd.f32 %v4324_v15, %v9115_v63  ;;  %7187 = vlog2.f32 %v4292_v16 }
0x3b11   :  { %v7182_v24 = vpop.eup %7181  ;;  %v4356_v26 = vadd.f32 %v4326_v25, %v9117_v60 }
0x3b12   :  { %v4328_v12 = vmul.f32 0.6931472, %v7182_v24  ;;  %v4301_v44 = vpop.xlane.xlu1 %4300  ;;  %v4485_v30 = vadd.f32 %v8952_v9, %v4355_v8 }
0x3b13   :  { %v4304_v21 = vpop.xlane.xlu0 %4303  ;;  %7189 = vlog2.f32 %v4301_v44  ;;  %v4486_v32 = vadd.f32 %v9105_v39, %v4356_v26 }
0x3b14   :  { %v4357_v42 = vadd.f32 %v4328_v12, %v9123_v49  ;;  %7191 = vlog2.f32 %v4304_v21  ;;  %4520 = vperm.xlu0 %6692, %v4485_v30   ;;  %v6468_v30 = vmul.f32 -1.442695, %v9197_v36 }
0x3b15   :  { %v7184_v35 = vpop.eup %7183  ;;  %4523 = vperm.xlu1 %6691, %v4486_v32  }
0x3b16   :  { %v4330_v59 = vmul.f32 0.6931472, %v7184_v35  ;;  %v4295_v63 = vpop.xlane.xlu1 %4294  ;;  %v4487_v15 = vadd.f32 %v8954_v45, %v4357_v42 }
0x3b17   :  { %v4298_v4 = vpop.xlane.xlu0 %4297  ;;  %7193 = vlog2.f32 %v4295_v63 }
0x3b18   :  { %v4358_v60 = vadd.f32 %v4330_v59, %v9131_v43  ;;  %4526 = vperm.xlu0 %6692, %v4487_v15   ;;  %7195 = vlog2.f32 %v4298_v4 }
0x3b19   :  { %v7186_v53 = vpop.eup %7185 }
0x3b1a   :  { %v7188_v9 = vpop.eup %7187  ;;  %v4332_v16 = vmul.f32 0.6931472, %v7186_v53  ;;  %v4488_v49 = vadd.f32 %v8956_v13, %v4358_v60  ;;  %v4307_v8 = vpop.xlane.xlu1 %4306 }
0x3b1b   :  { %v4310_v39 = vpop.xlane.xlu0 %4309  ;;  %v4334_v25 = vmul.f32 0.6931472, %v7188_v9  ;;  %7197 = vlog2.f32 %v4307_v8 }
0x3b1c   :  { %v4359_v24 = vadd.f32 %v4332_v16, %v9139_v22  ;;  %4529 = vperm.xlu1 %6691, %v4488_v49  }
0x3b1d   :  { %v7190_v26 = vpop.eup %7189  ;;  %v4360_v12 = vadd.f32 %v4334_v25, %v9125_v34 }
0x3b1e   :  { %v7192_v45 = vpop.eup %7191  ;;  %v4340_v44 = vmul.f32 0.6931472, %v7190_v26  ;;  %v4489_v21 = vadd.f32 %v8958_v5, %v4359_v24  ;;  %v4313_v63 = vpop.xlane.xlu1 %4312 }
0x3b1f   :  { %v4316_v43 = vpop.xlane.xlu0 %4315  ;;  %v4342_v32 = vmul.f32 0.6931472, %v7192_v45  ;;  %v4490_v42 = vadd.f32 %v9107_v2, %v4360_v12 }
0x3b20   :  { %v4363_v13 = vadd.f32 %v4340_v44, %v9147_v55  ;;  %7199 = vlog2.f32 %v4316_v43  ;;  %4532 = vperm.xlu0 %6692, %v4489_v21  }
0x3b21   :  { %v7194_v22 = vpop.eup %7193  ;;  %4535 = vperm.xlu1 %6691, %v4490_v42   ;;  %7201 = vlog2.f32 %v4310_v39  ;;  %v4364_v35 = vadd.f32 %v4342_v32, %v9133_v50 }
0x3b22   :  { %v4493_v34 = vadd.f32 %v8962_v56, %v4363_v13  ;;  %7203 = vpow2.f32 %v6468_v30  ;;  %v4336_v59 = vmul.f32 0.6931472, %v7194_v22  ;;  %v7196_v5 = vpop.eup %7195  ;;  %v4319_v9 = vpop.xlane.xlu1 %4318 }
0x3b23   :  { %7205 = vlog2.f32 %v4313_v63  ;;  %v4338_v2 = vmul.f32 0.6931472, %v7196_v5  ;;  %v4494_v55 = vadd.f32 %v9111_v61, %v4364_v35  ;;  %v4322_v61 = vpop.xlane.xlu0 %4321 }
0x3b24   :  { %v4361_v36 = vadd.f32 %v4336_v59, %v9157_v20  ;;  %7207 = vlog2.f32 %v4319_v9 }
0x3b25   :  { %4544 = vperm.xlu1 %6691, %v4493_v34   ;;  %v7198_v4 = vpop.eup %7197  ;;  %v4362_v60 = vadd.f32 %v4338_v2, %v9141_v58  ;;  %7209 = vlog2.f32 %v4322_v61 }
0x3b26   :  { %v4344_v53 = vmul.f32 0.6931472, %v7198_v4  ;;  %v4491_v50 = vadd.f32 %v8960_v29, %v4361_v36  ;;  %v2070_v21 = vpop.permute.xlu1 %2069 }
0x3b27   :  { %v4492_v8 = vadd.f32 %v9109_v46, %v4362_v60  ;;  %v4468_v42 = vpop.permute.xlu0 %4467 }
0x3b28   :  { %v4365_v20 = vadd.f32 %v4344_v53, %v9166_v10 }
0x3b29   :  { %4547 = vperm.xlu1 %6691, %v4494_v55  }
0x3b2a   :  { %v7200_v15 = vpop.eup %7199 }
0x3b2b   :  { %v4350_v56 = vmul.f32 0.6931472, %v7200_v15  ;;  %v7202_v16 = vpop.eup %7201 }
0x3b2c   :  { %v7204_v39 = vpop.eup %7203  ;;  %v4346_v25 = vmul.f32 0.6931472, %v7202_v16 }
0x3b2d   :  { %v4368_v49 = vadd.f32 %v4350_v56, %v9159_v19  ;;  %4538 = vperm.xlu1 %6691, %v4491_v50   ;;  %v7206_v58 = vpop.eup %7205  ;;  %v2063_v26 = vadd.f32 1.0, %v7204_v39  ;;  %v4495_v19 = vadd.f32 %v8971_v62, %v4365_v20  ;;  %v10275_v56 = vld [vmem:[#allocation6_spill] sm:$0xff] }
0x3b2e   :  { %v4366_v29 = vadd.f32 %v4346_v25, %v9149_v52  ;;  %v4348_v12 = vmul.f32 0.6931472, %v7206_v58  ;;  %v7208_v44 = vpop.eup %7207 }
0x3b2f   :  { %v4498_v24 = vadd.f32 %v9208_v40, %v4368_v49  ;;  %7211 = vrcp.f32 %v2063_v26  ;;  %v4352_v46 = vmul.f32 0.6931472, %v7208_v44  ;;  %v7210_v43 = vpop.eup %7209 }
0x3b30   :  { %v4367_v10 = vadd.f32 %v4348_v12, %v9175_v38  ;;  %v4496_v45 = vadd.f32 %v9113_v47, %v4366_v29  ;;  %v4354_v32 = vmul.f32 0.6931472, %v7210_v43 }
0x3b31   :  { %4541 = vperm.xlu1 %6691, %v4492_v8   ;;  %4559 = vperm.xlu0 %6692, %v4498_v24   ;;  %v4369_v52 = vadd.f32 %v4352_v46, %v9181_v41 }
0x3b32   :  { %v4497_v40 = vadd.f32 %v8982_v54, %v4367_v10  ;;  %v4370_v38 = vadd.f32 %v4354_v32, %v9168_v37 }
0x3b33   :  { %v4499_v47 = vadd.f32 %v9206_v28, %v4369_v52 }
0x3b34   :  { %v4500_v13 = vadd.f32 %v4468_v42, %v4370_v38 }
0x3b35   :  { %4550 = vperm.xlu1 %6691, %v4495_v19  }
0x3b39   :  { %4553 = vperm.xlu1 %6691, %v4496_v45   ;;  %v9239_v30 = vpop.eup %7211 }
0x3b3a   :  { %v2072_v62 = vmul.f32 %v9239_v30, %v2070_v21  ;;  %v2067_v9 = vmul.f32 %v9239_v30, %v10275_v56 }
0x3b3d   :  { %4556 = vperm.xlu1 %6691, %v4497_v40  }
0x3b41   :  { %2074 = vrot.lane.b32.xlu1 %v2072_v62, %s7427_s12 }
0x3b45   :  { %4562 = vperm.xlu1 %6691, %v4499_v47  }
0x3b49   :  { %4565 = vperm.xlu1 %6691, %v4500_v13  }
0x3b57   :  { %v4072_v63 = vpop.xlane.xlu0 %4071 }
0x3b58   :  { %vm4371_vm0 = vcmp.gt.f32.partialorder %v4072_v63, 0.5 }
0x3b93   :  { %v4521_v36 = vpop.permute.xlu0 %4520 }
0x3b94   :  { %v4524_v54 = vpop.permute.xlu1 %4523  ;;  %v4570_v16 = vrot.slane %v4521_v36, %v8322_v7 }
0x3b95   :  { %v4574_v50 = vrot.slane %v4524_v54, %v8319_v18 }
0x3b97   :  { %v4527_v55 = vpop.permute.xlu0 %4526  ;;  %v4575_v58 = vsel %vm2833_vm7, %v4574_v50, %v4570_v16  ;;  %v9310_v16 = vld [vmem:[%s10251_s4 + $0x28] sm:$0x7] }
0x3b98   :  { %v4579_v39 = vrot.slane %v4527_v55, %v8322_v7 }
0x3b9b   :  { %v4530_v22 = vpop.permute.xlu1 %4529 }
0x3b9c   :  { %v4583_v28 = vrot.slane %v4530_v22, %v8319_v18 }
0x3b9e   :  { %v4584_v25 = vsel %vm2833_vm7, %v4583_v28, %v4579_v39 }
0x3b9f   :  { %v4533_v15 = vpop.permute.xlu0 %4532  ;;  %v4639_v19 = vsel %vm2898_vm8, %v4584_v25, %v4575_v58 }
0x3ba0   :  { %v4536_v34 = vpop.permute.xlu1 %4535  ;;  %v4588_v53 = vrot.slane %v4533_v15, %v8322_v7 }
0x3ba1   :  { %v4592_v60 = vrot.slane %v4536_v34, %v8319_v18 }
0x3ba3   :  { %v4593_v24 = vsel %vm2833_vm7, %v4592_v60, %v4588_v53 }
0x3ba4   :  { %v4545_v35 = vpop.permute.xlu1 %4544  ;;  %v4640_v46 = vsel %vm2900_vm9, %v4593_v24, %v4639_v19 }
0x3ba5   :  { %v4606_v43 = vrot.slane %v4545_v35, %v8322_v7 }
0x3ba8   :  { %v4548_v59 = vpop.permute.xlu1 %4547 }
0x3ba9   :  { %v4610_v10 = vrot.slane %v4548_v59, %v8319_v18 }
0x3bab   :  { %v4611_v62 = vsel %vm2833_vm7, %v4610_v10, %v4606_v43 }
0x3bac   :  { %v4539_v41 = vpop.permute.xlu1 %4538 }
0x3bad   :  { %v4597_v61 = vrot.slane %v4539_v41, %v8322_v7 }
0x3bb0   :  { %v4542_v5 = vpop.permute.xlu1 %4541  ;;  %v4560_v29 = vpop.permute.xlu0 %4559 }
0x3bb1   :  { %v4601_v49 = vrot.slane %v4542_v5, %v8319_v18  ;;  %v4628_v52 = vrot.slane %v4560_v29, %v8319_v18 }
0x3bb3   :  { %v4602_v26 = vsel %vm2833_vm7, %v4601_v49, %v4597_v61 }
0x3bb4   :  { %v4551_v2 = vpop.permute.xlu1 %4550  ;;  %v4641_v21 = vsel %vm2902_vm10, %v4602_v26, %v4640_v46 }
0x3bb5   :  { %v4615_v40 = vrot.slane %v4551_v2, %v8322_v7  ;;  %v4642_v42 = vsel %vm2904_vm11, %v4611_v62, %v4641_v21 }
0x3bb8   :  { %v4554_v4 = vpop.permute.xlu1 %4553 }
0x3bb9   :  { %v4619_v12 = vrot.slane %v4554_v4, %v8319_v18 }
0x3bbb   :  { %v4620_v32 = vsel %vm2833_vm7, %v4619_v12, %v4615_v40 }
0x3bbc   :  { %v4557_v37 = vpop.permute.xlu1 %4556  ;;  %v4643_v22 = vsel %vm2906_vm12, %v4620_v32, %v4642_v42 }
0x3bbd   :  { %v4624_v45 = vrot.slane %v4557_v37, %v8322_v7 }
0x3bbf   :  { %v4629_v38 = vsel %vm2833_vm7, %v4628_v52, %v4624_v45 }
0x3bc0   :  { %v2075_v20 = vpop.permute.xlu1 %2074  ;;  %v4644_v34 = vsel %vm2908_vm13, %v4629_v38, %v4643_v22 }
0x3bc1   :  { %v2077_v8 = vadd.f32 %v2075_v20, %v2067_v9 }
0x3bc3   :  { %7213 = vtanh.f32 %v2077_v8 }
0x3bc4   :  { %v4563_v44 = vpop.permute.xlu1 %4562 }
0x3bc5   :  { %v4633_v13 = vrot.slane %v4563_v44, %v8322_v7 }
0x3bc8   :  { %v4566_v47 = vpop.permute.xlu1 %4565 }
0x3bc9   :  { %v4637_v54 = vrot.slane %v4566_v47, %v8319_v18 }
0x3bcb   :  { %v4638_v35 = vsel %vm2833_vm7, %v4637_v54, %v4633_v13 }
0x3bcc   :  { %v4645_v59 = vsel %vm2910_vm14, %v4638_v35, %v4644_v34 }
0x3bcd   :  { %v7214_v41 = vpop.eup %7213  ;;  %v9280_v5 = vsel %vm4371_vm0, %v4645_v59, %v9000_v23  ;;  %v9293_v23 = vld [vmem:[%s10251_s4 + $0x20] sm:$0xff] }
0x3bce   :  { %2080 = vrot.lane.b32.xlu0 %v7214_v41, %s7427_s12  ;;  %v4659_v36 = vrot.slane %v9280_v5, %v8048_v51  ;;  %v4652_v15 = vcombine.high %v9280_v5, %v9280_v5 }
0x3bd0   :  { %v4675_v2 = vrot.slane %v4659_v36, %v8048_v51  ;;  %v4667_v63 = vcombine.high %v4659_v36, %v4659_v36  ;;  %v4666_v9 = vrot.slane %v4652_v15, %v8048_v51  ;;  %v10276_v15 = vld [vmem:[#allocation4_spill] sm:$0xff] }
0x3bd2   :  { %v4704_v55 = vrot.slane %v4675_v2, %v7515_v11  ;;  %v4689_v4 = vrot.slane %v4667_v63, %v8048_v51  ;;  %v4697_v56 = vcombine.high %v4675_v2, %v4675_v2  ;;  %v4682_v20 = vrot.slane %v4666_v9, %v8048_v51 }
0x3bd3   :  { %v4668_v25 = vcombine.high %v4666_v9, %v4666_v9 }
0x3bd4   :  { %v9296_v37 = vadd.f32 %v9293_v23, %v4704_v55  ;;  %v4708_v28 = vrot.slane %v4689_v4, %v7515_v11  ;;  %v4712_v49 = vrot.slane %v4697_v56, %v7515_v11  ;;  %v4720_v24 = vrot.slane %v4682_v20, %v7515_v11  ;;  %v10277_v56 = vld [vmem:[#allocation7_spill] sm:$0xff] }
0x3bd5   :  { %v4699_v58 = vcombine.high %v4689_v4, %v4689_v4  ;;  %v4696_v19 = vrot.slane %v4668_v25, %v8048_v51  ;;  %v4698_v46 = vcombine.high %v4682_v20, %v4682_v20  ;;  %v9337_v40 = vadd.f32 %v9310_v16, %v4704_v55  ;;  %v10278_v25 = vld [vmem:[#allocation5_spill] sm:$0xff] }
0x3bd6   :  { %v4757_v60 = vsel %vm2431_vm5, %v9296_v37, -inf  ;;  %v9302_v53 = vadd.f32 %v9293_v23, %v4708_v28  ;;  %v9313_v39 = vadd.f32 %v9310_v16, %v4708_v28  ;;  %v9320_v8 = vadd.f32 %v9310_v16, %v4712_v49 }
0x3bd7   :  { %4758 = vmax.xlane.f32.xlu1 %v4757_v60  ;;  %v9326_v29 = vadd.f32 %v9310_v16, %v4720_v24  ;;  %v4716_v12 = vrot.slane %v4699_v58, %v7515_v11  ;;  %v4724_v44 = vrot.slane %v4696_v19, %v7515_v11  ;;  %v4728_v52 = vrot.slane %v4698_v46, %v7515_v11 }
0x3bd8   :  { %v4763_v50 = vsel %vm2431_vm5, %v9302_v53, -inf  ;;  %v4766_v61 = vsel %vm2435_vm4, %v9313_v39, -inf  ;;  %v4772_v26 = vsel %vm2435_vm4, %v9320_v8, -inf  ;;  %v4760_v32 = vsel %vm2435_vm4, %v9337_v40, -inf }
0x3bd9   :  { %v4784_v10 = vsel %vm2435_vm4, %v9326_v29, -inf  ;;  %v9333_v45 = vadd.f32 %v9310_v16, %v4716_v12  ;;  %v9342_v21 = vadd.f32 %v9310_v16, %v4724_v44  ;;  %v9348_v62 = vadd.f32 %v9293_v23, %v4712_v49 }
0x3bda   :  { %v9353_v47 = vadd.f32 %v9310_v16, %v4728_v52  ;;  %v9358_v13 = vadd.f32 %v9293_v23, %v4720_v24  ;;  %v9365_v34 = vadd.f32 %v9293_v23, %v4716_v12  ;;  %v9370_v59 = vadd.f32 %v9293_v23, %v4724_v44 }
0x3bdb   :  { %4764 = vmax.xlane.f32.xlu1 %v4763_v50  ;;  %v4778_v43 = vsel %vm2435_vm4, %v9333_v45, -inf  ;;  %v4790_v38 = vsel %vm2435_vm4, %v9342_v21, -inf  ;;  %v4769_v42 = vsel %vm2431_vm5, %v9348_v62, -inf  ;;  %v4700_v41 = vcombine.high %v4696_v19, %v4696_v19 }
0x3bdc   :  { %v4796_v54 = vsel %vm2435_vm4, %v9353_v47, -inf  ;;  %v4781_v22 = vsel %vm2431_vm5, %v9358_v13, -inf  ;;  %v4775_v35 = vsel %vm2431_vm5, %v9365_v34, -inf  ;;  %v4787_v36 = vsel %vm2431_vm5, %v9370_v59, -inf }
0x3bdd   :  { %v9375_v2 = vadd.f32 %v9293_v23, %v4728_v52  ;;  %v4732_v63 = vrot.slane %v4700_v41, %v7515_v11  ;;  %v9389_v60 = vadd.f32 %v8883_v48, %v7998_v31 }
0x3bdf   :  { %4767 = vmax.xlane.f32.xlu1 %v4766_v61  ;;  %v4793_v55 = vsel %vm2431_vm5, %v9375_v2, -inf  ;;  %v9381_v4 = vadd.f32 %v9293_v23, %v4732_v63  ;;  %v4954_v9 = vrot.slane %v9389_v60, %v7515_v11  ;;  %v4966_v50 = vrot.slane %v9389_v60, %v7774_v1 }
0x3be0   :  { %v4978_v49 = vrot.slane %v9389_v60, %v8008_v6  ;;  %v4990_v20 = vrot.slane %v9389_v60, %v8017_v27  ;;  %v5002_v48 = vrot.slane %v9389_v60, %v8022_v14  ;;  %v5014_v61 = vrot.slane %v9389_v60, %v8027_v57 }
0x3be1   :  { %v4799_v28 = vsel %vm2431_vm5, %v9381_v4, -inf  ;;  %v5026_v24 = vrot.slane %v9389_v60, %v8148_v0  ;;  %v9412_v12 = vadd.f32 %v9310_v16, %v4732_v63 }
0x3be3   :  { %4773 = vmax.xlane.f32.xlu1 %v4772_v26  ;;  %v4802_v19 = vsel %vm2435_vm4, %v9412_v12, -inf }
0x3be7   :  { %4785 = vmax.xlane.f32.xlu1 %v4784_v10 }
0x3beb   :  { %4779 = vmax.xlane.f32.xlu1 %v4778_v43 }
0x3bed   :  { %4761 = vmax.xlane.f32.xlu0 %v4760_v32 }
0x3bef   :  { %4791 = vmax.xlane.f32.xlu1 %v4790_v38 }
0x3bf1   :  { %4770 = vmax.xlane.f32.xlu0 %v4769_v42 }
0x3bf3   :  { %4797 = vmax.xlane.f32.xlu1 %v4796_v54 }
0x3bf5   :  { %4782 = vmax.xlane.f32.xlu0 %v4781_v22 }
0x3bf9   :  { %4776 = vmax.xlane.f32.xlu0 %v4775_v35 }
0x3bfd   :  { %4788 = vmax.xlane.f32.xlu0 %v4787_v36 }
0x3c01   :  { %4794 = vmax.xlane.f32.xlu0 %v4793_v55 }
0x3c04   :  { %1304 = vrot.lane.b32.xlu1 %v10276_v15, %s7430_s15 }
0x3c05   :  { %4800 = vmax.xlane.f32.xlu0 %v4799_v28 }
0x3c08   :  { %2002 = vrot.lane.b32.xlu1 %v10277_v56, %s7429_s14 }
0x3c0c   :  { %4957 = vbcast.lane.b32.xlu1 %v4954_v9, 511 }
0x3c10   :  { %4969 = vbcast.lane.b32.xlu1 %v4966_v50, 511 }
0x3c14   :  { %4981 = vbcast.lane.b32.xlu1 %v4978_v49, 511 }
0x3c18   :  { %4993 = vbcast.lane.b32.xlu1 %v4990_v20, 511 }
0x3c1b   :  { %1421 = vrot.lane.b32.xlu0 %v10278_v25, %s7430_s15 }
0x3c1c   :  { %5005 = vbcast.lane.b32.xlu1 %v5002_v48, 511 }
0x3c20   :  { %5017 = vbcast.lane.b32.xlu1 %v5014_v61, 511 }
0x3c24   :  { %5029 = vbcast.lane.b32.xlu1 %v5026_v24, 511 }
0x3c40   :  { %v2081_v58 = vpop.permute.xlu0 %2080 }
0x3c41   :  { %v2083_v26 = vmul.f32 %v9239_v30, %v2081_v58 }
0x3c43   :  { %2112 = vrot.lane.b32.xlu0 %v2083_v26, %s7429_s14 }
0x3c47   :  { %4961 = vbcast.lane.b32.xlu0 %v4954_v9, 263 }
0x3c48   :  { %4803 = vmax.xlane.f32.xlu1 %v4802_v19 }
0x3c4b   :  { %4973 = vbcast.lane.b32.xlu0 %v4966_v50, 263 }
0x3c4f   :  { %4985 = vbcast.lane.b32.xlu0 %v4978_v49, 263 }
0x3c53   :  { %4997 = vbcast.lane.b32.xlu0 %v4990_v20, 263 }
0x3c57   :  { %5009 = vbcast.lane.b32.xlu0 %v5002_v48, 263 }
0x3c5b   :  { %5021 = vbcast.lane.b32.xlu0 %v5014_v61, 263 }
0x3c5f   :  { %5033 = vbcast.lane.b32.xlu0 %v5026_v24, 263 }
0x3c64   :  { %v9416_v10 = vpop.xlane.xlu1 %4758 }
0x3c65   :  { %v4805_v30 = vsub.f32 %v9296_v37, %v9416_v10 }
0x3c67   :  { %v4821_v44 = vmul.f32 1.442695, %v4805_v30 }
0x3c68   :  { %v9420_v46 = vpop.xlane.xlu1 %4764 }
0x3c69   :  { %7215 = vpow2.f32 %v4821_v44  ;;  %v4807_v35 = vsub.f32 %v9302_v53, %v9420_v46 }
0x3c6c   :  { %v9422_v43 = vpop.xlane.xlu1 %4767 }
0x3c6d   :  { %v4808_v55 = vsub.f32 %v9313_v39, %v9422_v43 }
0x3c6f   :  { %v4827_v50 = vmul.f32 1.442695, %v4808_v55 }
0x3c70   :  { %v9424_v52 = vpop.xlane.xlu1 %4773 }
0x3c71   :  { %v4810_v32 = vsub.f32 %v9320_v8, %v9424_v52  ;;  %v4825_v8 = vmul.f32 1.442695, %v4807_v35 }
0x3c73   :  { %v7216_v38 = vpop.eup %7215  ;;  %v4831_v42 = vmul.f32 1.442695, %v4810_v32 }
0x3c74   :  { %v9428_v54 = vpop.xlane.xlu1 %4785  ;;  %v4853_v22 = vsel %vm2431_vm5, %v7216_v38, 0.0 }
0x3c75   :  { %7217 = vpow2.f32 %v4831_v42  ;;  %4854 = vadd.xlane.f32.xlu1 %v4853_v22  ;;  %v4814_v24 = vsub.f32 %v9326_v29, %v9428_v54 }
0x3c77   :  { %v4839_v30 = vmul.f32 1.442695, %v4814_v24 }
0x3c78   :  { %v9431_v37 = vpop.xlane.xlu1 %4779 }
0x3c79   :  { %v4812_v29 = vsub.f32 %v9333_v45, %v9431_v37 }
0x3c7a   :  { %v9435_v41 = vpop.xlane.xlu0 %4761 }
0x3c7b   :  { %v4806_v36 = vsub.f32 %v9337_v40, %v9435_v41 }
0x3c7c   :  { %v9439_v63 = vpop.xlane.xlu1 %4791 }
0x3c7d   :  { %v4823_v15 = vmul.f32 1.442695, %v4806_v36 }
0x3c7e   :  { %v9443_v28 = vpop.xlane.xlu0 %4770 }
0x3c7f   :  { %v7218_v56 = vpop.eup %7217  ;;  %7219 = vpow2.f32 %v4823_v15  ;;  %v4809_v40 = vsub.f32 %v9348_v62, %v9443_v28 }
0x3c80   :  { %v9445_v9 = vpop.xlane.xlu1 %4797  ;;  %v4868_v53 = vsel %vm2435_vm4, %v7218_v56, 0.0  ;;  %7221 = vpow2.f32 %v4825_v8 }
0x3c81   :  { %4869 = vadd.xlane.f32.xlu0 %v4868_v53  ;;  %7223 = vpow2.f32 %v4827_v50  ;;  %v4829_v39 = vmul.f32 1.442695, %v4809_v40 }
0x3c82   :  { %v9450_v49 = vpop.xlane.xlu0 %4782 }
0x3c83   :  { %v4813_v48 = vsub.f32 %v9358_v13, %v9450_v49  ;;  %7225 = vpow2.f32 %v4829_v39 }
0x3c84   :  { %v1305_v20 = vpop.permute.xlu1 %1304 }
0x3c85   :  { %1307 = vst.msk [vmem:[#allocation2 + $0x38] sm:$0xff] %vm269_vm3, %v1305_v20  ;;  %v4837_v58 = vmul.f32 1.442695, %v4813_v48 }
0x3c86   :  { %v9455_v25 = vpop.xlane.xlu0 %4776 }
0x3c87   :  { %7227 = vpow2.f32 %v4837_v58  ;;  %v4811_v13 = vsub.f32 %v9365_v34, %v9455_v25  ;;  %v4835_v34 = vmul.f32 1.442695, %v4812_v29 }
0x3c88   :  { %7229 = vpow2.f32 %v4839_v30  ;;  %v2003_v50 = vpop.permute.xlu1 %2002 }
0x3c89   :  { %v7220_v61 = vpop.eup %7219  ;;  %v4833_v42 = vmul.f32 1.442695, %v4811_v13 }
0x3c8a   :  { %v9459_v62 = vpop.xlane.xlu0 %4788  ;;  %v4856_v26 = vsel %vm2435_vm4, %v7220_v61, 0.0  ;;  %v7222_v19 = vpop.eup %7221 }
0x3c8b   :  { %4857 = vadd.xlane.f32.xlu1 %v4856_v26  ;;  %v4859_v32 = vsel %vm2431_vm5, %v7222_v19, 0.0  ;;  %v7224_v38 = vpop.eup %7223  ;;  %7231 = vpow2.f32 %v4833_v42  ;;  %v4815_v55 = vsub.f32 %v9370_v59, %v9459_v62 }
0x3c8c   :  { %v4862_v35 = vsel %vm2435_vm4, %v7224_v38, 0.0 }
0x3c8d   :  { %v7226_v36 = vpop.eup %7225  ;;  %v4841_v40 = vmul.f32 1.442695, %v4815_v55 }
0x3c8e   :  { %v9464_v44 = vpop.xlane.xlu0 %4794  ;;  %v4865_v53 = vsel %vm2431_vm5, %v7226_v36, 0.0 }
0x3c8f   :  { %4860 = vadd.xlane.f32.xlu1 %v4859_v32  ;;  %v4817_v48 = vsub.f32 %v9375_v2, %v9464_v44 }
0x3c91   :  { %v7228_v45 = vpop.eup %7227  ;;  %v4845_v19 = vmul.f32 1.442695, %v4817_v48 }
0x3c92   :  { %v9469_v22 = vpop.xlane.xlu0 %4800  ;;  %v4877_v20 = vsel %vm2431_vm5, %v7228_v45, 0.0  ;;  %v7230_v59 = vpop.eup %7229  ;;  %v5038_v45 = vrot.slane %v9389_v60, %v8256_v33 }
0x3c93   :  { %v4819_v8 = vsub.f32 %v9381_v4, %v9469_v22  ;;  %4863 = vadd.xlane.f32.xlu1 %v4862_v35  ;;  %v4816_v4 = vsub.f32 %v9342_v21, %v9439_v63  ;;  %v4880_v61 = vsel %vm2435_vm4, %v7230_v59, 0.0  ;;  %v4818_v21 = vsub.f32 %v9353_v47, %v9445_v9  ;;  %v9492_v47 = vpop.permute.xlu1 %4957 }
0x3c95   :  { %v4849_v15 = vmul.f32 1.442695, %v4819_v8  ;;  %v4843_v39 = vmul.f32 1.442695, %v4816_v4  ;;  %v7232_v24 = vpop.eup %7231  ;;  %v4847_v2 = vmul.f32 1.442695, %v4818_v21 }
0x3c96   :  { %v1422_v56 = vpop.permute.xlu0 %1421  ;;  %v4871_v30 = vsel %vm2431_vm5, %v7232_v24, 0.0 }
0x3c97   :  { %7233 = vpow2.f32 %v4849_v15  ;;  %1424 = vst.msk [vmem:[#allocation2 + $0x30] sm:$0xff] %vm269_vm3, %v1422_v56  ;;  %4866 = vadd.xlane.f32.xlu1 %v4865_v53  ;;  %v9496_v15 = vpop.permute.xlu1 %4969 }
0x3c98   :  { %2005 = vst.msk [vmem:[#allocation2 + $0x30] sm:$0xff] %vm159_vm2, %v2003_v50  ;;  %7235 = vpow2.f32 %v4835_v34 }
0x3c99   :  { %7237 = vpow2.f32 %v4841_v40 }
0x3c9a   :  { %7239 = vpow2.f32 %v4843_v39 }
0x3c9b   :  { %4878 = vadd.xlane.f32.xlu1 %v4877_v20  ;;  %7241 = vpow2.f32 %v4845_v19  ;;  %v9502_v50 = vpop.permute.xlu1 %4981 }
0x3c9c   :  { %7243 = vpow2.f32 %v4847_v2 }
0x3c9f   :  { %4881 = vadd.xlane.f32.xlu1 %v4880_v61  ;;  %v2133_v58 = vld [vmem:[#allocation2 + $0x30] sm:$0xff]  ;;  %v9505_v40 = vpop.permute.xlu1 %4993 }
0x3ca0   :  { %6671 = vmatprep.mubr.msk.f32.mxu1 %vm75_vm1, %v2133_v58 }
0x3ca1   :  { %v7234_v26 = vpop.eup %7233 }
0x3ca2   :  { %v4895_v13 = vsel %vm2431_vm5, %v7234_v26, 0.0  ;;  %v7236_v32 = vpop.eup %7235 }
0x3ca3   :  { %4872 = vadd.xlane.f32.xlu1 %v4871_v30  ;;  %4896 = vadd.xlane.f32.xlu0 %v4895_v13  ;;  %v4874_v38 = vsel %vm2435_vm4, %v7236_v32, 0.0  ;;  %v7238_v29 = vpop.eup %7237  ;;  %v9507_v20 = vpop.permute.xlu1 %5005 }
0x3ca4   :  { %v4883_v42 = vsel %vm2431_vm5, %v7238_v29, 0.0  ;;  %v7240_v35 = vpop.eup %7239 }
0x3ca5   :  { %v4886_v36 = vsel %vm2435_vm4, %v7240_v35, 0.0  ;;  %v7242_v8 = vpop.eup %7241 }
0x3ca6   :  { %v4889_v34 = vsel %vm2431_vm5, %v7242_v8, 0.0  ;;  %v7244_v55 = vpop.eup %7243 }
0x3ca7   :  { %4875 = vadd.xlane.f32.xlu1 %v4874_v38  ;;  %v4892_v53 = vsel %vm2435_vm4, %v7244_v55, 0.0  ;;  %v9509_v59 = vpop.permute.xlu1 %5017 }
0x3cab   :  { %4884 = vadd.xlane.f32.xlu1 %v4883_v42  ;;  %v9511_v39 = vpop.permute.xlu1 %5029 }
0x3caf   :  { %4887 = vadd.xlane.f32.xlu1 %v4886_v36 }
0x3cb3   :  { %4890 = vadd.xlane.f32.xlu1 %v4889_v34 }
0x3cb5   :  { %v2113_v56 = vpop.permute.xlu0 %2112 }
0x3cb6   :  { %2115 = vst.msk [vmem:[#allocation2 + $0x38] sm:$0xff] %vm159_vm2, %v2113_v56 }
0x3cb7   :  { %4893 = vadd.xlane.f32.xlu1 %v4892_v53 }
0x3cb9   :  { %5045 = vbcast.lane.b32.xlu0 %v5038_v45, 263  ;;  %v4962_v21 = vpop.permute.xlu0 %4961 }
0x3cbd   :  { %v2134_v4 = vld [vmem:[#allocation2 + $0x38] sm:$0xff]  ;;  %v4974_v19 = vpop.permute.xlu0 %4973 }
0x3cbe   :  { %6672 = vmatmul.mubr.msk.f32.gmra.mrb[42].mxu1 %vm75_vm1, %v2134_v4 }
0x3cc1   :  { %v4986_v30 = vpop.permute.xlu0 %4985 }
0x3cc5   :  { %v9518_v13 = vpop.permute.xlu0 %4997 }
0x3cc9   :  { %v9520_v32 = vpop.permute.xlu0 %5009 }
0x3ccd   :  { %v9522_v2 = vpop.permute.xlu0 %5021 }
0x3cd1   :  { %v9527_v29 = vpop.permute.xlu0 %5033 }
0x3cd5   :  { %v9513_v48 = vpop.xlane.xlu1 %4803 }
0x3cd6   :  { %v4820_v61 = vsub.f32 %v9412_v12, %v9513_v48  ;;  %v2273_v12 = vld [vmem:[%s10252_s5 + $0x28] sm:$0xff] }
0x3cd7   :  { %v4648_v35 = vsel %vm2277_vm6, %v2273_v12, 0.0 }
0x3cd8   :  { %v4851_v24 = vmul.f32 1.442695, %v4820_v61 }
0x3cda   :  { %7245 = vpow2.f32 %v4851_v24 }
0x3ce4   :  { %v7246_v58 = vpop.eup %7245 }
0x3ce5   :  { %v4898_v26 = vsel %vm2435_vm4, %v7246_v58, 0.0 }
0x3ce6   :  { %4899 = vadd.xlane.f32.xlu1 %v4898_v26 }
0x3cf7   :  { %5041 = vbcast.lane.b32.xlu1 %v5038_v45, 511 }
0x3d02   :  { %v4855_v38 = vpop.xlane.xlu1 %4854 }
0x3d03   :  { %7247 = vlog2.f32 %v4855_v38 }
0x3d0d   :  { %v7248_v34 = vpop.eup %7247 }
0x3d0e   :  { %v4870_v36 = vpop.xlane.xlu0 %4869  ;;  %v4902_v56 = vmul.f32 0.6931472, %v7248_v34 }
0x3d10   :  { %v4933_v61 = vadd.f32 %v4902_v56, %v9416_v10 }
0x3d18   :  { %v4858_v42 = vpop.xlane.xlu1 %4857 }
0x3d19   :  { %7249 = vlog2.f32 %v4858_v42 }
0x3d1b   :  { %4649 = vadd.xlane.f32.xlu1 %v4648_v35 }
0x3d1c   :  { %v4861_v8 = vpop.xlane.xlu1 %4860 }
0x3d1d   :  { %7251 = vlog2.f32 %v4861_v8 }
0x3d1e   :  { %7253 = vlog2.f32 %v4870_v36  ;;  %v5063_v36 = vadd.f32 %v9492_v47, %v4933_v61 }
0x3d20   :  { %v4864_v55 = vpop.xlane.xlu1 %4863 }
0x3d21   :  { %7255 = vlog2.f32 %v4864_v55 }
0x3d23   :  { %v7250_v53 = vpop.eup %7249 }
0x3d24   :  { %v4904_v45 = vmul.f32 0.6931472, %v7250_v53  ;;  %v4867_v4 = vpop.xlane.xlu1 %4866 }
0x3d25   :  { %7257 = vlog2.f32 %v4867_v4 }
0x3d26   :  { %v4934_v24 = vadd.f32 %v4904_v45, %v9435_v41 }
0x3d27   :  { %v7252_v58 = vpop.eup %7251 }
0x3d28   :  { %v4906_v26 = vmul.f32 0.6931472, %v7252_v58  ;;  %v4879_v38 = vpop.xlane.xlu1 %4878  ;;  %v5064_v12 = vadd.f32 %v4962_v21, %v4934_v24  ;;  %v7254_v42 = vpop.eup %7253 }
0x3d29   :  { %7259 = vlog2.f32 %v4879_v38  ;;  %v4912_v34 = vmul.f32 0.6931472, %v7254_v42 }
0x3d2a   :  { %v4935_v35 = vadd.f32 %v4906_v26, %v9420_v46  ;;  %5101 = vperm.xlu0 %6692, %v5064_v12  }
0x3d2b   :  { %v7256_v8 = vpop.eup %7255  ;;  %v4938_v21 = vadd.f32 %v4912_v34, %v9424_v52 }
0x3d2c   :  { %v4908_v55 = vmul.f32 0.6931472, %v7256_v8  ;;  %v4882_v53 = vpop.xlane.xlu1 %4881  ;;  %5098 = vperm.xlu1 %6691, %v5063_v36   ;;  %v5065_v41 = vadd.f32 %v9496_v15, %v4935_v35 }
0x3d2d   :  { %7261 = vlog2.f32 %v4882_v53  ;;  %v5068_v38 = vadd.f32 %v4986_v30, %v4938_v21 }
0x3d2e   :  { %v4936_v10 = vadd.f32 %v4908_v55, %v9422_v43 }
0x3d2f   :  { %v7258_v56 = vpop.eup %7257 }
0x3d30   :  { %v4910_v45 = vmul.f32 0.6931472, %v7258_v56  ;;  %v4873_v4 = vpop.xlane.xlu1 %4872  ;;  %5104 = vperm.xlu1 %6691, %v5065_v41   ;;  %v5066_v46 = vadd.f32 %v4974_v19, %v4936_v10 }
0x3d31   :  { %7263 = vlog2.f32 %v4873_v4 }
0x3d32   :  { %v4937_v47 = vadd.f32 %v4910_v45, %v9443_v28  ;;  %5107 = vperm.xlu0 %6692, %v5066_v46  }
0x3d33   :  { %v7260_v61 = vpop.eup %7259 }
0x3d34   :  { %v4918_v24 = vmul.f32 0.6931472, %v7260_v61  ;;  %v4876_v58 = vpop.xlane.xlu1 %4875  ;;  %v5067_v26 = vadd.f32 %v9502_v50, %v4937_v47 }
0x3d35   :  { %7265 = vlog2.f32 %v4876_v58 }
0x3d36   :  { %v4941_v43 = vadd.f32 %v4918_v24, %v9450_v49  ;;  %5110 = vperm.xlu1 %6691, %v5067_v26   ;;  %5113 = vperm.xlu0 %6692, %v5068_v38  }
0x3d37   :  { %v7262_v52 = vpop.eup %7261 }
0x3d38   :  { %v4920_v15 = vmul.f32 0.6931472, %v7262_v52  ;;  %v4885_v12 = vpop.xlane.xlu1 %4884  ;;  %v5071_v19 = vadd.f32 %v9507_v20, %v4941_v43 }
0x3d39   :  { %7267 = vlog2.f32 %v4885_v12 }
0x3d3a   :  { %v4942_v28 = vadd.f32 %v4920_v15, %v9428_v54  ;;  %5122 = vperm.xlu0 %6692, %v5071_v19  }
0x3d3b   :  { %v7264_v42 = vpop.eup %7263 }
0x3d3c   :  { %v4914_v35 = vmul.f32 0.6931472, %v7264_v42  ;;  %v4888_v36 = vpop.xlane.xlu1 %4887  ;;  %v5072_v50 = vadd.f32 %v9520_v32, %v4942_v28 }
0x3d3d   :  { %7269 = vlog2.f32 %v4888_v36 }
0x3d3e   :  { %v4939_v30 = vadd.f32 %v4914_v35, %v9455_v25  ;;  %5125 = vperm.xlu0 %6692, %v5072_v50  }
0x3d3f   :  { %v7266_v49 = vpop.eup %7265 }
0x3d40   :  { %v4916_v8 = vmul.f32 0.6931472, %v7266_v49  ;;  %v4891_v34 = vpop.xlane.xlu1 %4890  ;;  %v5069_v55 = vadd.f32 %v9505_v40, %v4939_v30 }
0x3d41   :  { %7271 = vlog2.f32 %v4891_v34 }
0x3d42   :  { %v4940_v20 = vadd.f32 %v4916_v8, %v9431_v37  ;;  %5116 = vperm.xlu0 %6692, %v5069_v55  }
0x3d43   :  { %v7268_v54 = vpop.eup %7267 }
0x3d44   :  { %v4922_v53 = vmul.f32 0.6931472, %v7268_v54  ;;  %v4894_v10 = vpop.xlane.xlu1 %4893  ;;  %v5070_v41 = vadd.f32 %v9518_v13, %v4940_v20 }
0x3d45   :  { %7273 = vlog2.f32 %v4894_v10 }
0x3d46   :  { %v4943_v32 = vadd.f32 %v4922_v53, %v9459_v62  ;;  %5119 = vperm.xlu0 %6692, %v5070_v41  }
0x3d47   :  { %v7270_v25 = vpop.eup %7269 }
0x3d48   :  { %v4924_v56 = vmul.f32 0.6931472, %v7270_v25  ;;  %v5073_v21 = vadd.f32 %v9509_v59, %v4943_v32  ;;  %v4897_v59 = vpop.xlane.xlu0 %4896 }
0x3d49   :  { %7275 = vlog2.f32 %v4897_v59 }
0x3d4a   :  { %v4944_v45 = vadd.f32 %v4924_v56, %v9439_v63  ;;  %5128 = vperm.xlu0 %6692, %v5073_v21  }
0x3d4b   :  { %v7272_v40 = vpop.eup %7271 }
0x3d4c   :  { %v4926_v4 = vmul.f32 0.6931472, %v7272_v40  ;;  %v5074_v37 = vadd.f32 %v9522_v2, %v4944_v45  ;;  %v5046_v35 = vpop.permute.xlu0 %5045 }
0x3d4e   :  { %v4945_v46 = vadd.f32 %v4926_v4, %v9464_v44  ;;  %5131 = vperm.xlu0 %6692, %v5074_v37  }
0x3d4f   :  { %v7274_v47 = vpop.eup %7273 }
0x3d50   :  { %v4928_v13 = vmul.f32 0.6931472, %v7274_v47  ;;  %v5075_v61 = vadd.f32 %v9511_v39, %v4945_v46 }
0x3d52   :  { %v4946_v62 = vadd.f32 %v4928_v13, %v9445_v9  ;;  %5134 = vperm.xlu0 %6692, %v5075_v61  }
0x3d53   :  { %v7276_v63 = vpop.eup %7275 }
0x3d54   :  { %v5076_v24 = vadd.f32 %v9527_v29, %v4946_v62  ;;  %v4930_v58 = vmul.f32 0.6931472, %v7276_v63 }
0x3d56   :  { %5137 = vperm.xlu0 %6692, %v5076_v24   ;;  %v4947_v2 = vadd.f32 %v4930_v58, %v9469_v22 }
0x3d73   :  { %v4900_v26 = vpop.xlane.xlu1 %4899 }
0x3d74   :  { %7277 = vlog2.f32 %v4900_v26 }
0x3d77   :  { %v5042_v38 = vpop.permute.xlu1 %5041 }
0x3d78   :  { %v5077_v44 = vadd.f32 %v5042_v38, %v4947_v2 }
0x3d7a   :  { %5140 = vperm.xlu0 %6692, %v5077_v44  }
0x3d7e   :  { %v7278_v15 = vpop.eup %7277 }
0x3d7f   :  { %v4932_v12 = vmul.f32 0.6931472, %v7278_v15 }
0x3d81   :  { %v4948_v28 = vadd.f32 %v4932_v12, %v9513_v48 }
0x3d83   :  { %v5078_v36 = vadd.f32 %v5046_v35, %v4948_v28 }
0x3d91   :  { %v9556_v43 = vpop.f32.mrb[42].mxu1 }
0x3d92   :  { %v2259_v52 = vpop.f32.mrb[43].mxu1 }
0x3d93   :  { %v9559_v39 = vadd.f32 %v2259_v52, %v7998_v31 }
0x3d95   :  { %v5532_v9 = vrot.slane %v9559_v39, %v7515_v11  ;;  %v5544_v29 = vrot.slane %v9559_v39, %v7774_v1  ;;  %v5556_v22 = vrot.slane %v9559_v39, %v8008_v6  ;;  %v5568_v19 = vrot.slane %v9559_v39, %v8017_v27 }
0x3d96   :  { %v9572_v42 = vrot.slane %v9559_v39, %v8022_v14 }
0x3d97   :  { %5539 = vbcast.lane.b32.xlu1 %v5532_v9, 263  ;;  %5535 = vbcast.lane.b32.xlu0 %v5532_v9, 511 }
0x3d9b   :  { %5547 = vbcast.lane.b32.xlu1 %v5544_v29, 511  ;;  %5551 = vbcast.lane.b32.xlu0 %v5544_v29, 263 }
0x3d9f   :  { %5559 = vbcast.lane.b32.xlu1 %v5556_v22, 511  ;;  %5563 = vbcast.lane.b32.xlu0 %v5556_v22, 263 }
0x3da3   :  { %5571 = vbcast.lane.b32.xlu1 %v5568_v19, 511  ;;  %5575 = vbcast.lane.b32.xlu0 %v5568_v19, 263 }
0x3da7   :  { %5583 = vbcast.lane.b32.xlu1 %v9572_v42, 511 }
0x3da8   :  { %v4650_v8 = vpop.xlane.xlu1 %4649 }
0x3da9   :  { %v5102_v50 = vpop.permute.xlu0 %5101  ;;  %vm4949_vm1 = vcmp.gt.f32.partialorder %v4650_v8, 0.5 }
0x3daa   :  { %v5152_v62 = vrot.slane %v5102_v50, %v8319_v18 }
0x3dab   :  { %5143 = vperm.xlu1 %6691, %v5078_v36  }
0x3dac   :  { %v5099_v55 = vpop.permute.xlu1 %5098 }
0x3dad   :  { %v5148_v13 = vrot.slane %v5099_v55, %v8322_v7 }
0x3daf   :  { %v5153_v26 = vsel %vm2833_vm7, %v5152_v62, %v5148_v13 }
0x3db0   :  { %v5105_v54 = vpop.permute.xlu1 %5104 }
0x3db1   :  { %v5108_v30 = vpop.permute.xlu0 %5107  ;;  %v5157_v40 = vrot.slane %v5105_v54, %v8322_v7 }
0x3db2   :  { %v5161_v4 = vrot.slane %v5108_v30, %v8319_v18 }
0x3db4   :  { %v5162_v24 = vsel %vm2833_vm7, %v5161_v4, %v5157_v40 }
0x3db5   :  { %v5114_v49 = vpop.permute.xlu0 %5113  ;;  %v5111_v10 = vpop.permute.xlu1 %5110  ;;  %v5217_v44 = vsel %vm2898_vm8, %v5162_v24, %v5153_v26 }
0x3db6   :  { %v5166_v37 = vrot.slane %v5111_v10, %v8322_v7  ;;  %v5170_v46 = vrot.slane %v5114_v49, %v8319_v18 }
0x3db8   :  { %v5171_v58 = vsel %vm2833_vm7, %v5170_v46, %v5166_v37 }
0x3db9   :  { %v5123_v34 = vpop.permute.xlu0 %5122  ;;  %v5218_v22 = vsel %vm2900_vm9, %v5171_v58, %v5217_v44 }
0x3dba   :  { %v5184_v12 = vrot.slane %v5123_v34, %v8322_v7 }
0x3dbd   :  { %v5126_v20 = vpop.permute.xlu0 %5125 }
0x3dbe   :  { %v5188_v52 = vrot.slane %v5126_v20, %v8319_v18 }
0x3dc0   :  { %v5189_v50 = vsel %vm2833_vm7, %v5188_v52, %v5184_v12 }
0x3dc1   :  { %v5117_v53 = vpop.permute.xlu0 %5116 }
0x3dc2   :  { %v5175_v59 = vrot.slane %v5117_v53, %v8322_v7 }
0x3dc5   :  { %v5120_v48 = vpop.permute.xlu0 %5119 }
0x3dc6   :  { %v5179_v61 = vrot.slane %v5120_v48, %v8319_v18 }
0x3dc8   :  { %v5180_v2 = vsel %vm2833_vm7, %v5179_v61, %v5175_v59 }
0x3dc9   :  { %v5129_v32 = vpop.permute.xlu0 %5128  ;;  %v5219_v19 = vsel %vm2902_vm10, %v5180_v2, %v5218_v22 }
0x3dca   :  { %v5193_v15 = vrot.slane %v5129_v32, %v8322_v7  ;;  %v5220_v55 = vsel %vm2904_vm11, %v5189_v50, %v5219_v19 }
0x3dcd   :  { %v5132_v56 = vpop.permute.xlu0 %5131 }
0x3dce   :  { %v5197_v38 = vrot.slane %v5132_v56, %v8319_v18 }
0x3dd0   :  { %v5198_v36 = vsel %vm2833_vm7, %v5197_v38, %v5193_v15 }
0x3dd1   :  { %v5135_v45 = vpop.permute.xlu0 %5134  ;;  %v5221_v34 = vsel %vm2906_vm12, %v5198_v36, %v5220_v55 }
0x3dd2   :  { %v5202_v28 = vrot.slane %v5135_v45, %v8322_v7 }
0x3dd5   :  { %v5138_v63 = vpop.permute.xlu0 %5137 }
0x3dd6   :  { %v5206_v9 = vrot.slane %v5138_v63, %v8319_v18 }
0x3dd8   :  { %v5207_v30 = vsel %vm2833_vm7, %v5206_v9, %v5202_v28 }
0x3dd9   :  { %v5222_v53 = vsel %vm2908_vm13, %v5207_v30, %v5221_v34 }
0x3df9   :  { %v5141_v35 = vpop.permute.xlu0 %5140 }
0x3dfa   :  { %v5211_v20 = vrot.slane %v5141_v35, %v8322_v7 }
0x3e09   :  { %v9575_v41 = vpop.permute.xlu1 %5539 }
0x3e0d   :  { %v9577_v25 = vpop.permute.xlu1 %5547 }
0x3e11   :  { %v9579_v21 = vpop.permute.xlu1 %5559 }
0x3e15   :  { %v9585_v47 = vpop.permute.xlu1 %5571 }
0x3e19   :  { %v9599_v29 = vpop.permute.xlu1 %5583 }
0x3e2a   :  { %v5144_v49 = vpop.permute.xlu1 %5143 }
0x3e2b   :  { %v5215_v54 = vrot.slane %v5144_v49, %v8319_v18 }
0x3e2d   :  { %v5216_v10 = vsel %vm2833_vm7, %v5215_v54, %v5211_v20 }
0x3e2e   :  { %v5223_v48 = vsel %vm2910_vm14, %v5216_v10, %v5222_v53 }
0x3e2f   :  { %v9617_v32 = vsel %vm4949_vm1, %v5223_v48, %v9280_v5 }
0x3e30   :  { %v5237_v56 = vrot.slane %v9617_v32, %v8048_v51  ;;  %v5230_v45 = vcombine.high %v9617_v32, %v9617_v32 }
0x3e32   :  { %v5253_v40 = vrot.slane %v5237_v56, %v8048_v51  ;;  %v5245_v4 = vcombine.high %v5237_v56, %v5237_v56  ;;  %v5244_v37 = vrot.slane %v5230_v45, %v8048_v51 }
0x3e34   :  { %v5282_v46 = vrot.slane %v5253_v40, %v7515_v11  ;;  %v5267_v8 = vrot.slane %v5245_v4, %v8048_v51  ;;  %v5260_v13 = vrot.slane %v5244_v37, %v8048_v51  ;;  %v5246_v61 = vcombine.high %v5244_v37, %v5244_v37 }
0x3e35   :  { %v5275_v58 = vcombine.high %v5253_v40, %v5253_v40 }
0x3e36   :  { %v9629_v5 = vadd.f32 %v9310_v16, %v5282_v46  ;;  %v9632_v62 = vadd.f32 %v9293_v23, %v5282_v46  ;;  %v5286_v24 = vrot.slane %v5267_v8, %v7515_v11  ;;  %v5298_v59 = vrot.slane %v5260_v13, %v7515_v11 }
0x3e37   :  { %v5277_v63 = vcombine.high %v5267_v8, %v5267_v8  ;;  %v5274_v26 = vrot.slane %v5246_v61, %v8048_v51  ;;  %v5290_v15 = vrot.slane %v5275_v58, %v7515_v11  ;;  %v5276_v12 = vcombine.high %v5260_v13, %v5260_v13 }
0x3e38   :  { %v5338_v2 = vsel %vm2435_vm4, %v9629_v5, -inf  ;;  %v5335_v38 = vsel %vm2431_vm5, %v9632_v62, -inf  ;;  %v9642_v44 = vadd.f32 %v9293_v23, %v5286_v24  ;;  %v9645_v52 = vadd.f32 %v9310_v16, %v5298_v59 }
0x3e39   :  { %5339 = vmax.xlane.f32.xlu1 %v5338_v2  ;;  %5336 = vmax.xlane.f32.xlu0 %v5335_v38  ;;  %v5294_v9 = vrot.slane %v5277_v63, %v7515_v11  ;;  %v9649_v22 = vadd.f32 %v9310_v16, %v5286_v24  ;;  %v5302_v36 = vrot.slane %v5274_v26, %v7515_v11 }
0x3e3a   :  { %v5341_v19 = vsel %vm2431_vm5, %v9642_v44, -inf  ;;  %v5362_v28 = vsel %vm2435_vm4, %v9645_v52, -inf  ;;  %v9661_v50 = vadd.f32 %v9293_v23, %v5290_v15  ;;  %v5306_v20 = vrot.slane %v5276_v12, %v7515_v11 }
0x3e3b   :  { %v9657_v35 = vadd.f32 %v9310_v16, %v5294_v9  ;;  %v5344_v30 = vsel %vm2435_vm4, %v9649_v22, -inf  ;;  %v9668_v55 = vadd.f32 %v9310_v16, %v5302_v36  ;;  %v9676_v53 = vadd.f32 %v9310_v16, %v5290_v15  ;;  %v9726_v15 = vpop.permute.xlu0 %5535 }
0x3e3c   :  { %v5347_v54 = vsel %vm2431_vm5, %v9661_v50, -inf  ;;  %v9679_v10 = vadd.f32 %v9310_v16, %v5306_v20  ;;  %v9686_v45 = vadd.f32 %v9293_v23, %v5298_v59  ;;  %v9691_v4 = vadd.f32 %v9293_v23, %v5294_v9 }
0x3e3d   :  { %5342 = vmax.xlane.f32.xlu0 %v5341_v19  ;;  %5363 = vmax.xlane.f32.xlu1 %v5362_v28  ;;  %v5356_v49 = vsel %vm2435_vm4, %v9657_v35, -inf  ;;  %v5368_v34 = vsel %vm2435_vm4, %v9668_v55, -inf  ;;  %v5350_v48 = vsel %vm2435_vm4, %v9676_v53, -inf  ;;  %v9696_v46 = vadd.f32 %v9293_v23, %v5302_v36 }
0x3e3e   :  { %v5374_v56 = vsel %vm2435_vm4, %v9679_v10, -inf  ;;  %v5359_v40 = vsel %vm2431_vm5, %v9686_v45, -inf  ;;  %v5353_v37 = vsel %vm2431_vm5, %v9691_v4, -inf  ;;  %v5278_v8 = vcombine.high %v5274_v26, %v5274_v26 }
0x3e3f   :  { %v5365_v13 = vsel %vm2431_vm5, %v9696_v46, -inf  ;;  %v9701_v61 = vadd.f32 %v9293_v23, %v5306_v20  ;;  %v5592_v63 = vrot.slane %v9559_v39, %v8027_v57  ;;  %v5604_v2 = vrot.slane %v9559_v39, %v8148_v0  ;;  %v9728_v12 = vpop.permute.xlu0 %5551 }
0x3e40   :  { %v5310_v24 = vrot.slane %v5278_v8, %v7515_v11  ;;  %v9723_v9 = vrot.slane %v9559_v39, %v8256_v33 }
0x3e41   :  { %5345 = vmax.xlane.f32.xlu0 %v5344_v30  ;;  %5357 = vmax.xlane.f32.xlu1 %v5356_v49  ;;  %v5371_v59 = vsel %vm2431_vm5, %v9701_v61, -inf }
0x3e42   :  { %v9709_v58 = vadd.f32 %v9293_v23, %v5310_v24  ;;  %v9717_v38 = vadd.f32 %v9310_v16, %v5310_v24 }
0x3e44   :  { %v5377_v26 = vsel %vm2431_vm5, %v9709_v58, -inf  ;;  %v5380_v23 = vsel %vm2435_vm4, %v9717_v38, -inf }
0x3e45   :  { %5348 = vmax.xlane.f32.xlu0 %v5347_v54  ;;  %5369 = vmax.xlane.f32.xlu1 %v5368_v34 }
0x3e49   :  { %5351 = vmax.xlane.f32.xlu0 %v5350_v48  ;;  %5375 = vmax.xlane.f32.xlu1 %v5374_v56 }
0x3e4d   :  { %5360 = vmax.xlane.f32.xlu0 %v5359_v40 }
0x3e51   :  { %5354 = vmax.xlane.f32.xlu0 %v5353_v37 }
0x3e55   :  { %5366 = vmax.xlane.f32.xlu0 %v5365_v13 }
0x3e59   :  { %5372 = vmax.xlane.f32.xlu0 %v5371_v59 }
0x3e5a   :  { %5595 = vbcast.lane.b32.xlu1 %v5592_v63, 511 }
0x3e5d   :  { %5378 = vmax.xlane.f32.xlu0 %v5377_v26 }
0x3e5e   :  { %5607 = vbcast.lane.b32.xlu1 %v5604_v2, 511 }
0x3e73   :  { %5587 = vbcast.lane.b32.xlu0 %v9572_v42, 263  ;;  %v9730_v42 = vpop.permute.xlu0 %5563 }
0x3e77   :  { %5599 = vbcast.lane.b32.xlu0 %v5592_v63, 263  ;;  %v9732_v19 = vpop.permute.xlu0 %5575 }
0x3e7b   :  { %5611 = vbcast.lane.b32.xlu0 %v5604_v2, 263 }
0x3e82   :  { %5381 = vmax.xlane.f32.xlu1 %v5380_v23 }
0x3e93   :  { %5619 = vbcast.lane.b32.xlu1 %v9723_v9, 511 }
0x3ec6   :  { %v9734_v16 = vpop.xlane.xlu1 %5339  ;;  %v9736_v28 = vpop.xlane.xlu0 %5336 }
0x3ec7   :  { %v5384_v36 = vsub.f32 %v9629_v5, %v9734_v16  ;;  %v5383_v30 = vsub.f32 %v9632_v62, %v9736_v28 }
0x3ec9   :  { %v5401_v49 = vmul.f32 1.442695, %v5384_v36  ;;  %v5399_v20 = vmul.f32 1.442695, %v5383_v30 }
0x3eca   :  { %v9742_v54 = vpop.xlane.xlu0 %5342  ;;  %v9746_v48 = vpop.xlane.xlu1 %5363 }
0x3ecb   :  { %7279 = vpow2.f32 %v5401_v49  ;;  %v5385_v34 = vsub.f32 %v9642_v44, %v9742_v54  ;;  %v5392_v63 = vsub.f32 %v9645_v52, %v9746_v48 }
0x3ecc   :  { %7281 = vpow2.f32 %v5399_v20 }
0x3ecd   :  { %v5403_v56 = vmul.f32 1.442695, %v5385_v34  ;;  %v5417_v49 = vmul.f32 1.442695, %v5392_v63 }
0x3ece   :  { %v9748_v40 = vpop.xlane.xlu0 %5345  ;;  %v9754_v8 = vpop.xlane.xlu1 %5357 }
0x3ecf   :  { %v5386_v5 = vsub.f32 %v9649_v22, %v9748_v40  ;;  %7283 = vpow2.f32 %v5403_v56  ;;  %v5390_v52 = vsub.f32 %v9657_v35, %v9754_v8 }
0x3ed1   :  { %v5405_v37 = vmul.f32 1.442695, %v5386_v5 }
0x3ed2   :  { %v9752_v62 = vpop.xlane.xlu0 %5348 }
0x3ed3   :  { %v5387_v13 = vsub.f32 %v9661_v50, %v9752_v62  ;;  %7285 = vpow2.f32 %v5405_v37  ;;  %v9766_v50 = vpop.xlane.xlu1 %5369  ;;  %v5413_v37 = vmul.f32 1.442695, %v5390_v52 }
0x3ed5   :  { %v7280_v44 = vpop.eup %7279  ;;  %v5407_v24 = vmul.f32 1.442695, %v5387_v13  ;;  %v5394_v13 = vsub.f32 %v9668_v55, %v9766_v50 }
0x3ed6   :  { %v7282_v59 = vpop.eup %7281  ;;  %v9760_v26 = vpop.xlane.xlu0 %5351  ;;  %v5434_v22 = vsel %vm2435_vm4, %v7280_v44, 0.0 }
0x3ed7   :  { %v5388_v2 = vsub.f32 %v9676_v53, %v9760_v26  ;;  %5435 = vadd.xlane.f32.xlu1 %v5434_v22  ;;  %v5431_v23 = vsel %vm2431_vm5, %v7282_v59, 0.0  ;;  %7287 = vpow2.f32 %v5407_v24  ;;  %v9779_v24 = vpop.xlane.xlu1 %5375  ;;  %v5421_v22 = vmul.f32 1.442695, %v5394_v13 }
0x3ed8   :  { %5432 = vadd.xlane.f32.xlu0 %v5431_v23 }
0x3ed9   :  { %v5409_v36 = vmul.f32 1.442695, %v5388_v2  ;;  %v7284_v30 = vpop.eup %7283  ;;  %v5396_v2 = vsub.f32 %v9679_v10, %v9779_v24 }
0x3eda   :  { %v9770_v20 = vpop.xlane.xlu0 %5360  ;;  %v5437_v53 = vsel %vm2431_vm5, %v7284_v30, 0.0 }
0x3edb   :  { %v5391_v34 = vsub.f32 %v9686_v45, %v9770_v20  ;;  %7289 = vpow2.f32 %v5409_v36 }
0x3edc   :  { %5438 = vadd.xlane.f32.xlu0 %v5437_v53  ;;  %7291 = vpow2.f32 %v5417_v49  ;;  %v5425_v49 = vmul.f32 1.442695, %v5396_v2 }
0x3edd   :  { %v5415_v56 = vmul.f32 1.442695, %v5391_v34  ;;  %v7286_v5 = vpop.eup %7285 }
0x3ede   :  { %v9777_v44 = vpop.xlane.xlu0 %5354  ;;  %v5440_v45 = vsel %vm2435_vm4, %v7286_v5, 0.0 }
0x3edf   :  { %7293 = vpow2.f32 %v5415_v56  ;;  %v5389_v35 = vsub.f32 %v9691_v4, %v9777_v44  ;;  %5441 = vadd.xlane.f32.xlu1 %v5440_v45 }
0x3ee0   :  { %7295 = vpow2.f32 %v5413_v37 }
0x3ee1   :  { %v5411_v59 = vmul.f32 1.442695, %v5389_v35  ;;  %v7288_v63 = vpop.eup %7287 }
0x3ee2   :  { %v9786_v23 = vpop.xlane.xlu0 %5366  ;;  %v5443_v36 = vsel %vm2431_vm5, %v7288_v63, 0.0 }
0x3ee3   :  { %7297 = vpow2.f32 %v5411_v59  ;;  %v5393_v55 = vsub.f32 %v9696_v46, %v9786_v23  ;;  %5444 = vadd.xlane.f32.xlu0 %v5443_v36 }
0x3ee4   :  { %7299 = vpow2.f32 %v5421_v22 }
0x3ee5   :  { %v5419_v4 = vmul.f32 1.442695, %v5393_v55  ;;  %v7290_v30 = vpop.eup %7289 }
0x3ee6   :  { %v9791_v52 = vpop.xlane.xlu0 %5372  ;;  %v5446_v10 = vsel %vm2435_vm4, %v7290_v30, 0.0  ;;  %v7292_v53 = vpop.eup %7291 }
0x3ee7   :  { %7301 = vpow2.f32 %v5419_v4  ;;  %v5395_v34 = vsub.f32 %v9701_v61, %v9791_v52  ;;  %5447 = vadd.xlane.f32.xlu1 %v5446_v10  ;;  %v5458_v35 = vsel %vm2435_vm4, %v7292_v53, 0.0 }
0x3ee8   :  { %7303 = vpow2.f32 %v5425_v49 }
0x3ee9   :  { %v7294_v56 = vpop.eup %7293  ;;  %v5423_v5 = vmul.f32 1.442695, %v5395_v34 }
0x3eea   :  { %v9796_v46 = vpop.xlane.xlu0 %5378  ;;  %v5455_v37 = vsel %vm2431_vm5, %v7294_v56, 0.0  ;;  %v7296_v45 = vpop.eup %7295 }
0x3eeb   :  { %7305 = vpow2.f32 %v5423_v5  ;;  %v5397_v13 = vsub.f32 %v9709_v58, %v9796_v46  ;;  %5456 = vadd.xlane.f32.xlu0 %v5455_v37  ;;  %5459 = vadd.xlane.f32.xlu1 %v5458_v35  ;;  %v5452_v22 = vsel %vm2435_vm4, %v7296_v45, 0.0  ;;  %v9809_v56 = vpop.permute.xlu1 %5595 }
0x3eed   :  { %v7298_v61 = vpop.eup %7297  ;;  %v5427_v59 = vmul.f32 1.442695, %v5397_v13 }
0x3eee   :  { %v5449_v63 = vsel %vm2431_vm5, %v7298_v61, 0.0  ;;  %v7300_v2 = vpop.eup %7299 }
0x3eef   :  { %7307 = vpow2.f32 %v5427_v59  ;;  %5450 = vadd.xlane.f32.xlu0 %v5449_v63  ;;  %5453 = vadd.xlane.f32.xlu1 %v5452_v22  ;;  %v5464_v58 = vsel %vm2435_vm4, %v7300_v2, 0.0  ;;  %v9811_v5 = vpop.permute.xlu1 %5607  ;;  %v9819_v59 = vpop.permute.xlu0 %5587 }
0x3ef1   :  { %v7302_v55 = vpop.eup %7301 }
0x3ef2   :  { %v5461_v36 = vsel %vm2431_vm5, %v7302_v55, 0.0  ;;  %v7304_v4 = vpop.eup %7303 }
0x3ef3   :  { %5462 = vadd.xlane.f32.xlu0 %v5461_v36  ;;  %5465 = vadd.xlane.f32.xlu1 %v5464_v58  ;;  %v5470_v34 = vsel %vm2435_vm4, %v7304_v4, 0.0  ;;  %v9821_v63 = vpop.permute.xlu0 %5599 }
0x3ef5   :  { %v7306_v30 = vpop.eup %7305 }
0x3ef6   :  { %v5467_v49 = vsel %vm2431_vm5, %v7306_v30, 0.0 }
0x3ef7   :  { %5468 = vadd.xlane.f32.xlu0 %v5467_v49  ;;  %5471 = vadd.xlane.f32.xlu1 %v5470_v34  ;;  %v9825_v2 = vpop.permute.xlu0 %5611 }
0x3ef9   :  { %v7308_v10 = vpop.eup %7307 }
0x3efa   :  { %v5473_v53 = vsel %vm2431_vm5, %v7308_v10, 0.0 }
0x3efb   :  { %5474 = vadd.xlane.f32.xlu0 %v5473_v53 }
0x3f0f   :  { %v9813_v37 = vpop.xlane.xlu1 %5381 }
0x3f10   :  { %v5398_v13 = vsub.f32 %v9717_v38, %v9813_v37 }
0x3f11   :  { %5623 = vbcast.lane.b32.xlu0 %v9723_v9, 263 }
0x3f12   :  { %v5429_v35 = vmul.f32 1.442695, %v5398_v13 }
0x3f13   :  { %v9823_v22 = vpop.permute.xlu1 %5619 }
0x3f14   :  { %7309 = vpow2.f32 %v5429_v35 }
0x3f1e   :  { %v7310_v45 = vpop.eup %7309 }
0x3f1f   :  { %v5476_v61 = vsel %vm2435_vm4, %v7310_v45, 0.0 }
0x3f20   :  { %5477 = vadd.xlane.f32.xlu1 %v5476_v61 }
0x3f64   :  { %v5436_v55 = vpop.xlane.xlu1 %5435 }
0x3f65   :  { %7311 = vlog2.f32 %v5436_v55  ;;  %v5433_v36 = vpop.xlane.xlu0 %5432 }
0x3f66   :  { %7313 = vlog2.f32 %v5433_v36 }
0x3f69   :  { %v5439_v38 = vpop.xlane.xlu0 %5438 }
0x3f6a   :  { %7315 = vlog2.f32 %v5439_v38 }
0x3f6c   :  { %v5442_v9 = vpop.xlane.xlu1 %5441 }
0x3f6d   :  { %7317 = vlog2.f32 %v5442_v9 }
0x3f6f   :  { %v7312_v58 = vpop.eup %7311 }
0x3f70   :  { %v7314_v4 = vpop.eup %7313  ;;  %v5482_v30 = vmul.f32 0.6931472, %v7312_v58  ;;  %v5445_v34 = vpop.xlane.xlu0 %5444 }
0x3f71   :  { %v5480_v49 = vmul.f32 0.6931472, %v7314_v4  ;;  %7319 = vlog2.f32 %v5445_v34 }
0x3f72   :  { %v5512_v10 = vadd.f32 %v5482_v30, %v9734_v16 }
0x3f73   :  { %v5511_v53 = vadd.f32 %v5480_v49, %v9736_v28 }
0x3f74   :  { %v7316_v13 = vpop.eup %7315  ;;  %v5642_v35 = vadd.f32 %v9575_v41, %v5512_v10  ;;  %v5448_v61 = vpop.xlane.xlu1 %5447 }
0x3f75   :  { %v5484_v45 = vmul.f32 0.6931472, %v7316_v13  ;;  %v5641_v55 = vadd.f32 %v9726_v15, %v5511_v53  ;;  %7321 = vlog2.f32 %v5448_v61 }
0x3f76   :  { %5679 = vperm.xlu0 %6692, %v5642_v35  }
0x3f77   :  { %v5513_v36 = vadd.f32 %v5484_v45, %v9742_v54  ;;  %5676 = vperm.xlu1 %6691, %v5641_v55   ;;  %v7318_v38 = vpop.eup %7317 }
0x3f78   :  { %v5457_v9 = vpop.xlane.xlu0 %5456  ;;  %v5486_v58 = vmul.f32 0.6931472, %v7318_v38  ;;  %v5460_v4 = vpop.xlane.xlu1 %5459 }
0x3f79   :  { %7323 = vlog2.f32 %v5457_v9  ;;  %v5643_v16 = vadd.f32 %v9577_v25, %v5513_v36 }
0x3f7a   :  { %7325 = vlog2.f32 %v5460_v4  ;;  %v5514_v28 = vadd.f32 %v5486_v58, %v9748_v40 }
0x3f7b   :  { %5682 = vperm.xlu1 %6691, %v5643_v16   ;;  %v7320_v41 = vpop.eup %7319 }
0x3f7c   :  { %v5451_v30 = vpop.xlane.xlu0 %5450  ;;  %v5644_v15 = vadd.f32 %v9728_v12, %v5514_v28  ;;  %v5488_v49 = vmul.f32 0.6931472, %v7320_v41  ;;  %v5454_v34 = vpop.xlane.xlu1 %5453 }
0x3f7d   :  { %7327 = vlog2.f32 %v5451_v30 }
0x3f7e   :  { %v5515_v54 = vadd.f32 %v5488_v49, %v9752_v62  ;;  %5685 = vperm.xlu0 %6692, %v5644_v15   ;;  %7329 = vlog2.f32 %v5454_v34 }
0x3f7f   :  { %v7322_v10 = vpop.eup %7321 }
0x3f80   :  { %v5490_v53 = vmul.f32 0.6931472, %v7322_v10  ;;  %v5463_v13 = vpop.xlane.xlu0 %5462  ;;  %v5645_v25 = vadd.f32 %v9579_v21, %v5515_v54  ;;  %v5466_v36 = vpop.xlane.xlu1 %5465 }
0x3f81   :  { %7331 = vlog2.f32 %v5463_v13 }
0x3f82   :  { %v5516_v40 = vadd.f32 %v5490_v53, %v9760_v26  ;;  %5688 = vperm.xlu1 %6691, %v5645_v25   ;;  %7333 = vlog2.f32 %v5466_v36 }
0x3f83   :  { %v7324_v35 = vpop.eup %7323 }
0x3f84   :  { %v7326_v45 = vpop.eup %7325  ;;  %v5496_v61 = vmul.f32 0.6931472, %v7324_v35  ;;  %v5646_v12 = vadd.f32 %v9730_v42, %v5516_v40  ;;  %v5469_v4 = vpop.xlane.xlu0 %5468 }
0x3f85   :  { %v5498_v55 = vmul.f32 0.6931472, %v7326_v45  ;;  %7335 = vlog2.f32 %v5469_v4  ;;  %v5472_v41 = vpop.xlane.xlu1 %5471 }
0x3f86   :  { %v5519_v62 = vadd.f32 %v5496_v61, %v9770_v20  ;;  %5691 = vperm.xlu0 %6692, %v5646_v12   ;;  %7337 = vlog2.f32 %v5472_v41 }
0x3f87   :  { %v7328_v38 = vpop.eup %7327  ;;  %v5520_v21 = vadd.f32 %v5498_v55, %v9746_v48 }
0x3f88   :  { %v5649_v9 = vadd.f32 %v9599_v29, %v5519_v62  ;;  %v5492_v58 = vmul.f32 0.6931472, %v7328_v38  ;;  %v7330_v26 = vpop.eup %7329  ;;  %v5475_v29 = vpop.xlane.xlu0 %5474 }
0x3f89   :  { %v5650_v16 = vadd.f32 %v9819_v59, %v5520_v21  ;;  %v5494_v28 = vmul.f32 0.6931472, %v7330_v26  ;;  %7339 = vlog2.f32 %v5475_v29 }
0x3f8a   :  { %5700 = vperm.xlu0 %6692, %v5649_v9   ;;  %v5517_v42 = vadd.f32 %v5492_v58, %v9777_v44 }
0x3f8b   :  { %v7332_v30 = vpop.eup %7331  ;;  %v5518_v20 = vadd.f32 %v5494_v28, %v9754_v8 }
0x3f8c   :  { %v5500_v15 = vmul.f32 0.6931472, %v7332_v30  ;;  %v5647_v48 = vadd.f32 %v9585_v47, %v5517_v42  ;;  %v7334_v49 = vpop.eup %7333 }
0x3f8d   :  { %v5648_v34 = vadd.f32 %v9732_v19, %v5518_v20  ;;  %v5502_v54 = vmul.f32 0.6931472, %v7334_v49 }
0x3f8e   :  { %5703 = vperm.xlu0 %6692, %v5650_v16   ;;  %v5521_v59 = vadd.f32 %v5500_v15, %v9786_v23 }
0x3f8f   :  { %v7336_v10 = vpop.eup %7335  ;;  %v5522_v44 = vadd.f32 %v5502_v54, %v9766_v50  ;;  %v9857_v50 = vld [vmem:[%s10252_s5 + $0x30] sm:$0xff] }
0x3f90   :  { %v5504_v53 = vmul.f32 0.6931472, %v7336_v10  ;;  %v5651_v13 = vadd.f32 %v9809_v56, %v5521_v59  ;;  %v7338_v8 = vpop.eup %7337  ;;  %v5226_v56 = vsel %vm2277_vm6, %v9857_v50, 0.0 }
0x3f91   :  { %v5652_v25 = vadd.f32 %v9821_v63, %v5522_v44  ;;  %v5506_v47 = vmul.f32 0.6931472, %v7338_v8 }
0x3f92   :  { %5694 = vperm.xlu0 %6692, %v5647_v48   ;;  %v5523_v35 = vadd.f32 %v5504_v53, %v9791_v52 }
0x3f93   :  { %v7340_v40 = vpop.eup %7339  ;;  %v5524_v19 = vadd.f32 %v5506_v47, %v9779_v24  ;;  %v9865_v24 = vadd.f32 %v9556_v43, %v7998_v31 }
0x3f94   :  { %v5508_v45 = vmul.f32 0.6931472, %v7340_v40  ;;  %v5653_v23 = vadd.f32 %v9811_v5, %v5523_v35 }
0x3f95   :  { %v5654_v63 = vadd.f32 %v9825_v2, %v5524_v19  ;;  %v6110_v12 = vrot.slane %v9865_v24, %v7515_v11  ;;  %v6134_v2 = vrot.slane %v9865_v24, %v8008_v6  ;;  %v6122_v62 = vrot.slane %v9865_v24, %v7774_v1 }
0x3f96   :  { %5697 = vperm.xlu0 %6692, %v5648_v34   ;;  %v5525_v52 = vadd.f32 %v5508_v45, %v9796_v46  ;;  %v6146_v46 = vrot.slane %v9865_v24, %v8017_v27  ;;  %v9879_v38 = vrot.slane %v9865_v24, %v8022_v14 }
0x3f98   :  { %v5655_v5 = vadd.f32 %v9823_v22, %v5525_v52  ;;  %v5624_v22 = vpop.permute.xlu0 %5623 }
0x3f9a   :  { %5706 = vperm.xlu0 %6692, %v5651_v13  }
0x3f9e   :  { %5709 = vperm.xlu0 %6692, %v5652_v25  }
0x3fa2   :  { %5712 = vperm.xlu0 %6692, %v5653_v23  }
0x3fa6   :  { %5715 = vperm.xlu0 %6692, %v5654_v63   ;;  %5227 = vadd.xlane.f32.xlu1 %v5226_v56 }
0x3faa   :  { %5718 = vperm.xlu0 %6692, %v5655_v5  }
0x3fad   :  { %v5478_v61 = vpop.xlane.xlu1 %5477 }
0x3fae   :  { %7341 = vlog2.f32 %v5478_v61  ;;  %6117 = vbcast.lane.b32.xlu0 %v6110_v12, 263 }
0x3fb2   :  { %6141 = vbcast.lane.b32.xlu0 %v6134_v2, 263 }
0x3fb6   :  { %6153 = vbcast.lane.b32.xlu0 %v6146_v46, 263 }
0x3fb8   :  { %v7342_v55 = vpop.eup %7341 }
0x3fb9   :  { %v5510_v31 = vmul.f32 0.6931472, %v7342_v55 }
0x3fbb   :  { %v5526_v43 = vadd.f32 %v5510_v31, %v9813_v37 }
0x3fbd   :  { %v5656_v36 = vadd.f32 %v5624_v22, %v5526_v43 }
0x3fbf   :  { %5721 = vperm.xlu1 %6691, %v5656_v36  }
0x3fc3   :  { %6113 = vbcast.lane.b32.xlu1 %v6110_v12, 511 }
0x3fc7   :  { %6125 = vbcast.lane.b32.xlu1 %v6122_v62, 511 }
0x3fcb   :  { %6129 = vbcast.lane.b32.xlu1 %v6122_v62, 263 }
0x3fcf   :  { %6137 = vbcast.lane.b32.xlu1 %v6134_v2, 511 }
0x3fd3   :  { %6149 = vbcast.lane.b32.xlu1 %v6146_v46, 511 }
0x3fd7   :  { %6161 = vbcast.lane.b32.xlu1 %v9879_v38, 511 }
0x3ff5   :  { %v5680_v27 = vpop.permute.xlu0 %5679 }
0x3ff6   :  { %v5677_v28 = vpop.permute.xlu1 %5676  ;;  %v5730_v29 = vrot.slane %v5680_v27, %v8319_v18 }
0x3ff7   :  { %v5726_v15 = vrot.slane %v5677_v28, %v8322_v7 }
0x3ff9   :  { %v5731_v13 = vsel %vm2833_vm7, %v5730_v29, %v5726_v15 }
0x3ffa   :  { %v5683_v42 = vpop.permute.xlu1 %5682 }
0x3ffb   :  { %v5735_v48 = vrot.slane %v5683_v42, %v8322_v7 }
0x3ffd   :  { %v5686_v9 = vpop.permute.xlu0 %5685 }
0x3ffe   :  { %v5739_v30 = vrot.slane %v5686_v9, %v8319_v18 }
0x4000   :  { %v5740_v59 = vsel %vm2833_vm7, %v5739_v30, %v5735_v48 }
0x4001   :  { %v5689_v20 = vpop.permute.xlu1 %5688  ;;  %v5795_v47 = vsel %vm2898_vm8, %v5740_v59, %v5731_v13 }
0x4002   :  { %v5744_v34 = vrot.slane %v5689_v20, %v8322_v7 }
0x4005   :  { %v5692_v37 = vpop.permute.xlu0 %5691 }
0x4006   :  { %v5748_v14 = vrot.slane %v5692_v37, %v8319_v18 }
0x4008   :  { %v5749_v44 = vsel %vm2833_vm7, %v5748_v14, %v5744_v34 }
0x4009   :  { %v5701_v21 = vpop.permute.xlu0 %5700  ;;  %v5796_v19 = vsel %vm2900_vm9, %v5749_v44, %v5795_v47 }
0x400a   :  { %v5762_v23 = vrot.slane %v5701_v21, %v8322_v7 }
0x400d   :  { %v5704_v58 = vpop.permute.xlu0 %5703 }
0x400e   :  { %v5766_v35 = vrot.slane %v5704_v58, %v8319_v18 }
0x4010   :  { %v5767_v61 = vsel %vm2833_vm7, %v5766_v35, %v5762_v23 }
0x4011   :  { %v5695_v4 = vpop.permute.xlu0 %5694 }
0x4012   :  { %v5753_v10 = vrot.slane %v5695_v4, %v8322_v7 }
0x4015   :  { %v5698_v26 = vpop.permute.xlu0 %5697 }
0x4016   :  { %v5757_v49 = vrot.slane %v5698_v26, %v8319_v18 }
0x4018   :  { %v5758_v8 = vsel %vm2833_vm7, %v5757_v49, %v5753_v10 }
0x4019   :  { %v5707_v16 = vpop.permute.xlu0 %5706  ;;  %v5797_v56 = vsel %vm2902_vm10, %v5758_v8, %v5796_v19 }
0x401a   :  { %v5771_v45 = vrot.slane %v5707_v16, %v8322_v7  ;;  %v5798_v46 = vsel %vm2904_vm11, %v5767_v61, %v5797_v56 }
0x401d   :  { %v5710_v1 = vpop.permute.xlu0 %5709 }
0x401e   :  { %v5775_v25 = vrot.slane %v5710_v1, %v8319_v18 }
0x4020   :  { %v5776_v5 = vsel %vm2833_vm7, %v5775_v25, %v5771_v45 }
0x4021   :  { %v5713_v41 = vpop.permute.xlu0 %5712  ;;  %v5799_v43 = vsel %vm2906_vm12, %v5776_v5, %v5798_v46 }
0x4022   :  { %v5780_v63 = vrot.slane %v5713_v41, %v8322_v7  ;;  %v7417_v41 = vld [vmem:[%s10251_s4 + $0x20] sm:$0xff] }
0x4025   :  { %v5716_v54 = vpop.permute.xlu0 %5715 }
0x4026   :  { %v5784_v40 = vrot.slane %v5716_v54, %v8319_v18 }
0x4028   :  { %v5785_v12 = vsel %vm2833_vm7, %v5784_v40, %v5780_v63 }
0x4029   :  { %v5719_v52 = vpop.permute.xlu0 %5718  ;;  %v5800_v22 = vsel %vm2908_vm13, %v5785_v12, %v5799_v43 }
0x402a   :  { %v5789_v55 = vrot.slane %v5719_v52, %v8322_v7 }
0x4033   :  { %v5228_v53 = vpop.xlane.xlu1 %5227 }
0x4034   :  { %vm5527_vm2 = vcmp.gt.f32.partialorder %v5228_v53, 0.5 }
0x403e   :  { %v5722_v2 = vpop.permute.xlu1 %5721 }
0x403f   :  { %v5793_v31 = vrot.slane %v5722_v2, %v8319_v18 }
0x4041   :  { %v5794_v36 = vsel %vm2833_vm7, %v5793_v31, %v5789_v55 }
0x4042   :  { %v5801_v62 = vsel %vm2910_vm14, %v5794_v36, %v5800_v22 }
0x4043   :  { %v9914_v27 = vsel %vm5527_vm2, %v5801_v62, %v9617_v32  ;;  %v9928_v32 = vld [vmem:[%s10251_s4 + $0x28] sm:$0x7] }
0x4044   :  { %v5815_v9 = vrot.slane %v9914_v27, %v8048_v51  ;;  %v5808_v37 = vcombine.high %v9914_v27, %v9914_v27 }
0x4046   :  { %v5831_v21 = vrot.slane %v5815_v9, %v8048_v51  ;;  %v5823_v58 = vcombine.high %v5815_v9, %v5815_v9  ;;  %v5822_v4 = vrot.slane %v5808_v37, %v8048_v51  ;;  %v6170_v37 = vrot.slane %v9865_v24, %v8027_v57 }
0x4047   :  { %v10019_v57 = vrot.slane %v9865_v24, %v8256_v33 }
0x4048   :  { %v5860_v26 = vrot.slane %v5831_v21, %v7515_v11  ;;  %v5845_v16 = vrot.slane %v5823_v58, %v8048_v51  ;;  %v5838_v28 = vrot.slane %v5822_v4, %v8048_v51  ;;  %v5824_v1 = vcombine.high %v5822_v4, %v5822_v4 }
0x4049   :  { %v5853_v29 = vcombine.high %v5831_v21, %v5831_v21  ;;  %v6182_v4 = vrot.slane %v9865_v24, %v8148_v0  ;;  %v10023_v0 = vpop.permute.xlu1 %6113 }
0x404a   :  { %v9931_v42 = vadd.f32 %v9928_v32, %v5860_v26  ;;  %v9936_v30 = vadd.f32 %v7417_v41, %v5860_v26  ;;  %v5864_v20 = vrot.slane %v5845_v16, %v7515_v11  ;;  %v5876_v14 = vrot.slane %v5838_v28, %v7515_v11 }
0x404b   :  { %v5852_v15 = vrot.slane %v5824_v1, %v8048_v51  ;;  %v5854_v48 = vcombine.high %v5838_v28, %v5838_v28  ;;  %v5868_v53 = vrot.slane %v5853_v29, %v7515_v11  ;;  %v5855_v56 = vcombine.high %v5845_v16, %v5845_v16 }
0x404c   :  { %v5916_v49 = vsel %vm2435_vm4, %v9931_v42, -inf  ;;  %v5913_v34 = vsel %vm2431_vm5, %v9936_v30, -inf  ;;  %v9945_v54 = vadd.f32 %v7417_v41, %v5864_v20  ;;  %v9947_v59 = vadd.f32 %v7417_v41, %v5876_v14 }
0x404d   :  { %5917 = vmax.xlane.f32.xlu1 %v5916_v49  ;;  %5914 = vmax.xlane.f32.xlu0 %v5913_v34  ;;  %v5880_v10 = vrot.slane %v5852_v15, %v7515_v11  ;;  %v9953_v51 = vadd.f32 %v9928_v32, %v5864_v20  ;;  %v5884_v25 = vrot.slane %v5854_v48, %v7515_v11  ;;  %v10025_v28 = vpop.permute.xlu1 %6125 }
0x404e   :  { %v5919_v44 = vsel %vm2431_vm5, %v9945_v54, -inf  ;;  %v5937_v13 = vsel %vm2431_vm5, %v9947_v59, -inf  ;;  %v5856_v47 = vcombine.high %v5852_v15, %v5852_v15  ;;  %v9961_v35 = vadd.f32 %v7417_v41, %v5868_v53 }
0x404f   :  { %v9958_v8 = vadd.f32 %v7417_v41, %v5880_v10  ;;  %v5922_v40 = vsel %vm2435_vm4, %v9953_v51, -inf  ;;  %v9967_v45 = vadd.f32 %v7417_v41, %v5884_v25  ;;  %v9975_v5 = vadd.f32 %v9928_v32, %v5868_v53 }
0x4050   :  { %v5888_v23 = vrot.slane %v5856_v47, %v7515_v11  ;;  %v5925_v63 = vsel %vm2431_vm5, %v9961_v35, -inf  ;;  %v9984_v46 = vadd.f32 %v9928_v32, %v5876_v14  ;;  %v5872_v55 = vrot.slane %v5855_v56, %v7515_v11 }
0x4051   :  { %5920 = vmax.xlane.f32.xlu0 %v5919_v44  ;;  %5938 = vmax.xlane.f32.xlu1 %v5937_v13  ;;  %v5943_v19 = vsel %vm2431_vm5, %v9958_v8, -inf  ;;  %v5949_v52 = vsel %vm2431_vm5, %v9967_v45, -inf  ;;  %v5928_v12 = vsel %vm2435_vm4, %v9975_v5, -inf  ;;  %v9999_v11 = vadd.f32 %v9928_v32, %v5880_v10  ;;  %v10027_v1 = vpop.permute.xlu1 %6129 }
0x4052   :  { %v9977_v61 = vadd.f32 %v7417_v41, %v5888_v23  ;;  %v5940_v31 = vsel %vm2435_vm4, %v9984_v46, -inf  ;;  %v9989_v43 = vadd.f32 %v7417_v41, %v5872_v55  ;;  %v9994_v36 = vadd.f32 %v9928_v32, %v5872_v55  ;;  %v10029_v41 = vpop.permute.xlu0 %6117 }
0x4053   :  { %v5946_v9 = vsel %vm2435_vm4, %v9999_v11, -inf  ;;  %v10006_v21 = vadd.f32 %v9928_v32, %v5884_v25  ;;  %v10013_v26 = vadd.f32 %v9928_v32, %v5888_v23 }
0x4054   :  { %v5955_v2 = vsel %vm2431_vm5, %v9977_v61, -inf  ;;  %v5931_v22 = vsel %vm2431_vm5, %v9989_v43, -inf  ;;  %v5934_v62 = vsel %vm2435_vm4, %v9994_v36, -inf }
0x4055   :  { %5923 = vmax.xlane.f32.xlu0 %v5922_v40  ;;  %5944 = vmax.xlane.f32.xlu1 %v5943_v19  ;;  %v5952_v58 = vsel %vm2435_vm4, %v10006_v21, -inf  ;;  %v5958_v16 = vsel %vm2435_vm4, %v10013_v26, -inf  ;;  %v10031_v20 = vpop.permute.xlu1 %6137 }
0x4056   :  { %v10033_v14 = vpop.permute.xlu0 %6141 }
0x4059   :  { %5926 = vmax.xlane.f32.xlu0 %v5925_v63  ;;  %5950 = vmax.xlane.f32.xlu1 %v5949_v52  ;;  %v10035_v33 = vpop.permute.xlu1 %6149 }
0x405a   :  { %v10037_v15 = vpop.permute.xlu0 %6153 }
0x405d   :  { %5929 = vmax.xlane.f32.xlu0 %v5928_v12  ;;  %5956 = vmax.xlane.f32.xlu1 %v5955_v2  ;;  %v10039_v29 = vpop.permute.xlu1 %6161 }
0x4061   :  { %5941 = vmax.xlane.f32.xlu0 %v5940_v31 }
0x4065   :  { %5932 = vmax.xlane.f32.xlu0 %v5931_v22 }
0x4069   :  { %5935 = vmax.xlane.f32.xlu0 %v5934_v62 }
0x406d   :  { %5947 = vmax.xlane.f32.xlu0 %v5946_v9 }
0x406e   :  { %6173 = vbcast.lane.b32.xlu1 %v6170_v37, 511 }
0x4071   :  { %5953 = vmax.xlane.f32.xlu0 %v5952_v58 }
0x4072   :  { %6185 = vbcast.lane.b32.xlu1 %v6182_v4, 511 }
0x4075   :  { %5959 = vmax.xlane.f32.xlu0 %v5958_v16 }
0x4076   :  { %6197 = vbcast.lane.b32.xlu1 %v10019_v57, 511 }
0x408b   :  { %6165 = vbcast.lane.b32.xlu0 %v9879_v38, 263 }
0x408f   :  { %6177 = vbcast.lane.b32.xlu0 %v6170_v37, 263 }
0x4093   :  { %6189 = vbcast.lane.b32.xlu0 %v6182_v4, 263 }
0x40da   :  { %v10041_v38 = vpop.xlane.xlu1 %5917  ;;  %v10043_v48 = vpop.xlane.xlu0 %5914 }
0x40db   :  { %v5962_v49 = vsub.f32 %v9931_v42, %v10041_v38  ;;  %v5961_v34 = vsub.f32 %v9936_v30, %v10043_v48 }
0x40dd   :  { %v5979_v10 = vmul.f32 1.442695, %v5962_v49  ;;  %v5977_v44 = vmul.f32 1.442695, %v5961_v34 }
0x40de   :  { %v10049_v53 = vpop.xlane.xlu0 %5920  ;;  %v10055_v40 = vpop.xlane.xlu1 %5938 }
0x40df   :  { %7343 = vpow2.f32 %v5979_v10  ;;  %v5963_v13 = vsub.f32 %v9945_v54, %v10049_v53  ;;  %v5969_v30 = vsub.f32 %v9947_v59, %v10055_v40 }
0x40e0   :  { %7345 = vpow2.f32 %v5977_v44 }
0x40e1   :  { %v5981_v25 = vmul.f32 1.442695, %v5963_v13  ;;  %v5993_v12 = vmul.f32 1.442695, %v5969_v30 }
0x40e2   :  { %v10053_v47 = vpop.xlane.xlu0 %5923  ;;  %v10065_v2 = vpop.xlane.xlu1 %5944 }
0x40e3   :  { %v5964_v42 = vsub.f32 %v9953_v51, %v10053_v47  ;;  %7347 = vpow2.f32 %v5981_v25 }
0x40e5   :  { %v5983_v19 = vmul.f32 1.442695, %v5964_v42 }
0x40e6   :  { %v10061_v23 = vpop.xlane.xlu0 %5926  ;;  %v10078_v58 = vpop.xlane.xlu1 %5950 }
0x40e7   :  { %v5965_v56 = vsub.f32 %v9961_v35, %v10061_v23  ;;  %7349 = vpow2.f32 %v5983_v19  ;;  %v5973_v44 = vsub.f32 %v9967_v45, %v10078_v58 }
0x40e9   :  { %v7344_v54 = vpop.eup %7343  ;;  %v5985_v63 = vmul.f32 1.442695, %v5965_v56  ;;  %v6001_v56 = vmul.f32 1.442695, %v5973_v44 }
0x40ea   :  { %v7346_v52 = vpop.eup %7345  ;;  %v10067_v55 = vpop.xlane.xlu0 %5929  ;;  %v6012_v51 = vsel %vm2435_vm4, %v7344_v54, 0.0 }
0x40eb   :  { %v5966_v31 = vsub.f32 %v9975_v5, %v10067_v55  ;;  %6013 = vadd.xlane.f32.xlu0 %v6012_v51  ;;  %v6009_v59 = vsel %vm2431_vm5, %v7346_v52, 0.0  ;;  %7351 = vpow2.f32 %v5985_v63  ;;  %v5971_v5 = vsub.f32 %v9958_v8, %v10065_v2  ;;  %v10089_v42 = vpop.xlane.xlu1 %5956 }
0x40ec   :  { %6010 = vadd.xlane.f32.xlu1 %v6009_v59  ;;  %7353 = vpow2.f32 %v5993_v12  ;;  %v5975_v54 = vsub.f32 %v9977_v61, %v10089_v42 }
0x40ed   :  { %v5987_v35 = vmul.f32 1.442695, %v5966_v31  ;;  %v7348_v22 = vpop.eup %7347 }
0x40ee   :  { %v10073_v62 = vpop.xlane.xlu0 %5941  ;;  %v6015_v37 = vsel %vm2431_vm5, %v7348_v22, 0.0  ;;  %v6005_v59 = vmul.f32 1.442695, %v5975_v54 }
0x40ef   :  { %v5970_v9 = vsub.f32 %v9984_v46, %v10073_v62  ;;  %7355 = vpow2.f32 %v5987_v35  ;;  %v5997_v46 = vmul.f32 1.442695, %v5971_v5 }
0x40f0   :  { %6016 = vadd.xlane.f32.xlu1 %v6015_v37 }
0x40f1   :  { %v5995_v4 = vmul.f32 1.442695, %v5970_v9  ;;  %v7350_v16 = vpop.eup %7349 }
0x40f2   :  { %v10082_v49 = vpop.xlane.xlu0 %5932  ;;  %v6018_v10 = vsel %vm2435_vm4, %v7350_v16, 0.0 }
0x40f3   :  { %7357 = vpow2.f32 %v5995_v4  ;;  %v5967_v34 = vsub.f32 %v9989_v43, %v10082_v49  ;;  %6019 = vadd.xlane.f32.xlu0 %v6018_v10 }
0x40f5   :  { %v5989_v13 = vmul.f32 1.442695, %v5967_v34  ;;  %v7352_v25 = vpop.eup %7351 }
0x40f6   :  { %v10091_v8 = vpop.xlane.xlu0 %5935  ;;  %v6021_v30 = vsel %vm2431_vm5, %v7352_v25, 0.0  ;;  %v7354_v43 = vpop.eup %7353 }
0x40f7   :  { %7359 = vpow2.f32 %v5989_v13  ;;  %v5968_v19 = vsub.f32 %v9994_v36, %v10091_v8  ;;  %6022 = vadd.xlane.f32.xlu1 %v6021_v30  ;;  %v6033_v51 = vsel %vm2431_vm5, %v7354_v43, 0.0 }
0x40f8   :  { %7361 = vpow2.f32 %v5997_v46 }
0x40f9   :  { %v5991_v45 = vmul.f32 1.442695, %v5968_v19  ;;  %v7356_v63 = vpop.eup %7355 }
0x40fa   :  { %v10098_v52 = vpop.xlane.xlu0 %5947  ;;  %v6024_v36 = vsel %vm2435_vm4, %v7356_v63, 0.0 }
0x40fb   :  { %7363 = vpow2.f32 %v5991_v45  ;;  %v5972_v12 = vsub.f32 %v9999_v11, %v10098_v52  ;;  %6034 = vadd.xlane.f32.xlu1 %v6033_v51  ;;  %6025 = vadd.xlane.f32.xlu0 %v6024_v36  ;;  %v10124_v51 = vpop.permute.xlu1 %6173 }
0x40fc   :  { %7365 = vpow2.f32 %v6001_v56 }
0x40fd   :  { %v7358_v31 = vpop.eup %7357  ;;  %v5999_v35 = vmul.f32 1.442695, %v5972_v12 }
0x40fe   :  { %v10104_v22 = vpop.xlane.xlu0 %5953  ;;  %v6036_v61 = vsel %vm2435_vm4, %v7358_v31, 0.0 }
0x40ff   :  { %7367 = vpow2.f32 %v5999_v35  ;;  %v5974_v9 = vsub.f32 %v10006_v21, %v10104_v22  ;;  %6037 = vadd.xlane.f32.xlu0 %v6036_v61  ;;  %v10128_v31 = vpop.permute.xlu1 %6185 }
0x4100   :  { %7369 = vpow2.f32 %v6005_v59 }
0x4101   :  { %v7360_v11 = vpop.eup %7359  ;;  %v6003_v37 = vmul.f32 1.442695, %v5974_v9 }
0x4102   :  { %v10109_v5 = vpop.xlane.xlu0 %5959  ;;  %v6027_v4 = vsel %vm2431_vm5, %v7360_v11, 0.0  ;;  %v7362_v16 = vpop.eup %7361 }
0x4103   :  { %7371 = vpow2.f32 %v6003_v37  ;;  %v5976_v34 = vsub.f32 %v10013_v26, %v10109_v5  ;;  %6028 = vadd.xlane.f32.xlu1 %v6027_v4  ;;  %v6039_v44 = vsel %vm2431_vm5, %v7362_v16, 0.0  ;;  %v10132_v35 = vpop.permute.xlu1 %6197 }
0x4105   :  { %v7364_v10 = vpop.eup %7363  ;;  %v6007_v46 = vmul.f32 1.442695, %v5976_v34 }
0x4106   :  { %v6030_v21 = vsel %vm2435_vm4, %v7364_v10, 0.0  ;;  %v7366_v13 = vpop.eup %7365  ;;  %v10122_v12 = vpop.permute.xlu0 %6165 }
0x4107   :  { %7373 = vpow2.f32 %v6007_v46  ;;  %6040 = vadd.xlane.f32.xlu1 %v6039_v44  ;;  %6031 = vadd.xlane.f32.xlu0 %v6030_v21  ;;  %v6045_v19 = vsel %vm2431_vm5, %v7366_v13, 0.0 }
0x4109   :  { %v7368_v25 = vpop.eup %7367 }
0x410a   :  { %v6042_v30 = vsel %vm2435_vm4, %v7368_v25, 0.0  ;;  %v7370_v43 = vpop.eup %7369  ;;  %v10126_v36 = vpop.permute.xlu0 %6177 }
0x410b   :  { %6046 = vadd.xlane.f32.xlu1 %v6045_v19  ;;  %6043 = vadd.xlane.f32.xlu0 %v6042_v30  ;;  %v6051_v56 = vsel %vm2431_vm5, %v7370_v43, 0.0 }
0x410d   :  { %v7372_v26 = vpop.eup %7371 }
0x410e   :  { %v6048_v54 = vsel %vm2435_vm4, %v7372_v26, 0.0  ;;  %v10130_v59 = vpop.permute.xlu0 %6189 }
0x410f   :  { %6052 = vadd.xlane.f32.xlu1 %v6051_v56  ;;  %6049 = vadd.xlane.f32.xlu0 %v6048_v54 }
0x4111   :  { %v7374_v45 = vpop.eup %7373 }
0x4112   :  { %v6054_v63 = vsel %vm2435_vm4, %v7374_v45, 0.0  ;;  %vm6400_vm4 = vcmask 7168  }
0x4113   :  { %6055 = vadd.xlane.f32.xlu0 %v6054_v63 }
0x4129   :  { %6201 = vbcast.lane.b32.xlu0 %v10019_v57, 263 }
0x4178   :  { %v6014_v61 = vpop.xlane.xlu0 %6013 }
0x4179   :  { %v6011_v9 = vpop.xlane.xlu1 %6010  ;;  %7375 = vlog2.f32 %v6014_v61 }
0x417a   :  { %7377 = vlog2.f32 %v6011_v9 }
0x417d   :  { %v6017_v11 = vpop.xlane.xlu1 %6016 }
0x417e   :  { %7379 = vlog2.f32 %v6017_v11 }
0x4180   :  { %v6020_v37 = vpop.xlane.xlu0 %6019 }
0x4181   :  { %7381 = vlog2.f32 %v6020_v37 }
0x4183   :  { %v7376_v57 = vpop.eup %7375 }
0x4184   :  { %v7378_v4 = vpop.eup %7377  ;;  %v6060_v16 = vmul.f32 0.6931472, %v7376_v57  ;;  %v6023_v10 = vpop.xlane.xlu1 %6022 }
0x4185   :  { %v6058_v34 = vmul.f32 0.6931472, %v7378_v4  ;;  %7383 = vlog2.f32 %v6023_v10 }
0x4186   :  { %v6090_v46 = vadd.f32 %v6060_v16, %v10041_v38 }
0x4187   :  { %v6089_v44 = vadd.f32 %v6058_v34, %v10043_v48 }
0x4188   :  { %v7380_v21 = vpop.eup %7379  ;;  %v6220_v13 = vadd.f32 %v10029_v41, %v6090_v46  ;;  %v6035_v30 = vpop.xlane.xlu1 %6034 }
0x4189   :  { %v6219_v25 = vadd.f32 %v10023_v0, %v6089_v44  ;;  %v6062_v19 = vmul.f32 0.6931472, %v7380_v21  ;;  %v6026_v43 = vpop.xlane.xlu0 %6025  ;;  %7385 = vlog2.f32 %v6035_v30 }
0x418a   :  { %6257 = vperm.xlu0 %6692, %v6220_v13   ;;  %7387 = vlog2.f32 %v6026_v43 }
0x418b   :  { %v6091_v26 = vadd.f32 %v6062_v19, %v10049_v53  ;;  %6254 = vperm.xlu1 %6691, %v6219_v25   ;;  %v7382_v56 = vpop.eup %7381 }
0x418c   :  { %v6064_v54 = vmul.f32 0.6931472, %v7382_v56 }
0x418d   :  { %v6221_v38 = vadd.f32 %v10025_v28, %v6091_v26  ;;  %v6038_v45 = vpop.xlane.xlu0 %6037 }
0x418e   :  { %7389 = vlog2.f32 %v6038_v45  ;;  %v6092_v48 = vadd.f32 %v6064_v54, %v10053_v47 }
0x418f   :  { %6260 = vperm.xlu1 %6691, %v6221_v38   ;;  %v7384_v41 = vpop.eup %7383 }
0x4190   :  { %v6029_v0 = vpop.xlane.xlu1 %6028  ;;  %v6222_v63 = vadd.f32 %v10027_v1, %v6092_v48  ;;  %v6066_v61 = vmul.f32 0.6931472, %v7384_v41 }
0x4191   :  { %7391 = vlog2.f32 %v6029_v0 }
0x4192   :  { %v6093_v9 = vadd.f32 %v6066_v61, %v10061_v23  ;;  %6263 = vperm.xlu0 %6692, %v6222_v63  }
0x4193   :  { %v7386_v53 = vpop.eup %7385 }
0x4194   :  { %v6032_v11 = vpop.xlane.xlu0 %6031  ;;  %v7388_v37 = vpop.eup %7387  ;;  %v6223_v28 = vadd.f32 %v10031_v20, %v6093_v9  ;;  %v6074_v57 = vmul.f32 0.6931472, %v7386_v53 }
0x4195   :  { %v6068_v4 = vmul.f32 0.6931472, %v7388_v37  ;;  %v6041_v16 = vpop.xlane.xlu1 %6040  ;;  %7393 = vlog2.f32 %v6032_v11 }
0x4196   :  { %6266 = vperm.xlu1 %6691, %v6223_v28   ;;  %7395 = vlog2.f32 %v6041_v16  ;;  %v6097_v1 = vadd.f32 %v6074_v57, %v10055_v40 }
0x4197   :  { %v6094_v34 = vadd.f32 %v6068_v4, %v10067_v55 }
0x4198   :  { %v7390_v47 = vpop.eup %7389  ;;  %v6044_v46 = vpop.xlane.xlu0 %6043  ;;  %v6227_v20 = vadd.f32 %v10039_v29, %v6097_v1 }
0x4199   :  { %v6224_v10 = vadd.f32 %v10033_v14, %v6094_v34  ;;  %v6076_v23 = vmul.f32 0.6931472, %v7390_v47  ;;  %7397 = vlog2.f32 %v6044_v46  ;;  %v6047_v25 = vpop.xlane.xlu1 %6046 }
0x419a   :  { %7399 = vlog2.f32 %v6047_v25 }
0x419b   :  { %v7392_v44 = vpop.eup %7391  ;;  %6269 = vperm.xlu0 %6692, %v6224_v10   ;;  %v6098_v21 = vadd.f32 %v6076_v23, %v10073_v62 }
0x419c   :  { %v6070_v13 = vmul.f32 0.6931472, %v7392_v44  ;;  %v6050_v14 = vpop.xlane.xlu0 %6049 }
0x419d   :  { %v6228_v55 = vadd.f32 %v10122_v12, %v6098_v21  ;;  %7401 = vlog2.f32 %v6050_v14  ;;  %v6053_v62 = vpop.xlane.xlu1 %6052 }
0x419e   :  { %v6095_v40 = vadd.f32 %v6070_v13, %v10082_v49  ;;  %7403 = vlog2.f32 %v6053_v62 }
0x419f   :  { %v7394_v19 = vpop.eup %7393  ;;  %6278 = vperm.xlu0 %6692, %v6227_v20  }
0x41a0   :  { %v6072_v30 = vmul.f32 0.6931472, %v7394_v19  ;;  %v7396_v43 = vpop.eup %7395  ;;  %v6225_v26 = vadd.f32 %v10035_v33, %v6095_v40  ;;  %v6056_v9 = vpop.xlane.xlu0 %6055 }
0x41a1   :  { %v6078_v56 = vmul.f32 0.6931472, %v7396_v43  ;;  %7405 = vlog2.f32 %v6056_v9 }
0x41a2   :  { %v6096_v29 = vadd.f32 %v6072_v30, %v10091_v8 }
0x41a3   :  { %6281 = vperm.xlu0 %6692, %v6228_v55   ;;  %v7398_v38 = vpop.eup %7397  ;;  %v6099_v54 = vadd.f32 %v6078_v56, %v10065_v2 }
0x41a4   :  { %v6226_v12 = vadd.f32 %v10037_v15, %v6096_v29  ;;  %v6080_v45 = vmul.f32 0.6931472, %v7398_v38  ;;  %v7400_v49 = vpop.eup %7399  ;;  %v6202_v57 = vpop.permute.xlu0 %6201 }
0x41a5   :  { %v6229_v48 = vadd.f32 %v10124_v51, %v6099_v54  ;;  %v6082_v41 = vmul.f32 0.6931472, %v7400_v49 }
0x41a6   :  { %v6100_v0 = vadd.f32 %v6080_v45, %v10098_v52  ;;  %v10164_v52 = vld [vmem:[%s10252_s5 + $0x38] sm:$0xff] }
0x41a7   :  { %6272 = vperm.xlu0 %6692, %v6225_v26   ;;  %v7402_v33 = vpop.eup %7401  ;;  %v6101_v8 = vadd.f32 %v6082_v41, %v10078_v58  ;;  %v5804_v58 = vsel %vm2277_vm6, %v10164_v52, 0.0 }
0x41a8   :  { %v6230_v63 = vadd.f32 %v10126_v36, %v6100_v0  ;;  %v6084_v61 = vmul.f32 0.6931472, %v7402_v33  ;;  %v7404_v53 = vpop.eup %7403 }
0x41a9   :  { %v6231_v15 = vadd.f32 %v10128_v31, %v6101_v8  ;;  %v6086_v2 = vmul.f32 0.6931472, %v7404_v53 }
0x41aa   :  { %v6102_v11 = vadd.f32 %v6084_v61, %v10104_v22 }
0x41ab   :  { %6275 = vperm.xlu0 %6692, %v6226_v12   ;;  %v6103_v51 = vadd.f32 %v6086_v2, %v10089_v42  ;;  %v7406_v37 = vpop.eup %7405 }
0x41ac   :  { %v6232_v36 = vadd.f32 %v10130_v59, %v6102_v11  ;;  %v6088_v22 = vmul.f32 0.6931472, %v7406_v37 }
0x41ad   :  { %v6233_v31 = vadd.f32 %v10132_v35, %v6103_v51 }
0x41ae   :  { %v6104_v28 = vadd.f32 %v6088_v22, %v10109_v5 }
0x41af   :  { %6284 = vperm.xlu0 %6692, %v6229_v48  }
0x41b0   :  { %v6234_v4 = vadd.f32 %v6202_v57, %v6104_v28  ;;  %v2268_v28 = vld [vmem:[%s10252_s5] sm:$0xff] }
0x41b3   :  { %6287 = vperm.xlu0 %6692, %v6230_v63  }
0x41b7   :  { %6290 = vperm.xlu0 %6692, %v6231_v15  }
0x41ba   :  { %5805 = vadd.xlane.f32.xlu1 %v5804_v58 }
0x41bb   :  { %6293 = vperm.xlu0 %6692, %v6232_v36   ;;  %v6385_v36 = vrot.slane %v9928_v32, %v8008_v6  ;;  %v7418_v32 = vld [vmem:[%s10252_s5 + $0x8] sm:$0xff] }
0x41bf   :  { %6296 = vperm.xlu0 %6692, %v6233_v31  }
0x41cb   :  { %6299 = vperm.xlu1 %6691, %v6234_v4  }
0x4209   :  { %v6258_v16 = vpop.permute.xlu0 %6257 }
0x420a   :  { %v6255_v46 = vpop.permute.xlu1 %6254  ;;  %v6308_v19 = vrot.slane %v6258_v16, %v8319_v18 }
0x420b   :  { %v6304_v25 = vrot.slane %v6255_v46, %v8322_v7 }
0x420d   :  { %v6309_v29 = vsel %vm2833_vm7, %v6308_v19, %v6304_v25  ;;  %v2312_v25 = vmul.f32 %v10164_v52, %v9865_v24 }
0x420e   :  { %v6261_v20 = vpop.permute.xlu1 %6260 }
0x420f   :  { %v6313_v55 = vrot.slane %v6261_v20, %v8322_v7  ;;  %v7421_v20 = vld [vmem:[%s10252_s5 + $0x20] sm:$0xff]  ;;  %v2313_v19 = vsel %vm2277_vm6, %v2312_v25, 0.0 }
0x4211   :  { %v6264_v47 = vpop.permute.xlu0 %6263 }
0x4212   :  { %v6317_v21 = vrot.slane %v6264_v47, %v8319_v18  ;;  %v10280_v47 = vld [vmem:[#allocation9_spill] sm:$0xff] }
0x4214   :  { %v6318_v43 = vsel %vm2833_vm7, %v6317_v21, %v6313_v55  ;;  %v7422_v21 = vld [vmem:[%s10252_s5 + $0x28] sm:$0xff] }
0x4215   :  { %v6267_v13 = vpop.permute.xlu1 %6266  ;;  %v6373_v54 = vsel %vm2898_vm8, %v6318_v43, %v6309_v29 }
0x4216   :  { %v6322_v30 = vrot.slane %v6267_v13, %v8322_v7  ;;  %v2302_v13 = vmul.f32 %v7422_v21, %v9389_v60  ;;  %v2307_v60 = vmul.f32 %v9857_v50, %v9559_v39 }
0x4218   :  { %v2308_v43 = vsel %vm2277_vm6, %v2307_v60, 0.0 }
0x421a   :  { %v6270_v34 = vpop.permute.xlu0 %6269 }
0x421b   :  { %v6326_v5 = vrot.slane %v6270_v34, %v8319_v18  ;;  %v2282_v34 = vmul.f32 %v7418_v32, %v10280_v47 }
0x421d   :  { %v6327_v56 = vsel %vm2833_vm7, %v6326_v5, %v6322_v30  ;;  %v2303_v5 = vsel %vm2277_vm6, %v2302_v13, 0.0 }
0x421e   :  { %v6279_v1 = vpop.permute.xlu0 %6278  ;;  %v6374_v48 = vsel %vm2900_vm9, %v6327_v56, %v6373_v54 }
0x421f   :  { %v6340_v0 = vrot.slane %v6279_v1, %v8322_v7  ;;  %v2283_v1 = vsel %vm2277_vm6, %v2282_v34, 0.0 }
0x4222   :  { %v6282_v10 = vpop.permute.xlu0 %6281 }
0x4223   :  { %v6344_v12 = vrot.slane %v6282_v10, %v8319_v18 }
0x4225   :  { %v6345_v9 = vsel %vm2833_vm7, %v6344_v12, %v6340_v0 }
0x4226   :  { %v6273_v42 = vpop.permute.xlu0 %6272 }
0x4227   :  { %v6331_v26 = vrot.slane %v6273_v42, %v8322_v7 }
0x422a   :  { %v6276_v23 = vpop.permute.xlu0 %6275 }
0x422b   :  { %v6335_v40 = vrot.slane %v6276_v23, %v8319_v18  ;;  %v7420_v23 = vld [vmem:[%s10252_s5 + $0x18] sm:$0xff] }
0x422d   :  { %v6336_v62 = vsel %vm2833_vm7, %v6335_v40, %v6331_v26 }
0x422e   :  { %v6285_v59 = vpop.permute.xlu0 %6284  ;;  %v6375_v33 = vsel %vm2902_vm10, %v6336_v62, %v6374_v48 }
0x422f   :  { %v6349_v41 = vrot.slane %v6285_v59, %v8322_v7  ;;  %v6376_v2 = vsel %vm2904_vm11, %v6345_v9, %v6375_v33  ;;  %v10281_v59 = vld [vmem:[#allocation11_spill] sm:$0xff] }
0x4230   :  { %v2292_v46 = vmul.f32 %v7420_v23, %v10281_v59 }
0x4232   :  { %v6288_v44 = vpop.permute.xlu0 %6287 }
0x4233   :  { %v6353_v38 = vrot.slane %v6288_v44, %v8319_v18  ;;  %v2293_v44 = vsel %vm2277_vm6, %v2292_v46, 0.0 }
0x4235   :  { %v6354_v61 = vsel %vm2833_vm7, %v6353_v38, %v6349_v41 }
0x4236   :  { %v6291_v35 = vpop.permute.xlu0 %6290  ;;  %v6377_v51 = vsel %vm2906_vm12, %v6354_v61, %v6376_v2 }
0x4237   :  { %v6358_v8 = vrot.slane %v6291_v35, %v8322_v7  ;;  %v2297_v35 = vmul.f32 %v7421_v20, %v8928_v3 }
0x423a   :  { %v6294_v14 = vpop.permute.xlu0 %6293 }
0x423b   :  { %v6362_v45 = vrot.slane %v6294_v14, %v8319_v18 }
0x423d   :  { %v6363_v53 = vsel %vm2833_vm7, %v6362_v45, %v6358_v8 }
0x423e   :  { %v6297_v63 = vpop.permute.xlu0 %6296  ;;  %v6378_v31 = vsel %vm2908_vm13, %v6363_v53, %v6377_v51 }
0x423f   :  { %v6367_v11 = vrot.slane %v6297_v63, %v8322_v7 }
0x4247   :  { %v5806_v49 = vpop.xlane.xlu1 %5805 }
0x4248   :  { %vm6105_vm3 = vcmp.gt.f32.partialorder %v5806_v49, 0.5 }
0x424b   :  { %v6300_v15 = vpop.permute.xlu1 %6299 }
0x424c   :  { %v6371_v58 = vrot.slane %v6300_v15, %v8319_v18  ;;  %v10279_v18 = vld [vmem:[#allocation10_spill] sm:$0xff] }
0x424d   :  { %v2276_v4 = vmul.f32 %v2268_v28, %v10279_v18 }
0x424e   :  { %v6372_v37 = vsel %vm2833_vm7, %v6371_v58, %v6367_v11 }
0x424f   :  { %v6379_v22 = vsel %vm2910_vm14, %v6372_v37, %v6378_v31  ;;  %v2278_v6 = vsel %vm2277_vm6, %v2276_v4, 0.0 }
0x4250   :  { %v6381_v7 = vsel %vm6105_vm3, %v6379_v22, %v9914_v27  ;;  %v7419_v27 = vld [vmem:[%s10252_s5 + $0x10] sm:$0xff] }
0x4251   :  { %v6386_v57 = vadd.f32 %v6385_v36, %v6381_v7  ;;  %v2287_v10 = vmul.f32 %v7419_v27, %v8301_v17  ;;  %v2298_v17 = vsel %vm2277_vm6, %v2297_v35, 0.0 }
0x4253   :  { %v6387_v16 = vsel %vm2277_vm6, %v6386_v57, -inf  ;;  %v2288_v42 = vsel %vm2277_vm6, %v2287_v10, 0.0 }
0x4254   :  { %6388 = vmax.xlane.f32.xlu0 %v6387_v16 }
0x4258   :  { %2279 = vadd.xlane.f32.xlu0 %v2278_v6 }
0x425c   :  { %2284 = vadd.xlane.f32.xlu0 %v2283_v1 }
0x4260   :  { %2289 = vadd.xlane.f32.xlu0 %v2288_v42 }
0x4264   :  { %2294 = vadd.xlane.f32.xlu0 %v2293_v44 }
0x4268   :  { %2299 = vadd.xlane.f32.xlu0 %v2298_v17 }
0x426c   :  { %2304 = vadd.xlane.f32.xlu0 %v2303_v5 }
0x4270   :  { %2314 = vadd.xlane.f32.xlu0 %v2313_v19 }
0x42e1   :  { %v6389_v3 = vpop.xlane.xlu0 %6388 }
0x42e2   :  { %v6390_v55 = vsub.f32 %v6386_v57, %v6389_v3 }
0x42e4   :  { %v6391_v40 = vmul.f32 1.442695, %v6390_v55 }
0x42e5   :  { %v2280_v26 = vpop.xlane.xlu0 %2279 }
0x42e6   :  { %7407 = vpow2.f32 %v6391_v40 }
0x42e9   :  { %v2285_v24 = vpop.xlane.xlu0 %2284 }
0x42ea   :  { %v2286_v62 = vadd.f32 %v2285_v24, %v2280_v26 }
0x42ed   :  { %v2290_v52 = vpop.xlane.xlu0 %2289 }
0x42ee   :  { %v2291_v54 = vadd.f32 %v2290_v52, %v2286_v62 }
0x42f0   :  { %v7408_v30 = vpop.eup %7407 }
0x42f1   :  { %v6393_v14 = vsel %vm2277_vm6, %v7408_v30, 0.0  ;;  %v2295_v56 = vpop.xlane.xlu0 %2294 }
0x42f2   :  { %6394 = vadd.xlane.f32.xlu1 %v6393_v14  ;;  %v2296_v12 = vadd.f32 %v2295_v56, %v2291_v54 }
0x42f5   :  { %v2300_v29 = vpop.xlane.xlu0 %2299 }
0x42f6   :  { %2309 = vadd.xlane.f32.xlu1 %v2308_v43  ;;  %v2301_v49 = vadd.f32 %v2300_v29, %v2296_v12 }
0x42f9   :  { %v2305_v45 = vpop.xlane.xlu0 %2304 }
0x42fa   :  { %v2306_v41 = vadd.f32 %v2305_v45, %v2301_v49 }
0x42fd   :  { %v2315_v33 = vpop.xlane.xlu0 %2314 }
0x437f   :  { %v6395_v38 = vpop.xlane.xlu1 %6394 }
0x4380   :  { %7409 = vlog2.f32 %v6395_v38 }
0x4383   :  { %v2310_v48 = vpop.xlane.xlu1 %2309 }
0x4384   :  { %v2311_v0 = vadd.f32 %v2310_v48, %v2306_v41 }
0x4386   :  { %v2316_v63 = vadd.f32 %v2315_v33, %v2311_v0 }
0x438a   :  { %v7410_v39 = vpop.eup %7409 }
0x438b   :  { %v6397_v50 = vmul.f32 0.6931472, %v7410_v39 }
0x438d   :  { %v6398_v8 = vadd.f32 %v6397_v50, %v6389_v3 }
0x438f   :  { %v6399_v61 = vsub.f32 %v2316_v63, %v6398_v8 }
0x4391   :  { %6401 = vst.msk [vmem:[%s10253_s6] sm:$0xff] %vm6400_vm4, %v6399_v61 }

</bundles_post_ra>
